<compile_context>
chip_gen: v5e
topology: v5e:2x2
jax: 0.10.0
libtpu: 0.0.40
codegen_flags: <defaults>
</compile_context>

<pallas_src>
import functools

import jax
import jax.numpy as jnp
from jax import lax
from jax.experimental import pallas as pl
from jax.experimental.pallas import tpu as pltpu

BN_EPS = 1e-5  # PyTorch BatchNorm2d default


def _round_up(x: int, m: int) -> int:
    return (x + m - 1) // m * m


def _gemm_bn_act_kernel(x_ref, w_ref, scale_ref, shift_ref, o_ref, acc_ref, *, act):
    """One (TM, Np) output tile: acc += x_tile @ w_tile; fused epilogue on the
    last K step applies the folded BatchNorm affine and the activation."""
    @pl.when(pl.program_id(1) == 0)
    def _init():
        acc_ref[...] = jnp.zeros_like(acc_ref)

    acc_ref[...] += jnp.dot(x_ref[...], w_ref[...],
                            preferred_element_type=jnp.float32)

    @pl.when(pl.program_id(1) == pl.num_programs(1) - 1)
    def _epilogue():
        y = acc_ref[...] * scale_ref[...] + shift_ref[...]   # folded BN / bias
        if act == "relu":
            y = jnp.maximum(y, 0.0)
        elif act == "tanh":
            y = jnp.tanh(y)
        o_ref[...] = y.astype(o_ref.dtype)


def fused_gemm_bn_act(x, w, scale, shift, act):
    """(M, K) @ (K, N) with a per-output-channel affine and activation fused
    into the Pallas kernel.  Operands are zero-padded to TPU-friendly tiles."""
    M, K = x.shape
    K2, N = w.shape
    assert K == K2 and scale.shape == (N,) and shift.shape == (N,)

    Np = _round_up(N, 128)               # lane-dense output columns
    Kp = _round_up(K, 128)
    TK = min(Kp, 512)
    Kp = _round_up(Kp, TK)
    TM = min(256, _round_up(M, 8))       # bounded for v7x 64 MiB VMEM
    Mp = _round_up(M, TM)

    xp = jnp.pad(x, ((0, Mp - M), (0, Kp - K)))
    wp = jnp.pad(w, ((0, Kp - K), (0, Np - N)))
    sp = jnp.pad(scale, (0, Np - N)).reshape(1, Np)
    tp = jnp.pad(shift, (0, Np - N)).reshape(1, Np)

    out = pl.pallas_call(
        functools.partial(_gemm_bn_act_kernel, act=act),
        out_shape=jax.ShapeDtypeStruct((Mp, Np), jnp.float32),
        grid_spec=pltpu.PrefetchScalarGridSpec(
            num_scalar_prefetch=0,
            grid=(Mp // TM, Kp // TK),
            in_specs=[
                pl.BlockSpec((TM, TK), lambda i, k: (i, k)),
                pl.BlockSpec((TK, Np), lambda i, k: (k, 0)),
                pl.BlockSpec((1, Np), lambda i, k: (0, 0)),
                pl.BlockSpec((1, Np), lambda i, k: (0, 0)),
            ],
            out_specs=pl.BlockSpec((TM, Np), lambda i, k: (i, 0)),
            scratch_shapes=[pltpu.VMEM((TM, Np), jnp.float32)],
        ),
        compiler_params=pltpu.CompilerParams(
            dimension_semantics=("parallel", "arbitrary")),
    )(xp, wp, sp, tp)
    return out[:M, :N]


# TODO(synk): BatchNorm2d is applied in eval mode (running stats folded into a
# per-channel affine); training-mode in-batch statistics are not computed in-kernel.
def _fold_bn(gamma, beta, mean, var, eps=BN_EPS):
    scale = gamma * lax.rsqrt(var + eps)
    return scale, beta - mean * scale


def _deconv4x4_s2p1(h_nhwc, w, scale, shift, act):
    """ConvTranspose2d(Cin, Cout, 4, stride=2, padding=1, bias=False) on NHWC
    input, lowered to an im2col GEMM with fused affine + activation."""
    B, H, W_, Cin = h_nhwc.shape
    Cout = w.shape[1]
    OH, OW = 2 * H, 2 * W_
    # transposed conv == plain conv (stride 1) of the zero-dilated, pad-2 input
    # with the spatially flipped, in/out-swapped kernel.
    zero = jnp.array(0, h_nhwc.dtype)
    xpad = lax.pad(h_nhwc, zero, ((0, 0, 0), (2, 2, 1), (2, 2, 1), (0, 0, 0)))
    patches = [xpad[:, ky:ky + OH, kx:kx + OW, :]
               for ky in range(4) for kx in range(4)]
    cols = jnp.concatenate(patches, axis=-1).reshape(B * OH * OW, 16 * Cin)
    wc = jnp.transpose(jnp.flip(w, (2, 3)), (2, 3, 0, 1)).reshape(16 * Cin, Cout)
    y = fused_gemm_bn_act(cols, wc, scale, shift, act)
    return y.reshape(B, OH, OW, Cout)


def netg_forward(x, params):
    """x: (B, nz, 1, 1) f32 -> (B, nc, 32, 32) f32 (same as _netG.forward)."""
    w1, bn1 = params["w1"], params["bn1"]
    w2, bn2 = params["w2"], params["bn2"]
    w3, bn3 = params["w3"], params["bn3"]
    w4 = params["w4"]

    B = x.shape[0]
    nz, C1 = w1.shape[0], w1.shape[1]

    # Layer 1: ConvT(nz->C1, 4, s=1, p=0) on a 1x1 input is a pure matmul.
    s1, t1 = _fold_bn(*bn1)
    y1 = fused_gemm_bn_act(x.reshape(B, nz), w1.reshape(nz, C1 * 16),
                           jnp.repeat(s1, 16), jnp.repeat(t1, 16), act="relu")
    h = jnp.transpose(y1.reshape(B, C1, 4, 4), (0, 2, 3, 1))        # NHWC

    # Layers 2-3: ConvT(4, s=2, p=1) + BN + ReLU.
    s2, t2 = _fold_bn(*bn2)
    h = _deconv4x4_s2p1(h, w2, s2, t2, act="relu")
    s3, t3 = _fold_bn(*bn3)
    h = _deconv4x4_s2p1(h, w3, s3, t3, act="relu")

    # Layer 4: ConvT(4, s=2, p=1) + Tanh (no BN, no bias).
    nc = w4.shape[1]
    h = _deconv4x4_s2p1(h, w4, jnp.ones((nc,), jnp.float32),
                        jnp.zeros((nc,), jnp.float32), act="tanh")
    return jnp.transpose(h, (0, 3, 1, 2))                           # NCHW


def init_params(key, nz, ngf, nc):
    """Deterministic parameters with the PyTorch module's shapes.
    ConvTranspose2d weight is (in_ch, out_ch, kH, kW); BatchNorm2d affine=True."""
    c1, c2, c3 = ngf * 8, ngf * 4, ngf * 2
    ks = jax.random.split(key, 7)

    def conv_w(k, cin, cout):
        return 0.02 * jax.random.normal(k, (cin, cout, 4, 4), jnp.float32)

    def bn_p(k, c):
        k1, k2, k3, k4 = jax.random.split(k, 4)
        gamma = 1.0 + 0.1 * jax.random.normal(k1, (c,), jnp.float32)
        beta = 0.1 * jax.random.normal(k2, (c,), jnp.float32)
        mean = 0.1 * jax.random.normal(k3, (c,), jnp.float32)
        var = 1.0 + 0.5 * jax.random.uniform(k4, (c,), jnp.float32)
        return gamma, beta, mean, var

    return {
        "w1": conv_w(ks[0], nz, c1), "bn1": bn_p(ks[1], c1),
        "w2": conv_w(ks[2], c1, c2), "bn2": bn_p(ks[3], c2),
        "w3": conv_w(ks[4], c2, c3), "bn3": bn_p(ks[5], c3),
        "w4": conv_w(ks[6], c3, nc),
    }


def reference_forward(x, params):
    """Pure-XLA reference (lax.conv_general_dilated transposed-conv identity)."""
    def convT(h, w, stride, pad):
        k = w.shape[2]
        w_oihw = jnp.transpose(jnp.flip(w, (2, 3)), (1, 0, 2, 3))
        return lax.conv_general_dilated(
            h, w_oihw, window_strides=(1, 1),
            padding=[(k - 1 - pad, k - 1 - pad)] * 2,
            lhs_dilation=(stride, stride),
            dimension_numbers=("NCHW", "OIHW", "NCHW"),
            precision=lax.Precision.HIGHEST)

    def bn(h, gamma, beta, mean, var, eps=BN_EPS):
        inv = lax.rsqrt(var + eps)
        return ((h - mean[None, :, None, None]) * inv[None, :, None, None]
                * gamma[None, :, None, None] + beta[None, :, None, None])

    h = jax.nn.relu(bn(convT(x, params["w1"], 1, 0), *params["bn1"]))
    h = jax.nn.relu(bn(convT(h, params["w2"], 2, 1), *params["bn2"]))
    h = jax.nn.relu(bn(convT(h, params["w3"], 2, 1), *params["bn3"]))
    return jnp.tanh(convT(h, params["w4"], 2, 1))


if __name__ == "__main__":
    key = jax.random.PRNGKey(0)
    kx, kp = jax.random.split(key)

    B, NZ, NGF, NC = 4, 32, 16, 3      # small shapes; output is (B, NC, 32, 32)
    x = jax.random.normal(kx, (B, NZ, 1, 1), jnp.float32)
    params = init_params(kp, NZ, NGF, NC)

    out = jax.jit(netg_forward)(x, params)
    out = jax.block_until_ready(out)

    ref = reference_forward(x, params)
    assert out.shape == (B, NC, 32, 32), out.shape
    assert jnp.allclose(out, ref, atol=2e-3, rtol=2e-3), "mismatch vs reference"

    print("KERNEL_OK")
</pallas_src>

<mosaic_0001>
module attributes {stable_mosaic.version = 11 : i64} {
  func.func @_gemm_bn_act_kernel(%arg0: i32, %arg1: i32, %arg2: memref<8x128xf32, #tpu.memory_space<vmem>>, %arg3: memref<128x2048xf32, #tpu.memory_space<vmem>>, %arg4: memref<1x2048xf32, #tpu.memory_space<vmem>>, %arg5: memref<1x2048xf32, #tpu.memory_space<vmem>>, %arg6: memref<8x2048xf32, #tpu.memory_space<vmem>>, %arg7: memref<8x2048xf32, #tpu.memory_space<vmem>>) attributes {dimension_semantics = [#tpu.dimension_semantics<parallel>, #tpu.dimension_semantics<arbitrary>], iteration_bounds = array<i64: 1, 1>, scalar_prefetch = 0 : i64, scratch_operands = 1 : i64, tpu.core_type = #tpu.core_type<tc>, window_params = [{transform_indices = @transform_0, window_bounds = array<i64: 8, 128>}, {transform_indices = @transform_1, window_bounds = array<i64: 128, 2048>}, {pipeline_mode = #tpu.pipeline_mode<synchronous>, transform_indices = @transform_2, window_bounds = array<i64: 1, 2048>}, {pipeline_mode = #tpu.pipeline_mode<synchronous>, transform_indices = @transform_3, window_bounds = array<i64: 1, 2048>}, {transform_indices = @transform_4, window_bounds = array<i64: 8, 2048>}]} {
    %c0_i32 = arith.constant 0 : i32
    %0 = arith.cmpi eq, %arg1, %c0_i32 : i32
    %1 = arith.extui %0 : i1 to i32
    %c0_i32_0 = arith.constant 0 : i32
    %2 = arith.cmpi ne, %1, %c0_i32_0 : i32
    scf.if %2 {
      %cst_10 = arith.constant 0.000000e+00 : f32
      %12 = vector.broadcast %cst_10 : f32 to vector<8x2048xf32>
      %c0_11 = arith.constant 0 : index
      %c0_12 = arith.constant 0 : index
      %13 = vector.load %arg7[%c0_11, %c0_12] : memref<8x2048xf32, #tpu.memory_space<vmem>>, vector<8x2048xf32>
      tpu.vector_store %arg7[%c0_11, %c0_12], %12 {strides = array<i32>} : memref<8x2048xf32, #tpu.memory_space<vmem>>, vector<8x2048xf32>,
    } else {
    }
    %c0 = arith.constant 0 : index
    %c0_1 = arith.constant 0 : index
    %3 = vector.load %arg7[%c0, %c0_1] : memref<8x2048xf32, #tpu.memory_space<vmem>>, vector<8x2048xf32>
    %c0_2 = arith.constant 0 : index
    %c0_3 = arith.constant 0 : index
    %4 = vector.load %arg2[%c0_2, %c0_3] : memref<8x128xf32, #tpu.memory_space<vmem>>, vector<8x128xf32>
    %c0_4 = arith.constant 0 : index
    %c0_5 = arith.constant 0 : index
    %5 = vector.load %arg3[%c0_4, %c0_5] : memref<128x2048xf32, #tpu.memory_space<vmem>>, vector<128x2048xf32>
    %cst = arith.constant dense<0.000000e+00> : vector<8x2048xf32>
    %6 = tpu.matmul %4, %5, %cst {dimension_numbers = #tpu.dot_dimension_numbers<[1], [0], [0], [1], [0, 0, 1, 1], [], []>} : vector<8x128xf32>, vector<128x2048xf32>, vector<8x2048xf32> -> vector<8x2048xf32>
    %7 = arith.addf %3, %6 : vector<8x2048xf32>
    %c0_6 = arith.constant 0 : index
    %c0_7 = arith.constant 0 : index
    %8 = vector.load %arg7[%c0_6, %c0_7] : memref<8x2048xf32, #tpu.memory_space<vmem>>, vector<8x2048xf32>
    tpu.vector_store %arg7[%c0_6, %c0_7], %7 {strides = array<i32>} : memref<8x2048xf32, #tpu.memory_space<vmem>>, vector<8x2048xf32>,
    %c0_i32_8 = arith.constant 0 : i32
    %9 = arith.cmpi eq, %arg1, %c0_i32_8 : i32
    %10 = arith.extui %9 : i1 to i32
    %c0_i32_9 = arith.constant 0 : i32
    %11 = arith.cmpi ne, %10, %c0_i32_9 : i32
    scf.if %11 {
      %c0_10 = arith.constant 0 : index
      %c0_11 = arith.constant 0 : index
      %12 = vector.load %arg7[%c0_10, %c0_11] : memref<8x2048xf32, #tpu.memory_space<vmem>>, vector<8x2048xf32>
      %c0_12 = arith.constant 0 : index
      %c0_13 = arith.constant 0 : index
      %13 = vector.load %arg4[%c0_12, %c0_13] : memref<1x2048xf32, #tpu.memory_space<vmem>>, vector<1x2048xf32>
      %14 = vector.broadcast %13 : vector<1x2048xf32> to vector<8x2048xf32>
      %15 = arith.mulf %12, %14 : vector<8x2048xf32>
      %c0_14 = arith.constant 0 : index
      %c0_15 = arith.constant 0 : index
      %16 = vector.load %arg5[%c0_14, %c0_15] : memref<1x2048xf32, #tpu.memory_space<vmem>>, vector<1x2048xf32>
      %17 = vector.broadcast %16 : vector<1x2048xf32> to vector<8x2048xf32>
      %18 = arith.addf %15, %17 : vector<8x2048xf32>
      %cst_16 = arith.constant 0.000000e+00 : f32
      %19 = vector.broadcast %cst_16 : f32 to vector<8x2048xf32>
      %20 = arith.maximumf %18, %19 : vector<8x2048xf32>
      %c0_17 = arith.constant 0 : index
      %c0_18 = arith.constant 0 : index
      %21 = vector.load %arg6[%c0_17, %c0_18] : memref<8x2048xf32, #tpu.memory_space<vmem>>, vector<8x2048xf32>
      tpu.vector_store %arg6[%c0_17, %c0_18], %20 {strides = array<i32>} : memref<8x2048xf32, #tpu.memory_space<vmem>>, vector<8x2048xf32>,
    } else {
    }
    return
  }
  func.func @transform_0(%arg0: i32, %arg1: i32) -> (i32, i32) {
    %c0_i32 = arith.constant 0 : i32
    return %arg0, %arg1 : i32, i32
  }
  func.func @transform_1(%arg0: i32, %arg1: i32) -> (i32, i32) {
    %c0_i32 = arith.constant 0 : i32
    %c0_i32_0 = arith.constant 0 : i32
    return %arg1, %c0_i32 : i32, i32
  }
  func.func @transform_2(%arg0: i32, %arg1: i32) -> (i32, i32) {
    %c0_i32 = arith.constant 0 : i32
    %c0_i32_0 = arith.constant 0 : i32
    %c0_i32_1 = arith.constant 0 : i32
    return %c0_i32, %c0_i32_0 : i32, i32
  }
  func.func @transform_3(%arg0: i32, %arg1: i32) -> (i32, i32) {
    %c0_i32 = arith.constant 0 : i32
    %c0_i32_0 = arith.constant 0 : i32
    %c0_i32_1 = arith.constant 0 : i32
    return %c0_i32, %c0_i32_0 : i32, i32
  }
  func.func @transform_4(%arg0: i32, %arg1: i32) -> (i32, i32) {
    %c0_i32 = arith.constant 0 : i32
    %c0_i32_0 = arith.constant 0 : i32
    return %arg0, %c0_i32 : i32, i32
  }
}

module attributes {stable_mosaic.version = 11 : i64} {
  func.func @_gemm_bn_act_kernel(%arg0: i32, %arg1: i32, %arg2: memref<256x512xf32, #tpu.memory_space<vmem>>, %arg3: memref<512x128xf32, #tpu.memory_space<vmem>>, %arg4: memref<1x128xf32, #tpu.memory_space<vmem>>, %arg5: memref<1x128xf32, #tpu.memory_space<vmem>>, %arg6: memref<256x128xf32, #tpu.memory_space<vmem>>, %arg7: memref<256x128xf32, #tpu.memory_space<vmem>>) attributes {dimension_semantics = [#tpu.dimension_semantics<parallel>, #tpu.dimension_semantics<arbitrary>], iteration_bounds = array<i64: 1, 4>, scalar_prefetch = 0 : i64, scratch_operands = 1 : i64, tpu.core_type = #tpu.core_type<tc>, window_params = [{transform_indices = @transform_0, window_bounds = array<i64: 256, 512>}, {transform_indices = @transform_1, window_bounds = array<i64: 512, 128>}, {pipeline_mode = #tpu.pipeline_mode<synchronous>, transform_indices = @transform_2, window_bounds = array<i64: 1, 128>}, {pipeline_mode = #tpu.pipeline_mode<synchronous>, transform_indices = @transform_3, window_bounds = array<i64: 1, 128>}, {transform_indices = @transform_4, window_bounds = array<i64: 256, 128>}]} {
    %c0_i32 = arith.constant 0 : i32
    %0 = arith.cmpi eq, %arg1, %c0_i32 : i32
    %1 = arith.extui %0 : i1 to i32
    %c0_i32_0 = arith.constant 0 : i32
    %2 = arith.cmpi ne, %1, %c0_i32_0 : i32
    scf.if %2 {
      %cst_9 = arith.constant 0.000000e+00 : f32
      %12 = vector.broadcast %cst_9 : f32 to vector<256x128xf32>
      %c0_10 = arith.constant 0 : index
      %c0_11 = arith.constant 0 : index
      %13 = vector.load %arg7[%c0_10, %c0_11] : memref<256x128xf32, #tpu.memory_space<vmem>>, vector<256x128xf32>
      tpu.vector_store %arg7[%c0_10, %c0_11], %12 {strides = array<i32>} : memref<256x128xf32, #tpu.memory_space<vmem>>, vector<256x128xf32>,
    } else {
    }
    %c0 = arith.constant 0 : index
    %c0_1 = arith.constant 0 : index
    %3 = vector.load %arg7[%c0, %c0_1] : memref<256x128xf32, #tpu.memory_space<vmem>>, vector<256x128xf32>
    %c0_2 = arith.constant 0 : index
    %c0_3 = arith.constant 0 : index
    %4 = vector.load %arg2[%c0_2, %c0_3] : memref<256x512xf32, #tpu.memory_space<vmem>>, vector<256x512xf32>
    %c0_4 = arith.constant 0 : index
    %c0_5 = arith.constant 0 : index
    %5 = vector.load %arg3[%c0_4, %c0_5] : memref<512x128xf32, #tpu.memory_space<vmem>>, vector<512x128xf32>
    %cst = arith.constant dense<0.000000e+00> : vector<256x128xf32>
    %6 = tpu.matmul %4, %5, %cst {dimension_numbers = #tpu.dot_dimension_numbers<[1], [0], [0], [1], [0, 0, 1, 1], [], []>} : vector<256x512xf32>, vector<512x128xf32>, vector<256x128xf32> -> vector<256x128xf32>
    %7 = arith.addf %3, %6 : vector<256x128xf32>
    %c0_6 = arith.constant 0 : index
    %c0_7 = arith.constant 0 : index
    %8 = vector.load %arg7[%c0_6, %c0_7] : memref<256x128xf32, #tpu.memory_space<vmem>>, vector<256x128xf32>
    tpu.vector_store %arg7[%c0_6, %c0_7], %7 {strides = array<i32>} : memref<256x128xf32, #tpu.memory_space<vmem>>, vector<256x128xf32>,
    %c3_i32 = arith.constant 3 : i32
    %9 = arith.cmpi eq, %arg1, %c3_i32 : i32
    %10 = arith.extui %9 : i1 to i32
    %c0_i32_8 = arith.constant 0 : i32
    %11 = arith.cmpi ne, %10, %c0_i32_8 : i32
    scf.if %11 {
      %c0_9 = arith.constant 0 : index
      %c0_10 = arith.constant 0 : index
      %12 = vector.load %arg7[%c0_9, %c0_10] : memref<256x128xf32, #tpu.memory_space<vmem>>, vector<256x128xf32>
      %c0_11 = arith.constant 0 : index
      %c0_12 = arith.constant 0 : index
      %13 = vector.load %arg4[%c0_11, %c0_12] : memref<1x128xf32, #tpu.memory_space<vmem>>, vector<1x128xf32>
      %14 = vector.broadcast %13 : vector<1x128xf32> to vector<256x128xf32>
      %15 = arith.mulf %12, %14 : vector<256x128xf32>
      %c0_13 = arith.constant 0 : index
      %c0_14 = arith.constant 0 : index
      %16 = vector.load %arg5[%c0_13, %c0_14] : memref<1x128xf32, #tpu.memory_space<vmem>>, vector<1x128xf32>
      %17 = vector.broadcast %16 : vector<1x128xf32> to vector<256x128xf32>
      %18 = arith.addf %15, %17 : vector<256x128xf32>
      %cst_15 = arith.constant 0.000000e+00 : f32
      %19 = vector.broadcast %cst_15 : f32 to vector<256x128xf32>
      %20 = arith.maximumf %18, %19 : vector<256x128xf32>
      %c0_16 = arith.constant 0 : index
      %c0_17 = arith.constant 0 : index
      %21 = vector.load %arg6[%c0_16, %c0_17] : memref<256x128xf32, #tpu.memory_space<vmem>>, vector<256x128xf32>
      tpu.vector_store %arg6[%c0_16, %c0_17], %20 {strides = array<i32>} : memref<256x128xf32, #tpu.memory_space<vmem>>, vector<256x128xf32>,
    } else {
    }
    return
  }
  func.func @transform_0(%arg0: i32, %arg1: i32) -> (i32, i32) {
    %c0_i32 = arith.constant 0 : i32
    return %arg0, %arg1 : i32, i32
  }
  func.func @transform_1(%arg0: i32, %arg1: i32) -> (i32, i32) {
    %c0_i32 = arith.constant 0 : i32
    %c0_i32_0 = arith.constant 0 : i32
    return %arg1, %c0_i32 : i32, i32
  }
  func.func @transform_2(%arg0: i32, %arg1: i32) -> (i32, i32) {
    %c0_i32 = arith.constant 0 : i32
    %c0_i32_0 = arith.constant 0 : i32
    %c0_i32_1 = arith.constant 0 : i32
    return %c0_i32, %c0_i32_0 : i32, i32
  }
  func.func @transform_3(%arg0: i32, %arg1: i32) -> (i32, i32) {
    %c0_i32 = arith.constant 0 : i32
    %c0_i32_0 = arith.constant 0 : i32
    %c0_i32_1 = arith.constant 0 : i32
    return %c0_i32, %c0_i32_0 : i32, i32
  }
  func.func @transform_4(%arg0: i32, %arg1: i32) -> (i32, i32) {
    %c0_i32 = arith.constant 0 : i32
    %c0_i32_0 = arith.constant 0 : i32
    return %arg0, %c0_i32 : i32, i32
  }
}

module attributes {stable_mosaic.version = 11 : i64} {
  func.func @_gemm_bn_act_kernel(%arg0: i32, %arg1: i32, %arg2: memref<256x512xf32, #tpu.memory_space<vmem>>, %arg3: memref<512x128xf32, #tpu.memory_space<vmem>>, %arg4: memref<1x128xf32, #tpu.memory_space<vmem>>, %arg5: memref<1x128xf32, #tpu.memory_space<vmem>>, %arg6: memref<256x128xf32, #tpu.memory_space<vmem>>, %arg7: memref<256x128xf32, #tpu.memory_space<vmem>>) attributes {dimension_semantics = [#tpu.dimension_semantics<parallel>, #tpu.dimension_semantics<arbitrary>], iteration_bounds = array<i64: 4, 2>, scalar_prefetch = 0 : i64, scratch_operands = 1 : i64, tpu.core_type = #tpu.core_type<tc>, window_params = [{transform_indices = @transform_0, window_bounds = array<i64: 256, 512>}, {transform_indices = @transform_1, window_bounds = array<i64: 512, 128>}, {pipeline_mode = #tpu.pipeline_mode<synchronous>, transform_indices = @transform_2, window_bounds = array<i64: 1, 128>}, {pipeline_mode = #tpu.pipeline_mode<synchronous>, transform_indices = @transform_3, window_bounds = array<i64: 1, 128>}, {transform_indices = @transform_4, window_bounds = array<i64: 256, 128>}]} {
    %c0_i32 = arith.constant 0 : i32
    %0 = arith.cmpi eq, %arg1, %c0_i32 : i32
    %1 = arith.extui %0 : i1 to i32
    %c0_i32_0 = arith.constant 0 : i32
    %2 = arith.cmpi ne, %1, %c0_i32_0 : i32
    scf.if %2 {
      %cst_9 = arith.constant 0.000000e+00 : f32
      %12 = vector.broadcast %cst_9 : f32 to vector<256x128xf32>
      %c0_10 = arith.constant 0 : index
      %c0_11 = arith.constant 0 : index
      %13 = vector.load %arg7[%c0_10, %c0_11] : memref<256x128xf32, #tpu.memory_space<vmem>>, vector<256x128xf32>
      tpu.vector_store %arg7[%c0_10, %c0_11], %12 {strides = array<i32>} : memref<256x128xf32, #tpu.memory_space<vmem>>, vector<256x128xf32>,
    } else {
    }
    %c0 = arith.constant 0 : index
    %c0_1 = arith.constant 0 : index
    %3 = vector.load %arg7[%c0, %c0_1] : memref<256x128xf32, #tpu.memory_space<vmem>>, vector<256x128xf32>
    %c0_2 = arith.constant 0 : index
    %c0_3 = arith.constant 0 : index
    %4 = vector.load %arg2[%c0_2, %c0_3] : memref<256x512xf32, #tpu.memory_space<vmem>>, vector<256x512xf32>
    %c0_4 = arith.constant 0 : index
    %c0_5 = arith.constant 0 : index
    %5 = vector.load %arg3[%c0_4, %c0_5] : memref<512x128xf32, #tpu.memory_space<vmem>>, vector<512x128xf32>
    %cst = arith.constant dense<0.000000e+00> : vector<256x128xf32>
    %6 = tpu.matmul %4, %5, %cst {dimension_numbers = #tpu.dot_dimension_numbers<[1], [0], [0], [1], [0, 0, 1, 1], [], []>} : vector<256x512xf32>, vector<512x128xf32>, vector<256x128xf32> -> vector<256x128xf32>
    %7 = arith.addf %3, %6 : vector<256x128xf32>
    %c0_6 = arith.constant 0 : index
    %c0_7 = arith.constant 0 : index
    %8 = vector.load %arg7[%c0_6, %c0_7] : memref<256x128xf32, #tpu.memory_space<vmem>>, vector<256x128xf32>
    tpu.vector_store %arg7[%c0_6, %c0_7], %7 {strides = array<i32>} : memref<256x128xf32, #tpu.memory_space<vmem>>, vector<256x128xf32>,
    %c1_i32 = arith.constant 1 : i32
    %9 = arith.cmpi eq, %arg1, %c1_i32 : i32
    %10 = arith.extui %9 : i1 to i32
    %c0_i32_8 = arith.constant 0 : i32
    %11 = arith.cmpi ne, %10, %c0_i32_8 : i32
    scf.if %11 {
      %c0_9 = arith.constant 0 : index
      %c0_10 = arith.constant 0 : index
      %12 = vector.load %arg7[%c0_9, %c0_10] : memref<256x128xf32, #tpu.memory_space<vmem>>, vector<256x128xf32>
      %c0_11 = arith.constant 0 : index
      %c0_12 = arith.constant 0 : index
      %13 = vector.load %arg4[%c0_11, %c0_12] : memref<1x128xf32, #tpu.memory_space<vmem>>, vector<1x128xf32>
      %14 = vector.broadcast %13 : vector<1x128xf32> to vector<256x128xf32>
      %15 = arith.mulf %12, %14 : vector<256x128xf32>
      %c0_13 = arith.constant 0 : index
      %c0_14 = arith.constant 0 : index
      %16 = vector.load %arg5[%c0_13, %c0_14] : memref<1x128xf32, #tpu.memory_space<vmem>>, vector<1x128xf32>
      %17 = vector.broadcast %16 : vector<1x128xf32> to vector<256x128xf32>
      %18 = arith.addf %15, %17 : vector<256x128xf32>
      %cst_15 = arith.constant 0.000000e+00 : f32
      %19 = vector.broadcast %cst_15 : f32 to vector<256x128xf32>
      %20 = arith.maximumf %18, %19 : vector<256x128xf32>
      %c0_16 = arith.constant 0 : index
      %c0_17 = arith.constant 0 : index
      %21 = vector.load %arg6[%c0_16, %c0_17] : memref<256x128xf32, #tpu.memory_space<vmem>>, vector<256x128xf32>
      tpu.vector_store %arg6[%c0_16, %c0_17], %20 {strides = array<i32>} : memref<256x128xf32, #tpu.memory_space<vmem>>, vector<256x128xf32>,
    } else {
    }
    return
  }
  func.func @transform_0(%arg0: i32, %arg1: i32) -> (i32, i32) {
    %c0_i32 = arith.constant 0 : i32
    return %arg0, %arg1 : i32, i32
  }
  func.func @transform_1(%arg0: i32, %arg1: i32) -> (i32, i32) {
    %c0_i32 = arith.constant 0 : i32
    %c0_i32_0 = arith.constant 0 : i32
    return %arg1, %c0_i32 : i32, i32
  }
  func.func @transform_2(%arg0: i32, %arg1: i32) -> (i32, i32) {
    %c0_i32 = arith.constant 0 : i32
    %c0_i32_0 = arith.constant 0 : i32
    %c0_i32_1 = arith.constant 0 : i32
    return %c0_i32, %c0_i32_0 : i32, i32
  }
  func.func @transform_3(%arg0: i32, %arg1: i32) -> (i32, i32) {
    %c0_i32 = arith.constant 0 : i32
    %c0_i32_0 = arith.constant 0 : i32
    %c0_i32_1 = arith.constant 0 : i32
    return %c0_i32, %c0_i32_0 : i32, i32
  }
  func.func @transform_4(%arg0: i32, %arg1: i32) -> (i32, i32) {
    %c0_i32 = arith.constant 0 : i32
    %c0_i32_0 = arith.constant 0 : i32
    return %arg0, %c0_i32 : i32, i32
  }
}

module attributes {stable_mosaic.version = 11 : i64} {
  func.func @_gemm_bn_act_kernel(%arg0: i32, %arg1: i32, %arg2: memref<256x512xf32, #tpu.memory_space<vmem>>, %arg3: memref<512x128xf32, #tpu.memory_space<vmem>>, %arg4: memref<1x128xf32, #tpu.memory_space<vmem>>, %arg5: memref<1x128xf32, #tpu.memory_space<vmem>>, %arg6: memref<256x128xf32, #tpu.memory_space<vmem>>, %arg7: memref<256x128xf32, #tpu.memory_space<vmem>>) attributes {dimension_semantics = [#tpu.dimension_semantics<parallel>, #tpu.dimension_semantics<arbitrary>], iteration_bounds = array<i64: 16, 1>, scalar_prefetch = 0 : i64, scratch_operands = 1 : i64, tpu.core_type = #tpu.core_type<tc>, window_params = [{transform_indices = @transform_0, window_bounds = array<i64: 256, 512>}, {transform_indices = @transform_1, window_bounds = array<i64: 512, 128>}, {pipeline_mode = #tpu.pipeline_mode<synchronous>, transform_indices = @transform_2, window_bounds = array<i64: 1, 128>}, {pipeline_mode = #tpu.pipeline_mode<synchronous>, transform_indices = @transform_3, window_bounds = array<i64: 1, 128>}, {transform_indices = @transform_4, window_bounds = array<i64: 256, 128>}]} {
    %c0_i32 = arith.constant 0 : i32
    %0 = arith.cmpi eq, %arg1, %c0_i32 : i32
    %1 = arith.extui %0 : i1 to i32
    %c0_i32_0 = arith.constant 0 : i32
    %2 = arith.cmpi ne, %1, %c0_i32_0 : i32
    scf.if %2 {
      %cst_10 = arith.constant 0.000000e+00 : f32
      %12 = vector.broadcast %cst_10 : f32 to vector<256x128xf32>
      %c0_11 = arith.constant 0 : index
      %c0_12 = arith.constant 0 : index
      %13 = vector.load %arg7[%c0_11, %c0_12] : memref<256x128xf32, #tpu.memory_space<vmem>>, vector<256x128xf32>
      tpu.vector_store %arg7[%c0_11, %c0_12], %12 {strides = array<i32>} : memref<256x128xf32, #tpu.memory_space<vmem>>, vector<256x128xf32>,
    } else {
    }
    %c0 = arith.constant 0 : index
    %c0_1 = arith.constant 0 : index
    %3 = vector.load %arg7[%c0, %c0_1] : memref<256x128xf32, #tpu.memory_space<vmem>>, vector<256x128xf32>
    %c0_2 = arith.constant 0 : index
    %c0_3 = arith.constant 0 : index
    %4 = vector.load %arg2[%c0_2, %c0_3] : memref<256x512xf32, #tpu.memory_space<vmem>>, vector<256x512xf32>
    %c0_4 = arith.constant 0 : index
    %c0_5 = arith.constant 0 : index
    %5 = vector.load %arg3[%c0_4, %c0_5] : memref<512x128xf32, #tpu.memory_space<vmem>>, vector<512x128xf32>
    %cst = arith.constant dense<0.000000e+00> : vector<256x128xf32>
    %6 = tpu.matmul %4, %5, %cst {dimension_numbers = #tpu.dot_dimension_numbers<[1], [0], [0], [1], [0, 0, 1, 1], [], []>} : vector<256x512xf32>, vector<512x128xf32>, vector<256x128xf32> -> vector<256x128xf32>
    %7 = arith.addf %3, %6 : vector<256x128xf32>
    %c0_6 = arith.constant 0 : index
    %c0_7 = arith.constant 0 : index
    %8 = vector.load %arg7[%c0_6, %c0_7] : memref<256x128xf32, #tpu.memory_space<vmem>>, vector<256x128xf32>
    tpu.vector_store %arg7[%c0_6, %c0_7], %7 {strides = array<i32>} : memref<256x128xf32, #tpu.memory_space<vmem>>, vector<256x128xf32>,
    %c0_i32_8 = arith.constant 0 : i32
    %9 = arith.cmpi eq, %arg1, %c0_i32_8 : i32
    %10 = arith.extui %9 : i1 to i32
    %c0_i32_9 = arith.constant 0 : i32
    %11 = arith.cmpi ne, %10, %c0_i32_9 : i32
    scf.if %11 {
      %c0_10 = arith.constant 0 : index
      %c0_11 = arith.constant 0 : index
      %12 = vector.load %arg7[%c0_10, %c0_11] : memref<256x128xf32, #tpu.memory_space<vmem>>, vector<256x128xf32>
      %c0_12 = arith.constant 0 : index
      %c0_13 = arith.constant 0 : index
      %13 = vector.load %arg4[%c0_12, %c0_13] : memref<1x128xf32, #tpu.memory_space<vmem>>, vector<1x128xf32>
      %14 = vector.broadcast %13 : vector<1x128xf32> to vector<256x128xf32>
      %15 = arith.mulf %12, %14 : vector<256x128xf32>
      %c0_14 = arith.constant 0 : index
      %c0_15 = arith.constant 0 : index
      %16 = vector.load %arg5[%c0_14, %c0_15] : memref<1x128xf32, #tpu.memory_space<vmem>>, vector<1x128xf32>
      %17 = vector.broadcast %16 : vector<1x128xf32> to vector<256x128xf32>
      %18 = arith.addf %15, %17 : vector<256x128xf32>
      %19 = math.tanh %18 : vector<256x128xf32>
      %c0_16 = arith.constant 0 : index
      %c0_17 = arith.constant 0 : index
      %20 = vector.load %arg6[%c0_16, %c0_17] : memref<256x128xf32, #tpu.memory_space<vmem>>, vector<256x128xf32>
      tpu.vector_store %arg6[%c0_16, %c0_17], %19 {strides = array<i32>} : memref<256x128xf32, #tpu.memory_space<vmem>>, vector<256x128xf32>,
    } else {
    }
    return
  }
  func.func @transform_0(%arg0: i32, %arg1: i32) -> (i32, i32) {
    %c0_i32 = arith.constant 0 : i32
    return %arg0, %arg1 : i32, i32
  }
  func.func @transform_1(%arg0: i32, %arg1: i32) -> (i32, i32) {
    %c0_i32 = arith.constant 0 : i32
    %c0_i32_0 = arith.constant 0 : i32
    return %arg1, %c0_i32 : i32, i32
  }
  func.func @transform_2(%arg0: i32, %arg1: i32) -> (i32, i32) {
    %c0_i32 = arith.constant 0 : i32
    %c0_i32_0 = arith.constant 0 : i32
    %c0_i32_1 = arith.constant 0 : i32
    return %c0_i32, %c0_i32_0 : i32, i32
  }
  func.func @transform_3(%arg0: i32, %arg1: i32) -> (i32, i32) {
    %c0_i32 = arith.constant 0 : i32
    %c0_i32_0 = arith.constant 0 : i32
    %c0_i32_1 = arith.constant 0 : i32
    return %c0_i32, %c0_i32_0 : i32, i32
  }
  func.func @transform_4(%arg0: i32, %arg1: i32) -> (i32, i32) {
    %c0_i32 = arith.constant 0 : i32
    %c0_i32_0 = arith.constant 0 : i32
    return %arg0, %c0_i32 : i32, i32
  }
}

</mosaic_0001>

<bundles_post_ra>
// kernel: netg_forward.4
= control target key start
LH: loop header
LB: loop body
LE: loop exit
PB: predicated region body
PF: predicated region fallthrough
CT: control target
= control target key end

     0   :  { %s1695_s1 = inlined_call_operand.vmem [shape: f32[128,2048], index: 1, kind: input, shape index: {}]   ;;  %s1696_s0 = inlined_call_operand.vmem [shape: f32[8,128], index: 0, kind: input, shape index: {}]   ;;  %s1697_s2 = inlined_call_operand.vmem [shape: f32[1,2048], index: 2, kind: input, shape index: {}]   ;;  %s1698_s3 = inlined_call_operand.vmem [shape: f32[1,2048], index: 3, kind: input, shape index: {}]   ;;  %s1699_s4 = inlined_call_operand.vmem [shape: f32[8,2048], index: 4, kind: output, shape index: {}]  }
   0x1   :  { %v296_v0 = vld [vmem:[%s1695_s1 + $0x790] sm:$0xff]  ;;  %v297_v1 = vld [vmem:[%s1695_s1 + $0x798] sm:$0xff]  ;;  %v294_v6 = vld [vmem:[%s1695_s1 + $0x780] sm:$0xff] }
   0x2   :  { %v280_v2 = vld [vmem:[%s1695_s1 + $0x710] sm:$0xff]  ;;  %350 = vmatpush.msra.mxu2 %v296_v0  ;;  %370 = vmatpush.msra.mxu3 %v297_v1  ;;  %v281_v3 = vld [vmem:[%s1695_s1 + $0x718] sm:$0xff]  ;;  %v295_v7 = vld [vmem:[%s1695_s1 + $0x788] sm:$0xff] }
   0x3   :  { %v264_v4 = vld [vmem:[%s1695_s1 + $0x690] sm:$0xff]  ;;  %v265_v5 = vld [vmem:[%s1695_s1 + $0x698] sm:$0xff]  ;;  %v278_v8 = vld [vmem:[%s1695_s1 + $0x700] sm:$0xff]  ;;  %310 = vmatpush.msra.mxu0 %v294_v6  ;;  %330 = vmatpush.msra.mxu1 %v295_v7 }
   0x4   :  { %351 = vmatpush.msra.mxu2 %v280_v2  ;;  %371 = vmatpush.msra.mxu3 %v281_v3  ;;  %v279_v9 = vld [vmem:[%s1695_s1 + $0x708] sm:$0xff]  ;;  %v248_v10 = vld [vmem:[%s1695_s1 + $0x610] sm:$0xff]  ;;  %v249_v11 = vld [vmem:[%s1695_s1 + $0x618] sm:$0xff] }
   0x5   :  { %v262_v12 = vld [vmem:[%s1695_s1 + $0x680] sm:$0xff]  ;;  %v263_v13 = vld [vmem:[%s1695_s1 + $0x688] sm:$0xff]  ;;  %311 = vmatpush.msra.mxu0 %v278_v8  ;;  %331 = vmatpush.msra.mxu1 %v279_v9  ;;  %v232_v14 = vld [vmem:[%s1695_s1 + $0x590] sm:$0xff] }
   0x6   :  { %352 = vmatpush.msra.mxu2 %v264_v4  ;;  %372 = vmatpush.msra.mxu3 %v265_v5  ;;  %v233_v15 = vld [vmem:[%s1695_s1 + $0x598] sm:$0xff]  ;;  %v246_v16 = vld [vmem:[%s1695_s1 + $0x600] sm:$0xff]  ;;  %v247_v17 = vld [vmem:[%s1695_s1 + $0x608] sm:$0xff] }
   0x7   :  { %312 = vmatpush.msra.mxu0 %v262_v12  ;;  %332 = vmatpush.msra.mxu1 %v263_v13  ;;  %v216_v18 = vld [vmem:[%s1695_s1 + $0x510] sm:$0xff]  ;;  %v217_v19 = vld [vmem:[%s1695_s1 + $0x518] sm:$0xff]  ;;  %v230_v20 = vld [vmem:[%s1695_s1 + $0x580] sm:$0xff] }
   0x8   :  { %353 = vmatpush.msra.mxu2 %v248_v10  ;;  %373 = vmatpush.msra.mxu3 %v249_v11  ;;  %v231_v21 = vld [vmem:[%s1695_s1 + $0x588] sm:$0xff]  ;;  %v200_v22 = vld [vmem:[%s1695_s1 + $0x490] sm:$0xff]  ;;  %v201_v23 = vld [vmem:[%s1695_s1 + $0x498] sm:$0xff] }
   0x9   :  { %313 = vmatpush.msra.mxu0 %v246_v16  ;;  %333 = vmatpush.msra.mxu1 %v247_v17  ;;  %v214_v24 = vld [vmem:[%s1695_s1 + $0x500] sm:$0xff]  ;;  %v215_v25 = vld [vmem:[%s1695_s1 + $0x508] sm:$0xff]  ;;  %v184_v26 = vld [vmem:[%s1695_s1 + $0x410] sm:$0xff] }
   0xa   :  { %354 = vmatpush.msra.mxu2 %v232_v14  ;;  %374 = vmatpush.msra.mxu3 %v233_v15  ;;  %v185_v27 = vld [vmem:[%s1695_s1 + $0x418] sm:$0xff]  ;;  %v198_v28 = vld [vmem:[%s1695_s1 + $0x480] sm:$0xff]  ;;  %v199_v29 = vld [vmem:[%s1695_s1 + $0x488] sm:$0xff] }
   0xb   :  { %314 = vmatpush.msra.mxu0 %v230_v20  ;;  %334 = vmatpush.msra.mxu1 %v231_v21  ;;  %v168_v30 = vld [vmem:[%s1695_s1 + $0x390] sm:$0xff]  ;;  %v169_v31 = vld [vmem:[%s1695_s1 + $0x398] sm:$0xff]  ;;  %v182_v32 = vld [vmem:[%s1695_s1 + $0x400] sm:$0xff] }
   0xc   :  { %355 = vmatpush.msra.mxu2 %v216_v18  ;;  %375 = vmatpush.msra.mxu3 %v217_v19  ;;  %v183_v33 = vld [vmem:[%s1695_s1 + $0x408] sm:$0xff]  ;;  %v152_v34 = vld [vmem:[%s1695_s1 + $0x310] sm:$0xff]  ;;  %v153_v35 = vld [vmem:[%s1695_s1 + $0x318] sm:$0xff] }
   0xd   :  { %315 = vmatpush.msra.mxu0 %v214_v24  ;;  %335 = vmatpush.msra.mxu1 %v215_v25  ;;  %v166_v36 = vld [vmem:[%s1695_s1 + $0x380] sm:$0xff]  ;;  %v167_v37 = vld [vmem:[%s1695_s1 + $0x388] sm:$0xff]  ;;  %v136_v38 = vld [vmem:[%s1695_s1 + $0x290] sm:$0xff] }
   0xe   :  { %356 = vmatpush.msra.mxu2 %v200_v22  ;;  %376 = vmatpush.msra.mxu3 %v201_v23  ;;  %v137_v39 = vld [vmem:[%s1695_s1 + $0x298] sm:$0xff]  ;;  %v150_v40 = vld [vmem:[%s1695_s1 + $0x300] sm:$0xff]  ;;  %v151_v41 = vld [vmem:[%s1695_s1 + $0x308] sm:$0xff] }
   0xf   :  { %316 = vmatpush.msra.mxu0 %v198_v28  ;;  %336 = vmatpush.msra.mxu1 %v199_v29  ;;  %v120_v42 = vld [vmem:[%s1695_s1 + $0x210] sm:$0xff]  ;;  %v121_v43 = vld [vmem:[%s1695_s1 + $0x218] sm:$0xff]  ;;  %v134_v44 = vld [vmem:[%s1695_s1 + $0x280] sm:$0xff] }
  0x10   :  { %357 = vmatpush.msra.mxu2 %v184_v26  ;;  %377 = vmatpush.msra.mxu3 %v185_v27  ;;  %v135_v45 = vld [vmem:[%s1695_s1 + $0x288] sm:$0xff]  ;;  %v104_v46 = vld [vmem:[%s1695_s1 + $0x190] sm:$0xff]  ;;  %v105_v47 = vld [vmem:[%s1695_s1 + $0x198] sm:$0xff] }
  0x11   :  { %317 = vmatpush.msra.mxu0 %v182_v32  ;;  %337 = vmatpush.msra.mxu1 %v183_v33  ;;  %v118_v48 = vld [vmem:[%s1695_s1 + $0x200] sm:$0xff]  ;;  %v119_v49 = vld [vmem:[%s1695_s1 + $0x208] sm:$0xff]  ;;  %v88_v50 = vld [vmem:[%s1695_s1 + $0x110] sm:$0xff] }
  0x12   :  { %358 = vmatpush.msra.mxu2 %v168_v30  ;;  %378 = vmatpush.msra.mxu3 %v169_v31  ;;  %v89_v51 = vld [vmem:[%s1695_s1 + $0x118] sm:$0xff]  ;;  %v102_v52 = vld [vmem:[%s1695_s1 + $0x180] sm:$0xff]  ;;  %v103_v53 = vld [vmem:[%s1695_s1 + $0x188] sm:$0xff] }
  0x13   :  { %318 = vmatpush.msra.mxu0 %v166_v36  ;;  %338 = vmatpush.msra.mxu1 %v167_v37  ;;  %v72_v54 = vld [vmem:[%s1695_s1 + $0x90] sm:$0xff]  ;;  %v73_v55 = vld [vmem:[%s1695_s1 + $0x98] sm:$0xff]  ;;  %v86_v56 = vld [vmem:[%s1695_s1 + $0x100] sm:$0xff] }
  0x14   :  { %359 = vmatpush.msra.mxu2 %v152_v34  ;;  %379 = vmatpush.msra.mxu3 %v153_v35  ;;  %v87_v57 = vld [vmem:[%s1695_s1 + $0x108] sm:$0xff]  ;;  %v56_v58 = vld [vmem:[%s1695_s1 + $0x10] sm:$0xff]  ;;  %v57_v59 = vld [vmem:[%s1695_s1 + $0x18] sm:$0xff] }
  0x15   :  { %319 = vmatpush.msra.mxu0 %v150_v40  ;;  %339 = vmatpush.msra.mxu1 %v151_v41  ;;  %v300_v60 = vld [vmem:[%s1695_s1 + $0x7b0] sm:$0xff]  ;;  %v301_v61 = vld [vmem:[%s1695_s1 + $0x7b8] sm:$0xff]  ;;  %v70_v62 = vld [vmem:[%s1695_s1 + $0x80] sm:$0xff] }
  0x16   :  { %360 = vmatpush.msra.mxu2 %v136_v38  ;;  %380 = vmatpush.msra.mxu3 %v137_v39  ;;  %v71_v63 = vld [vmem:[%s1695_s1 + $0x88] sm:$0xff]  ;;  %v284_v0 = vld [vmem:[%s1695_s1 + $0x730] sm:$0xff]  ;;  %v285_v1 = vld [vmem:[%s1695_s1 + $0x738] sm:$0xff] }
  0x17   :  { %320 = vmatpush.msra.mxu0 %v134_v44  ;;  %340 = vmatpush.msra.mxu1 %v135_v45  ;;  %v54_v2 = vld [vmem:[%s1695_s1] sm:$0xff]  ;;  %v55_v3 = vld [vmem:[%s1695_s1 + $0x8] sm:$0xff]  ;;  %v268_v4 = vld [vmem:[%s1695_s1 + $0x6b0] sm:$0xff] }
  0x18   :  { %361 = vmatpush.msra.mxu2 %v120_v42  ;;  %381 = vmatpush.msra.mxu3 %v121_v43  ;;  %v269_v5 = vld [vmem:[%s1695_s1 + $0x6b8] sm:$0xff]  ;;  %v298_v6 = vld [vmem:[%s1695_s1 + $0x7a0] sm:$0xff]  ;;  %v299_v7 = vld [vmem:[%s1695_s1 + $0x7a8] sm:$0xff] }
  0x19   :  { %321 = vmatpush.msra.mxu0 %v118_v48  ;;  %341 = vmatpush.msra.mxu1 %v119_v49  ;;  %v252_v8 = vld [vmem:[%s1695_s1 + $0x630] sm:$0xff]  ;;  %v253_v9 = vld [vmem:[%s1695_s1 + $0x638] sm:$0xff]  ;;  %v282_v10 = vld [vmem:[%s1695_s1 + $0x720] sm:$0xff] }
  0x1a   :  { %362 = vmatpush.msra.mxu2 %v104_v46  ;;  %382 = vmatpush.msra.mxu3 %v105_v47  ;;  %v283_v11 = vld [vmem:[%s1695_s1 + $0x728] sm:$0xff]  ;;  %v236_v12 = vld [vmem:[%s1695_s1 + $0x5b0] sm:$0xff]  ;;  %v237_v13 = vld [vmem:[%s1695_s1 + $0x5b8] sm:$0xff] }
  0x1b   :  { %322 = vmatpush.msra.mxu0 %v102_v52  ;;  %342 = vmatpush.msra.mxu1 %v103_v53  ;;  %v266_v14 = vld [vmem:[%s1695_s1 + $0x6a0] sm:$0xff]  ;;  %v267_v15 = vld [vmem:[%s1695_s1 + $0x6a8] sm:$0xff]  ;;  %v220_v16 = vld [vmem:[%s1695_s1 + $0x530] sm:$0xff] }
  0x1c   :  { %363 = vmatpush.msra.mxu2 %v88_v50  ;;  %383 = vmatpush.msra.mxu3 %v89_v51  ;;  %v221_v17 = vld [vmem:[%s1695_s1 + $0x538] sm:$0xff]  ;;  %v250_v18 = vld [vmem:[%s1695_s1 + $0x620] sm:$0xff]  ;;  %v251_v19 = vld [vmem:[%s1695_s1 + $0x628] sm:$0xff] }
  0x1d   :  { %323 = vmatpush.msra.mxu0 %v86_v56  ;;  %343 = vmatpush.msra.mxu1 %v87_v57  ;;  %v204_v20 = vld [vmem:[%s1695_s1 + $0x4b0] sm:$0xff]  ;;  %v205_v21 = vld [vmem:[%s1695_s1 + $0x4b8] sm:$0xff]  ;;  %v234_v22 = vld [vmem:[%s1695_s1 + $0x5a0] sm:$0xff] }
  0x1e   :  { %364 = vmatpush.msra.mxu2 %v72_v54  ;;  %384 = vmatpush.msra.mxu3 %v73_v55  ;;  %v235_v23 = vld [vmem:[%s1695_s1 + $0x5a8] sm:$0xff]  ;;  %v188_v24 = vld [vmem:[%s1695_s1 + $0x430] sm:$0xff]  ;;  %v189_v25 = vld [vmem:[%s1695_s1 + $0x438] sm:$0xff] }
  0x1f   :  { %324 = vmatpush.msra.mxu0 %v70_v62  ;;  %344 = vmatpush.msra.mxu1 %v71_v63  ;;  %v218_v26 = vld [vmem:[%s1695_s1 + $0x520] sm:$0xff]  ;;  %v219_v27 = vld [vmem:[%s1695_s1 + $0x528] sm:$0xff]  ;;  %v172_v28 = vld [vmem:[%s1695_s1 + $0x3b0] sm:$0xff] }
  0x20   :  { %365 = vmatpush.msra.mxu2 %v56_v58  ;;  %385 = vmatpush.msra.mxu3 %v57_v59  ;;  %v173_v29 = vld [vmem:[%s1695_s1 + $0x3b8] sm:$0xff]  ;;  %v202_v30 = vld [vmem:[%s1695_s1 + $0x4a0] sm:$0xff]  ;;  %v203_v31 = vld [vmem:[%s1695_s1 + $0x4a8] sm:$0xff] }
  0x21   :  { %325 = vmatpush.msra.mxu0 %v54_v2  ;;  %345 = vmatpush.msra.mxu1 %v55_v3  ;;  %v156_v32 = vld [vmem:[%s1695_s1 + $0x330] sm:$0xff]  ;;  %v157_v33 = vld [vmem:[%s1695_s1 + $0x338] sm:$0xff]  ;;  %v186_v34 = vld [vmem:[%s1695_s1 + $0x420] sm:$0xff] }
  0x22   :  { %430 = vmatpush.msrb.mxu2 %v300_v60  ;;  %450 = vmatpush.msrb.mxu3 %v301_v61  ;;  %v187_v35 = vld [vmem:[%s1695_s1 + $0x428] sm:$0xff]  ;;  %v140_v36 = vld [vmem:[%s1695_s1 + $0x2b0] sm:$0xff]  ;;  %v141_v37 = vld [vmem:[%s1695_s1 + $0x2b8] sm:$0xff] }
  0x23   :  { %390 = vmatpush.msrb.mxu0 %v298_v6  ;;  %410 = vmatpush.msrb.mxu1 %v299_v7  ;;  %v170_v38 = vld [vmem:[%s1695_s1 + $0x3a0] sm:$0xff]  ;;  %v171_v39 = vld [vmem:[%s1695_s1 + $0x3a8] sm:$0xff]  ;;  %v124_v40 = vld [vmem:[%s1695_s1 + $0x230] sm:$0xff] }
  0x24   :  { %431 = vmatpush.msrb.mxu2 %v284_v0  ;;  %451 = vmatpush.msrb.mxu3 %v285_v1  ;;  %v125_v41 = vld [vmem:[%s1695_s1 + $0x238] sm:$0xff]  ;;  %v154_v42 = vld [vmem:[%s1695_s1 + $0x320] sm:$0xff]  ;;  %v155_v43 = vld [vmem:[%s1695_s1 + $0x328] sm:$0xff] }
  0x25   :  { %391 = vmatpush.msrb.mxu0 %v282_v10  ;;  %411 = vmatpush.msrb.mxu1 %v283_v11  ;;  %v108_v44 = vld [vmem:[%s1695_s1 + $0x1b0] sm:$0xff]  ;;  %v109_v45 = vld [vmem:[%s1695_s1 + $0x1b8] sm:$0xff]  ;;  %v138_v46 = vld [vmem:[%s1695_s1 + $0x2a0] sm:$0xff] }
  0x26   :  { %432 = vmatpush.msrb.mxu2 %v268_v4  ;;  %452 = vmatpush.msrb.mxu3 %v269_v5  ;;  %v139_v47 = vld [vmem:[%s1695_s1 + $0x2a8] sm:$0xff]  ;;  %v92_v48 = vld [vmem:[%s1695_s1 + $0x130] sm:$0xff]  ;;  %v93_v49 = vld [vmem:[%s1695_s1 + $0x138] sm:$0xff] }
  0x27   :  { %392 = vmatpush.msrb.mxu0 %v266_v14  ;;  %412 = vmatpush.msrb.mxu1 %v267_v15  ;;  %v122_v50 = vld [vmem:[%s1695_s1 + $0x220] sm:$0xff]  ;;  %v123_v51 = vld [vmem:[%s1695_s1 + $0x228] sm:$0xff]  ;;  %v76_v52 = vld [vmem:[%s1695_s1 + $0xb0] sm:$0xff] }
  0x28   :  { %433 = vmatpush.msrb.mxu2 %v252_v8  ;;  %453 = vmatpush.msrb.mxu3 %v253_v9  ;;  %v77_v53 = vld [vmem:[%s1695_s1 + $0xb8] sm:$0xff]  ;;  %v106_v54 = vld [vmem:[%s1695_s1 + $0x1a0] sm:$0xff]  ;;  %v107_v55 = vld [vmem:[%s1695_s1 + $0x1a8] sm:$0xff] }
  0x29   :  { %393 = vmatpush.msrb.mxu0 %v250_v18  ;;  %413 = vmatpush.msrb.mxu1 %v251_v19  ;;  %v60_v56 = vld [vmem:[%s1695_s1 + $0x30] sm:$0xff]  ;;  %v61_v57 = vld [vmem:[%s1695_s1 + $0x38] sm:$0xff]  ;;  %v1215_v58 = vld [vmem:[%s1696_s0] sm:$0xff] }
  0x2a   :  { %434 = vmatpush.msrb.mxu2 %v236_v12  ;;  %454 = vmatpush.msrb.mxu3 %v237_v13  ;;  %v304_v59 = vld [vmem:[%s1695_s1 + $0x7d0] sm:$0xff]  ;;  %v305_v60 = vld [vmem:[%s1695_s1 + $0x7d8] sm:$0xff]  ;;  %v90_v61 = vld [vmem:[%s1695_s1 + $0x120] sm:$0xff] }
  0x2b   :  { %394 = vmatpush.msrb.mxu0 %v234_v22  ;;  %414 = vmatpush.msrb.mxu1 %v235_v23  ;;  %v91_v62 = vld [vmem:[%s1695_s1 + $0x128] sm:$0xff]  ;;  %v288_v63 = vld [vmem:[%s1695_s1 + $0x750] sm:$0xff]  ;;  %v289_v0 = vld [vmem:[%s1695_s1 + $0x758] sm:$0xff] }
  0x2c   :  { %435 = vmatpush.msrb.mxu2 %v220_v16  ;;  %455 = vmatpush.msrb.mxu3 %v221_v17  ;;  %v74_v1 = vld [vmem:[%s1695_s1 + $0xa0] sm:$0xff]  ;;  %v75_v2 = vld [vmem:[%s1695_s1 + $0xa8] sm:$0xff]  ;;  %v272_v3 = vld [vmem:[%s1695_s1 + $0x6d0] sm:$0xff] }
  0x2d   :  { %395 = vmatpush.msrb.mxu0 %v218_v26  ;;  %415 = vmatpush.msrb.mxu1 %v219_v27  ;;  %v273_v4 = vld [vmem:[%s1695_s1 + $0x6d8] sm:$0xff]  ;;  %v58_v5 = vld [vmem:[%s1695_s1 + $0x20] sm:$0xff]  ;;  %v59_v6 = vld [vmem:[%s1695_s1 + $0x28] sm:$0xff] }
  0x2e   :  { %436 = vmatpush.msrb.mxu2 %v204_v20  ;;  %456 = vmatpush.msrb.mxu3 %v205_v21  ;;  %v302_v7 = vld [vmem:[%s1695_s1 + $0x7c0] sm:$0xff]  ;;  %v303_v8 = vld [vmem:[%s1695_s1 + $0x7c8] sm:$0xff]  ;;  %v256_v9 = vld [vmem:[%s1695_s1 + $0x650] sm:$0xff] }
  0x2f   :  { %396 = vmatpush.msrb.mxu0 %v202_v30  ;;  %416 = vmatpush.msrb.mxu1 %v203_v31  ;;  %v257_v10 = vld [vmem:[%s1695_s1 + $0x658] sm:$0xff]  ;;  %v286_v11 = vld [vmem:[%s1695_s1 + $0x740] sm:$0xff]  ;;  %v287_v12 = vld [vmem:[%s1695_s1 + $0x748] sm:$0xff] }
  0x30   :  { %437 = vmatpush.msrb.mxu2 %v188_v24  ;;  %457 = vmatpush.msrb.mxu3 %v189_v25  ;;  %v240_v13 = vld [vmem:[%s1695_s1 + $0x5d0] sm:$0xff]  ;;  %v241_v14 = vld [vmem:[%s1695_s1 + $0x5d8] sm:$0xff]  ;;  %v270_v15 = vld [vmem:[%s1695_s1 + $0x6c0] sm:$0xff] }
  0x31   :  { %397 = vmatpush.msrb.mxu0 %v186_v34  ;;  %417 = vmatpush.msrb.mxu1 %v187_v35  ;;  %v271_v16 = vld [vmem:[%s1695_s1 + $0x6c8] sm:$0xff]  ;;  %v224_v17 = vld [vmem:[%s1695_s1 + $0x550] sm:$0xff]  ;;  %v225_v18 = vld [vmem:[%s1695_s1 + $0x558] sm:$0xff] }
  0x32   :  { %438 = vmatpush.msrb.mxu2 %v172_v28  ;;  %458 = vmatpush.msrb.mxu3 %v173_v29  ;;  %v254_v19 = vld [vmem:[%s1695_s1 + $0x640] sm:$0xff]  ;;  %v255_v20 = vld [vmem:[%s1695_s1 + $0x648] sm:$0xff]  ;;  %v208_v21 = vld [vmem:[%s1695_s1 + $0x4d0] sm:$0xff] }
  0x33   :  { %398 = vmatpush.msrb.mxu0 %v170_v38  ;;  %418 = vmatpush.msrb.mxu1 %v171_v39  ;;  %v209_v22 = vld [vmem:[%s1695_s1 + $0x4d8] sm:$0xff]  ;;  %v238_v23 = vld [vmem:[%s1695_s1 + $0x5c0] sm:$0xff]  ;;  %v239_v24 = vld [vmem:[%s1695_s1 + $0x5c8] sm:$0xff] }
  0x34   :  { %439 = vmatpush.msrb.mxu2 %v156_v32  ;;  %459 = vmatpush.msrb.mxu3 %v157_v33  ;;  %v192_v25 = vld [vmem:[%s1695_s1 + $0x450] sm:$0xff]  ;;  %v193_v26 = vld [vmem:[%s1695_s1 + $0x458] sm:$0xff]  ;;  %v222_v27 = vld [vmem:[%s1695_s1 + $0x540] sm:$0xff] }
  0x35   :  { %399 = vmatpush.msrb.mxu0 %v154_v42  ;;  %419 = vmatpush.msrb.mxu1 %v155_v43  ;;  %v223_v28 = vld [vmem:[%s1695_s1 + $0x548] sm:$0xff]  ;;  %v176_v29 = vld [vmem:[%s1695_s1 + $0x3d0] sm:$0xff]  ;;  %v177_v30 = vld [vmem:[%s1695_s1 + $0x3d8] sm:$0xff] }
  0x36   :  { %440 = vmatpush.msrb.mxu2 %v140_v36  ;;  %460 = vmatpush.msrb.mxu3 %v141_v37  ;;  %v206_v31 = vld [vmem:[%s1695_s1 + $0x4c0] sm:$0xff]  ;;  %v207_v32 = vld [vmem:[%s1695_s1 + $0x4c8] sm:$0xff]  ;;  %v160_v33 = vld [vmem:[%s1695_s1 + $0x350] sm:$0xff] }
  0x37   :  { %400 = vmatpush.msrb.mxu0 %v138_v46  ;;  %420 = vmatpush.msrb.mxu1 %v139_v47  ;;  %v161_v34 = vld [vmem:[%s1695_s1 + $0x358] sm:$0xff]  ;;  %v190_v35 = vld [vmem:[%s1695_s1 + $0x440] sm:$0xff]  ;;  %v191_v36 = vld [vmem:[%s1695_s1 + $0x448] sm:$0xff] }
  0x38   :  { %441 = vmatpush.msrb.mxu2 %v124_v40  ;;  %461 = vmatpush.msrb.mxu3 %v125_v41  ;;  %v144_v37 = vld [vmem:[%s1695_s1 + $0x2d0] sm:$0xff]  ;;  %v145_v38 = vld [vmem:[%s1695_s1 + $0x2d8] sm:$0xff]  ;;  %v174_v39 = vld [vmem:[%s1695_s1 + $0x3c0] sm:$0xff] }
  0x39   :  { %401 = vmatpush.msrb.mxu0 %v122_v50  ;;  %421 = vmatpush.msrb.mxu1 %v123_v51  ;;  %v175_v40 = vld [vmem:[%s1695_s1 + $0x3c8] sm:$0xff]  ;;  %v128_v41 = vld [vmem:[%s1695_s1 + $0x250] sm:$0xff]  ;;  %v129_v42 = vld [vmem:[%s1695_s1 + $0x258] sm:$0xff] }
  0x3a   :  { %442 = vmatpush.msrb.mxu2 %v108_v44  ;;  %462 = vmatpush.msrb.mxu3 %v109_v45  ;;  %v158_v43 = vld [vmem:[%s1695_s1 + $0x340] sm:$0xff]  ;;  %v159_v44 = vld [vmem:[%s1695_s1 + $0x348] sm:$0xff]  ;;  %v112_v45 = vld [vmem:[%s1695_s1 + $0x1d0] sm:$0xff] }
  0x3b   :  { %402 = vmatpush.msrb.mxu0 %v106_v54  ;;  %422 = vmatpush.msrb.mxu1 %v107_v55  ;;  %v113_v46 = vld [vmem:[%s1695_s1 + $0x1d8] sm:$0xff]  ;;  %v142_v47 = vld [vmem:[%s1695_s1 + $0x2c0] sm:$0xff] }
  0x3c   :  { %443 = vmatpush.msrb.mxu2 %v92_v48  ;;  %463 = vmatpush.msrb.mxu3 %v93_v49  ;;  %v143_v48 = vld [vmem:[%s1695_s1 + $0x2c8] sm:$0xff]  ;;  %v96_v49 = vld [vmem:[%s1695_s1 + $0x150] sm:$0xff]  ;;  %v97_v50 = vld [vmem:[%s1695_s1 + $0x158] sm:$0xff] }
  0x3d   :  { %366 = vmatmul.f32.vlgmr.msra.gmra.mxu2 %v1215_v58  ;;  %386 = vmatmul.f32.vlgmr.msra.gmra.mxu3 %v1215_v58  ;;  %v126_v51 = vld [vmem:[%s1695_s1 + $0x240] sm:$0xff]  ;;  %v81_v54 = vld [vmem:[%s1695_s1 + $0xd8] sm:$0xff] }
  0x3e   :  { %444 = vmatpush.msrb.mxu2 %v76_v52  ;;  %464 = vmatpush.msrb.mxu3 %v77_v53  ;;  %v127_v52 = vld [vmem:[%s1695_s1 + $0x248] sm:$0xff]  ;;  %v80_v53 = vld [vmem:[%s1695_s1 + $0xd0] sm:$0xff]  ;;  %v110_v55 = vld [vmem:[%s1695_s1 + $0x1c0] sm:$0xff] }
  0x3f   :  { %403 = vmatpush.msrb.mxu0 %v90_v61  ;;  %423 = vmatpush.msrb.mxu1 %v91_v62  ;;  %v309_v61 = vld [vmem:[%s1695_s1 + $0x7f8] sm:$0xff]  ;;  %v94_v62 = vld [vmem:[%s1695_s1 + $0x140] sm:$0xff] }
  0x40   :  { %445 = vmatpush.msrb.mxu2 %v60_v56  ;;  %465 = vmatpush.msrb.mxu3 %v61_v57  ;;  %v111_v56 = vld [vmem:[%s1695_s1 + $0x1c8] sm:$0xff]  ;;  %v64_v57 = vld [vmem:[%s1695_s1 + $0x50] sm:$0xff] }
  0x41   :  { %404 = vmatpush.msrb.mxu0 %v74_v1  ;;  %424 = vmatpush.msrb.mxu1 %v75_v2  ;;  %v293_v1 = vld [vmem:[%s1695_s1 + $0x778] sm:$0xff]  ;;  %v78_v2 = vld [vmem:[%s1695_s1 + $0xc0] sm:$0xff] }
  0x42   :  { %510 = vmatpush.msra.mxu2 %v304_v59  ;;  %530 = vmatpush.msra.mxu3 %v305_v60  ;;  %v65_v59 = vld [vmem:[%s1695_s1 + $0x58] sm:$0xff]  ;;  %v308_v60 = vld [vmem:[%s1695_s1 + $0x7f0] sm:$0xff] }
  0x43   :  { %405 = vmatpush.msrb.mxu0 %v58_v5  ;;  %425 = vmatpush.msrb.mxu1 %v59_v6  ;;  %v277_v5 = vld [vmem:[%s1695_s1 + $0x6f8] sm:$0xff]  ;;  %v62_v6 = vld [vmem:[%s1695_s1 + $0x40] sm:$0xff] }
  0x44   :  { %511 = vmatpush.msra.mxu2 %v288_v63  ;;  %531 = vmatpush.msra.mxu3 %v289_v0  ;;  %v95_v63 = vld [vmem:[%s1695_s1 + $0x148] sm:$0xff]  ;;  %v292_v0 = vld [vmem:[%s1695_s1 + $0x770] sm:$0xff] }
  0x45   :  { %326 = vmatmul.f32.vlgmr.msra.gmra.mxu0 %v1215_v58  ;;  %346 = vmatmul.f32.vlgmr.msra.gmra.mxu1 %v1215_v58 }
  0x46   :  { %512 = vmatpush.msra.mxu2 %v272_v3  ;;  %532 = vmatpush.msra.mxu3 %v273_v4  ;;  %v79_v3 = vld [vmem:[%s1695_s1 + $0xc8] sm:$0xff]  ;;  %v276_v4 = vld [vmem:[%s1695_s1 + $0x6f0] sm:$0xff] }
  0x47   :  { %470 = vmatpush.msra.mxu0 %v302_v7  ;;  %490 = vmatpush.msra.mxu1 %v303_v8  ;;  %v63_v7 = vld [vmem:[%s1695_s1 + $0x48] sm:$0xff]  ;;  %v306_v8 = vld [vmem:[%s1695_s1 + $0x7e0] sm:$0xff] }
  0x48   :  { %513 = vmatpush.msra.mxu2 %v256_v9  ;;  %533 = vmatpush.msra.mxu3 %v257_v10  ;;  %v307_v9 = vld [vmem:[%s1695_s1 + $0x7e8] sm:$0xff]  ;;  %v260_v10 = vld [vmem:[%s1695_s1 + $0x670] sm:$0xff] }
  0x49   :  { %471 = vmatpush.msra.mxu0 %v286_v11  ;;  %491 = vmatpush.msra.mxu1 %v287_v12  ;;  %v261_v11 = vld [vmem:[%s1695_s1 + $0x678] sm:$0xff]  ;;  %v290_v12 = vld [vmem:[%s1695_s1 + $0x760] sm:$0xff] }
  0x4a   :  { %514 = vmatpush.msra.mxu2 %v240_v13  ;;  %534 = vmatpush.msra.mxu3 %v241_v14  ;;  %v291_v13 = vld [vmem:[%s1695_s1 + $0x768] sm:$0xff]  ;;  %v244_v14 = vld [vmem:[%s1695_s1 + $0x5f0] sm:$0xff] }
  0x4b   :  { %472 = vmatpush.msra.mxu0 %v270_v15  ;;  %492 = vmatpush.msra.mxu1 %v271_v16  ;;  %v245_v15 = vld [vmem:[%s1695_s1 + $0x5f8] sm:$0xff]  ;;  %v274_v16 = vld [vmem:[%s1695_s1 + $0x6e0] sm:$0xff] }
  0x4c   :  { %515 = vmatpush.msra.mxu2 %v224_v17  ;;  %535 = vmatpush.msra.mxu3 %v225_v18  ;;  %v275_v17 = vld [vmem:[%s1695_s1 + $0x6e8] sm:$0xff]  ;;  %v228_v18 = vld [vmem:[%s1695_s1 + $0x570] sm:$0xff] }
  0x4d   :  { %473 = vmatpush.msra.mxu0 %v254_v19  ;;  %493 = vmatpush.msra.mxu1 %v255_v20  ;;  %v229_v19 = vld [vmem:[%s1695_s1 + $0x578] sm:$0xff]  ;;  %v258_v20 = vld [vmem:[%s1695_s1 + $0x660] sm:$0xff] }
  0x4e   :  { %516 = vmatpush.msra.mxu2 %v208_v21  ;;  %536 = vmatpush.msra.mxu3 %v209_v22  ;;  %v259_v21 = vld [vmem:[%s1695_s1 + $0x668] sm:$0xff]  ;;  %v212_v22 = vld [vmem:[%s1695_s1 + $0x4f0] sm:$0xff] }
  0x4f   :  { %474 = vmatpush.msra.mxu0 %v238_v23  ;;  %494 = vmatpush.msra.mxu1 %v239_v24  ;;  %v213_v23 = vld [vmem:[%s1695_s1 + $0x4f8] sm:$0xff]  ;;  %v242_v24 = vld [vmem:[%s1695_s1 + $0x5e0] sm:$0xff] }
  0x50   :  { %517 = vmatpush.msra.mxu2 %v192_v25  ;;  %537 = vmatpush.msra.mxu3 %v193_v26  ;;  %v243_v25 = vld [vmem:[%s1695_s1 + $0x5e8] sm:$0xff]  ;;  %v196_v26 = vld [vmem:[%s1695_s1 + $0x470] sm:$0xff] }
  0x51   :  { %475 = vmatpush.msra.mxu0 %v222_v27  ;;  %495 = vmatpush.msra.mxu1 %v223_v28  ;;  %v197_v27 = vld [vmem:[%s1695_s1 + $0x478] sm:$0xff]  ;;  %v226_v28 = vld [vmem:[%s1695_s1 + $0x560] sm:$0xff] }
  0x52   :  { %518 = vmatpush.msra.mxu2 %v176_v29  ;;  %538 = vmatpush.msra.mxu3 %v177_v30  ;;  %v227_v29 = vld [vmem:[%s1695_s1 + $0x568] sm:$0xff]  ;;  %v180_v30 = vld [vmem:[%s1695_s1 + $0x3f0] sm:$0xff] }
  0x53   :  { %476 = vmatpush.msra.mxu0 %v206_v31  ;;  %496 = vmatpush.msra.mxu1 %v207_v32  ;;  %v181_v31 = vld [vmem:[%s1695_s1 + $0x3f8] sm:$0xff]  ;;  %v210_v32 = vld [vmem:[%s1695_s1 + $0x4e0] sm:$0xff] }
  0x54   :  { %519 = vmatpush.msra.mxu2 %v160_v33  ;;  %539 = vmatpush.msra.mxu3 %v161_v34  ;;  %v211_v33 = vld [vmem:[%s1695_s1 + $0x4e8] sm:$0xff]  ;;  %v164_v34 = vld [vmem:[%s1695_s1 + $0x370] sm:$0xff] }
  0x55   :  { %477 = vmatpush.msra.mxu0 %v190_v35  ;;  %497 = vmatpush.msra.mxu1 %v191_v36  ;;  %v165_v35 = vld [vmem:[%s1695_s1 + $0x378] sm:$0xff]  ;;  %v194_v36 = vld [vmem:[%s1695_s1 + $0x460] sm:$0xff] }
  0x56   :  { %520 = vmatpush.msra.mxu2 %v144_v37  ;;  %540 = vmatpush.msra.mxu3 %v145_v38  ;;  %v195_v37 = vld [vmem:[%s1695_s1 + $0x468] sm:$0xff]  ;;  %v148_v38 = vld [vmem:[%s1695_s1 + $0x2f0] sm:$0xff] }
  0x57   :  { %478 = vmatpush.msra.mxu0 %v174_v39  ;;  %498 = vmatpush.msra.mxu1 %v175_v40  ;;  %v149_v39 = vld [vmem:[%s1695_s1 + $0x2f8] sm:$0xff]  ;;  %v178_v40 = vld [vmem:[%s1695_s1 + $0x3e0] sm:$0xff] }
  0x58   :  { %521 = vmatpush.msra.mxu2 %v128_v41  ;;  %541 = vmatpush.msra.mxu3 %v129_v42  ;;  %v179_v41 = vld [vmem:[%s1695_s1 + $0x3e8] sm:$0xff]  ;;  %v132_v42 = vld [vmem:[%s1695_s1 + $0x270] sm:$0xff] }
  0x59   :  { %479 = vmatpush.msra.mxu0 %v158_v43  ;;  %499 = vmatpush.msra.mxu1 %v159_v44  ;;  %v133_v43 = vld [vmem:[%s1695_s1 + $0x278] sm:$0xff]  ;;  %v162_v44 = vld [vmem:[%s1695_s1 + $0x360] sm:$0xff] }
  0x5a   :  { %522 = vmatpush.msra.mxu2 %v112_v45  ;;  %542 = vmatpush.msra.mxu3 %v113_v46  ;;  %v163_v45 = vld [vmem:[%s1695_s1 + $0x368] sm:$0xff]  ;;  %v116_v46 = vld [vmem:[%s1695_s1 + $0x1f0] sm:$0xff] }
  0x5b   :  { %480 = vmatpush.msra.mxu0 %v142_v47  ;;  %500 = vmatpush.msra.mxu1 %v143_v48  ;;  %v117_v47 = vld [vmem:[%s1695_s1 + $0x1f8] sm:$0xff]  ;;  %v146_v48 = vld [vmem:[%s1695_s1 + $0x2e0] sm:$0xff] }
  0x5c   :  { %523 = vmatpush.msra.mxu2 %v96_v49  ;;  %543 = vmatpush.msra.mxu3 %v97_v50  ;;  %v147_v49 = vld [vmem:[%s1695_s1 + $0x2e8] sm:$0xff]  ;;  %v100_v50 = vld [vmem:[%s1695_s1 + $0x170] sm:$0xff] }
  0x5d   :  { %481 = vmatpush.msra.mxu0 %v126_v51  ;;  %501 = vmatpush.msra.mxu1 %v127_v52  ;;  %v101_v51 = vld [vmem:[%s1695_s1 + $0x178] sm:$0xff]  ;;  %v130_v52 = vld [vmem:[%s1695_s1 + $0x260] sm:$0xff] }
  0x5e   :  { %524 = vmatpush.msra.mxu2 %v80_v53  ;;  %544 = vmatpush.msra.mxu3 %v81_v54  ;;  %v131_v53 = vld [vmem:[%s1695_s1 + $0x268] sm:$0xff]  ;;  %v84_v54 = vld [vmem:[%s1695_s1 + $0xf0] sm:$0xff] }
  0x5f   :  { %482 = vmatpush.msra.mxu0 %v110_v55  ;;  %502 = vmatpush.msra.mxu1 %v111_v56  ;;  %v85_v55 = vld [vmem:[%s1695_s1 + $0xf8] sm:$0xff]  ;;  %v114_v56 = vld [vmem:[%s1695_s1 + $0x1e0] sm:$0xff] }
  0x60   :  { %525 = vmatpush.msra.mxu2 %v64_v57  ;;  %545 = vmatpush.msra.mxu3 %v65_v59  ;;  %v115_v57 = vld [vmem:[%s1695_s1 + $0x1e8] sm:$0xff]  ;;  %v68_v59 = vld [vmem:[%s1695_s1 + $0x70] sm:$0xff] }
  0x61   :  { %446 = vmatmul.f32.vlgmr.msrb.gmra.mxu2 %v1215_v58  ;;  %466 = vmatmul.f32.vlgmr.msrb.gmra.mxu3 %v1215_v58 }
  0x62   :  { %590 = vmatpush.msrb.mxu2 %v308_v60  ;;  %610 = vmatpush.msrb.mxu3 %v309_v61  ;;  %v69_v60 = vld [vmem:[%s1695_s1 + $0x78] sm:$0xff]  ;;  %v98_v61 = vld [vmem:[%s1695_s1 + $0x160] sm:$0xff] }
  0x63   :  { %483 = vmatpush.msra.mxu0 %v94_v62  ;;  %503 = vmatpush.msra.mxu1 %v95_v63  ;;  %v99_v62 = vld [vmem:[%s1695_s1 + $0x168] sm:$0xff]  ;;  %v82_v63 = vld [vmem:[%s1695_s1 + $0xe0] sm:$0xff] }
  0x64   :  { %591 = vmatpush.msrb.mxu2 %v292_v0  ;;  %611 = vmatpush.msrb.mxu3 %v293_v1  ;;  %v83_v0 = vld [vmem:[%s1695_s1 + $0xe8] sm:$0xff]  ;;  %v66_v1 = vld [vmem:[%s1695_s1 + $0x60] sm:$0xff] }
  0x65   :  { %484 = vmatpush.msra.mxu0 %v78_v2  ;;  %504 = vmatpush.msra.mxu1 %v79_v3  ;;  %v67_v2 = vld [vmem:[%s1695_s1 + $0x68] sm:$0xff]  ;;  %v681_v3 = vld [vmem:[%s1697_s2] sm:$0xff] }
  0x66   :  { %592 = vmatpush.msrb.mxu2 %v276_v4  ;;  %612 = vmatpush.msrb.mxu3 %v277_v5  ;;  %v733_v4 = vld [vmem:[%s1698_s3] sm:$0xff]  ;;  %v687_v5 = vperm.slane %v681_v3, 2 }
  0x67   :  { %485 = vmatpush.msra.mxu0 %v62_v6  ;;  %505 = vmatpush.msra.mxu1 %v63_v7  ;;  %v688_v6 = vperm.slane %v681_v3, 3  ;;  %v685_v7 = vperm.slane %v681_v3, 0 }
  0x68   :  { %406 = vmatmul.f32.vlgmr.msrb.gmra.mxu0 %v1215_v58  ;;  %426 = vmatmul.f32.vlgmr.msrb.gmra.mxu1 %v1215_v58 }
  0x69   :  { %550 = vmatpush.msrb.mxu0 %v306_v8  ;;  %570 = vmatpush.msrb.mxu1 %v307_v9  ;;  %v686_v8 = vperm.slane %v681_v3, 1  ;;  %v739_v9 = vperm.slane %v733_v4, 2 }
  0x6a   :  { %593 = vmatpush.msrb.mxu2 %v260_v10  ;;  %613 = vmatpush.msrb.mxu3 %v261_v11  ;;  %v740_v10 = vperm.slane %v733_v4, 3  ;;  %v737_v11 = vperm.slane %v733_v4, 0 }
  0x6b   :  { %551 = vmatpush.msrb.mxu0 %v290_v12  ;;  %571 = vmatpush.msrb.mxu1 %v291_v13  ;;  %v738_v12 = vperm.slane %v733_v4, 1 }
  0x6c   :  { %594 = vmatpush.msrb.mxu2 %v244_v14  ;;  %614 = vmatpush.msrb.mxu3 %v245_v15 }
  0x6d   :  { %552 = vmatpush.msrb.mxu0 %v274_v16  ;;  %572 = vmatpush.msrb.mxu1 %v275_v17 }
  0x6e   :  { %595 = vmatpush.msrb.mxu2 %v228_v18  ;;  %615 = vmatpush.msrb.mxu3 %v229_v19 }
  0x6f   :  { %553 = vmatpush.msrb.mxu0 %v258_v20  ;;  %573 = vmatpush.msrb.mxu1 %v259_v21 }
  0x70   :  { %596 = vmatpush.msrb.mxu2 %v212_v22  ;;  %616 = vmatpush.msrb.mxu3 %v213_v23 }
  0x71   :  { %554 = vmatpush.msrb.mxu0 %v242_v24  ;;  %574 = vmatpush.msrb.mxu1 %v243_v25 }
  0x72   :  { %597 = vmatpush.msrb.mxu2 %v196_v26  ;;  %617 = vmatpush.msrb.mxu3 %v197_v27 }
  0x73   :  { %555 = vmatpush.msrb.mxu0 %v226_v28  ;;  %575 = vmatpush.msrb.mxu1 %v227_v29  ;;  %v691_v28 = vperm.slane %v681_v3, 6  ;;  %v692_v29 = vperm.slane %v681_v3, 7 }
  0x74   :  { %598 = vmatpush.msrb.mxu2 %v180_v30  ;;  %618 = vmatpush.msrb.mxu3 %v181_v31  ;;  %v689_v30 = vperm.slane %v681_v3, 4  ;;  %v690_v31 = vperm.slane %v681_v3, 5 }
  0x75   :  { %556 = vmatpush.msrb.mxu0 %v210_v32  ;;  %576 = vmatpush.msrb.mxu1 %v211_v33  ;;  %v743_v32 = vperm.slane %v733_v4, 6  ;;  %v744_v33 = vperm.slane %v733_v4, 7 }
  0x76   :  { %599 = vmatpush.msrb.mxu2 %v164_v34  ;;  %619 = vmatpush.msrb.mxu3 %v165_v35  ;;  %v741_v34 = vperm.slane %v733_v4, 4  ;;  %v742_v35 = vperm.slane %v733_v4, 5 }
  0x77   :  { %557 = vmatpush.msrb.mxu0 %v194_v36  ;;  %577 = vmatpush.msrb.mxu1 %v195_v37 }
  0x78   :  { %600 = vmatpush.msrb.mxu2 %v148_v38  ;;  %620 = vmatpush.msrb.mxu3 %v149_v39 }
  0x79   :  { %558 = vmatpush.msrb.mxu0 %v178_v40  ;;  %578 = vmatpush.msrb.mxu1 %v179_v41 }
  0x7a   :  { %601 = vmatpush.msrb.mxu2 %v132_v42  ;;  %621 = vmatpush.msrb.mxu3 %v133_v43 }
  0x7b   :  { %526 = vmatmul.f32.vlgmr.msra.gmra.mxu2 %v1215_v58  ;;  %546 = vmatmul.f32.vlgmr.msra.gmra.mxu3 %v1215_v58 }
  0x7c   :  { %559 = vmatpush.msrb.mxu0 %v162_v44  ;;  %579 = vmatpush.msrb.mxu1 %v163_v45 }
  0x7d   :  { %602 = vmatpush.msrb.mxu2 %v116_v46  ;;  %622 = vmatpush.msrb.mxu3 %v117_v47 }
  0x7e   :  { %560 = vmatpush.msrb.mxu0 %v146_v48  ;;  %580 = vmatpush.msrb.mxu1 %v147_v49 }
  0x7f   :  { %603 = vmatpush.msrb.mxu2 %v100_v50  ;;  %623 = vmatpush.msrb.mxu3 %v101_v51 }
  0x80   :  { %561 = vmatpush.msrb.mxu0 %v130_v52  ;;  %581 = vmatpush.msrb.mxu1 %v131_v53  ;;  %v682_v52 = vld [vmem:[%s1697_s2 + $0x8] sm:$0xff] }
  0x81   :  { %604 = vmatpush.msrb.mxu2 %v84_v54  ;;  %624 = vmatpush.msrb.mxu3 %v85_v55  ;;  %v734_v53 = vld [vmem:[%s1698_s3 + $0x8] sm:$0xff]  ;;  %v695_v54 = vperm.slane %v682_v52, 2  ;;  %v696_v55 = vperm.slane %v682_v52, 3 }
  0x82   :  { %486 = vmatmul.f32.vlgmr.msra.gmra.mxu0 %v1215_v58  ;;  %506 = vmatmul.f32.vlgmr.msra.gmra.mxu1 %v1215_v58 }
  0x83   :  { %562 = vmatpush.msrb.mxu0 %v114_v56  ;;  %582 = vmatpush.msrb.mxu1 %v115_v57  ;;  %v693_v56 = vperm.slane %v682_v52, 0  ;;  %v694_v57 = vperm.slane %v682_v52, 1 }
  0x84   :  { %605 = vmatpush.msrb.mxu2 %v68_v59  ;;  %625 = vmatpush.msrb.mxu3 %v69_v60  ;;  %v747_v59 = vperm.slane %v734_v53, 2  ;;  %v748_v60 = vperm.slane %v734_v53, 3 }
  0x85   :  { %606 = vmatmul.f32.vlgmr.msrb.gmra.mxu2 %v1215_v58  ;;  %626 = vmatmul.f32.vlgmr.msrb.gmra.mxu3 %v1215_v58 }
  0x86   :  { %563 = vmatpush.msrb.mxu0 %v98_v61  ;;  %583 = vmatpush.msrb.mxu1 %v99_v62  ;;  %v745_v61 = vperm.slane %v734_v53, 0  ;;  %v746_v62 = vperm.slane %v734_v53, 1 }
  0x88   :  { %564 = vmatpush.msrb.mxu0 %v82_v63  ;;  %584 = vmatpush.msrb.mxu1 %v83_v0 }
  0x8a   :  { %565 = vmatpush.msrb.mxu0 %v66_v1  ;;  %585 = vmatpush.msrb.mxu1 %v67_v2 }
  0x8b   :  { %566 = vmatmul.f32.vlgmr.msrb.gmra.mxu0 %v1215_v58  ;;  %586 = vmatmul.f32.vlgmr.msrb.gmra.mxu1 %v1215_v58 }
  0xc0   :  { %v367_v13 = vpop.f32.mrf.mxu2  ;;  %v387_v14 = vpop.f32.mrf.mxu3 }
  0xc1   :  { %v719_v16 = vmul.f32 %v687_v5, %v367_v13  ;;  %v720_v17 = vmul.f32 %v688_v6, %v387_v14 }
  0xc2   :  { %v327_v15 = vpop.f32.mrf.mxu0  ;;  %v347_v58 = vpop.f32.mrf.mxu1 }
  0xc3   :  { %v717_v18 = vmul.f32 %v685_v7, %v327_v15  ;;  %v718_v19 = vmul.f32 %v686_v8, %v347_v58  ;;  %v771_v20 = vadd.f32 %v739_v9, %v719_v16  ;;  %v772_v21 = vadd.f32 %v740_v10, %v720_v17 }
  0xc4   :  { %v697_v15 = vperm.slane %v682_v52, 4  ;;  %v698_v58 = vperm.slane %v682_v52, 5  ;;  %v699_v16 = vperm.slane %v682_v52, 6  ;;  %v700_v17 = vperm.slane %v682_v52, 7 }
  0xc5   :  { %v769_v22 = vadd.f32 %v737_v11, %v717_v18  ;;  %v770_v23 = vadd.f32 %v738_v12, %v718_v19  ;;  %v787_v24 = vmax.f32 %v771_v20, 0.0  ;;  %v788_v27 = vmax.f32 %v772_v21, 0.0 }
  0xc6   :  { %v749_v18 = vperm.slane %v734_v53, 4  ;;  %v750_v19 = vperm.slane %v734_v53, 5 }
  0xc7   :  { %v785_v25 = vmax.f32 %v769_v22, 0.0  ;;  %v786_v26 = vmax.f32 %v770_v23, 0.0  ;;  %803 = vst [vmem:[%s1699_s4 + $0x10] sm:$0xff] %v787_v24  ;;  %v751_v22 = vperm.slane %v734_v53, 6  ;;  %v752_v23 = vperm.slane %v734_v53, 7 }
  0xc8   :  { %804 = vst [vmem:[%s1699_s4 + $0x18] sm:$0xff] %v788_v27 }
  0xc9   :  { %801 = vst [vmem:[%s1699_s4] sm:$0xff] %v785_v25 }
  0xca   :  { %802 = vst [vmem:[%s1699_s4 + $0x8] sm:$0xff] %v786_v26 }
  0xe4   :  { %v447_v36 = vpop.f32.mrf.mxu2  ;;  %v467_v37 = vpop.f32.mrf.mxu3 }
  0xe5   :  { %v407_v38 = vpop.f32.mrf.mxu0  ;;  %v427_v39 = vpop.f32.mrf.mxu1  ;;  %v723_v40 = vmul.f32 %v691_v28, %v447_v36  ;;  %v724_v41 = vmul.f32 %v692_v29, %v467_v37 }
  0xe6   :  { %v721_v42 = vmul.f32 %v689_v30, %v407_v38  ;;  %v722_v43 = vmul.f32 %v690_v31, %v427_v39 }
  0xe7   :  { %v775_v44 = vadd.f32 %v743_v32, %v723_v40  ;;  %v776_v45 = vadd.f32 %v744_v33, %v724_v41 }
  0xe8   :  { %v773_v46 = vadd.f32 %v741_v34, %v721_v42  ;;  %v774_v47 = vadd.f32 %v742_v35, %v722_v43 }
  0xe9   :  { %v791_v48 = vmax.f32 %v775_v44, 0.0  ;;  %v792_v51 = vmax.f32 %v776_v45, 0.0 }
  0xea   :  { %v789_v49 = vmax.f32 %v773_v46, 0.0  ;;  %v790_v50 = vmax.f32 %v774_v47, 0.0 }
  0xeb   :  { %807 = vst [vmem:[%s1699_s4 + $0x30] sm:$0xff] %v791_v48 }
  0xec   :  { %805 = vst [vmem:[%s1699_s4 + $0x20] sm:$0xff] %v789_v49 }
  0xed   :  { %806 = vst [vmem:[%s1699_s4 + $0x28] sm:$0xff] %v790_v50 }
  0xee   :  { %808 = vst [vmem:[%s1699_s4 + $0x38] sm:$0xff] %v792_v51 }
  0xfe   :  { %v527_v63 = vpop.f32.mrf.mxu2  ;;  %v547_v0 = vpop.f32.mrf.mxu3 }
  0xff   :  { %v487_v1 = vpop.f32.mrf.mxu0  ;;  %v507_v2 = vpop.f32.mrf.mxu1  ;;  %v727_v3 = vmul.f32 %v695_v54, %v527_v63  ;;  %v728_v4 = vmul.f32 %v696_v55, %v547_v0 }
 0x100   :  { %v725_v5 = vmul.f32 %v693_v56, %v487_v1  ;;  %v726_v6 = vmul.f32 %v694_v57, %v507_v2 }
 0x101   :  { %v779_v7 = vadd.f32 %v747_v59, %v727_v3  ;;  %v780_v8 = vadd.f32 %v748_v60, %v728_v4 }
 0x102   :  { %v777_v9 = vadd.f32 %v745_v61, %v725_v5  ;;  %v778_v10 = vadd.f32 %v746_v62, %v726_v6 }
 0x103   :  { %v795_v11 = vmax.f32 %v779_v7, 0.0  ;;  %v796_v14 = vmax.f32 %v780_v8, 0.0 }
 0x104   :  { %v793_v12 = vmax.f32 %v777_v9, 0.0  ;;  %v794_v13 = vmax.f32 %v778_v10, 0.0 }
 0x105   :  { %811 = vst [vmem:[%s1699_s4 + $0x50] sm:$0xff] %v795_v11 }
 0x106   :  { %809 = vst [vmem:[%s1699_s4 + $0x40] sm:$0xff] %v793_v12 }
 0x107   :  { %810 = vst [vmem:[%s1699_s4 + $0x48] sm:$0xff] %v794_v13 }
 0x108   :  { %812 = vst [vmem:[%s1699_s4 + $0x58] sm:$0xff] %v796_v14  ;;  %v567_v20 = vpop.f32.mrf.mxu0  ;;  %v587_v21 = vpop.f32.mrf.mxu1 }
 0x109   :  { %v729_v24 = vmul.f32 %v697_v15, %v567_v20  ;;  %v730_v25 = vmul.f32 %v698_v58, %v587_v21  ;;  %v607_v26 = vpop.f32.mrf.mxu2  ;;  %v627_v27 = vpop.f32.mrf.mxu3 }
 0x10a   :  { %v731_v28 = vmul.f32 %v699_v16, %v607_v26  ;;  %v732_v29 = vmul.f32 %v700_v17, %v627_v27 }
 0x10b   :  { %v781_v30 = vadd.f32 %v749_v18, %v729_v24  ;;  %v782_v31 = vadd.f32 %v750_v19, %v730_v25 }
 0x10c   :  { %v783_v32 = vadd.f32 %v751_v22, %v731_v28  ;;  %v784_v33 = vadd.f32 %v752_v23, %v732_v29 }
 0x10d   :  { %v797_v34 = vmax.f32 %v781_v30, 0.0  ;;  %v798_v35 = vmax.f32 %v782_v31, 0.0 }
 0x10e   :  { %v799_v36 = vmax.f32 %v783_v32, 0.0  ;;  %v800_v37 = vmax.f32 %v784_v33, 0.0 }
 0x10f   :  { %813 = vst [vmem:[%s1699_s4 + $0x60] sm:$0xff] %v797_v34 }
 0x110   :  { %814 = vst [vmem:[%s1699_s4 + $0x68] sm:$0xff] %v798_v35 }
 0x111   :  { %815 = vst [vmem:[%s1699_s4 + $0x70] sm:$0xff] %v799_v36 }
 0x112   :  { %816 = vst [vmem:[%s1699_s4 + $0x78] sm:$0xff] %v800_v37 }

// kernel: netg_forward.5
= control target key start
LH: loop header
LB: loop body
LE: loop exit
PB: predicated region body
PF: predicated region fallthrough
CT: control target
= control target key end

     0   :  { %s1671_s15 = smov 0   ;;  %s1673_s16 = smov 0   ;;  %s2364_s0 = inlined_call_operand.vmem [shape: f32[256,2048], index: 0, kind: input, shape index: {}]   ;;  %s2365_s1 = inlined_call_operand.vmem [shape: f32[2048,128], index: 1, kind: input, shape index: {}]   ;;  %s2366_s2 = inlined_call_operand.vmem [shape: f32[1,128], index: 2, kind: input, shape index: {}]   ;;  %s2367_s3 = inlined_call_operand.vmem [shape: f32[1,128], index: 3, kind: input, shape index: {}]   ;;  %s2368_s4 = inlined_call_operand.vmem [shape: f32[256,128], index: 4, kind: output, shape index: {}]  }
   0x1   :  { %s1675_s17 = smov 0   ;;  %s1677_s18 = smov 0  }
   0x2   :  { %s1679_s19 = smov 0  }
   0x3 LB: > { %s23_s20 = sadd.s32 1, %s1639_s18  ;;  %p42_p1 = scmp.ne.s32.totalorder %s1631_s16, %s1627_s15  ;;  %s1643_s19 = sphi %s1679_s19, %s14_s19   ;;  %s1639_s18 = sphi %s1677_s18, %s2372_s18   ;;  %s1635_s17 = sphi %s1675_s17, %s2371_s17   ;;  %s1631_s16 = sphi %s1673_s16, %s2370_s16   ;;  %s1627_s15 = sphi %s1671_s15, %s2369_s15  }
   0x4   : > { %p24_p0 = scmp.ge.s32.totalorder %s23_s20, 4  ;;  %p43_p2 = scmp.eq.s32.totalorder %s1643_s19, 0 }
   0x5   : > { %s35_s22 = sadd.s32 1, %s1631_s16  ;;  %p1547_p5 = scmp.ge.s32.totalorder %s1643_s19, 4 }
   0x6   : > { %s2374_s20 = smov (%p24_p0, %s23_s20), 0  ;;  %p44_p3 = por %p43_p2, %p42_p1 }
   0x7   : > { %s31_s21 = ssub.s32 %s1639_s18, %s2374_s20  ;;  %168 = sbr.rel (%p1547_p5) target bundleno = 144 (0x90), region = 24 }
   0x8   : > { %p33_p4 = scmp.eq.s32.totalorder %s31_s21, 0 }
   0xa   : > { %s1706_s23 = scalar_select %p33_p4, %s1631_s16, %s35_s22  }
   0xc   : > { %171 = sbr.rel (!%p44_p3) target bundleno = 144 (0x90), region = 28  ;;  %s173_s24 = sand.u32 (%p44_p3), 1, %s1631_s16  }
   0xd   : > { %s1561_s25 = sshll.u32 (%p44_p3), %s1639_s18, 5  ;;  %s1548_s26 = sshll.u32 (%p44_p3), %s173_s24, 10 }
   0xe   : > { %s1714_s29 = scalar_lea.vmem (%p44_p3), %s2364_s0, %s1561_s25  ;;  %s1719_s30 = scalar_lea.vmem (%p44_p3), [#allocation3], %s1548_s26 }
   0xf   : > { %v194_v0 = vld [vmem:[%s1714_s29] sm:$0xff] (%p44_p3)  ;;  %v196_v1 = vld [vmem:[%s1714_s29 + $0x8] sm:$0xff] (%p44_p3)  ;;  %v198_v2 = vld [vmem:[%s1714_s29 + $0x10] sm:$0xff] (%p44_p3) }
  0x10   : > { %195 = vst [vmem:[%s1719_s30] sm:$0xff] (%p44_p3), %v194_v0  ;;  %v200_v3 = vld [vmem:[%s1714_s29 + $0x18] sm:$0xff] (%p44_p3)  ;;  %v202_v4 = vld [vmem:[%s1714_s29 + $0x80] sm:$0xff] (%p44_p3)  ;;  %v204_v5 = vld [vmem:[%s1714_s29 + $0x88] sm:$0xff] (%p44_p3) }
  0x11   : > { %197 = vst [vmem:[%s1719_s30 + $0x8] sm:$0xff] %v196_v1  ;;  %v206_v6 = vld [vmem:[%s1714_s29 + $0x90] sm:$0xff]  ;;  %v208_v7 = vld [vmem:[%s1714_s29 + $0x98] sm:$0xff]  ;;  %v210_v8 = vld [vmem:[%s1714_s29 + $0x100] sm:$0xff] }
  0x12   : > { %199 = vst [vmem:[%s1719_s30 + $0x10] sm:$0xff] %v198_v2  ;;  %v212_v9 = vld [vmem:[%s1714_s29 + $0x108] sm:$0xff]  ;;  %v214_v10 = vld [vmem:[%s1714_s29 + $0x110] sm:$0xff]  ;;  %v216_v11 = vld [vmem:[%s1714_s29 + $0x118] sm:$0xff] }
  0x13   : > { %201 = vst [vmem:[%s1719_s30 + $0x18] sm:$0xff] %v200_v3  ;;  %v218_v12 = vld [vmem:[%s1714_s29 + $0x180] sm:$0xff]  ;;  %v220_v13 = vld [vmem:[%s1714_s29 + $0x188] sm:$0xff]  ;;  %v222_v14 = vld [vmem:[%s1714_s29 + $0x190] sm:$0xff] }
  0x14   : > { %203 = vst [vmem:[%s1719_s30 + $0x20] sm:$0xff] %v202_v4  ;;  %v224_v15 = vld [vmem:[%s1714_s29 + $0x198] sm:$0xff]  ;;  %v226_v16 = vld [vmem:[%s1714_s29 + $0x200] sm:$0xff]  ;;  %v228_v17 = vld [vmem:[%s1714_s29 + $0x208] sm:$0xff] }
  0x15   : > { %205 = vst [vmem:[%s1719_s30 + $0x28] sm:$0xff] %v204_v5  ;;  %v230_v18 = vld [vmem:[%s1714_s29 + $0x210] sm:$0xff]  ;;  %v232_v19 = vld [vmem:[%s1714_s29 + $0x218] sm:$0xff]  ;;  %v234_v20 = vld [vmem:[%s1714_s29 + $0x280] sm:$0xff] }
  0x16   : > { %207 = vst [vmem:[%s1719_s30 + $0x30] sm:$0xff] %v206_v6  ;;  %v236_v21 = vld [vmem:[%s1714_s29 + $0x288] sm:$0xff]  ;;  %v238_v22 = vld [vmem:[%s1714_s29 + $0x290] sm:$0xff]  ;;  %v240_v23 = vld [vmem:[%s1714_s29 + $0x298] sm:$0xff] }
  0x17   : > { %209 = vst [vmem:[%s1719_s30 + $0x38] sm:$0xff] %v208_v7  ;;  %v242_v24 = vld [vmem:[%s1714_s29 + $0x300] sm:$0xff]  ;;  %v244_v25 = vld [vmem:[%s1714_s29 + $0x308] sm:$0xff]  ;;  %v246_v26 = vld [vmem:[%s1714_s29 + $0x310] sm:$0xff] }
  0x18   : > { %211 = vst [vmem:[%s1719_s30 + $0x40] sm:$0xff] %v210_v8  ;;  %v248_v27 = vld [vmem:[%s1714_s29 + $0x318] sm:$0xff]  ;;  %v250_v28 = vld [vmem:[%s1714_s29 + $0x380] sm:$0xff]  ;;  %v252_v29 = vld [vmem:[%s1714_s29 + $0x388] sm:$0xff] }
  0x19   : > { %213 = vst [vmem:[%s1719_s30 + $0x48] sm:$0xff] %v212_v9  ;;  %v254_v30 = vld [vmem:[%s1714_s29 + $0x390] sm:$0xff]  ;;  %v256_v31 = vld [vmem:[%s1714_s29 + $0x398] sm:$0xff]  ;;  %v258_v32 = vld [vmem:[%s1714_s29 + $0x400] sm:$0xff] }
  0x1a   : > { %215 = vst [vmem:[%s1719_s30 + $0x50] sm:$0xff] %v214_v10  ;;  %v260_v33 = vld [vmem:[%s1714_s29 + $0x408] sm:$0xff]  ;;  %v262_v34 = vld [vmem:[%s1714_s29 + $0x410] sm:$0xff]  ;;  %v264_v35 = vld [vmem:[%s1714_s29 + $0x418] sm:$0xff] }
  0x1b   : > { %217 = vst [vmem:[%s1719_s30 + $0x58] sm:$0xff] %v216_v11  ;;  %v266_v36 = vld [vmem:[%s1714_s29 + $0x480] sm:$0xff]  ;;  %v268_v37 = vld [vmem:[%s1714_s29 + $0x488] sm:$0xff]  ;;  %v270_v38 = vld [vmem:[%s1714_s29 + $0x490] sm:$0xff] }
  0x1c   : > { %219 = vst [vmem:[%s1719_s30 + $0x60] sm:$0xff] %v218_v12  ;;  %v272_v39 = vld [vmem:[%s1714_s29 + $0x498] sm:$0xff]  ;;  %v274_v40 = vld [vmem:[%s1714_s29 + $0x500] sm:$0xff]  ;;  %v276_v41 = vld [vmem:[%s1714_s29 + $0x508] sm:$0xff] }
  0x1d   : > { %221 = vst [vmem:[%s1719_s30 + $0x68] sm:$0xff] %v220_v13  ;;  %v278_v42 = vld [vmem:[%s1714_s29 + $0x510] sm:$0xff]  ;;  %v280_v43 = vld [vmem:[%s1714_s29 + $0x518] sm:$0xff]  ;;  %v282_v44 = vld [vmem:[%s1714_s29 + $0x580] sm:$0xff] }
  0x1e   : > { %223 = vst [vmem:[%s1719_s30 + $0x70] sm:$0xff] %v222_v14  ;;  %v284_v45 = vld [vmem:[%s1714_s29 + $0x588] sm:$0xff]  ;;  %v286_v46 = vld [vmem:[%s1714_s29 + $0x590] sm:$0xff]  ;;  %v288_v47 = vld [vmem:[%s1714_s29 + $0x598] sm:$0xff] }
  0x1f   : > { %225 = vst [vmem:[%s1719_s30 + $0x78] sm:$0xff] %v224_v15  ;;  %v290_v48 = vld [vmem:[%s1714_s29 + $0x600] sm:$0xff]  ;;  %v292_v49 = vld [vmem:[%s1714_s29 + $0x608] sm:$0xff]  ;;  %v294_v50 = vld [vmem:[%s1714_s29 + $0x610] sm:$0xff] }
  0x20   : > { %227 = vst [vmem:[%s1719_s30 + $0x80] sm:$0xff] %v226_v16  ;;  %v296_v51 = vld [vmem:[%s1714_s29 + $0x618] sm:$0xff]  ;;  %v298_v52 = vld [vmem:[%s1714_s29 + $0x680] sm:$0xff]  ;;  %v300_v53 = vld [vmem:[%s1714_s29 + $0x688] sm:$0xff] }
  0x21   : > { %229 = vst [vmem:[%s1719_s30 + $0x88] sm:$0xff] %v228_v17  ;;  %v302_v54 = vld [vmem:[%s1714_s29 + $0x690] sm:$0xff]  ;;  %v304_v55 = vld [vmem:[%s1714_s29 + $0x698] sm:$0xff]  ;;  %v306_v56 = vld [vmem:[%s1714_s29 + $0x700] sm:$0xff] }
  0x22   : > { %231 = vst [vmem:[%s1719_s30 + $0x90] sm:$0xff] %v230_v18  ;;  %v308_v57 = vld [vmem:[%s1714_s29 + $0x708] sm:$0xff]  ;;  %v310_v58 = vld [vmem:[%s1714_s29 + $0x710] sm:$0xff]  ;;  %v312_v59 = vld [vmem:[%s1714_s29 + $0x718] sm:$0xff] }
  0x23   : > { %233 = vst [vmem:[%s1719_s30 + $0x98] sm:$0xff] %v232_v19  ;;  %v314_v60 = vld [vmem:[%s1714_s29 + $0x780] sm:$0xff]  ;;  %v316_v61 = vld [vmem:[%s1714_s29 + $0x788] sm:$0xff]  ;;  %v318_v62 = vld [vmem:[%s1714_s29 + $0x790] sm:$0xff] }
  0x24   : > { %235 = vst [vmem:[%s1719_s30 + $0xa0] sm:$0xff] %v234_v20  ;;  %v320_v63 = vld [vmem:[%s1714_s29 + $0x798] sm:$0xff]  ;;  %v322_v0 = vld [vmem:[%s1714_s29 + $0x800] sm:$0xff]  ;;  %v324_v1 = vld [vmem:[%s1714_s29 + $0x808] sm:$0xff] }
  0x25   : > { %237 = vst [vmem:[%s1719_s30 + $0xa8] sm:$0xff] %v236_v21  ;;  %v326_v2 = vld [vmem:[%s1714_s29 + $0x810] sm:$0xff]  ;;  %v328_v3 = vld [vmem:[%s1714_s29 + $0x818] sm:$0xff]  ;;  %v330_v4 = vld [vmem:[%s1714_s29 + $0x880] sm:$0xff] }
  0x26   : > { %239 = vst [vmem:[%s1719_s30 + $0xb0] sm:$0xff] %v238_v22  ;;  %v332_v5 = vld [vmem:[%s1714_s29 + $0x888] sm:$0xff]  ;;  %v334_v6 = vld [vmem:[%s1714_s29 + $0x890] sm:$0xff]  ;;  %v336_v7 = vld [vmem:[%s1714_s29 + $0x898] sm:$0xff] }
  0x27   : > { %241 = vst [vmem:[%s1719_s30 + $0xb8] sm:$0xff] %v240_v23  ;;  %v338_v8 = vld [vmem:[%s1714_s29 + $0x900] sm:$0xff]  ;;  %v340_v9 = vld [vmem:[%s1714_s29 + $0x908] sm:$0xff]  ;;  %v342_v10 = vld [vmem:[%s1714_s29 + $0x910] sm:$0xff] }
  0x28   : > { %243 = vst [vmem:[%s1719_s30 + $0xc0] sm:$0xff] %v242_v24  ;;  %v344_v11 = vld [vmem:[%s1714_s29 + $0x918] sm:$0xff]  ;;  %v346_v12 = vld [vmem:[%s1714_s29 + $0x980] sm:$0xff]  ;;  %v348_v13 = vld [vmem:[%s1714_s29 + $0x988] sm:$0xff] }
  0x29   : > { %245 = vst [vmem:[%s1719_s30 + $0xc8] sm:$0xff] %v244_v25  ;;  %v350_v14 = vld [vmem:[%s1714_s29 + $0x990] sm:$0xff]  ;;  %v352_v15 = vld [vmem:[%s1714_s29 + $0x998] sm:$0xff]  ;;  %v354_v16 = vld [vmem:[%s1714_s29 + $0xa00] sm:$0xff] }
  0x2a   : > { %247 = vst [vmem:[%s1719_s30 + $0xd0] sm:$0xff] %v246_v26  ;;  %v356_v17 = vld [vmem:[%s1714_s29 + $0xa08] sm:$0xff]  ;;  %v358_v18 = vld [vmem:[%s1714_s29 + $0xa10] sm:$0xff]  ;;  %v360_v19 = vld [vmem:[%s1714_s29 + $0xa18] sm:$0xff] }
  0x2b   : > { %249 = vst [vmem:[%s1719_s30 + $0xd8] sm:$0xff] %v248_v27  ;;  %v362_v20 = vld [vmem:[%s1714_s29 + $0xa80] sm:$0xff]  ;;  %v364_v21 = vld [vmem:[%s1714_s29 + $0xa88] sm:$0xff]  ;;  %v366_v22 = vld [vmem:[%s1714_s29 + $0xa90] sm:$0xff] }
  0x2c   : > { %251 = vst [vmem:[%s1719_s30 + $0xe0] sm:$0xff] %v250_v28  ;;  %v368_v23 = vld [vmem:[%s1714_s29 + $0xa98] sm:$0xff]  ;;  %v370_v24 = vld [vmem:[%s1714_s29 + $0xb00] sm:$0xff]  ;;  %v372_v25 = vld [vmem:[%s1714_s29 + $0xb08] sm:$0xff] }
  0x2d   : > { %253 = vst [vmem:[%s1719_s30 + $0xe8] sm:$0xff] %v252_v29  ;;  %v374_v26 = vld [vmem:[%s1714_s29 + $0xb10] sm:$0xff]  ;;  %v376_v27 = vld [vmem:[%s1714_s29 + $0xb18] sm:$0xff]  ;;  %v378_v28 = vld [vmem:[%s1714_s29 + $0xb80] sm:$0xff] }
  0x2e   : > { %255 = vst [vmem:[%s1719_s30 + $0xf0] sm:$0xff] %v254_v30  ;;  %v380_v29 = vld [vmem:[%s1714_s29 + $0xb88] sm:$0xff]  ;;  %v382_v30 = vld [vmem:[%s1714_s29 + $0xb90] sm:$0xff] }
  0x2f   : > { %257 = vst [vmem:[%s1719_s30 + $0xf8] sm:$0xff] %v256_v31  ;;  %v384_v31 = vld [vmem:[%s1714_s29 + $0xb98] sm:$0xff] }
  0x30   : > { %259 = vst [vmem:[%s1719_s30 + $0x100] sm:$0xff] %v258_v32  ;;  %v386_v32 = vld [vmem:[%s1714_s29 + $0xc00] sm:$0xff] }
  0x31   : > { %261 = vst [vmem:[%s1719_s30 + $0x108] sm:$0xff] %v260_v33  ;;  %v388_v33 = vld [vmem:[%s1714_s29 + $0xc08] sm:$0xff] }
  0x32   : > { %263 = vst [vmem:[%s1719_s30 + $0x110] sm:$0xff] %v262_v34  ;;  %v390_v34 = vld [vmem:[%s1714_s29 + $0xc10] sm:$0xff] }
  0x33   : > { %265 = vst [vmem:[%s1719_s30 + $0x118] sm:$0xff] %v264_v35  ;;  %v392_v35 = vld [vmem:[%s1714_s29 + $0xc18] sm:$0xff] }
  0x34   : > { %267 = vst [vmem:[%s1719_s30 + $0x120] sm:$0xff] %v266_v36  ;;  %v394_v36 = vld [vmem:[%s1714_s29 + $0xc80] sm:$0xff] }
  0x35   : > { %269 = vst [vmem:[%s1719_s30 + $0x128] sm:$0xff] %v268_v37  ;;  %v396_v37 = vld [vmem:[%s1714_s29 + $0xc88] sm:$0xff] }
  0x36   : > { %271 = vst [vmem:[%s1719_s30 + $0x130] sm:$0xff] %v270_v38  ;;  %v398_v38 = vld [vmem:[%s1714_s29 + $0xc90] sm:$0xff] }
  0x37   : > { %273 = vst [vmem:[%s1719_s30 + $0x138] sm:$0xff] %v272_v39  ;;  %v400_v39 = vld [vmem:[%s1714_s29 + $0xc98] sm:$0xff] }
  0x38   : > { %275 = vst [vmem:[%s1719_s30 + $0x140] sm:$0xff] %v274_v40  ;;  %v402_v40 = vld [vmem:[%s1714_s29 + $0xd00] sm:$0xff] }
  0x39   : > { %277 = vst [vmem:[%s1719_s30 + $0x148] sm:$0xff] %v276_v41  ;;  %v404_v41 = vld [vmem:[%s1714_s29 + $0xd08] sm:$0xff] }
  0x3a   : > { %279 = vst [vmem:[%s1719_s30 + $0x150] sm:$0xff] %v278_v42  ;;  %v406_v42 = vld [vmem:[%s1714_s29 + $0xd10] sm:$0xff] }
  0x3b   : > { %281 = vst [vmem:[%s1719_s30 + $0x158] sm:$0xff] %v280_v43  ;;  %v408_v43 = vld [vmem:[%s1714_s29 + $0xd18] sm:$0xff] }
  0x3c   : > { %283 = vst [vmem:[%s1719_s30 + $0x160] sm:$0xff] %v282_v44  ;;  %v410_v44 = vld [vmem:[%s1714_s29 + $0xd80] sm:$0xff] }
  0x3d   : > { %285 = vst [vmem:[%s1719_s30 + $0x168] sm:$0xff] %v284_v45  ;;  %v412_v45 = vld [vmem:[%s1714_s29 + $0xd88] sm:$0xff] }
  0x3e   : > { %287 = vst [vmem:[%s1719_s30 + $0x170] sm:$0xff] %v286_v46  ;;  %v414_v46 = vld [vmem:[%s1714_s29 + $0xd90] sm:$0xff] }
  0x3f   : > { %289 = vst [vmem:[%s1719_s30 + $0x178] sm:$0xff] %v288_v47  ;;  %v416_v47 = vld [vmem:[%s1714_s29 + $0xd98] sm:$0xff] }
  0x40   : > { %291 = vst [vmem:[%s1719_s30 + $0x180] sm:$0xff] %v290_v48  ;;  %v418_v48 = vld [vmem:[%s1714_s29 + $0xe00] sm:$0xff] }
  0x41   : > { %293 = vst [vmem:[%s1719_s30 + $0x188] sm:$0xff] %v292_v49  ;;  %v420_v49 = vld [vmem:[%s1714_s29 + $0xe08] sm:$0xff] }
  0x42   : > { %295 = vst [vmem:[%s1719_s30 + $0x190] sm:$0xff] %v294_v50  ;;  %v422_v50 = vld [vmem:[%s1714_s29 + $0xe10] sm:$0xff] }
  0x43   : > { %297 = vst [vmem:[%s1719_s30 + $0x198] sm:$0xff] %v296_v51  ;;  %v424_v51 = vld [vmem:[%s1714_s29 + $0xe18] sm:$0xff] }
  0x44   : > { %299 = vst [vmem:[%s1719_s30 + $0x1a0] sm:$0xff] %v298_v52  ;;  %v426_v52 = vld [vmem:[%s1714_s29 + $0xe80] sm:$0xff] }
  0x45   : > { %301 = vst [vmem:[%s1719_s30 + $0x1a8] sm:$0xff] %v300_v53  ;;  %v428_v53 = vld [vmem:[%s1714_s29 + $0xe88] sm:$0xff] }
  0x46   : > { %303 = vst [vmem:[%s1719_s30 + $0x1b0] sm:$0xff] %v302_v54  ;;  %v430_v54 = vld [vmem:[%s1714_s29 + $0xe90] sm:$0xff] }
  0x47   : > { %305 = vst [vmem:[%s1719_s30 + $0x1b8] sm:$0xff] %v304_v55  ;;  %v432_v55 = vld [vmem:[%s1714_s29 + $0xe98] sm:$0xff] }
  0x48   : > { %307 = vst [vmem:[%s1719_s30 + $0x1c0] sm:$0xff] %v306_v56  ;;  %v434_v56 = vld [vmem:[%s1714_s29 + $0xf00] sm:$0xff] }
  0x49   : > { %309 = vst [vmem:[%s1719_s30 + $0x1c8] sm:$0xff] %v308_v57  ;;  %v436_v57 = vld [vmem:[%s1714_s29 + $0xf08] sm:$0xff] }
  0x4a   : > { %311 = vst [vmem:[%s1719_s30 + $0x1d0] sm:$0xff] %v310_v58  ;;  %v438_v58 = vld [vmem:[%s1714_s29 + $0xf10] sm:$0xff] }
  0x4b   : > { %313 = vst [vmem:[%s1719_s30 + $0x1d8] sm:$0xff] %v312_v59  ;;  %v440_v59 = vld [vmem:[%s1714_s29 + $0xf18] sm:$0xff] }
  0x4c   : > { %315 = vst [vmem:[%s1719_s30 + $0x1e0] sm:$0xff] %v314_v60  ;;  %v442_v60 = vld [vmem:[%s1714_s29 + $0xf80] sm:$0xff] }
  0x4d   : > { %317 = vst [vmem:[%s1719_s30 + $0x1e8] sm:$0xff] %v316_v61  ;;  %v444_v61 = vld [vmem:[%s1714_s29 + $0xf88] sm:$0xff] }
  0x4e   : > { %319 = vst [vmem:[%s1719_s30 + $0x1f0] sm:$0xff] %v318_v62  ;;  %v446_v62 = vld [vmem:[%s1714_s29 + $0xf90] sm:$0xff] }
  0x4f   : > { %321 = vst [vmem:[%s1719_s30 + $0x1f8] sm:$0xff] %v320_v63  ;;  %v448_v63 = vld [vmem:[%s1714_s29 + $0xf98] sm:$0xff] }
  0x50   : > { %323 = vst [vmem:[%s1719_s30 + $0x200] sm:$0xff] %v322_v0 }
  0x51   : > { %325 = vst [vmem:[%s1719_s30 + $0x208] sm:$0xff] %v324_v1 }
  0x52   : > { %327 = vst [vmem:[%s1719_s30 + $0x210] sm:$0xff] %v326_v2 }
  0x53   : > { %329 = vst [vmem:[%s1719_s30 + $0x218] sm:$0xff] %v328_v3 }
  0x54   : > { %331 = vst [vmem:[%s1719_s30 + $0x220] sm:$0xff] %v330_v4 }
  0x55   : > { %333 = vst [vmem:[%s1719_s30 + $0x228] sm:$0xff] %v332_v5 }
  0x56   : > { %335 = vst [vmem:[%s1719_s30 + $0x230] sm:$0xff] %v334_v6 }
  0x57   : > { %337 = vst [vmem:[%s1719_s30 + $0x238] sm:$0xff] %v336_v7 }
  0x58   : > { %339 = vst [vmem:[%s1719_s30 + $0x240] sm:$0xff] %v338_v8 }
  0x59   : > { %341 = vst [vmem:[%s1719_s30 + $0x248] sm:$0xff] %v340_v9 }
  0x5a   : > { %343 = vst [vmem:[%s1719_s30 + $0x250] sm:$0xff] %v342_v10 }
  0x5b   : > { %345 = vst [vmem:[%s1719_s30 + $0x258] sm:$0xff] %v344_v11 }
  0x5c   : > { %347 = vst [vmem:[%s1719_s30 + $0x260] sm:$0xff] %v346_v12 }
  0x5d   : > { %349 = vst [vmem:[%s1719_s30 + $0x268] sm:$0xff] %v348_v13 }
  0x5e   : > { %351 = vst [vmem:[%s1719_s30 + $0x270] sm:$0xff] %v350_v14 }
  0x5f   : > { %353 = vst [vmem:[%s1719_s30 + $0x278] sm:$0xff] %v352_v15 }
  0x60   : > { %355 = vst [vmem:[%s1719_s30 + $0x280] sm:$0xff] %v354_v16 }
  0x61   : > { %357 = vst [vmem:[%s1719_s30 + $0x288] sm:$0xff] %v356_v17 }
  0x62   : > { %359 = vst [vmem:[%s1719_s30 + $0x290] sm:$0xff] %v358_v18 }
  0x63   : > { %361 = vst [vmem:[%s1719_s30 + $0x298] sm:$0xff] %v360_v19 }
  0x64   : > { %363 = vst [vmem:[%s1719_s30 + $0x2a0] sm:$0xff] %v362_v20 }
  0x65   : > { %365 = vst [vmem:[%s1719_s30 + $0x2a8] sm:$0xff] %v364_v21 }
  0x66   : > { %367 = vst [vmem:[%s1719_s30 + $0x2b0] sm:$0xff] %v366_v22 }
  0x67   : > { %369 = vst [vmem:[%s1719_s30 + $0x2b8] sm:$0xff] %v368_v23 }
  0x68   : > { %371 = vst [vmem:[%s1719_s30 + $0x2c0] sm:$0xff] %v370_v24 }
  0x69   : > { %373 = vst [vmem:[%s1719_s30 + $0x2c8] sm:$0xff] %v372_v25 }
  0x6a   : > { %375 = vst [vmem:[%s1719_s30 + $0x2d0] sm:$0xff] %v374_v26 }
  0x6b   : > { %377 = vst [vmem:[%s1719_s30 + $0x2d8] sm:$0xff] %v376_v27 }
  0x6c   : > { %379 = vst [vmem:[%s1719_s30 + $0x2e0] sm:$0xff] %v378_v28 }
  0x6d   : > { %381 = vst [vmem:[%s1719_s30 + $0x2e8] sm:$0xff] %v380_v29 }
  0x6e   : > { %383 = vst [vmem:[%s1719_s30 + $0x2f0] sm:$0xff] %v382_v30 }
  0x6f   : > { %385 = vst [vmem:[%s1719_s30 + $0x2f8] sm:$0xff] %v384_v31 }
  0x70   : > { %387 = vst [vmem:[%s1719_s30 + $0x300] sm:$0xff] %v386_v32 }
  0x71   : > { %389 = vst [vmem:[%s1719_s30 + $0x308] sm:$0xff] %v388_v33 }
  0x72   : > { %391 = vst [vmem:[%s1719_s30 + $0x310] sm:$0xff] %v390_v34 }
  0x73   : > { %393 = vst [vmem:[%s1719_s30 + $0x318] sm:$0xff] %v392_v35 }
  0x74   : > { %395 = vst [vmem:[%s1719_s30 + $0x320] sm:$0xff] %v394_v36 }
  0x75   : > { %397 = vst [vmem:[%s1719_s30 + $0x328] sm:$0xff] %v396_v37 }
  0x76   : > { %399 = vst [vmem:[%s1719_s30 + $0x330] sm:$0xff] %v398_v38 }
  0x77   : > { %401 = vst [vmem:[%s1719_s30 + $0x338] sm:$0xff] %v400_v39 }
  0x78   : > { %403 = vst [vmem:[%s1719_s30 + $0x340] sm:$0xff] %v402_v40 }
  0x79   : > { %405 = vst [vmem:[%s1719_s30 + $0x348] sm:$0xff] %v404_v41 }
  0x7a   : > { %407 = vst [vmem:[%s1719_s30 + $0x350] sm:$0xff] %v406_v42 }
  0x7b   : > { %409 = vst [vmem:[%s1719_s30 + $0x358] sm:$0xff] %v408_v43 }
  0x7c   : > { %411 = vst [vmem:[%s1719_s30 + $0x360] sm:$0xff] %v410_v44 }
  0x7d   : > { %413 = vst [vmem:[%s1719_s30 + $0x368] sm:$0xff] %v412_v45 }
  0x7e   : > { %415 = vst [vmem:[%s1719_s30 + $0x370] sm:$0xff] %v414_v46 }
  0x7f   : > { %417 = vst [vmem:[%s1719_s30 + $0x378] sm:$0xff] %v416_v47 }
  0x80   : > { %419 = vst [vmem:[%s1719_s30 + $0x380] sm:$0xff] %v418_v48 }
  0x81   : > { %421 = vst [vmem:[%s1719_s30 + $0x388] sm:$0xff] %v420_v49 }
  0x82   : > { %423 = vst [vmem:[%s1719_s30 + $0x390] sm:$0xff] %v422_v50 }
  0x83   : > { %425 = vst [vmem:[%s1719_s30 + $0x398] sm:$0xff] %v424_v51 }
  0x84   : > { %427 = vst [vmem:[%s1719_s30 + $0x3a0] sm:$0xff] %v426_v52 }
  0x85   : > { %429 = vst [vmem:[%s1719_s30 + $0x3a8] sm:$0xff] %v428_v53 }
  0x86   : > { %431 = vst [vmem:[%s1719_s30 + $0x3b0] sm:$0xff] %v430_v54 }
  0x87   : > { %433 = vst [vmem:[%s1719_s30 + $0x3b8] sm:$0xff] %v432_v55 }
  0x88   : > { %435 = vst [vmem:[%s1719_s30 + $0x3c0] sm:$0xff] %v434_v56 }
  0x89   : > { %437 = vst [vmem:[%s1719_s30 + $0x3c8] sm:$0xff] %v436_v57 }
  0x8a   : > { %439 = vst [vmem:[%s1719_s30 + $0x3d0] sm:$0xff] %v438_v58 }
  0x8b   : > { %441 = vst [vmem:[%s1719_s30 + $0x3d8] sm:$0xff] %v440_v59 }
  0x8c   : > { %443 = vst [vmem:[%s1719_s30 + $0x3e0] sm:$0xff] %v442_v60 }
  0x8d   : > { %445 = vst [vmem:[%s1719_s30 + $0x3e8] sm:$0xff] %v444_v61 }
  0x8e   : > { %447 = vst [vmem:[%s1719_s30 + $0x3f0] sm:$0xff] %v446_v62 }
  0x8f   : > { %449 = vst [vmem:[%s1719_s30 + $0x3f8] sm:$0xff] %v448_v63 }
  0x90 PF: > { %p1551_p6 = scmp.ge.s32.totalorder %s1643_s19, 1  ;;  %p463_p7 = scmp.lt.s32.totalorder %s1643_s19, 5 }
  0x92   : > { %p464_p8 = pnand %p1551_p6, %p463_p7 }
  0x93   : > { %s470_s5 = sand.u32 (!%p464_p8), 1, %s1627_s15   ;;  %s1553_s6 = sshll.u32 (!%p464_p8), %s1635_s17, 6 }
  0x94   : > { %467 = sbr.rel (%p464_p8) target bundleno = 650 (0x28a), region = 55  ;;  %s1552_s7 = sshll.u32 (!%p464_p8), %s470_s5, 10 }
  0x95   : > { %p503_p9 = scmp.lt.s32.totalorder (!%p464_p8), %s1553_s6, 255  ;;  %s1983_s12 = scalar_lea.vmem (!%p464_p8), [#allocation3], %s1552_s7 }
  0x96   : > { %p1555_p10 = scmp.ne.s32.totalorder (!%p464_p8), %s1635_s17, 0 }
  0x99   : > { %s2376_s6 = smov (!%p503_p9, %s1553_s6), 255  ;;  %517 = sbr.rel (%p1555_p10) target bundleno = 191 (0xbf), region = 63 }
  0x9a   : > { %s1554_s8 = sshll.u32 %s2376_s6, 3 }
  0x9b   : > { %s1981_s11 = scalar_lea.vmem %s2365_s1, %s1554_s8 }
  0x9e   : > { %v1645_v0 = vmov 0.0  }
  0x9f   : > { %518 = vst [vmem:[#allocation2 + $0xb0] sm:$0xff] %v1645_v0 }
  0xa0   : > { %519 = vst [vmem:[#allocation2] sm:$0xff] %v1645_v0 }
  0xa1   : > { %520 = vst [vmem:[#allocation2 + $0xd8] sm:$0xff] %v1645_v0 }
  0xa2   : > { %521 = vst [vmem:[#allocation2 + $0x18] sm:$0xff] %v1645_v0 }
  0xa3   : > { %522 = vst [vmem:[#allocation2 + $0x50] sm:$0xff] %v1645_v0 }
  0xa4   : > { %523 = vst [vmem:[#allocation2 + $0x68] sm:$0xff] %v1645_v0 }
  0xa5   : > { %524 = vst [vmem:[#allocation2 + $0x30] sm:$0xff] %v1645_v0 }
  0xa6   : > { %525 = vst [vmem:[#allocation2 + $0x48] sm:$0xff] %v1645_v0 }
  0xa7   : > { %526 = vst [vmem:[#allocation2 + $0x80] sm:$0xff] %v1645_v0 }
  0xa8   : > { %527 = vst [vmem:[#allocation2 + $0x88] sm:$0xff] %v1645_v0 }
  0xa9   : > { %528 = vst [vmem:[#allocation2 + $0xe8] sm:$0xff] %v1645_v0 }
  0xaa   : > { %529 = vst [vmem:[#allocation2 + $0xb8] sm:$0xff] %v1645_v0 }
  0xab   : > { %530 = vst [vmem:[#allocation2 + $0x60] sm:$0xff] %v1645_v0 }
  0xac   : > { %531 = vst [vmem:[#allocation2 + $0xf0] sm:$0xff] %v1645_v0 }
  0xad   : > { %532 = vst [vmem:[#allocation2 + $0x8] sm:$0xff] %v1645_v0 }
  0xae   : > { %533 = vst [vmem:[#allocation2 + $0x78] sm:$0xff] %v1645_v0 }
  0xaf   : > { %534 = vst [vmem:[#allocation2 + $0x38] sm:$0xff] %v1645_v0 }
  0xb0   : > { %535 = vst [vmem:[#allocation2 + $0x58] sm:$0xff] %v1645_v0 }
  0xb1   : > { %536 = vst [vmem:[#allocation2 + $0x40] sm:$0xff] %v1645_v0 }
  0xb2   : > { %537 = vst [vmem:[#allocation2 + $0xc8] sm:$0xff] %v1645_v0 }
  0xb3   : > { %538 = vst [vmem:[#allocation2 + $0xe0] sm:$0xff] %v1645_v0 }
  0xb4   : > { %539 = vst [vmem:[#allocation2 + $0x90] sm:$0xff] %v1645_v0 }
  0xb5   : > { %540 = vst [vmem:[#allocation2 + $0x70] sm:$0xff] %v1645_v0 }
  0xb6   : > { %541 = vst [vmem:[#allocation2 + $0xc0] sm:$0xff] %v1645_v0 }
  0xb7   : > { %542 = vst [vmem:[#allocation2 + $0xa8] sm:$0xff] %v1645_v0 }
  0xb8   : > { %543 = vst [vmem:[#allocation2 + $0xd0] sm:$0xff] %v1645_v0 }
  0xb9   : > { %544 = vst [vmem:[#allocation2 + $0x10] sm:$0xff] %v1645_v0 }
  0xba   : > { %545 = vst [vmem:[#allocation2 + $0x28] sm:$0xff] %v1645_v0 }
  0xbb   : > { %546 = vst [vmem:[#allocation2 + $0xa0] sm:$0xff] %v1645_v0 }
  0xbc   : > { %547 = vst [vmem:[#allocation2 + $0xf8] sm:$0xff] %v1645_v0 }
  0xbd   : > { %548 = vst [vmem:[#allocation2 + $0x20] sm:$0xff] %v1645_v0 }
  0xbe   : > { %549 = vst [vmem:[#allocation2 + $0x98] sm:$0xff] %v1645_v0 }
  0xbf PF: > { %v757_v1 = vld [vmem:[%s1981_s11 + $0x178] sm:$0xff]  ;;  %v756_v2 = vld [vmem:[%s1981_s11 + $0x170] sm:$0xff]  ;;  %v755_v6 = vld [vmem:[%s1981_s11 + $0x168] sm:$0xff]  ;;  %p1556_p11 = scmp.ne.s32.totalorder %s1635_s17, 3 }
  0xc0   : > { %v773_v3 = vld [vmem:[%s1981_s11 + $0x1f8] sm:$0xff]  ;;  %1000 = vmatpush.msra.mxu2 %v757_v1  ;;  %v772_v7 = vld [vmem:[%s1981_s11 + $0x1f0] sm:$0xff]  ;;  %v771_v10 = vld [vmem:[%s1981_s11 + $0x1e8] sm:$0xff] }
  0xc1   : > { %1113 = vmatpush.msra.mxu3 %v773_v3  ;;  %v725_v4 = vld [vmem:[%s1981_s11 + $0x78] sm:$0xff]  ;;  %v724_v8 = vld [vmem:[%s1981_s11 + $0x70] sm:$0xff]  ;;  %v723_v11 = vld [vmem:[%s1981_s11 + $0x68] sm:$0xff] }
  0xc2   : > { %v741_v5 = vld [vmem:[%s1981_s11 + $0xf8] sm:$0xff]  ;;  %774 = vmatpush.msra.mxu0 %v725_v4  ;;  %v740_v9 = vld [vmem:[%s1981_s11 + $0xf0] sm:$0xff]  ;;  %1001 = vmatpush.msra.mxu2 %v756_v2  ;;  %v754_v12 = vld [vmem:[%s1981_s11 + $0x160] sm:$0xff] }
  0xc3   : > { %887 = vmatpush.msra.mxu1 %v741_v5  ;;  %1114 = vmatpush.msra.mxu3 %v772_v7  ;;  %v739_v13 = vld [vmem:[%s1981_s11 + $0xe8] sm:$0xff]  ;;  %v770_v14 = vld [vmem:[%s1981_s11 + $0x1e0] sm:$0xff]  ;;  %v753_v17 = vld [vmem:[%s1981_s11 + $0x158] sm:$0xff] }
  0xc4   : > { %775 = vmatpush.msra.mxu0 %v724_v8  ;;  %1002 = vmatpush.msra.mxu2 %v755_v6  ;;  %v722_v15 = vld [vmem:[%s1981_s11 + $0x60] sm:$0xff]  ;;  %v769_v18 = vld [vmem:[%s1981_s11 + $0x1d8] sm:$0xff]  ;;  %v752_v21 = vld [vmem:[%s1981_s11 + $0x150] sm:$0xff] }
  0xc5   : > { %888 = vmatpush.msra.mxu1 %v740_v9  ;;  %1115 = vmatpush.msra.mxu3 %v771_v10  ;;  %v738_v16 = vld [vmem:[%s1981_s11 + $0xe0] sm:$0xff]  ;;  %v721_v19 = vld [vmem:[%s1981_s11 + $0x58] sm:$0xff]  ;;  %v768_v22 = vld [vmem:[%s1981_s11 + $0x1d0] sm:$0xff] }
  0xc6   : > { %776 = vmatpush.msra.mxu0 %v723_v11  ;;  %1003 = vmatpush.msra.mxu2 %v754_v12  ;;  %v737_v20 = vld [vmem:[%s1981_s11 + $0xd8] sm:$0xff]  ;;  %v720_v23 = vld [vmem:[%s1981_s11 + $0x50] sm:$0xff]  ;;  %v751_v25 = vld [vmem:[%s1981_s11 + $0x148] sm:$0xff] }
  0xc7   : > { %889 = vmatpush.msra.mxu1 %v739_v13  ;;  %1116 = vmatpush.msra.mxu3 %v770_v14  ;;  %v736_v24 = vld [vmem:[%s1981_s11 + $0xd0] sm:$0xff]  ;;  %v767_v26 = vld [vmem:[%s1981_s11 + $0x1c8] sm:$0xff]  ;;  %v750_v29 = vld [vmem:[%s1981_s11 + $0x140] sm:$0xff] }
  0xc8   : > { %777 = vmatpush.msra.mxu0 %v722_v15  ;;  %1004 = vmatpush.msra.mxu2 %v753_v17  ;;  %v719_v27 = vld [vmem:[%s1981_s11 + $0x48] sm:$0xff]  ;;  %v766_v30 = vld [vmem:[%s1981_s11 + $0x1c0] sm:$0xff]  ;;  %v749_v33 = vld [vmem:[%s1981_s11 + $0x138] sm:$0xff] }
  0xc9   : > { %890 = vmatpush.msra.mxu1 %v738_v16  ;;  %1117 = vmatpush.msra.mxu3 %v769_v18  ;;  %v735_v28 = vld [vmem:[%s1981_s11 + $0xc8] sm:$0xff]  ;;  %v718_v31 = vld [vmem:[%s1981_s11 + $0x40] sm:$0xff]  ;;  %v765_v34 = vld [vmem:[%s1981_s11 + $0x1b8] sm:$0xff] }
  0xca   : > { %778 = vmatpush.msra.mxu0 %v721_v19  ;;  %1005 = vmatpush.msra.mxu2 %v752_v21  ;;  %v734_v32 = vld [vmem:[%s1981_s11 + $0xc0] sm:$0xff]  ;;  %v717_v35 = vld [vmem:[%s1981_s11 + $0x38] sm:$0xff]  ;;  %v748_v37 = vld [vmem:[%s1981_s11 + $0x130] sm:$0xff] }
  0xcb   : > { %891 = vmatpush.msra.mxu1 %v737_v20  ;;  %1118 = vmatpush.msra.mxu3 %v768_v22  ;;  %v733_v36 = vld [vmem:[%s1981_s11 + $0xb8] sm:$0xff]  ;;  %v764_v38 = vld [vmem:[%s1981_s11 + $0x1b0] sm:$0xff]  ;;  %v747_v41 = vld [vmem:[%s1981_s11 + $0x128] sm:$0xff] }
  0xcc   : > { %779 = vmatpush.msra.mxu0 %v720_v23  ;;  %1006 = vmatpush.msra.mxu2 %v751_v25  ;;  %v716_v39 = vld [vmem:[%s1981_s11 + $0x30] sm:$0xff]  ;;  %v763_v42 = vld [vmem:[%s1981_s11 + $0x1a8] sm:$0xff]  ;;  %v746_v45 = vld [vmem:[%s1981_s11 + $0x120] sm:$0xff] }
  0xcd   : > { %892 = vmatpush.msra.mxu1 %v736_v24  ;;  %1119 = vmatpush.msra.mxu3 %v767_v26  ;;  %v732_v40 = vld [vmem:[%s1981_s11 + $0xb0] sm:$0xff]  ;;  %v715_v43 = vld [vmem:[%s1981_s11 + $0x28] sm:$0xff]  ;;  %v762_v46 = vld [vmem:[%s1981_s11 + $0x1a0] sm:$0xff] }
  0xce   : > { %780 = vmatpush.msra.mxu0 %v719_v27  ;;  %1007 = vmatpush.msra.mxu2 %v750_v29  ;;  %v731_v44 = vld [vmem:[%s1981_s11 + $0xa8] sm:$0xff]  ;;  %v714_v47 = vld [vmem:[%s1981_s11 + $0x20] sm:$0xff]  ;;  %v745_v49 = vld [vmem:[%s1981_s11 + $0x118] sm:$0xff] }
  0xcf   : > { %893 = vmatpush.msra.mxu1 %v735_v28  ;;  %1120 = vmatpush.msra.mxu3 %v766_v30  ;;  %v730_v48 = vld [vmem:[%s1981_s11 + $0xa0] sm:$0xff]  ;;  %v761_v50 = vld [vmem:[%s1981_s11 + $0x198] sm:$0xff]  ;;  %v744_v53 = vld [vmem:[%s1981_s11 + $0x110] sm:$0xff] }
  0xd0   : > { %781 = vmatpush.msra.mxu0 %v718_v31  ;;  %1008 = vmatpush.msra.mxu2 %v749_v33  ;;  %v713_v51 = vld [vmem:[%s1981_s11 + $0x18] sm:$0xff]  ;;  %v760_v54 = vld [vmem:[%s1981_s11 + $0x190] sm:$0xff]  ;;  %v743_v57 = vld [vmem:[%s1981_s11 + $0x108] sm:$0xff] }
  0xd1   : > { %894 = vmatpush.msra.mxu1 %v734_v32  ;;  %1121 = vmatpush.msra.mxu3 %v765_v34  ;;  %v729_v52 = vld [vmem:[%s1981_s11 + $0x98] sm:$0xff]  ;;  %v712_v55 = vld [vmem:[%s1981_s11 + $0x10] sm:$0xff]  ;;  %v759_v58 = vld [vmem:[%s1981_s11 + $0x188] sm:$0xff] }
  0xd2   : > { %782 = vmatpush.msra.mxu0 %v717_v35  ;;  %1009 = vmatpush.msra.mxu2 %v748_v37  ;;  %v728_v56 = vld [vmem:[%s1981_s11 + $0x90] sm:$0xff]  ;;  %v711_v59 = vld [vmem:[%s1981_s11 + $0x8] sm:$0xff]  ;;  %v742_v61 = vld [vmem:[%s1981_s11 + $0x100] sm:$0xff] }
  0xd3   : > { %895 = vmatpush.msra.mxu1 %v733_v36  ;;  %1122 = vmatpush.msra.mxu3 %v764_v38  ;;  %v727_v60 = vld [vmem:[%s1981_s11 + $0x88] sm:$0xff]  ;;  %v758_v62 = vld [vmem:[%s1981_s11 + $0x180] sm:$0xff]  ;;  %v584_v63 = vld [vmem:[%s1983_s12 + $0x10] sm:$0xff] }
  0xd4   : > { %783 = vmatpush.msra.mxu0 %v716_v39  ;;  %1010 = vmatpush.msra.mxu2 %v747_v41  ;;  %v585_v0 = vld [vmem:[%s1983_s12 + $0x18] sm:$0xff]  ;;  %v710_v1 = vld [vmem:[%s1981_s11] sm:$0xff]  ;;  %v583_v4 = vld [vmem:[%s1983_s12 + $0x8] sm:$0xff] }
  0xd5   : > { %896 = vmatpush.msra.mxu1 %v732_v40  ;;  %1123 = vmatpush.msra.mxu3 %v763_v42  ;;  %v726_v2 = vld [vmem:[%s1981_s11 + $0x80] sm:$0xff]  ;;  %v588_v5 = vld [vmem:[%s1983_s12 + $0x30] sm:$0xff]  ;;  %v589_v6 = vld [vmem:[%s1983_s12 + $0x38] sm:$0xff] }
  0xd6   : > { %784 = vmatpush.msra.mxu0 %v715_v43  ;;  %1011 = vmatpush.msra.mxu2 %v746_v45  ;;  %v582_v3 = vld [vmem:[%s1983_s12] sm:$0xff]  ;;  %v587_v8 = vld [vmem:[%s1983_s12 + $0x28] sm:$0xff]  ;;  %v592_v9 = vld [vmem:[%s1983_s12 + $0x50] sm:$0xff] }
  0xd7   : > { %897 = vmatpush.msra.mxu1 %v731_v44  ;;  %1124 = vmatpush.msra.mxu3 %v762_v46  ;;  %v586_v7 = vld [vmem:[%s1983_s12 + $0x20] sm:$0xff]  ;;  %v593_v10 = vld [vmem:[%s1983_s12 + $0x58] sm:$0xff]  ;;  %v591_v12 = vld [vmem:[%s1983_s12 + $0x48] sm:$0xff] }
  0xd8   : > { %785 = vmatpush.msra.mxu0 %v714_v47  ;;  %1012 = vmatpush.msra.mxu2 %v745_v49  ;;  %v590_v11 = vld [vmem:[%s1983_s12 + $0x40] sm:$0xff]  ;;  %v596_v13 = vld [vmem:[%s1983_s12 + $0x70] sm:$0xff]  ;;  %v597_v14 = vld [vmem:[%s1983_s12 + $0x78] sm:$0xff] }
  0xd9   : > { %898 = vmatpush.msra.mxu1 %v730_v48  ;;  %1125 = vmatpush.msra.mxu3 %v761_v50  ;;  %v594_v15 = vld [vmem:[%s1983_s12 + $0x60] sm:$0xff]  ;;  %v595_v16 = vld [vmem:[%s1983_s12 + $0x68] sm:$0xff]  ;;  %v600_v17 = vld [vmem:[%s1983_s12 + $0x90] sm:$0xff] }
  0xda   : > { %786 = vmatpush.msra.mxu0 %v713_v51  ;;  %1013 = vmatpush.msra.mxu2 %v744_v53  ;;  %v601_v18 = vld [vmem:[%s1983_s12 + $0x98] sm:$0xff]  ;;  %v598_v19 = vld [vmem:[%s1983_s12 + $0x80] sm:$0xff]  ;;  %v599_v20 = vld [vmem:[%s1983_s12 + $0x88] sm:$0xff] }
  0xdb   : > { %899 = vmatpush.msra.mxu1 %v729_v52  ;;  %1126 = vmatpush.msra.mxu3 %v760_v54  ;;  %v604_v21 = vld [vmem:[%s1983_s12 + $0xb0] sm:$0xff]  ;;  %v605_v22 = vld [vmem:[%s1983_s12 + $0xb8] sm:$0xff]  ;;  %v602_v23 = vld [vmem:[%s1983_s12 + $0xa0] sm:$0xff] }
  0xdc   : > { %787 = vmatpush.msra.mxu0 %v712_v55  ;;  %1014 = vmatpush.msra.mxu2 %v743_v57  ;;  %v603_v24 = vld [vmem:[%s1983_s12 + $0xa8] sm:$0xff]  ;;  %v608_v25 = vld [vmem:[%s1983_s12 + $0xd0] sm:$0xff]  ;;  %v609_v26 = vld [vmem:[%s1983_s12 + $0xd8] sm:$0xff] }
  0xdd   : > { %900 = vmatpush.msra.mxu1 %v728_v56  ;;  %1127 = vmatpush.msra.mxu3 %v759_v58  ;;  %v606_v27 = vld [vmem:[%s1983_s12 + $0xc0] sm:$0xff]  ;;  %v607_v28 = vld [vmem:[%s1983_s12 + $0xc8] sm:$0xff]  ;;  %v612_v29 = vld [vmem:[%s1983_s12 + $0xf0] sm:$0xff] }
  0xde   : > { %788 = vmatpush.msra.mxu0 %v711_v59  ;;  %1015 = vmatpush.msra.mxu2 %v742_v61  ;;  %v613_v30 = vld [vmem:[%s1983_s12 + $0xf8] sm:$0xff]  ;;  %v610_v31 = vld [vmem:[%s1983_s12 + $0xe0] sm:$0xff]  ;;  %v611_v32 = vld [vmem:[%s1983_s12 + $0xe8] sm:$0xff] }
  0xdf   : > { %901 = vmatpush.msra.mxu1 %v727_v60  ;;  %1128 = vmatpush.msra.mxu3 %v758_v62  ;;  %v616_v33 = vld [vmem:[%s1983_s12 + $0x110] sm:$0xff]  ;;  %v617_v34 = vld [vmem:[%s1983_s12 + $0x118] sm:$0xff]  ;;  %v614_v35 = vld [vmem:[%s1983_s12 + $0x100] sm:$0xff] }
  0xe0   : > { %1016 = vmatmul.f32.vlgmr.msra.gmra.mxu2 %v584_v63  ;;  %1129 = vmatmul.f32.vlgmr.msra.gmra.mxu3 %v585_v0  ;;  %v615_v36 = vld [vmem:[%s1983_s12 + $0x108] sm:$0xff]  ;;  %v620_v37 = vld [vmem:[%s1983_s12 + $0x130] sm:$0xff]  ;;  %v621_v38 = vld [vmem:[%s1983_s12 + $0x138] sm:$0xff] }
  0xe1   : > { %789 = vmatpush.msra.mxu0 %v710_v1  ;;  %902 = vmatpush.msra.mxu1 %v726_v2  ;;  %v618_v39 = vld [vmem:[%s1983_s12 + $0x120] sm:$0xff]  ;;  %v619_v40 = vld [vmem:[%s1983_s12 + $0x128] sm:$0xff]  ;;  %v624_v41 = vld [vmem:[%s1983_s12 + $0x150] sm:$0xff] }
  0xe2   : > { %790 = vmatmul.f32.vlgmr.msra.gmra.mxu0 %v582_v3  ;;  %903 = vmatmul.f32.vlgmr.msra.gmra.mxu1 %v583_v4  ;;  %v625_v42 = vld [vmem:[%s1983_s12 + $0x158] sm:$0xff]  ;;  %v622_v43 = vld [vmem:[%s1983_s12 + $0x140] sm:$0xff]  ;;  %v623_v44 = vld [vmem:[%s1983_s12 + $0x148] sm:$0xff] }
  0xe3   : > { %v628_v45 = vld [vmem:[%s1983_s12 + $0x170] sm:$0xff]  ;;  %v629_v46 = vld [vmem:[%s1983_s12 + $0x178] sm:$0xff]  ;;  %v626_v47 = vld [vmem:[%s1983_s12 + $0x160] sm:$0xff] }
  0xe4   : > { %v627_v48 = vld [vmem:[%s1983_s12 + $0x168] sm:$0xff]  ;;  %v632_v49 = vld [vmem:[%s1983_s12 + $0x190] sm:$0xff]  ;;  %v633_v50 = vld [vmem:[%s1983_s12 + $0x198] sm:$0xff] }
  0xe5   : > { %v630_v51 = vld [vmem:[%s1983_s12 + $0x180] sm:$0xff]  ;;  %v631_v52 = vld [vmem:[%s1983_s12 + $0x188] sm:$0xff]  ;;  %v636_v53 = vld [vmem:[%s1983_s12 + $0x1b0] sm:$0xff] }
  0xe6   : > { %v637_v54 = vld [vmem:[%s1983_s12 + $0x1b8] sm:$0xff]  ;;  %v634_v55 = vld [vmem:[%s1983_s12 + $0x1a0] sm:$0xff]  ;;  %v635_v56 = vld [vmem:[%s1983_s12 + $0x1a8] sm:$0xff] }
  0xe7   : > { %v640_v57 = vld [vmem:[%s1983_s12 + $0x1d0] sm:$0xff]  ;;  %v641_v58 = vld [vmem:[%s1983_s12 + $0x1d8] sm:$0xff]  ;;  %v638_v59 = vld [vmem:[%s1983_s12 + $0x1c0] sm:$0xff] }
  0xe8   : > { %1019 = vmatmul.f32.gmra.mxu2 %v588_v5  ;;  %1132 = vmatmul.f32.gmra.mxu3 %v589_v6  ;;  %v639_v60 = vld [vmem:[%s1983_s12 + $0x1c8] sm:$0xff]  ;;  %v644_v61 = vld [vmem:[%s1983_s12 + $0x1f0] sm:$0xff]  ;;  %v645_v62 = vld [vmem:[%s1983_s12 + $0x1f8] sm:$0xff] }
  0xe9   : > { %v642_v63 = vld [vmem:[%s1983_s12 + $0x1e0] sm:$0xff]  ;;  %v643_v0 = vld [vmem:[%s1983_s12 + $0x1e8] sm:$0xff]  ;;  %v648_v1 = vld [vmem:[%s1983_s12 + $0x210] sm:$0xff] }
  0xea   : > { %793 = vmatmul.f32.gmra.mxu0 %v586_v7  ;;  %906 = vmatmul.f32.gmra.mxu1 %v587_v8  ;;  %v649_v2 = vld [vmem:[%s1983_s12 + $0x218] sm:$0xff]  ;;  %v646_v5 = vld [vmem:[%s1983_s12 + $0x200] sm:$0xff]  ;;  %v647_v6 = vld [vmem:[%s1983_s12 + $0x208] sm:$0xff] }
  0xf0   : > { %1022 = vmatmul.f32.gmra.mxu2 %v592_v9  ;;  %1135 = vmatmul.f32.gmra.mxu3 %v593_v10 }
  0xf2   : > { %796 = vmatmul.f32.gmra.mxu0 %v590_v11  ;;  %909 = vmatmul.f32.gmra.mxu1 %v591_v12  ;;  %v550_v11 = vld [vmem:[#allocation2 + $0xb0] sm:$0xff] }
  0xf3   : > { %v652_v12 = vld [vmem:[%s1983_s12 + $0x230] sm:$0xff] }
  0xf8   : > { %1025 = vmatmul.f32.gmra.mxu2 %v596_v13  ;;  %1138 = vmatmul.f32.gmra.mxu3 %v597_v14  ;;  %v653_v13 = vld [vmem:[%s1983_s12 + $0x238] sm:$0xff] }
  0xfa   : > { %799 = vmatmul.f32.gmra.mxu0 %v594_v15  ;;  %912 = vmatmul.f32.gmra.mxu1 %v595_v16 }
 0x100   : > { %1028 = vmatmul.f32.gmra.mxu2 %v600_v17  ;;  %1141 = vmatmul.f32.gmra.mxu3 %v601_v18  ;;  %v650_v17 = vld [vmem:[%s1983_s12 + $0x220] sm:$0xff]  ;;  %v651_v18 = vld [vmem:[%s1983_s12 + $0x228] sm:$0xff] }
 0x102   : > { %802 = vmatmul.f32.gmra.mxu0 %v598_v19  ;;  %915 = vmatmul.f32.gmra.mxu1 %v599_v20 }
 0x108   : > { %1031 = vmatmul.f32.gmra.mxu2 %v604_v21  ;;  %1144 = vmatmul.f32.gmra.mxu3 %v605_v22 }
 0x10a   : > { %805 = vmatmul.f32.gmra.mxu0 %v602_v23  ;;  %918 = vmatmul.f32.gmra.mxu1 %v603_v24  ;;  %v551_v24 = vld [vmem:[#allocation2] sm:$0xff] }
 0x110   : > { %1034 = vmatmul.f32.gmra.mxu2 %v608_v25  ;;  %1147 = vmatmul.f32.gmra.mxu3 %v609_v26  ;;  %v656_v25 = vld [vmem:[%s1983_s12 + $0x250] sm:$0xff]  ;;  %v657_v26 = vld [vmem:[%s1983_s12 + $0x258] sm:$0xff] }
 0x112   : > { %808 = vmatmul.f32.gmra.mxu0 %v606_v27  ;;  %921 = vmatmul.f32.gmra.mxu1 %v607_v28 }
 0x118   : > { %1037 = vmatmul.f32.gmra.mxu2 %v612_v29  ;;  %1150 = vmatmul.f32.gmra.mxu3 %v613_v30  ;;  %v654_v30 = vld [vmem:[%s1983_s12 + $0x240] sm:$0xff] }
 0x11a   : > { %811 = vmatmul.f32.gmra.mxu0 %v610_v31  ;;  %924 = vmatmul.f32.gmra.mxu1 %v611_v32  ;;  %v655_v31 = vld [vmem:[%s1983_s12 + $0x248] sm:$0xff] }
 0x120   : > { %1040 = vmatmul.f32.gmra.mxu2 %v616_v33  ;;  %1153 = vmatmul.f32.gmra.mxu3 %v617_v34 }
 0x122   : > { %814 = vmatmul.f32.gmra.mxu0 %v614_v35  ;;  %927 = vmatmul.f32.gmra.mxu1 %v615_v36 }
 0x128   : > { %1043 = vmatmul.f32.gmra.mxu2 %v620_v37  ;;  %1156 = vmatmul.f32.gmra.mxu3 %v621_v38  ;;  %v552_v37 = vld [vmem:[#allocation2 + $0xd8] sm:$0xff]  ;;  %v660_v38 = vld [vmem:[%s1983_s12 + $0x270] sm:$0xff] }
 0x12a   : > { %817 = vmatmul.f32.gmra.mxu0 %v618_v39  ;;  %930 = vmatmul.f32.gmra.mxu1 %v619_v40  ;;  %v661_v39 = vld [vmem:[%s1983_s12 + $0x278] sm:$0xff] }
 0x130   : > { %1046 = vmatmul.f32.gmra.mxu2 %v624_v41  ;;  %1159 = vmatmul.f32.gmra.mxu3 %v625_v42 }
 0x132   : > { %820 = vmatmul.f32.gmra.mxu0 %v622_v43  ;;  %933 = vmatmul.f32.gmra.mxu1 %v623_v44  ;;  %v658_v43 = vld [vmem:[%s1983_s12 + $0x260] sm:$0xff]  ;;  %v659_v44 = vld [vmem:[%s1983_s12 + $0x268] sm:$0xff] }
 0x138   : > { %1049 = vmatmul.f32.gmra.mxu2 %v628_v45  ;;  %1162 = vmatmul.f32.gmra.mxu3 %v629_v46 }
 0x13a   : > { %823 = vmatmul.f32.gmra.mxu0 %v626_v47  ;;  %936 = vmatmul.f32.gmra.mxu1 %v627_v48 }
 0x140   : > { %1052 = vmatmul.f32.gmra.mxu2 %v632_v49  ;;  %1165 = vmatmul.f32.gmra.mxu3 %v633_v50  ;;  %v553_v50 = vld [vmem:[#allocation2 + $0x18] sm:$0xff] }
 0x142   : > { %826 = vmatmul.f32.gmra.mxu0 %v630_v51  ;;  %939 = vmatmul.f32.gmra.mxu1 %v631_v52  ;;  %v664_v51 = vld [vmem:[%s1983_s12 + $0x290] sm:$0xff]  ;;  %v665_v52 = vld [vmem:[%s1983_s12 + $0x298] sm:$0xff] }
 0x148   : > { %1055 = vmatmul.f32.gmra.mxu2 %v636_v53  ;;  %1168 = vmatmul.f32.gmra.mxu3 %v637_v54 }
 0x14a   : > { %829 = vmatmul.f32.gmra.mxu0 %v634_v55  ;;  %942 = vmatmul.f32.gmra.mxu1 %v635_v56  ;;  %v662_v56 = vld [vmem:[%s1983_s12 + $0x280] sm:$0xff] }
 0x150   : > { %1058 = vmatmul.f32.gmra.mxu2 %v640_v57  ;;  %1171 = vmatmul.f32.gmra.mxu3 %v641_v58  ;;  %v663_v57 = vld [vmem:[%s1983_s12 + $0x288] sm:$0xff] }
 0x152   : > { %832 = vmatmul.f32.gmra.mxu0 %v638_v59  ;;  %945 = vmatmul.f32.gmra.mxu1 %v639_v60 }
 0x158   : > { %1061 = vmatmul.f32.gmra.mxu2 %v644_v61  ;;  %1174 = vmatmul.f32.gmra.mxu3 %v645_v62 }
 0x15a   : > { %835 = vmatmul.f32.gmra.mxu0 %v642_v63  ;;  %948 = vmatmul.f32.gmra.mxu1 %v643_v0  ;;  %v554_v63 = vld [vmem:[#allocation2 + $0x50] sm:$0xff] }
 0x15b   : > { %v668_v0 = vld [vmem:[%s1983_s12 + $0x2b0] sm:$0xff] }
 0x15f   : > { %v791_v3 = vpop.f32.mrf.mxu0  ;;  %v904_v4 = vpop.f32.mrf.mxu1 }
 0x160   : > { %1064 = vmatmul.f32.gmra.mxu2 %v648_v1  ;;  %v905_v7 = vadd.f32 %v904_v4, %v791_v3  ;;  %1177 = vmatmul.f32.gmra.mxu3 %v649_v2  ;;  %v669_v1 = vld [vmem:[%s1983_s12 + $0x2b8] sm:$0xff] }
 0x162   : > { %838 = vmatmul.f32.gmra.mxu0 %v646_v5  ;;  %951 = vmatmul.f32.gmra.mxu1 %v647_v6  ;;  %v666_v5 = vld [vmem:[%s1983_s12 + $0x2a0] sm:$0xff]  ;;  %v667_v6 = vld [vmem:[%s1983_s12 + $0x2a8] sm:$0xff] }
 0x163   : > { %v1017_v8 = vpop.f32.mrf.mxu2  ;;  %v1130_v9 = vpop.f32.mrf.mxu3 }
 0x164   : > { %v1018_v10 = vadd.f32 %v1017_v8, %v905_v7 }
 0x166   : > { %v1131_v14 = vadd.f32 %v1130_v9, %v1018_v10 }
 0x167   : > { %v794_v15 = vpop.f32.mrf.mxu0  ;;  %v907_v16 = vpop.f32.mrf.mxu1 }
 0x168   : > { %v1226_v19 = vadd.f32 %v1131_v14, %v550_v11  ;;  %1067 = vmatmul.f32.gmra.mxu2 %v652_v12  ;;  %v908_v20 = vadd.f32 %v907_v16, %v794_v15  ;;  %1180 = vmatmul.f32.gmra.mxu3 %v653_v13  ;;  %v555_v12 = vld [vmem:[#allocation2 + $0x68] sm:$0xff]  ;;  %v672_v13 = vld [vmem:[%s1983_s12 + $0x2d0] sm:$0xff]  ;;  %v673_v14 = vld [vmem:[%s1983_s12 + $0x2d8] sm:$0xff] }
 0x16a   : > { %1258 = vst [vmem:[#allocation2 + $0xb0] sm:$0xff] %v1226_v19  ;;  %841 = vmatmul.f32.gmra.mxu0 %v650_v17  ;;  %954 = vmatmul.f32.gmra.mxu1 %v651_v18  ;;  %v670_v18 = vld [vmem:[%s1983_s12 + $0x2c0] sm:$0xff]  ;;  %v671_v19 = vld [vmem:[%s1983_s12 + $0x2c8] sm:$0xff] }
 0x16b   : > { %v1020_v21 = vpop.f32.mrf.mxu2  ;;  %v1133_v22 = vpop.f32.mrf.mxu3 }
 0x16c   : > { %v1021_v23 = vadd.f32 %v1020_v21, %v908_v20 }
 0x16e   : > { %v1134_v27 = vadd.f32 %v1133_v22, %v1021_v23 }
 0x16f   : > { %v797_v28 = vpop.f32.mrf.mxu0  ;;  %v910_v29 = vpop.f32.mrf.mxu1 }
 0x170   : > { %v1227_v32 = vadd.f32 %v1134_v27, %v551_v24  ;;  %1070 = vmatmul.f32.gmra.mxu2 %v656_v25  ;;  %v911_v33 = vadd.f32 %v910_v29, %v797_v28  ;;  %1183 = vmatmul.f32.gmra.mxu3 %v657_v26  ;;  %v556_v25 = vld [vmem:[#allocation2 + $0x30] sm:$0xff]  ;;  %v677_v27 = vld [vmem:[%s1983_s12 + $0x2f8] sm:$0xff] }
 0x171   : > { %v676_v26 = vld [vmem:[%s1983_s12 + $0x2f0] sm:$0xff] }
 0x172   : > { %1259 = vst [vmem:[#allocation2] sm:$0xff] %v1227_v32  ;;  %844 = vmatmul.f32.gmra.mxu0 %v654_v30  ;;  %957 = vmatmul.f32.gmra.mxu1 %v655_v31  ;;  %v674_v31 = vld [vmem:[%s1983_s12 + $0x2e0] sm:$0xff]  ;;  %v675_v32 = vld [vmem:[%s1983_s12 + $0x2e8] sm:$0xff] }
 0x173   : > { %v1023_v34 = vpop.f32.mrf.mxu2  ;;  %v1136_v35 = vpop.f32.mrf.mxu3 }
 0x174   : > { %v1024_v36 = vadd.f32 %v1023_v34, %v911_v33 }
 0x176   : > { %v1137_v40 = vadd.f32 %v1136_v35, %v1024_v36 }
 0x177   : > { %v800_v41 = vpop.f32.mrf.mxu0  ;;  %v913_v42 = vpop.f32.mrf.mxu1 }
 0x178   : > { %v1228_v45 = vadd.f32 %v1137_v40, %v552_v37  ;;  %1073 = vmatmul.f32.gmra.mxu2 %v660_v38  ;;  %v914_v46 = vadd.f32 %v913_v42, %v800_v41  ;;  %1186 = vmatmul.f32.gmra.mxu3 %v661_v39  ;;  %v557_v38 = vld [vmem:[#allocation2 + $0x48] sm:$0xff]  ;;  %v680_v39 = vld [vmem:[%s1983_s12 + $0x310] sm:$0xff]  ;;  %v681_v40 = vld [vmem:[%s1983_s12 + $0x318] sm:$0xff] }
 0x17a   : > { %1260 = vst [vmem:[#allocation2 + $0xd8] sm:$0xff] %v1228_v45  ;;  %847 = vmatmul.f32.gmra.mxu0 %v658_v43  ;;  %960 = vmatmul.f32.gmra.mxu1 %v659_v44  ;;  %v678_v44 = vld [vmem:[%s1983_s12 + $0x300] sm:$0xff]  ;;  %v679_v45 = vld [vmem:[%s1983_s12 + $0x308] sm:$0xff] }
 0x17b   : > { %v1026_v47 = vpop.f32.mrf.mxu2  ;;  %v1139_v48 = vpop.f32.mrf.mxu3 }
 0x17c   : > { %v1027_v49 = vadd.f32 %v1026_v47, %v914_v46 }
 0x17e   : > { %v1140_v53 = vadd.f32 %v1139_v48, %v1027_v49 }
 0x17f   : > { %v803_v54 = vpop.f32.mrf.mxu0  ;;  %v916_v55 = vpop.f32.mrf.mxu1 }
 0x180   : > { %v1229_v58 = vadd.f32 %v1140_v53, %v553_v50  ;;  %1076 = vmatmul.f32.gmra.mxu2 %v664_v51  ;;  %v917_v59 = vadd.f32 %v916_v55, %v803_v54  ;;  %1189 = vmatmul.f32.gmra.mxu3 %v665_v52  ;;  %v558_v51 = vld [vmem:[#allocation2 + $0x80] sm:$0xff]  ;;  %v684_v52 = vld [vmem:[%s1983_s12 + $0x330] sm:$0xff]  ;;  %v685_v53 = vld [vmem:[%s1983_s12 + $0x338] sm:$0xff] }
 0x182   : > { %1261 = vst [vmem:[#allocation2 + $0x18] sm:$0xff] %v1229_v58  ;;  %850 = vmatmul.f32.gmra.mxu0 %v662_v56  ;;  %963 = vmatmul.f32.gmra.mxu1 %v663_v57  ;;  %v682_v57 = vld [vmem:[%s1983_s12 + $0x320] sm:$0xff]  ;;  %v683_v58 = vld [vmem:[%s1983_s12 + $0x328] sm:$0xff] }
 0x183   : > { %v1029_v60 = vpop.f32.mrf.mxu2  ;;  %v1142_v61 = vpop.f32.mrf.mxu3 }
 0x184   : > { %v1030_v62 = vadd.f32 %v1029_v60, %v917_v59 }
 0x186   : > { %v1143_v2 = vadd.f32 %v1142_v61, %v1030_v62 }
 0x187   : > { %v806_v3 = vpop.f32.mrf.mxu0  ;;  %v919_v4 = vpop.f32.mrf.mxu1 }
 0x188   : > { %v1230_v7 = vadd.f32 %v1143_v2, %v554_v63  ;;  %1079 = vmatmul.f32.gmra.mxu2 %v668_v0  ;;  %v920_v8 = vadd.f32 %v919_v4, %v806_v3  ;;  %1192 = vmatmul.f32.gmra.mxu3 %v669_v1  ;;  %v559_v0 = vld [vmem:[#allocation2 + $0x88] sm:$0xff]  ;;  %v688_v1 = vld [vmem:[%s1983_s12 + $0x350] sm:$0xff]  ;;  %v689_v2 = vld [vmem:[%s1983_s12 + $0x358] sm:$0xff] }
 0x18a   : > { %1262 = vst [vmem:[#allocation2 + $0x50] sm:$0xff] %v1230_v7  ;;  %853 = vmatmul.f32.gmra.mxu0 %v666_v5  ;;  %966 = vmatmul.f32.gmra.mxu1 %v667_v6  ;;  %v686_v6 = vld [vmem:[%s1983_s12 + $0x340] sm:$0xff]  ;;  %v687_v7 = vld [vmem:[%s1983_s12 + $0x348] sm:$0xff] }
 0x18b   : > { %v1032_v9 = vpop.f32.mrf.mxu2  ;;  %v1145_v10 = vpop.f32.mrf.mxu3 }
 0x18c   : > { %v1033_v11 = vadd.f32 %v1032_v9, %v920_v8 }
 0x18e   : > { %v1146_v15 = vadd.f32 %v1145_v10, %v1033_v11 }
 0x18f   : > { %v809_v16 = vpop.f32.mrf.mxu0  ;;  %v922_v17 = vpop.f32.mrf.mxu1 }
 0x190   : > { %v1231_v20 = vadd.f32 %v1146_v15, %v555_v12  ;;  %1082 = vmatmul.f32.gmra.mxu2 %v672_v13  ;;  %v923_v21 = vadd.f32 %v922_v17, %v809_v16  ;;  %1195 = vmatmul.f32.gmra.mxu3 %v673_v14  ;;  %v560_v13 = vld [vmem:[#allocation2 + $0xe8] sm:$0xff]  ;;  %v692_v14 = vld [vmem:[%s1983_s12 + $0x370] sm:$0xff]  ;;  %v693_v15 = vld [vmem:[%s1983_s12 + $0x378] sm:$0xff] }
 0x192   : > { %1263 = vst [vmem:[#allocation2 + $0x68] sm:$0xff] %v1231_v20  ;;  %856 = vmatmul.f32.gmra.mxu0 %v670_v18  ;;  %969 = vmatmul.f32.gmra.mxu1 %v671_v19  ;;  %v690_v19 = vld [vmem:[%s1983_s12 + $0x360] sm:$0xff]  ;;  %v691_v20 = vld [vmem:[%s1983_s12 + $0x368] sm:$0xff] }
 0x193   : > { %v1035_v22 = vpop.f32.mrf.mxu2  ;;  %v1148_v23 = vpop.f32.mrf.mxu3 }
 0x194   : > { %v1036_v24 = vadd.f32 %v1035_v22, %v923_v21 }
 0x196   : > { %v1149_v28 = vadd.f32 %v1148_v23, %v1036_v24 }
 0x197   : > { %v812_v29 = vpop.f32.mrf.mxu0  ;;  %v925_v30 = vpop.f32.mrf.mxu1 }
 0x198   : > { %v1232_v33 = vadd.f32 %v1149_v28, %v556_v25  ;;  %1085 = vmatmul.f32.gmra.mxu2 %v676_v26  ;;  %v926_v34 = vadd.f32 %v925_v30, %v812_v29  ;;  %1198 = vmatmul.f32.gmra.mxu3 %v677_v27  ;;  %v561_v26 = vld [vmem:[#allocation2 + $0xb8] sm:$0xff]  ;;  %v696_v27 = vld [vmem:[%s1983_s12 + $0x390] sm:$0xff] }
 0x199   : > { %v697_v28 = vld [vmem:[%s1983_s12 + $0x398] sm:$0xff] }
 0x19a   : > { %1264 = vst [vmem:[#allocation2 + $0x30] sm:$0xff] %v1232_v33  ;;  %859 = vmatmul.f32.gmra.mxu0 %v674_v31  ;;  %972 = vmatmul.f32.gmra.mxu1 %v675_v32  ;;  %v694_v32 = vld [vmem:[%s1983_s12 + $0x380] sm:$0xff]  ;;  %v695_v33 = vld [vmem:[%s1983_s12 + $0x388] sm:$0xff] }
 0x19b   : > { %v1038_v35 = vpop.f32.mrf.mxu2  ;;  %v1151_v36 = vpop.f32.mrf.mxu3 }
 0x19c   : > { %v1039_v37 = vadd.f32 %v1038_v35, %v926_v34 }
 0x19e   : > { %v1152_v41 = vadd.f32 %v1151_v36, %v1039_v37 }
 0x19f   : > { %v815_v42 = vpop.f32.mrf.mxu0  ;;  %v928_v43 = vpop.f32.mrf.mxu1 }
 0x1a0   : > { %v1233_v46 = vadd.f32 %v1152_v41, %v557_v38  ;;  %1088 = vmatmul.f32.gmra.mxu2 %v680_v39  ;;  %v929_v47 = vadd.f32 %v928_v43, %v815_v42  ;;  %1201 = vmatmul.f32.gmra.mxu3 %v681_v40  ;;  %v562_v39 = vld [vmem:[#allocation2 + $0x60] sm:$0xff]  ;;  %v700_v40 = vld [vmem:[%s1983_s12 + $0x3b0] sm:$0xff]  ;;  %v701_v41 = vld [vmem:[%s1983_s12 + $0x3b8] sm:$0xff] }
 0x1a2   : > { %1265 = vst [vmem:[#allocation2 + $0x48] sm:$0xff] %v1233_v46  ;;  %862 = vmatmul.f32.gmra.mxu0 %v678_v44  ;;  %975 = vmatmul.f32.gmra.mxu1 %v679_v45  ;;  %v698_v45 = vld [vmem:[%s1983_s12 + $0x3a0] sm:$0xff]  ;;  %v699_v46 = vld [vmem:[%s1983_s12 + $0x3a8] sm:$0xff] }
 0x1a3   : > { %v1041_v48 = vpop.f32.mrf.mxu2  ;;  %v1154_v49 = vpop.f32.mrf.mxu3 }
 0x1a4   : > { %v1042_v50 = vadd.f32 %v1041_v48, %v929_v47 }
 0x1a6   : > { %v1155_v54 = vadd.f32 %v1154_v49, %v1042_v50 }
 0x1a7   : > { %v818_v55 = vpop.f32.mrf.mxu0  ;;  %v931_v56 = vpop.f32.mrf.mxu1 }
 0x1a8   : > { %v1234_v59 = vadd.f32 %v1155_v54, %v558_v51  ;;  %1091 = vmatmul.f32.gmra.mxu2 %v684_v52  ;;  %v932_v60 = vadd.f32 %v931_v56, %v818_v55  ;;  %1204 = vmatmul.f32.gmra.mxu3 %v685_v53  ;;  %v563_v52 = vld [vmem:[#allocation2 + $0xf0] sm:$0xff]  ;;  %v705_v54 = vld [vmem:[%s1983_s12 + $0x3d8] sm:$0xff] }
 0x1a9   : > { %v704_v53 = vld [vmem:[%s1983_s12 + $0x3d0] sm:$0xff] }
 0x1aa   : > { %1266 = vst [vmem:[#allocation2 + $0x80] sm:$0xff] %v1234_v59  ;;  %865 = vmatmul.f32.gmra.mxu0 %v682_v57  ;;  %978 = vmatmul.f32.gmra.mxu1 %v683_v58  ;;  %v702_v58 = vld [vmem:[%s1983_s12 + $0x3c0] sm:$0xff]  ;;  %v703_v59 = vld [vmem:[%s1983_s12 + $0x3c8] sm:$0xff] }
 0x1ab   : > { %v1044_v61 = vpop.f32.mrf.mxu2  ;;  %v1157_v62 = vpop.f32.mrf.mxu3 }
 0x1ac   : > { %v1045_v63 = vadd.f32 %v1044_v61, %v932_v60 }
 0x1ae   : > { %v1158_v3 = vadd.f32 %v1157_v62, %v1045_v63 }
 0x1af   : > { %v821_v4 = vpop.f32.mrf.mxu0  ;;  %v934_v5 = vpop.f32.mrf.mxu1 }
 0x1b0   : > { %v1235_v8 = vadd.f32 %v1158_v3, %v559_v0  ;;  %1094 = vmatmul.f32.gmra.mxu2 %v688_v1  ;;  %v935_v9 = vadd.f32 %v934_v5, %v821_v4  ;;  %1207 = vmatmul.f32.gmra.mxu3 %v689_v2  ;;  %v564_v1 = vld [vmem:[#allocation2 + $0x8] sm:$0xff]  ;;  %v708_v2 = vld [vmem:[%s1983_s12 + $0x3f0] sm:$0xff]  ;;  %v709_v3 = vld [vmem:[%s1983_s12 + $0x3f8] sm:$0xff] }
 0x1b2   : > { %1267 = vst [vmem:[#allocation2 + $0x88] sm:$0xff] %v1235_v8  ;;  %868 = vmatmul.f32.gmra.mxu0 %v686_v6  ;;  %981 = vmatmul.f32.gmra.mxu1 %v687_v7  ;;  %v706_v7 = vld [vmem:[%s1983_s12 + $0x3e0] sm:$0xff]  ;;  %v707_v8 = vld [vmem:[%s1983_s12 + $0x3e8] sm:$0xff] }
 0x1b3   : > { %v1047_v10 = vpop.f32.mrf.mxu2  ;;  %v1160_v11 = vpop.f32.mrf.mxu3 }
 0x1b4   : > { %v1048_v12 = vadd.f32 %v1047_v10, %v935_v9 }
 0x1b6   : > { %v1161_v16 = vadd.f32 %v1160_v11, %v1048_v12 }
 0x1b7   : > { %v824_v17 = vpop.f32.mrf.mxu0  ;;  %v937_v18 = vpop.f32.mrf.mxu1 }
 0x1b8   : > { %v1236_v21 = vadd.f32 %v1161_v16, %v560_v13  ;;  %1097 = vmatmul.f32.gmra.mxu2 %v692_v14  ;;  %v938_v22 = vadd.f32 %v937_v18, %v824_v17  ;;  %1210 = vmatmul.f32.gmra.mxu3 %v693_v15  ;;  %v565_v14 = vld [vmem:[#allocation2 + $0x78] sm:$0xff] }
 0x1ba   : > { %1268 = vst [vmem:[#allocation2 + $0xe8] sm:$0xff] %v1236_v21  ;;  %871 = vmatmul.f32.gmra.mxu0 %v690_v19  ;;  %984 = vmatmul.f32.gmra.mxu1 %v691_v20 }
 0x1bb   : > { %v1050_v23 = vpop.f32.mrf.mxu2  ;;  %v1163_v24 = vpop.f32.mrf.mxu3 }
 0x1bc   : > { %v1051_v25 = vadd.f32 %v1050_v23, %v938_v22  ;;  %v566_v23 = vld [vmem:[#allocation2 + $0x38] sm:$0xff] }
 0x1be   : > { %v1164_v29 = vadd.f32 %v1163_v24, %v1051_v25 }
 0x1bf   : > { %v827_v30 = vpop.f32.mrf.mxu0  ;;  %v940_v31 = vpop.f32.mrf.mxu1 }
 0x1c0   : > { %v1237_v34 = vadd.f32 %v1164_v29, %v561_v26  ;;  %1100 = vmatmul.f32.gmra.mxu2 %v696_v27  ;;  %v941_v35 = vadd.f32 %v940_v31, %v827_v30  ;;  %1213 = vmatmul.f32.gmra.mxu3 %v697_v28 }
 0x1c2   : > { %1269 = vst [vmem:[#allocation2 + $0xb8] sm:$0xff] %v1237_v34  ;;  %874 = vmatmul.f32.gmra.mxu0 %v694_v32  ;;  %987 = vmatmul.f32.gmra.mxu1 %v695_v33  ;;  %v567_v32 = vld [vmem:[#allocation2 + $0x58] sm:$0xff] }
 0x1c3   : > { %v1053_v36 = vpop.f32.mrf.mxu2  ;;  %v1166_v37 = vpop.f32.mrf.mxu3 }
 0x1c4   : > { %v1054_v38 = vadd.f32 %v1053_v36, %v941_v35 }
 0x1c6   : > { %v1167_v42 = vadd.f32 %v1166_v37, %v1054_v38 }
 0x1c7   : > { %v830_v43 = vpop.f32.mrf.mxu0  ;;  %v943_v44 = vpop.f32.mrf.mxu1 }
 0x1c8   : > { %v1238_v47 = vadd.f32 %v1167_v42, %v562_v39  ;;  %1103 = vmatmul.f32.gmra.mxu2 %v700_v40  ;;  %v944_v48 = vadd.f32 %v943_v44, %v830_v43  ;;  %1216 = vmatmul.f32.gmra.mxu3 %v701_v41  ;;  %v568_v41 = vld [vmem:[#allocation2 + $0x40] sm:$0xff] }
 0x1ca   : > { %1270 = vst [vmem:[#allocation2 + $0x60] sm:$0xff] %v1238_v47  ;;  %877 = vmatmul.f32.gmra.mxu0 %v698_v45  ;;  %990 = vmatmul.f32.gmra.mxu1 %v699_v46 }
 0x1cb   : > { %v1056_v49 = vpop.f32.mrf.mxu2  ;;  %v1169_v50 = vpop.f32.mrf.mxu3 }
 0x1cc   : > { %v1057_v51 = vadd.f32 %v1056_v49, %v944_v48 }
 0x1ce   : > { %v1170_v55 = vadd.f32 %v1169_v50, %v1057_v51  ;;  %v569_v50 = vld [vmem:[#allocation2 + $0xc8] sm:$0xff] }
 0x1cf   : > { %v833_v56 = vpop.f32.mrf.mxu0  ;;  %v946_v57 = vpop.f32.mrf.mxu1 }
 0x1d0   : > { %v1239_v60 = vadd.f32 %v1170_v55, %v563_v52  ;;  %1106 = vmatmul.f32.gmra.mxu2 %v704_v53  ;;  %v947_v61 = vadd.f32 %v946_v57, %v833_v56  ;;  %1219 = vmatmul.f32.gmra.mxu3 %v705_v54 }
 0x1d2   : > { %1271 = vst [vmem:[#allocation2 + $0xf0] sm:$0xff] %v1239_v60  ;;  %880 = vmatmul.f32.gmra.mxu0 %v702_v58  ;;  %993 = vmatmul.f32.gmra.mxu1 %v703_v59  ;;  %v570_v59 = vld [vmem:[#allocation2 + $0xe0] sm:$0xff] }
 0x1d3   : > { %v1059_v62 = vpop.f32.mrf.mxu2  ;;  %v1172_v63 = vpop.f32.mrf.mxu3 }
 0x1d4   : > { %v1060_v0 = vadd.f32 %v1059_v62, %v947_v61 }
 0x1d6   : > { %v1173_v4 = vadd.f32 %v1172_v63, %v1060_v0 }
 0x1d7   : > { %v836_v5 = vpop.f32.mrf.mxu0  ;;  %v949_v6 = vpop.f32.mrf.mxu1 }
 0x1d8   : > { %v1240_v9 = vadd.f32 %v1173_v4, %v564_v1  ;;  %1109 = vmatmul.f32.gmra.mxu2 %v708_v2  ;;  %v950_v10 = vadd.f32 %v949_v6, %v836_v5  ;;  %1222 = vmatmul.f32.gmra.mxu3 %v709_v3  ;;  %v571_v4 = vld [vmem:[#allocation2 + $0x90] sm:$0xff] }
 0x1da   : > { %1272 = vst [vmem:[#allocation2 + $0x8] sm:$0xff] %v1240_v9  ;;  %883 = vmatmul.f32.gmra.mxu0 %v706_v7  ;;  %996 = vmatmul.f32.gmra.mxu1 %v707_v8 }
 0x1db   : > { %v1062_v11 = vpop.f32.mrf.mxu2  ;;  %v1175_v12 = vpop.f32.mrf.mxu3 }
 0x1dc   : > { %v1063_v13 = vadd.f32 %v1062_v11, %v950_v10 }
 0x1de   : > { %v1176_v15 = vadd.f32 %v1175_v12, %v1063_v13  ;;  %v572_v13 = vld [vmem:[#allocation2 + $0x70] sm:$0xff] }
 0x1df   : > { %v839_v16 = vpop.f32.mrf.mxu0  ;;  %v952_v17 = vpop.f32.mrf.mxu1 }
 0x1e0   : > { %v1241_v18 = vadd.f32 %v1176_v15, %v565_v14  ;;  %v953_v19 = vadd.f32 %v952_v17, %v839_v16 }
 0x1e2   : > { %1273 = vst [vmem:[#allocation2 + $0x78] sm:$0xff] %v1241_v18 }
 0x1e3   : > { %v1065_v20 = vpop.f32.mrf.mxu2  ;;  %v1178_v21 = vpop.f32.mrf.mxu3 }
 0x1e4   : > { %v1066_v22 = vadd.f32 %v1065_v20, %v953_v19 }
 0x1e6   : > { %v1179_v24 = vadd.f32 %v1178_v21, %v1066_v22  ;;  %v573_v22 = vld [vmem:[#allocation2 + $0xc0] sm:$0xff] }
 0x1e7   : > { %v842_v25 = vpop.f32.mrf.mxu0  ;;  %v955_v26 = vpop.f32.mrf.mxu1 }
 0x1e8   : > { %v1242_v27 = vadd.f32 %v1179_v24, %v566_v23  ;;  %v956_v28 = vadd.f32 %v955_v26, %v842_v25 }
 0x1ea   : > { %1274 = vst [vmem:[#allocation2 + $0x38] sm:$0xff] %v1242_v27 }
 0x1eb   : > { %v1068_v29 = vpop.f32.mrf.mxu2  ;;  %v1181_v30 = vpop.f32.mrf.mxu3 }
 0x1ec   : > { %v1069_v31 = vadd.f32 %v1068_v29, %v956_v28 }
 0x1ee   : > { %v1182_v33 = vadd.f32 %v1181_v30, %v1069_v31  ;;  %v574_v31 = vld [vmem:[#allocation2 + $0xa8] sm:$0xff] }
 0x1ef   : > { %v845_v34 = vpop.f32.mrf.mxu0  ;;  %v958_v35 = vpop.f32.mrf.mxu1 }
 0x1f0   : > { %v1243_v36 = vadd.f32 %v1182_v33, %v567_v32  ;;  %v959_v37 = vadd.f32 %v958_v35, %v845_v34 }
 0x1f2   : > { %1275 = vst [vmem:[#allocation2 + $0x58] sm:$0xff] %v1243_v36 }
 0x1f3   : > { %v1071_v38 = vpop.f32.mrf.mxu2  ;;  %v1184_v39 = vpop.f32.mrf.mxu3 }
 0x1f4   : > { %v1072_v40 = vadd.f32 %v1071_v38, %v959_v37 }
 0x1f6   : > { %v1185_v42 = vadd.f32 %v1184_v39, %v1072_v40  ;;  %v575_v40 = vld [vmem:[#allocation2 + $0xd0] sm:$0xff] }
 0x1f7   : > { %v848_v43 = vpop.f32.mrf.mxu0  ;;  %v961_v44 = vpop.f32.mrf.mxu1 }
 0x1f8   : > { %v1244_v45 = vadd.f32 %v1185_v42, %v568_v41  ;;  %v962_v46 = vadd.f32 %v961_v44, %v848_v43 }
 0x1fa   : > { %1276 = vst [vmem:[#allocation2 + $0x40] sm:$0xff] %v1244_v45 }
 0x1fb   : > { %v1074_v47 = vpop.f32.mrf.mxu2  ;;  %v1187_v48 = vpop.f32.mrf.mxu3 }
 0x1fc   : > { %v1075_v49 = vadd.f32 %v1074_v47, %v962_v46 }
 0x1fe   : > { %v1188_v51 = vadd.f32 %v1187_v48, %v1075_v49  ;;  %v576_v49 = vld [vmem:[#allocation2 + $0x10] sm:$0xff] }
 0x1ff   : > { %v851_v52 = vpop.f32.mrf.mxu0  ;;  %v964_v53 = vpop.f32.mrf.mxu1 }
 0x200   : > { %v1245_v54 = vadd.f32 %v1188_v51, %v569_v50  ;;  %v965_v55 = vadd.f32 %v964_v53, %v851_v52 }
 0x202   : > { %1277 = vst [vmem:[#allocation2 + $0xc8] sm:$0xff] %v1245_v54 }
 0x203   : > { %v1077_v56 = vpop.f32.mrf.mxu2  ;;  %v1190_v57 = vpop.f32.mrf.mxu3 }
 0x204   : > { %v1078_v58 = vadd.f32 %v1077_v56, %v965_v55 }
 0x206   : > { %v1191_v60 = vadd.f32 %v1190_v57, %v1078_v58  ;;  %v577_v58 = vld [vmem:[#allocation2 + $0x28] sm:$0xff] }
 0x207   : > { %v854_v61 = vpop.f32.mrf.mxu0  ;;  %v967_v62 = vpop.f32.mrf.mxu1 }
 0x208   : > { %v1246_v63 = vadd.f32 %v1191_v60, %v570_v59  ;;  %v968_v0 = vadd.f32 %v967_v62, %v854_v61 }
 0x20a   : > { %1278 = vst [vmem:[#allocation2 + $0xe0] sm:$0xff] %v1246_v63 }
 0x20b   : > { %v1080_v1 = vpop.f32.mrf.mxu2  ;;  %v1193_v2 = vpop.f32.mrf.mxu3 }
 0x20c   : > { %v1081_v3 = vadd.f32 %v1080_v1, %v968_v0 }
 0x20e   : > { %v1194_v5 = vadd.f32 %v1193_v2, %v1081_v3  ;;  %v578_v3 = vld [vmem:[#allocation2 + $0xa0] sm:$0xff] }
 0x20f   : > { %v857_v6 = vpop.f32.mrf.mxu0  ;;  %v970_v7 = vpop.f32.mrf.mxu1 }
 0x210   : > { %v1247_v8 = vadd.f32 %v1194_v5, %v571_v4  ;;  %v971_v9 = vadd.f32 %v970_v7, %v857_v6 }
 0x212   : > { %1279 = vst [vmem:[#allocation2 + $0x90] sm:$0xff] %v1247_v8 }
 0x213   : > { %v1083_v10 = vpop.f32.mrf.mxu2  ;;  %v1196_v11 = vpop.f32.mrf.mxu3 }
 0x214   : > { %v1084_v12 = vadd.f32 %v1083_v10, %v971_v9 }
 0x216   : > { %v1197_v14 = vadd.f32 %v1196_v11, %v1084_v12  ;;  %v579_v12 = vld [vmem:[#allocation2 + $0xf8] sm:$0xff] }
 0x217   : > { %v860_v15 = vpop.f32.mrf.mxu0  ;;  %v973_v16 = vpop.f32.mrf.mxu1 }
 0x218   : > { %v1248_v17 = vadd.f32 %v1197_v14, %v572_v13  ;;  %v974_v18 = vadd.f32 %v973_v16, %v860_v15 }
 0x21a   : > { %1280 = vst [vmem:[#allocation2 + $0x70] sm:$0xff] %v1248_v17 }
 0x21b   : > { %v1086_v19 = vpop.f32.mrf.mxu2  ;;  %v1199_v20 = vpop.f32.mrf.mxu3 }
 0x21c   : > { %v1087_v21 = vadd.f32 %v1086_v19, %v974_v18 }
 0x21e   : > { %v1200_v23 = vadd.f32 %v1199_v20, %v1087_v21  ;;  %v580_v21 = vld [vmem:[#allocation2 + $0x20] sm:$0xff] }
 0x21f   : > { %v863_v24 = vpop.f32.mrf.mxu0  ;;  %v976_v25 = vpop.f32.mrf.mxu1 }
 0x220   : > { %v1249_v26 = vadd.f32 %v1200_v23, %v573_v22  ;;  %v977_v27 = vadd.f32 %v976_v25, %v863_v24 }
 0x222   : > { %1281 = vst [vmem:[#allocation2 + $0xc0] sm:$0xff] %v1249_v26 }
 0x223   : > { %v1089_v28 = vpop.f32.mrf.mxu2  ;;  %v1202_v29 = vpop.f32.mrf.mxu3 }
 0x224   : > { %v1090_v30 = vadd.f32 %v1089_v28, %v977_v27 }
 0x226   : > { %v1203_v32 = vadd.f32 %v1202_v29, %v1090_v30  ;;  %v581_v30 = vld [vmem:[#allocation2 + $0x98] sm:$0xff] }
 0x227   : > { %v866_v33 = vpop.f32.mrf.mxu0  ;;  %v979_v34 = vpop.f32.mrf.mxu1 }
 0x228   : > { %v1250_v35 = vadd.f32 %v1203_v32, %v574_v31  ;;  %v980_v36 = vadd.f32 %v979_v34, %v866_v33 }
 0x22a   : > { %1282 = vst [vmem:[#allocation2 + $0xa8] sm:$0xff] %v1250_v35 }
 0x22b   : > { %v1092_v37 = vpop.f32.mrf.mxu2  ;;  %v1205_v38 = vpop.f32.mrf.mxu3 }
 0x22c   : > { %v1093_v39 = vadd.f32 %v1092_v37, %v980_v36 }
 0x22e   : > { %v1206_v41 = vadd.f32 %v1205_v38, %v1093_v39 }
 0x22f   : > { %v869_v42 = vpop.f32.mrf.mxu0  ;;  %v982_v43 = vpop.f32.mrf.mxu1 }
 0x230   : > { %v1251_v44 = vadd.f32 %v1206_v41, %v575_v40  ;;  %v983_v45 = vadd.f32 %v982_v43, %v869_v42 }
 0x232   : > { %1283 = vst [vmem:[#allocation2 + $0xd0] sm:$0xff] %v1251_v44 }
 0x233   : > { %v1095_v46 = vpop.f32.mrf.mxu2  ;;  %v1208_v47 = vpop.f32.mrf.mxu3 }
 0x234   : > { %v1096_v48 = vadd.f32 %v1095_v46, %v983_v45 }
 0x236   : > { %v1209_v50 = vadd.f32 %v1208_v47, %v1096_v48 }
 0x237   : > { %v872_v51 = vpop.f32.mrf.mxu0  ;;  %v985_v52 = vpop.f32.mrf.mxu1 }
 0x238   : > { %v1252_v53 = vadd.f32 %v1209_v50, %v576_v49  ;;  %v986_v54 = vadd.f32 %v985_v52, %v872_v51 }
 0x23a   : > { %1284 = vst [vmem:[#allocation2 + $0x10] sm:$0xff] %v1252_v53 }
 0x23b   : > { %v1098_v55 = vpop.f32.mrf.mxu2  ;;  %v1211_v56 = vpop.f32.mrf.mxu3 }
 0x23c   : > { %v1099_v57 = vadd.f32 %v1098_v55, %v986_v54 }
 0x23e   : > { %v1212_v59 = vadd.f32 %v1211_v56, %v1099_v57 }
 0x23f   : > { %v875_v60 = vpop.f32.mrf.mxu0  ;;  %v988_v61 = vpop.f32.mrf.mxu1 }
 0x240   : > { %v1253_v62 = vadd.f32 %v1212_v59, %v577_v58  ;;  %v989_v63 = vadd.f32 %v988_v61, %v875_v60 }
 0x242   : > { %1285 = vst [vmem:[#allocation2 + $0x28] sm:$0xff] %v1253_v62 }
 0x243   : > { %v1101_v0 = vpop.f32.mrf.mxu2  ;;  %v1214_v1 = vpop.f32.mrf.mxu3 }
 0x244   : > { %v1102_v2 = vadd.f32 %v1101_v0, %v989_v63 }
 0x246   : > { %v1215_v4 = vadd.f32 %v1214_v1, %v1102_v2 }
 0x247   : > { %v878_v5 = vpop.f32.mrf.mxu0  ;;  %v991_v6 = vpop.f32.mrf.mxu1 }
 0x248   : > { %v1254_v7 = vadd.f32 %v1215_v4, %v578_v3  ;;  %v992_v8 = vadd.f32 %v991_v6, %v878_v5 }
 0x24a   : > { %1286 = vst [vmem:[#allocation2 + $0xa0] sm:$0xff] %v1254_v7 }
 0x24b   : > { %v1104_v9 = vpop.f32.mrf.mxu2  ;;  %v1217_v10 = vpop.f32.mrf.mxu3 }
 0x24c   : > { %v1105_v11 = vadd.f32 %v1104_v9, %v992_v8 }
 0x24e   : > { %v1218_v13 = vadd.f32 %v1217_v10, %v1105_v11 }
 0x24f   : > { %v881_v14 = vpop.f32.mrf.mxu0  ;;  %v994_v15 = vpop.f32.mrf.mxu1 }
 0x250   : > { %v1255_v16 = vadd.f32 %v1218_v13, %v579_v12  ;;  %v995_v17 = vadd.f32 %v994_v15, %v881_v14 }
 0x252   : > { %1287 = vst [vmem:[#allocation2 + $0xf8] sm:$0xff] %v1255_v16 }
 0x253   : > { %v1107_v18 = vpop.f32.mrf.mxu2  ;;  %v1220_v19 = vpop.f32.mrf.mxu3 }
 0x254   : > { %v1108_v20 = vadd.f32 %v1107_v18, %v995_v17 }
 0x256   : > { %v1221_v22 = vadd.f32 %v1220_v19, %v1108_v20 }
 0x257   : > { %v884_v23 = vpop.f32.mrf.mxu0  ;;  %v997_v24 = vpop.f32.mrf.mxu1 }
 0x258   : > { %v1256_v25 = vadd.f32 %v1221_v22, %v580_v21  ;;  %v998_v26 = vadd.f32 %v997_v24, %v884_v23 }
 0x25a   : > { %1288 = vst [vmem:[#allocation2 + $0x20] sm:$0xff] %v1256_v25 }
 0x25b   : > { %v1110_v27 = vpop.f32.mrf.mxu2  ;;  %v1223_v28 = vpop.f32.mrf.mxu3 }
 0x25c   : > { %v1111_v29 = vadd.f32 %v1110_v27, %v998_v26 }
 0x25e   : > { %v1224_v31 = vadd.f32 %v1223_v28, %v1111_v29  ;;  %1293 = sbr.rel (%p1556_p11) target bundleno = 650 (0x28a), region = 67 }
 0x260   : > { %v1257_v32 = vadd.f32 %v1224_v31, %v581_v30 }
 0x262   : > { %1289 = vst [vmem:[#allocation2 + $0x98] sm:$0xff] %v1257_v32 }
 0x263   : > { %v1294_v33 = vld [vmem:[#allocation2 + $0xb0] sm:$0xff]  ;;  %v2182_v34 = vld [vmem:[%s2366_s2] ss:$0 sm:$0xff]  ;;  %v1296_v39 = vld [vmem:[#allocation2 + $0xd8] sm:$0xff] }
 0x264   : > { %v2187_v35 = vld [vmem:[%s2367_s3] ss:$0 sm:$0xff]  ;;  %v1330_v37 = vmul.f32 %v2182_v34, %v1294_v33  ;;  %v1297_v40 = vld [vmem:[#allocation2 + $0x18] sm:$0xff]  ;;  %v1298_v41 = vld [vmem:[#allocation2 + $0x50] sm:$0xff]  ;;  %v1332_v42 = vmul.f32 %v2182_v34, %v1296_v39 }
 0x265   : > { %v1295_v36 = vld [vmem:[#allocation2] sm:$0xff]  ;;  %v1333_v43 = vmul.f32 %v2182_v34, %v1297_v40  ;;  %v1334_v44 = vmul.f32 %v2182_v34, %v1298_v41  ;;  %v1299_v45 = vld [vmem:[#allocation2 + $0x68] sm:$0xff]  ;;  %v1300_v46 = vld [vmem:[#allocation2 + $0x30] sm:$0xff] }
 0x266   : > { %v1331_v38 = vmul.f32 %v2182_v34, %v1295_v36  ;;  %v1301_v47 = vld [vmem:[#allocation2 + $0x48] sm:$0xff]  ;;  %v1366_v48 = vadd.f32 %v2187_v35, %v1330_v37  ;;  %v1335_v50 = vmul.f32 %v2182_v34, %v1299_v45  ;;  %v1336_v51 = vmul.f32 %v2182_v34, %v1300_v46  ;;  %v1302_v56 = vld [vmem:[#allocation2 + $0x80] sm:$0xff]  ;;  %v1305_v63 = vld [vmem:[#allocation2 + $0xb8] sm:$0xff] }
 0x267   : > { %v1368_v52 = vadd.f32 %v2187_v35, %v1332_v42  ;;  %v1369_v53 = vadd.f32 %v2187_v35, %v1333_v43  ;;  %v1370_v54 = vadd.f32 %v2187_v35, %v1334_v44  ;;  %v1337_v55 = vmul.f32 %v2182_v34, %v1301_v47  ;;  %v1303_v57 = vld [vmem:[#allocation2 + $0x88] sm:$0xff]  ;;  %v1306_v0 = vld [vmem:[#allocation2 + $0x60] sm:$0xff]  ;;  %v1307_v4 = vld [vmem:[#allocation2 + $0xf0] sm:$0xff] }
 0x268   : > { %v1367_v49 = vadd.f32 %v2187_v35, %v1331_v38  ;;  %v1398_v58 = vmax.f32 %v1366_v48, 0.0  ;;  %v1371_v60 = vadd.f32 %v2187_v35, %v1335_v50  ;;  %v1372_v61 = vadd.f32 %v2187_v35, %v1336_v51  ;;  %v1304_v62 = vld [vmem:[#allocation2 + $0xe8] sm:$0xff]  ;;  %v1309_v10 = vld [vmem:[#allocation2 + $0x78] sm:$0xff]  ;;  %v1312_v27 = vld [vmem:[#allocation2 + $0x40] sm:$0xff] }
 0x269   : > { %v1400_v1 = vmax.f32 %v1368_v52, 0.0  ;;  %v1401_v2 = vmax.f32 %v1369_v53, 0.0  ;;  %v1373_v3 = vadd.f32 %v2187_v35, %v1337_v55  ;;  %v1308_v5 = vld [vmem:[#allocation2 + $0x8] sm:$0xff]  ;;  %v1402_v6 = vmax.f32 %v1370_v54, 0.0  ;;  %v1310_v23 = vld [vmem:[#allocation2 + $0x38] sm:$0xff]  ;;  %v1314_v31 = vld [vmem:[#allocation2 + $0xe0] sm:$0xff] }
 0x26a   : > { %v1399_v59 = vmax.f32 %v1367_v49, 0.0  ;;  %1430 = vst [vmem:[%s2368_s4] sm:$0xff] %v1398_v58  ;;  %v1403_v7 = vmax.f32 %v1371_v60, 0.0  ;;  %v1338_v8 = vmul.f32 %v2182_v34, %v1302_v56  ;;  %v1339_v9 = vmul.f32 %v2182_v34, %v1303_v57  ;;  %v1311_v24 = vld [vmem:[#allocation2 + $0x58] sm:$0xff]  ;;  %v1313_v28 = vld [vmem:[#allocation2 + $0xc8] sm:$0xff]  ;;  %v1315_v38 = vld [vmem:[#allocation2 + $0x90] sm:$0xff] }
 0x26b   : > { %v1404_v11 = vmax.f32 %v1372_v61, 0.0  ;;  %v1340_v12 = vmul.f32 %v2182_v34, %v1304_v62  ;;  %v1341_v13 = vmul.f32 %v2182_v34, %v1305_v63  ;;  %v1342_v14 = vmul.f32 %v2182_v34, %v1306_v0  ;;  %1432 = vst [vmem:[%s2368_s4 + $0x10] sm:$0xff] %v1400_v1  ;;  %v1316_v43 = vld [vmem:[#allocation2 + $0x70] sm:$0xff]  ;;  %v1317_v47 = vld [vmem:[#allocation2 + $0xc0] sm:$0xff]  ;;  %v1318_v51 = vld [vmem:[#allocation2 + $0xa8] sm:$0xff] }
 0x26c   : > { %1431 = vst [vmem:[%s2368_s4 + $0x8] sm:$0xff] %v1399_v59  ;;  %v1374_v15 = vadd.f32 %v2187_v35, %v1338_v8  ;;  %v1375_v16 = vadd.f32 %v2187_v35, %v1339_v9  ;;  %v1343_v17 = vmul.f32 %v2182_v34, %v1307_v4  ;;  %v1344_v18 = vmul.f32 %v2182_v34, %v1308_v5  ;;  %v1319_v55 = vld [vmem:[#allocation2 + $0xd0] sm:$0xff]  ;;  %v1321_v63 = vld [vmem:[#allocation2 + $0x28] sm:$0xff] }
 0x26d   : > { %1433 = vst [vmem:[%s2368_s4 + $0x18] sm:$0xff] %v1401_v2  ;;  %v1405_v19 = vmax.f32 %v1373_v3, 0.0  ;;  %v1376_v20 = vadd.f32 %v2187_v35, %v1340_v12  ;;  %v1377_v21 = vadd.f32 %v2187_v35, %v1341_v13  ;;  %v1345_v22 = vmul.f32 %v2182_v34, %v1309_v10  ;;  %v1320_v59 = vld [vmem:[#allocation2 + $0x10] sm:$0xff]  ;;  %v1322_v3 = vld [vmem:[#allocation2 + $0xa0] sm:$0xff] }
 0x26e   : > { %1434 = vst [vmem:[%s2368_s4 + $0x20] sm:$0xff] %v1402_v6  ;;  %v1406_v25 = vmax.f32 %v1374_v15, 0.0  ;;  %v1378_v26 = vadd.f32 %v2187_v35, %v1342_v14  ;;  %v1407_v29 = vmax.f32 %v1375_v16, 0.0  ;;  %v1379_v30 = vadd.f32 %v2187_v35, %v1343_v17  ;;  %v1325_v15 = vld [vmem:[#allocation2 + $0x98] sm:$0xff] }
 0x26f   : > { %1435 = vst [vmem:[%s2368_s4 + $0x28] sm:$0xff] %v1403_v7  ;;  %v1408_v32 = vmax.f32 %v1376_v20, 0.0  ;;  %v1380_v33 = vadd.f32 %v2187_v35, %v1344_v18  ;;  %v1346_v36 = vmul.f32 %v2182_v34, %v1310_v23  ;;  %v1347_v37 = vmul.f32 %v2182_v34, %v1311_v24  ;;  %v1323_v7 = vld [vmem:[#allocation2 + $0xf8] sm:$0xff] }
 0x270   : > { %1436 = vst [vmem:[%s2368_s4 + $0x30] sm:$0xff] %v1404_v11  ;;  %v1409_v39 = vmax.f32 %v1377_v21, 0.0  ;;  %v1381_v40 = vadd.f32 %v2187_v35, %v1345_v22  ;;  %v1348_v41 = vmul.f32 %v2182_v34, %v1312_v27  ;;  %v1349_v42 = vmul.f32 %v2182_v34, %v1313_v28  ;;  %v1324_v11 = vld [vmem:[#allocation2 + $0x20] sm:$0xff] }
 0x271   : > { %1437 = vst [vmem:[%s2368_s4 + $0x38] sm:$0xff] %v1405_v19  ;;  %v1410_v44 = vmax.f32 %v1378_v26, 0.0  ;;  %v1382_v45 = vadd.f32 %v2187_v35, %v1346_v36  ;;  %v1350_v46 = vmul.f32 %v2182_v34, %v1314_v31  ;;  %v1411_v48 = vmax.f32 %v1379_v30, 0.0 }
 0x272   : > { %1438 = vst [vmem:[%s2368_s4 + $0x40] sm:$0xff] %v1406_v25  ;;  %v1383_v49 = vadd.f32 %v2187_v35, %v1347_v37  ;;  %v1351_v50 = vmul.f32 %v2182_v34, %v1315_v38  ;;  %v1412_v52 = vmax.f32 %v1380_v33, 0.0  ;;  %v1384_v53 = vadd.f32 %v2187_v35, %v1348_v41 }
 0x273   : > { %1439 = vst [vmem:[%s2368_s4 + $0x48] sm:$0xff] %v1407_v29  ;;  %v1352_v54 = vmul.f32 %v2182_v34, %v1316_v43  ;;  %v1413_v56 = vmax.f32 %v1381_v40, 0.0  ;;  %v1385_v57 = vadd.f32 %v2187_v35, %v1349_v42  ;;  %v1353_v58 = vmul.f32 %v2182_v34, %v1317_v47 }
 0x274   : > { %1440 = vst [vmem:[%s2368_s4 + $0x50] sm:$0xff] %v1408_v32  ;;  %v1414_v60 = vmax.f32 %v1382_v45, 0.0  ;;  %v1386_v61 = vadd.f32 %v2187_v35, %v1350_v46  ;;  %v1354_v62 = vmul.f32 %v2182_v34, %v1318_v51  ;;  %v1415_v0 = vmax.f32 %v1383_v49, 0.0 }
 0x275   : > { %1441 = vst [vmem:[%s2368_s4 + $0x58] sm:$0xff] %v1409_v39  ;;  %v1387_v1 = vadd.f32 %v2187_v35, %v1351_v50  ;;  %v1355_v2 = vmul.f32 %v2182_v34, %v1319_v55  ;;  %v1416_v4 = vmax.f32 %v1384_v53, 0.0  ;;  %v1388_v5 = vadd.f32 %v2187_v35, %v1352_v54 }
 0x276   : > { %1442 = vst [vmem:[%s2368_s4 + $0x60] sm:$0xff] %v1410_v44  ;;  %v1356_v6 = vmul.f32 %v2182_v34, %v1320_v59  ;;  %v1417_v8 = vmax.f32 %v1385_v57, 0.0  ;;  %v1389_v9 = vadd.f32 %v2187_v35, %v1353_v58  ;;  %v1357_v10 = vmul.f32 %v2182_v34, %v1321_v63 }
 0x277   : > { %1443 = vst [vmem:[%s2368_s4 + $0x68] sm:$0xff] %v1411_v48  ;;  %v1418_v12 = vmax.f32 %v1386_v61, 0.0  ;;  %v1390_v13 = vadd.f32 %v2187_v35, %v1354_v62  ;;  %v1358_v14 = vmul.f32 %v2182_v34, %v1322_v3  ;;  %v1419_v16 = vmax.f32 %v1387_v1, 0.0 }
 0x278   : > { %1444 = vst [vmem:[%s2368_s4 + $0x70] sm:$0xff] %v1412_v52  ;;  %v1391_v17 = vadd.f32 %v2187_v35, %v1355_v2  ;;  %v1359_v18 = vmul.f32 %v2182_v34, %v1323_v7  ;;  %v1420_v19 = vmax.f32 %v1388_v5, 0.0  ;;  %v1392_v20 = vadd.f32 %v2187_v35, %v1356_v6 }
 0x279   : > { %1445 = vst [vmem:[%s2368_s4 + $0x78] sm:$0xff] %v1413_v56  ;;  %v1360_v21 = vmul.f32 %v2182_v34, %v1324_v11  ;;  %v1421_v22 = vmax.f32 %v1389_v9, 0.0  ;;  %v1393_v23 = vadd.f32 %v2187_v35, %v1357_v10  ;;  %v1361_v24 = vmul.f32 %v2182_v34, %v1325_v15 }
 0x27a   : > { %1446 = vst [vmem:[%s2368_s4 + $0x80] sm:$0xff] %v1414_v60  ;;  %v1422_v25 = vmax.f32 %v1390_v13, 0.0  ;;  %v1394_v26 = vadd.f32 %v2187_v35, %v1358_v14  ;;  %v1423_v27 = vmax.f32 %v1391_v17, 0.0  ;;  %v1395_v28 = vadd.f32 %v2187_v35, %v1359_v18 }
 0x27b   : > { %1447 = vst [vmem:[%s2368_s4 + $0x88] sm:$0xff] %v1415_v0  ;;  %v1424_v29 = vmax.f32 %v1392_v20, 0.0  ;;  %v1396_v34 = vadd.f32 %v2187_v35, %v1360_v21  ;;  %v1425_v30 = vmax.f32 %v1393_v23, 0.0  ;;  %v1397_v31 = vadd.f32 %v2187_v35, %v1361_v24 }
 0x27c   : > { %1448 = vst [vmem:[%s2368_s4 + $0x90] sm:$0xff] %v1416_v4  ;;  %v1426_v32 = vmax.f32 %v1394_v26, 0.0  ;;  %v1427_v33 = vmax.f32 %v1395_v28, 0.0 }
 0x27d   : > { %1449 = vst [vmem:[%s2368_s4 + $0x98] sm:$0xff] %v1417_v8  ;;  %v1428_v36 = vmax.f32 %v1396_v34, 0.0  ;;  %v1429_v35 = vmax.f32 %v1397_v31, 0.0 }
 0x27e   : > { %1450 = vst [vmem:[%s2368_s4 + $0xa0] sm:$0xff] %v1418_v12 }
 0x27f   : > { %1451 = vst [vmem:[%s2368_s4 + $0xa8] sm:$0xff] %v1419_v16 }
 0x280   : > { %1452 = vst [vmem:[%s2368_s4 + $0xb0] sm:$0xff] %v1420_v19 }
 0x281   : > { %1453 = vst [vmem:[%s2368_s4 + $0xb8] sm:$0xff] %v1421_v22 }
 0x282   : > { %1454 = vst [vmem:[%s2368_s4 + $0xc0] sm:$0xff] %v1422_v25 }
 0x283   : > { %1455 = vst [vmem:[%s2368_s4 + $0xc8] sm:$0xff] %v1423_v27 }
 0x284   : > { %1456 = vst [vmem:[%s2368_s4 + $0xd0] sm:$0xff] %v1424_v29 }
 0x285   : > { %1457 = vst [vmem:[%s2368_s4 + $0xd8] sm:$0xff] %v1425_v30 }
 0x286   : > { %1458 = vst [vmem:[%s2368_s4 + $0xe0] sm:$0xff] %v1426_v32 }
 0x287   : > { %1459 = vst [vmem:[%s2368_s4 + $0xe8] sm:$0xff] %v1427_v33 }
 0x288   : > { %1460 = vst [vmem:[%s2368_s4 + $0xf0] sm:$0xff] %v1428_v36 }
 0x289   : > { %1461 = vst [vmem:[%s2368_s4 + $0xf8] sm:$0xff] %v1429_v35 }
 0x28a PF: > { %s14_s19 = sadd.s32 1, %s1643_s19   ;;  %s2369_s15 = smov %s1631_s16 }
 0x28b   : > { %p11_p12 = scmp.ge.s32.totalorder %s14_s19, 6   ;;  %s2370_s16 = smov %s1706_s23 }
 0x28c   : > { %s2371_s17 = smov %s1639_s18  ;;  %s2372_s18 = smov %s2374_s20 }
 0x28d   :  { %13 = sbr.rel (!%p11_p12) target bundleno = 3 (0x3), region = 105 }

// kernel: netg_forward.6
= control target key start
LH: loop header
LB: loop body
LE: loop exit
PB: predicated region body
PF: predicated region fallthrough
CT: control target
= control target key end

     0   :  { %s1712_s15 = smov 0   ;;  %s1714_s16 = smov 0   ;;  %s2370_s0 = inlined_call_operand.vmem [shape: f32[1024,1024], index: 0, kind: input, shape index: {}]   ;;  %s2371_s1 = inlined_call_operand.vmem [shape: f32[1024,128], index: 1, kind: input, shape index: {}]   ;;  %s2372_s2 = inlined_call_operand.vmem [shape: f32[1,128], index: 2, kind: input, shape index: {}]   ;;  %s2373_s3 = inlined_call_operand.vmem [shape: f32[1,128], index: 3, kind: input, shape index: {}]   ;;  %s2374_s4 = inlined_call_operand.vmem [shape: f32[1024,128], index: 4, kind: output, shape index: {}]  }
   0x1   :  { %s1716_s17 = smov 0   ;;  %s1718_s18 = smov 0  }
   0x2   :  { %s1720_s19 = smov 0   ;;  %s1722_s20 = smov 0  }
   0x3   :  { %s1724_s21 = smov 0  }
   0x4 LB: > { %s23_s22 = sadd.s32 1, %s1676_s19  ;;  %s26_s23 = sadd.s32 1, %s1680_s20  ;;  %s1684_s21 = sphi %s1724_s21, %s14_s21   ;;  %s1680_s20 = sphi %s1722_s20, %s2380_s20   ;;  %s1676_s19 = sphi %s1720_s19, %s2379_s19   ;;  %s1672_s18 = sphi %s1718_s18, %s2378_s18   ;;  %s1668_s17 = sphi %s1716_s17, %s2377_s17   ;;  %s1664_s16 = sphi %s1714_s16, %s2376_s16   ;;  %s1660_s15 = sphi %s1712_s15, %s2375_s15  }
   0x5   : > { %p24_p0 = scmp.ge.s32.totalorder %s23_s22, 2  ;;  %p42_p1 = scmp.ne.s32.totalorder %s1664_s16, %s1660_s15 }
   0x6   : > { %p43_p2 = scmp.eq.s32.totalorder %s1684_s21, 0  ;;  %s35_s27 = sadd.s32 1, %s1664_s16 }
   0x7   : > { %s2382_s22 = smov (%p24_p0, %s23_s22), 0  ;;  %s2384_s23 = smov (!%p24_p0, %s26_s23), %s1680_s20 }
   0x8   : > { %p44_p3 = por %p43_p2, %p42_p1  ;;  %p28_p4 = scmp.ge.s32.totalorder %s2384_s23, 4 }
   0x9   : > { %s31_s24 = ssub.s32 %s1676_s19, %s2382_s22  ;;  %p1554_p6 = scmp.ge.s32.totalorder %s1684_s21, 8 }
   0xa   : > { %s2386_s23 = smov (%p28_p4, %s2384_s23), 0 }
   0xb   : > { %s30_s25 = ssub.s32 %s1680_s20, %s2386_s23  ;;  %168 = sbr.rel (%p1554_p6) target bundleno = 151 (0x97), region = 24 }
   0xc   : > { %s32_s26 = sor.u32 %s31_s24, %s30_s25 }
   0xd   : > { %p33_p5 = scmp.eq.s32.totalorder %s32_s26, 0 }
   0xf   : > { %s1763_s28 = scalar_select %p33_p5, %s1664_s16, %s35_s27  }
  0x10   : > { %171 = sbr.rel (!%p44_p3) target bundleno = 151 (0x97), region = 28  ;;  %s173_s29 = sand.u32 (%p44_p3), 1, %s1664_s16  }
  0x11   : > { %s1557_s30 = sshll.u32 (%p44_p3), %s1676_s19, 2  ;;  %s1555_s5 = sshll.u32 (%p44_p3), %s173_s29, 10 }
  0x12   : > { %s1570_s6 = sshll.u32 (%p44_p3), %s1680_s20, 8  ;;  %s1777_s12 = scalar_lea.vmem (%p44_p3), [#allocation3], %s1555_s5 }
  0x13   : > { %s179_s7 = sadd.s32 (%p44_p3), %s1570_s6, %s1557_s30 }
  0x14   : > { %s1559_s8 = sshll.u32 (%p44_p3), %s179_s7, 3 }
  0x15   : > { %s1772_s11 = scalar_lea.vmem %s2370_s0, %s1559_s8 }
  0x16   : > { %v194_v0 = vld [vmem:[%s1772_s11] sm:$0xff]  ;;  %v196_v1 = vld [vmem:[%s1772_s11 + $0x8] sm:$0xff]  ;;  %v198_v2 = vld [vmem:[%s1772_s11 + $0x10] sm:$0xff] }
  0x17   : > { %195 = vst [vmem:[%s1777_s12] sm:$0xff] %v194_v0  ;;  %v200_v3 = vld [vmem:[%s1772_s11 + $0x18] sm:$0xff]  ;;  %v202_v4 = vld [vmem:[%s1772_s11 + $0x40] sm:$0xff]  ;;  %v204_v5 = vld [vmem:[%s1772_s11 + $0x48] sm:$0xff] }
  0x18   : > { %197 = vst [vmem:[%s1777_s12 + $0x8] sm:$0xff] %v196_v1  ;;  %v206_v6 = vld [vmem:[%s1772_s11 + $0x50] sm:$0xff]  ;;  %v208_v7 = vld [vmem:[%s1772_s11 + $0x58] sm:$0xff]  ;;  %v210_v8 = vld [vmem:[%s1772_s11 + $0x80] sm:$0xff] }
  0x19   : > { %199 = vst [vmem:[%s1777_s12 + $0x10] sm:$0xff] %v198_v2  ;;  %v212_v9 = vld [vmem:[%s1772_s11 + $0x88] sm:$0xff]  ;;  %v214_v10 = vld [vmem:[%s1772_s11 + $0x90] sm:$0xff]  ;;  %v216_v11 = vld [vmem:[%s1772_s11 + $0x98] sm:$0xff] }
  0x1a   : > { %201 = vst [vmem:[%s1777_s12 + $0x18] sm:$0xff] %v200_v3  ;;  %v218_v12 = vld [vmem:[%s1772_s11 + $0xc0] sm:$0xff]  ;;  %v220_v13 = vld [vmem:[%s1772_s11 + $0xc8] sm:$0xff]  ;;  %v222_v14 = vld [vmem:[%s1772_s11 + $0xd0] sm:$0xff] }
  0x1b   : > { %203 = vst [vmem:[%s1777_s12 + $0x20] sm:$0xff] %v202_v4  ;;  %v224_v15 = vld [vmem:[%s1772_s11 + $0xd8] sm:$0xff]  ;;  %v226_v16 = vld [vmem:[%s1772_s11 + $0x100] sm:$0xff]  ;;  %v228_v17 = vld [vmem:[%s1772_s11 + $0x108] sm:$0xff] }
  0x1c   : > { %205 = vst [vmem:[%s1777_s12 + $0x28] sm:$0xff] %v204_v5  ;;  %v230_v18 = vld [vmem:[%s1772_s11 + $0x110] sm:$0xff]  ;;  %v232_v19 = vld [vmem:[%s1772_s11 + $0x118] sm:$0xff]  ;;  %v234_v20 = vld [vmem:[%s1772_s11 + $0x140] sm:$0xff] }
  0x1d   : > { %207 = vst [vmem:[%s1777_s12 + $0x30] sm:$0xff] %v206_v6  ;;  %v236_v21 = vld [vmem:[%s1772_s11 + $0x148] sm:$0xff]  ;;  %v238_v22 = vld [vmem:[%s1772_s11 + $0x150] sm:$0xff]  ;;  %v240_v23 = vld [vmem:[%s1772_s11 + $0x158] sm:$0xff] }
  0x1e   : > { %209 = vst [vmem:[%s1777_s12 + $0x38] sm:$0xff] %v208_v7  ;;  %v242_v24 = vld [vmem:[%s1772_s11 + $0x180] sm:$0xff]  ;;  %v244_v25 = vld [vmem:[%s1772_s11 + $0x188] sm:$0xff]  ;;  %v246_v26 = vld [vmem:[%s1772_s11 + $0x190] sm:$0xff] }
  0x1f   : > { %211 = vst [vmem:[%s1777_s12 + $0x40] sm:$0xff] %v210_v8  ;;  %v248_v27 = vld [vmem:[%s1772_s11 + $0x198] sm:$0xff]  ;;  %v250_v28 = vld [vmem:[%s1772_s11 + $0x1c0] sm:$0xff]  ;;  %v252_v29 = vld [vmem:[%s1772_s11 + $0x1c8] sm:$0xff] }
  0x20   : > { %213 = vst [vmem:[%s1777_s12 + $0x48] sm:$0xff] %v212_v9  ;;  %v254_v30 = vld [vmem:[%s1772_s11 + $0x1d0] sm:$0xff]  ;;  %v256_v31 = vld [vmem:[%s1772_s11 + $0x1d8] sm:$0xff]  ;;  %v258_v32 = vld [vmem:[%s1772_s11 + $0x200] sm:$0xff] }
  0x21   : > { %215 = vst [vmem:[%s1777_s12 + $0x50] sm:$0xff] %v214_v10  ;;  %v260_v33 = vld [vmem:[%s1772_s11 + $0x208] sm:$0xff]  ;;  %v262_v34 = vld [vmem:[%s1772_s11 + $0x210] sm:$0xff]  ;;  %v264_v35 = vld [vmem:[%s1772_s11 + $0x218] sm:$0xff] }
  0x22   : > { %217 = vst [vmem:[%s1777_s12 + $0x58] sm:$0xff] %v216_v11  ;;  %v266_v36 = vld [vmem:[%s1772_s11 + $0x240] sm:$0xff]  ;;  %v268_v37 = vld [vmem:[%s1772_s11 + $0x248] sm:$0xff]  ;;  %v270_v38 = vld [vmem:[%s1772_s11 + $0x250] sm:$0xff] }
  0x23   : > { %219 = vst [vmem:[%s1777_s12 + $0x60] sm:$0xff] %v218_v12  ;;  %v272_v39 = vld [vmem:[%s1772_s11 + $0x258] sm:$0xff]  ;;  %v274_v40 = vld [vmem:[%s1772_s11 + $0x280] sm:$0xff]  ;;  %v276_v41 = vld [vmem:[%s1772_s11 + $0x288] sm:$0xff] }
  0x24   : > { %221 = vst [vmem:[%s1777_s12 + $0x68] sm:$0xff] %v220_v13  ;;  %v278_v42 = vld [vmem:[%s1772_s11 + $0x290] sm:$0xff]  ;;  %v280_v43 = vld [vmem:[%s1772_s11 + $0x298] sm:$0xff]  ;;  %v282_v44 = vld [vmem:[%s1772_s11 + $0x2c0] sm:$0xff] }
  0x25   : > { %223 = vst [vmem:[%s1777_s12 + $0x70] sm:$0xff] %v222_v14  ;;  %v284_v45 = vld [vmem:[%s1772_s11 + $0x2c8] sm:$0xff]  ;;  %v286_v46 = vld [vmem:[%s1772_s11 + $0x2d0] sm:$0xff]  ;;  %v288_v47 = vld [vmem:[%s1772_s11 + $0x2d8] sm:$0xff] }
  0x26   : > { %225 = vst [vmem:[%s1777_s12 + $0x78] sm:$0xff] %v224_v15  ;;  %v290_v48 = vld [vmem:[%s1772_s11 + $0x300] sm:$0xff]  ;;  %v292_v49 = vld [vmem:[%s1772_s11 + $0x308] sm:$0xff]  ;;  %v294_v50 = vld [vmem:[%s1772_s11 + $0x310] sm:$0xff] }
  0x27   : > { %227 = vst [vmem:[%s1777_s12 + $0x80] sm:$0xff] %v226_v16  ;;  %v296_v51 = vld [vmem:[%s1772_s11 + $0x318] sm:$0xff]  ;;  %v298_v52 = vld [vmem:[%s1772_s11 + $0x340] sm:$0xff]  ;;  %v300_v53 = vld [vmem:[%s1772_s11 + $0x348] sm:$0xff] }
  0x28   : > { %229 = vst [vmem:[%s1777_s12 + $0x88] sm:$0xff] %v228_v17  ;;  %v302_v54 = vld [vmem:[%s1772_s11 + $0x350] sm:$0xff]  ;;  %v304_v55 = vld [vmem:[%s1772_s11 + $0x358] sm:$0xff]  ;;  %v306_v56 = vld [vmem:[%s1772_s11 + $0x380] sm:$0xff] }
  0x29   : > { %231 = vst [vmem:[%s1777_s12 + $0x90] sm:$0xff] %v230_v18  ;;  %v308_v57 = vld [vmem:[%s1772_s11 + $0x388] sm:$0xff]  ;;  %v310_v58 = vld [vmem:[%s1772_s11 + $0x390] sm:$0xff]  ;;  %v312_v59 = vld [vmem:[%s1772_s11 + $0x398] sm:$0xff] }
  0x2a   : > { %233 = vst [vmem:[%s1777_s12 + $0x98] sm:$0xff] %v232_v19  ;;  %v314_v60 = vld [vmem:[%s1772_s11 + $0x3c0] sm:$0xff]  ;;  %v316_v61 = vld [vmem:[%s1772_s11 + $0x3c8] sm:$0xff]  ;;  %v318_v62 = vld [vmem:[%s1772_s11 + $0x3d0] sm:$0xff] }
  0x2b   : > { %235 = vst [vmem:[%s1777_s12 + $0xa0] sm:$0xff] %v234_v20  ;;  %v320_v63 = vld [vmem:[%s1772_s11 + $0x3d8] sm:$0xff]  ;;  %v322_v0 = vld [vmem:[%s1772_s11 + $0x400] sm:$0xff]  ;;  %v324_v1 = vld [vmem:[%s1772_s11 + $0x408] sm:$0xff] }
  0x2c   : > { %237 = vst [vmem:[%s1777_s12 + $0xa8] sm:$0xff] %v236_v21  ;;  %v326_v2 = vld [vmem:[%s1772_s11 + $0x410] sm:$0xff]  ;;  %v328_v3 = vld [vmem:[%s1772_s11 + $0x418] sm:$0xff]  ;;  %v330_v4 = vld [vmem:[%s1772_s11 + $0x440] sm:$0xff] }
  0x2d   : > { %239 = vst [vmem:[%s1777_s12 + $0xb0] sm:$0xff] %v238_v22  ;;  %v332_v5 = vld [vmem:[%s1772_s11 + $0x448] sm:$0xff]  ;;  %v334_v6 = vld [vmem:[%s1772_s11 + $0x450] sm:$0xff]  ;;  %v336_v7 = vld [vmem:[%s1772_s11 + $0x458] sm:$0xff] }
  0x2e   : > { %241 = vst [vmem:[%s1777_s12 + $0xb8] sm:$0xff] %v240_v23  ;;  %v338_v8 = vld [vmem:[%s1772_s11 + $0x480] sm:$0xff]  ;;  %v340_v9 = vld [vmem:[%s1772_s11 + $0x488] sm:$0xff]  ;;  %v342_v10 = vld [vmem:[%s1772_s11 + $0x490] sm:$0xff] }
  0x2f   : > { %243 = vst [vmem:[%s1777_s12 + $0xc0] sm:$0xff] %v242_v24  ;;  %v344_v11 = vld [vmem:[%s1772_s11 + $0x498] sm:$0xff]  ;;  %v346_v12 = vld [vmem:[%s1772_s11 + $0x4c0] sm:$0xff]  ;;  %v348_v13 = vld [vmem:[%s1772_s11 + $0x4c8] sm:$0xff] }
  0x30   : > { %245 = vst [vmem:[%s1777_s12 + $0xc8] sm:$0xff] %v244_v25  ;;  %v350_v14 = vld [vmem:[%s1772_s11 + $0x4d0] sm:$0xff]  ;;  %v352_v15 = vld [vmem:[%s1772_s11 + $0x4d8] sm:$0xff]  ;;  %v354_v16 = vld [vmem:[%s1772_s11 + $0x500] sm:$0xff] }
  0x31   : > { %247 = vst [vmem:[%s1777_s12 + $0xd0] sm:$0xff] %v246_v26  ;;  %v356_v17 = vld [vmem:[%s1772_s11 + $0x508] sm:$0xff]  ;;  %v358_v18 = vld [vmem:[%s1772_s11 + $0x510] sm:$0xff]  ;;  %v360_v19 = vld [vmem:[%s1772_s11 + $0x518] sm:$0xff] }
  0x32   : > { %249 = vst [vmem:[%s1777_s12 + $0xd8] sm:$0xff] %v248_v27  ;;  %v362_v20 = vld [vmem:[%s1772_s11 + $0x540] sm:$0xff]  ;;  %v364_v21 = vld [vmem:[%s1772_s11 + $0x548] sm:$0xff]  ;;  %v366_v22 = vld [vmem:[%s1772_s11 + $0x550] sm:$0xff] }
  0x33   : > { %251 = vst [vmem:[%s1777_s12 + $0xe0] sm:$0xff] %v250_v28  ;;  %v368_v23 = vld [vmem:[%s1772_s11 + $0x558] sm:$0xff]  ;;  %v370_v24 = vld [vmem:[%s1772_s11 + $0x580] sm:$0xff]  ;;  %v372_v25 = vld [vmem:[%s1772_s11 + $0x588] sm:$0xff] }
  0x34   : > { %253 = vst [vmem:[%s1777_s12 + $0xe8] sm:$0xff] %v252_v29  ;;  %v374_v26 = vld [vmem:[%s1772_s11 + $0x590] sm:$0xff]  ;;  %v376_v27 = vld [vmem:[%s1772_s11 + $0x598] sm:$0xff]  ;;  %v378_v28 = vld [vmem:[%s1772_s11 + $0x5c0] sm:$0xff] }
  0x35   : > { %255 = vst [vmem:[%s1777_s12 + $0xf0] sm:$0xff] %v254_v30  ;;  %v380_v29 = vld [vmem:[%s1772_s11 + $0x5c8] sm:$0xff]  ;;  %v382_v30 = vld [vmem:[%s1772_s11 + $0x5d0] sm:$0xff] }
  0x36   : > { %257 = vst [vmem:[%s1777_s12 + $0xf8] sm:$0xff] %v256_v31  ;;  %v384_v31 = vld [vmem:[%s1772_s11 + $0x5d8] sm:$0xff] }
  0x37   : > { %259 = vst [vmem:[%s1777_s12 + $0x100] sm:$0xff] %v258_v32  ;;  %v386_v32 = vld [vmem:[%s1772_s11 + $0x600] sm:$0xff] }
  0x38   : > { %261 = vst [vmem:[%s1777_s12 + $0x108] sm:$0xff] %v260_v33  ;;  %v388_v33 = vld [vmem:[%s1772_s11 + $0x608] sm:$0xff] }
  0x39   : > { %263 = vst [vmem:[%s1777_s12 + $0x110] sm:$0xff] %v262_v34  ;;  %v390_v34 = vld [vmem:[%s1772_s11 + $0x610] sm:$0xff] }
  0x3a   : > { %265 = vst [vmem:[%s1777_s12 + $0x118] sm:$0xff] %v264_v35  ;;  %v392_v35 = vld [vmem:[%s1772_s11 + $0x618] sm:$0xff] }
  0x3b   : > { %267 = vst [vmem:[%s1777_s12 + $0x120] sm:$0xff] %v266_v36  ;;  %v394_v36 = vld [vmem:[%s1772_s11 + $0x640] sm:$0xff] }
  0x3c   : > { %269 = vst [vmem:[%s1777_s12 + $0x128] sm:$0xff] %v268_v37  ;;  %v396_v37 = vld [vmem:[%s1772_s11 + $0x648] sm:$0xff] }
  0x3d   : > { %271 = vst [vmem:[%s1777_s12 + $0x130] sm:$0xff] %v270_v38  ;;  %v398_v38 = vld [vmem:[%s1772_s11 + $0x650] sm:$0xff] }
  0x3e   : > { %273 = vst [vmem:[%s1777_s12 + $0x138] sm:$0xff] %v272_v39  ;;  %v400_v39 = vld [vmem:[%s1772_s11 + $0x658] sm:$0xff] }
  0x3f   : > { %275 = vst [vmem:[%s1777_s12 + $0x140] sm:$0xff] %v274_v40  ;;  %v402_v40 = vld [vmem:[%s1772_s11 + $0x680] sm:$0xff] }
  0x40   : > { %277 = vst [vmem:[%s1777_s12 + $0x148] sm:$0xff] %v276_v41  ;;  %v404_v41 = vld [vmem:[%s1772_s11 + $0x688] sm:$0xff] }
  0x41   : > { %279 = vst [vmem:[%s1777_s12 + $0x150] sm:$0xff] %v278_v42  ;;  %v406_v42 = vld [vmem:[%s1772_s11 + $0x690] sm:$0xff] }
  0x42   : > { %281 = vst [vmem:[%s1777_s12 + $0x158] sm:$0xff] %v280_v43  ;;  %v408_v43 = vld [vmem:[%s1772_s11 + $0x698] sm:$0xff] }
  0x43   : > { %283 = vst [vmem:[%s1777_s12 + $0x160] sm:$0xff] %v282_v44  ;;  %v410_v44 = vld [vmem:[%s1772_s11 + $0x6c0] sm:$0xff] }
  0x44   : > { %285 = vst [vmem:[%s1777_s12 + $0x168] sm:$0xff] %v284_v45  ;;  %v412_v45 = vld [vmem:[%s1772_s11 + $0x6c8] sm:$0xff] }
  0x45   : > { %287 = vst [vmem:[%s1777_s12 + $0x170] sm:$0xff] %v286_v46  ;;  %v414_v46 = vld [vmem:[%s1772_s11 + $0x6d0] sm:$0xff] }
  0x46   : > { %289 = vst [vmem:[%s1777_s12 + $0x178] sm:$0xff] %v288_v47  ;;  %v416_v47 = vld [vmem:[%s1772_s11 + $0x6d8] sm:$0xff] }
  0x47   : > { %291 = vst [vmem:[%s1777_s12 + $0x180] sm:$0xff] %v290_v48  ;;  %v418_v48 = vld [vmem:[%s1772_s11 + $0x700] sm:$0xff] }
  0x48   : > { %293 = vst [vmem:[%s1777_s12 + $0x188] sm:$0xff] %v292_v49  ;;  %v420_v49 = vld [vmem:[%s1772_s11 + $0x708] sm:$0xff] }
  0x49   : > { %295 = vst [vmem:[%s1777_s12 + $0x190] sm:$0xff] %v294_v50  ;;  %v422_v50 = vld [vmem:[%s1772_s11 + $0x710] sm:$0xff] }
  0x4a   : > { %297 = vst [vmem:[%s1777_s12 + $0x198] sm:$0xff] %v296_v51  ;;  %v424_v51 = vld [vmem:[%s1772_s11 + $0x718] sm:$0xff] }
  0x4b   : > { %299 = vst [vmem:[%s1777_s12 + $0x1a0] sm:$0xff] %v298_v52  ;;  %v426_v52 = vld [vmem:[%s1772_s11 + $0x740] sm:$0xff] }
  0x4c   : > { %301 = vst [vmem:[%s1777_s12 + $0x1a8] sm:$0xff] %v300_v53  ;;  %v428_v53 = vld [vmem:[%s1772_s11 + $0x748] sm:$0xff] }
  0x4d   : > { %303 = vst [vmem:[%s1777_s12 + $0x1b0] sm:$0xff] %v302_v54  ;;  %v430_v54 = vld [vmem:[%s1772_s11 + $0x750] sm:$0xff] }
  0x4e   : > { %305 = vst [vmem:[%s1777_s12 + $0x1b8] sm:$0xff] %v304_v55  ;;  %v432_v55 = vld [vmem:[%s1772_s11 + $0x758] sm:$0xff] }
  0x4f   : > { %307 = vst [vmem:[%s1777_s12 + $0x1c0] sm:$0xff] %v306_v56  ;;  %v434_v56 = vld [vmem:[%s1772_s11 + $0x780] sm:$0xff] }
  0x50   : > { %309 = vst [vmem:[%s1777_s12 + $0x1c8] sm:$0xff] %v308_v57  ;;  %v436_v57 = vld [vmem:[%s1772_s11 + $0x788] sm:$0xff] }
  0x51   : > { %311 = vst [vmem:[%s1777_s12 + $0x1d0] sm:$0xff] %v310_v58  ;;  %v438_v58 = vld [vmem:[%s1772_s11 + $0x790] sm:$0xff] }
  0x52   : > { %313 = vst [vmem:[%s1777_s12 + $0x1d8] sm:$0xff] %v312_v59  ;;  %v440_v59 = vld [vmem:[%s1772_s11 + $0x798] sm:$0xff] }
  0x53   : > { %315 = vst [vmem:[%s1777_s12 + $0x1e0] sm:$0xff] %v314_v60  ;;  %v442_v60 = vld [vmem:[%s1772_s11 + $0x7c0] sm:$0xff] }
  0x54   : > { %317 = vst [vmem:[%s1777_s12 + $0x1e8] sm:$0xff] %v316_v61  ;;  %v444_v61 = vld [vmem:[%s1772_s11 + $0x7c8] sm:$0xff] }
  0x55   : > { %319 = vst [vmem:[%s1777_s12 + $0x1f0] sm:$0xff] %v318_v62  ;;  %v446_v62 = vld [vmem:[%s1772_s11 + $0x7d0] sm:$0xff] }
  0x56   : > { %321 = vst [vmem:[%s1777_s12 + $0x1f8] sm:$0xff] %v320_v63  ;;  %v448_v63 = vld [vmem:[%s1772_s11 + $0x7d8] sm:$0xff] }
  0x57   : > { %323 = vst [vmem:[%s1777_s12 + $0x200] sm:$0xff] %v322_v0 }
  0x58   : > { %325 = vst [vmem:[%s1777_s12 + $0x208] sm:$0xff] %v324_v1 }
  0x59   : > { %327 = vst [vmem:[%s1777_s12 + $0x210] sm:$0xff] %v326_v2 }
  0x5a   : > { %329 = vst [vmem:[%s1777_s12 + $0x218] sm:$0xff] %v328_v3 }
  0x5b   : > { %331 = vst [vmem:[%s1777_s12 + $0x220] sm:$0xff] %v330_v4 }
  0x5c   : > { %333 = vst [vmem:[%s1777_s12 + $0x228] sm:$0xff] %v332_v5 }
  0x5d   : > { %335 = vst [vmem:[%s1777_s12 + $0x230] sm:$0xff] %v334_v6 }
  0x5e   : > { %337 = vst [vmem:[%s1777_s12 + $0x238] sm:$0xff] %v336_v7 }
  0x5f   : > { %339 = vst [vmem:[%s1777_s12 + $0x240] sm:$0xff] %v338_v8 }
  0x60   : > { %341 = vst [vmem:[%s1777_s12 + $0x248] sm:$0xff] %v340_v9 }
  0x61   : > { %343 = vst [vmem:[%s1777_s12 + $0x250] sm:$0xff] %v342_v10 }
  0x62   : > { %345 = vst [vmem:[%s1777_s12 + $0x258] sm:$0xff] %v344_v11 }
  0x63   : > { %347 = vst [vmem:[%s1777_s12 + $0x260] sm:$0xff] %v346_v12 }
  0x64   : > { %349 = vst [vmem:[%s1777_s12 + $0x268] sm:$0xff] %v348_v13 }
  0x65   : > { %351 = vst [vmem:[%s1777_s12 + $0x270] sm:$0xff] %v350_v14 }
  0x66   : > { %353 = vst [vmem:[%s1777_s12 + $0x278] sm:$0xff] %v352_v15 }
  0x67   : > { %355 = vst [vmem:[%s1777_s12 + $0x280] sm:$0xff] %v354_v16 }
  0x68   : > { %357 = vst [vmem:[%s1777_s12 + $0x288] sm:$0xff] %v356_v17 }
  0x69   : > { %359 = vst [vmem:[%s1777_s12 + $0x290] sm:$0xff] %v358_v18 }
  0x6a   : > { %361 = vst [vmem:[%s1777_s12 + $0x298] sm:$0xff] %v360_v19 }
  0x6b   : > { %363 = vst [vmem:[%s1777_s12 + $0x2a0] sm:$0xff] %v362_v20 }
  0x6c   : > { %365 = vst [vmem:[%s1777_s12 + $0x2a8] sm:$0xff] %v364_v21 }
  0x6d   : > { %367 = vst [vmem:[%s1777_s12 + $0x2b0] sm:$0xff] %v366_v22 }
  0x6e   : > { %369 = vst [vmem:[%s1777_s12 + $0x2b8] sm:$0xff] %v368_v23 }
  0x6f   : > { %371 = vst [vmem:[%s1777_s12 + $0x2c0] sm:$0xff] %v370_v24 }
  0x70   : > { %373 = vst [vmem:[%s1777_s12 + $0x2c8] sm:$0xff] %v372_v25 }
  0x71   : > { %375 = vst [vmem:[%s1777_s12 + $0x2d0] sm:$0xff] %v374_v26 }
  0x72   : > { %377 = vst [vmem:[%s1777_s12 + $0x2d8] sm:$0xff] %v376_v27 }
  0x73   : > { %379 = vst [vmem:[%s1777_s12 + $0x2e0] sm:$0xff] %v378_v28 }
  0x74   : > { %381 = vst [vmem:[%s1777_s12 + $0x2e8] sm:$0xff] %v380_v29 }
  0x75   : > { %383 = vst [vmem:[%s1777_s12 + $0x2f0] sm:$0xff] %v382_v30 }
  0x76   : > { %385 = vst [vmem:[%s1777_s12 + $0x2f8] sm:$0xff] %v384_v31 }
  0x77   : > { %387 = vst [vmem:[%s1777_s12 + $0x300] sm:$0xff] %v386_v32 }
  0x78   : > { %389 = vst [vmem:[%s1777_s12 + $0x308] sm:$0xff] %v388_v33 }
  0x79   : > { %391 = vst [vmem:[%s1777_s12 + $0x310] sm:$0xff] %v390_v34 }
  0x7a   : > { %393 = vst [vmem:[%s1777_s12 + $0x318] sm:$0xff] %v392_v35 }
  0x7b   : > { %395 = vst [vmem:[%s1777_s12 + $0x320] sm:$0xff] %v394_v36 }
  0x7c   : > { %397 = vst [vmem:[%s1777_s12 + $0x328] sm:$0xff] %v396_v37 }
  0x7d   : > { %399 = vst [vmem:[%s1777_s12 + $0x330] sm:$0xff] %v398_v38 }
  0x7e   : > { %401 = vst [vmem:[%s1777_s12 + $0x338] sm:$0xff] %v400_v39 }
  0x7f   : > { %403 = vst [vmem:[%s1777_s12 + $0x340] sm:$0xff] %v402_v40 }
  0x80   : > { %405 = vst [vmem:[%s1777_s12 + $0x348] sm:$0xff] %v404_v41 }
  0x81   : > { %407 = vst [vmem:[%s1777_s12 + $0x350] sm:$0xff] %v406_v42 }
  0x82   : > { %409 = vst [vmem:[%s1777_s12 + $0x358] sm:$0xff] %v408_v43 }
  0x83   : > { %411 = vst [vmem:[%s1777_s12 + $0x360] sm:$0xff] %v410_v44 }
  0x84   : > { %413 = vst [vmem:[%s1777_s12 + $0x368] sm:$0xff] %v412_v45 }
  0x85   : > { %415 = vst [vmem:[%s1777_s12 + $0x370] sm:$0xff] %v414_v46 }
  0x86   : > { %417 = vst [vmem:[%s1777_s12 + $0x378] sm:$0xff] %v416_v47 }
  0x87   : > { %419 = vst [vmem:[%s1777_s12 + $0x380] sm:$0xff] %v418_v48 }
  0x88   : > { %421 = vst [vmem:[%s1777_s12 + $0x388] sm:$0xff] %v420_v49 }
  0x89   : > { %423 = vst [vmem:[%s1777_s12 + $0x390] sm:$0xff] %v422_v50 }
  0x8a   : > { %425 = vst [vmem:[%s1777_s12 + $0x398] sm:$0xff] %v424_v51 }
  0x8b   : > { %427 = vst [vmem:[%s1777_s12 + $0x3a0] sm:$0xff] %v426_v52 }
  0x8c   : > { %429 = vst [vmem:[%s1777_s12 + $0x3a8] sm:$0xff] %v428_v53 }
  0x8d   : > { %431 = vst [vmem:[%s1777_s12 + $0x3b0] sm:$0xff] %v430_v54 }
  0x8e   : > { %433 = vst [vmem:[%s1777_s12 + $0x3b8] sm:$0xff] %v432_v55 }
  0x8f   : > { %435 = vst [vmem:[%s1777_s12 + $0x3c0] sm:$0xff] %v434_v56 }
  0x90   : > { %437 = vst [vmem:[%s1777_s12 + $0x3c8] sm:$0xff] %v436_v57 }
  0x91   : > { %439 = vst [vmem:[%s1777_s12 + $0x3d0] sm:$0xff] %v438_v58 }
  0x92   : > { %441 = vst [vmem:[%s1777_s12 + $0x3d8] sm:$0xff] %v440_v59 }
  0x93   : > { %443 = vst [vmem:[%s1777_s12 + $0x3e0] sm:$0xff] %v442_v60 }
  0x94   : > { %445 = vst [vmem:[%s1777_s12 + $0x3e8] sm:$0xff] %v444_v61 }
  0x95   : > { %447 = vst [vmem:[%s1777_s12 + $0x3f0] sm:$0xff] %v446_v62 }
  0x96   : > { %449 = vst [vmem:[%s1777_s12 + $0x3f8] sm:$0xff] %v448_v63 }
  0x97 PF: > { %p1560_p7 = scmp.ge.s32.totalorder %s1684_s21, 1  ;;  %p463_p8 = scmp.lt.s32.totalorder %s1684_s21, 9 }
  0x99   : > { %p464_p9 = pnand %p1560_p7, %p463_p8 }
  0x9a   : > { %s470_s13 = sand.u32 (!%p464_p9), 1, %s1660_s15   ;;  %s1562_s14 = sshll.u32 (!%p464_p9), %s1668_s17, 6 }
  0x9b   : > { %467 = sbr.rel (%p464_p9) target bundleno = 660 (0x294), region = 55  ;;  %s1561_s24 = sshll.u32 (!%p464_p9), %s470_s13, 10 }
  0x9c   : > { %p503_p10 = scmp.lt.s32.totalorder (!%p464_p9), %s1562_s14, 127  ;;  %s1564_s25 = sshll.u32 (!%p464_p9), %s1672_s18, 5 }
  0x9d   : > { %p509_p11 = scmp.lt.s32.totalorder (!%p464_p9), %s1564_s25, 127  ;;  %s2047_s15 = scalar_lea.vmem (!%p464_p9), [#allocation3], %s1561_s24 }
  0x9e   : > { %p1566_p12 = scmp.ne.s32.totalorder (!%p464_p9), %s1668_s17, 0 }
  0xa0   : > { %s2388_s14 = smov (!%p503_p10, %s1562_s14), 127  ;;  %s2390_s25 = smov (!%p509_p11, %s1564_s25), 127 }
  0xa1   : > { %s1563_s26 = sshll.u32 %s2388_s14, 3  ;;  %s1565_s5 = sshll.u32 %s2390_s25, 3 }
  0xa2   : > { %s2040_s30 = scalar_lea.vmem %s2371_s1, %s1563_s26  ;;  %s2045_s8 = scalar_lea.vmem %s2374_s4, %s1565_s5 }
  0xa3   : > { %517 = sbr.rel (%p1566_p12) target bundleno = 201 (0xc9), region = 63 }
  0xa8   : > { %v1686_v0 = vmov 0.0  }
  0xa9   : > { %518 = vst [vmem:[#allocation2 + $0xb0] sm:$0xff] %v1686_v0 }
  0xaa   : > { %519 = vst [vmem:[#allocation2] sm:$0xff] %v1686_v0 }
  0xab   : > { %520 = vst [vmem:[#allocation2 + $0xd8] sm:$0xff] %v1686_v0 }
  0xac   : > { %521 = vst [vmem:[#allocation2 + $0x18] sm:$0xff] %v1686_v0 }
  0xad   : > { %522 = vst [vmem:[#allocation2 + $0x50] sm:$0xff] %v1686_v0 }
  0xae   : > { %523 = vst [vmem:[#allocation2 + $0x68] sm:$0xff] %v1686_v0 }
  0xaf   : > { %524 = vst [vmem:[#allocation2 + $0x30] sm:$0xff] %v1686_v0 }
  0xb0   : > { %525 = vst [vmem:[#allocation2 + $0x48] sm:$0xff] %v1686_v0 }
  0xb1   : > { %526 = vst [vmem:[#allocation2 + $0x80] sm:$0xff] %v1686_v0 }
  0xb2   : > { %527 = vst [vmem:[#allocation2 + $0x88] sm:$0xff] %v1686_v0 }
  0xb3   : > { %528 = vst [vmem:[#allocation2 + $0xe8] sm:$0xff] %v1686_v0 }
  0xb4   : > { %529 = vst [vmem:[#allocation2 + $0xb8] sm:$0xff] %v1686_v0 }
  0xb5   : > { %530 = vst [vmem:[#allocation2 + $0x60] sm:$0xff] %v1686_v0 }
  0xb6   : > { %531 = vst [vmem:[#allocation2 + $0xf0] sm:$0xff] %v1686_v0 }
  0xb7   : > { %532 = vst [vmem:[#allocation2 + $0x8] sm:$0xff] %v1686_v0 }
  0xb8   : > { %533 = vst [vmem:[#allocation2 + $0x78] sm:$0xff] %v1686_v0 }
  0xb9   : > { %534 = vst [vmem:[#allocation2 + $0x38] sm:$0xff] %v1686_v0 }
  0xba   : > { %535 = vst [vmem:[#allocation2 + $0x58] sm:$0xff] %v1686_v0 }
  0xbb   : > { %536 = vst [vmem:[#allocation2 + $0x40] sm:$0xff] %v1686_v0 }
  0xbc   : > { %537 = vst [vmem:[#allocation2 + $0xc8] sm:$0xff] %v1686_v0 }
  0xbd   : > { %538 = vst [vmem:[#allocation2 + $0xe0] sm:$0xff] %v1686_v0 }
  0xbe   : > { %539 = vst [vmem:[#allocation2 + $0x90] sm:$0xff] %v1686_v0 }
  0xbf   : > { %540 = vst [vmem:[#allocation2 + $0x70] sm:$0xff] %v1686_v0 }
  0xc0   : > { %541 = vst [vmem:[#allocation2 + $0xc0] sm:$0xff] %v1686_v0 }
  0xc1   : > { %542 = vst [vmem:[#allocation2 + $0xa8] sm:$0xff] %v1686_v0 }
  0xc2   : > { %543 = vst [vmem:[#allocation2 + $0xd0] sm:$0xff] %v1686_v0 }
  0xc3   : > { %544 = vst [vmem:[#allocation2 + $0x10] sm:$0xff] %v1686_v0 }
  0xc4   : > { %545 = vst [vmem:[#allocation2 + $0x28] sm:$0xff] %v1686_v0 }
  0xc5   : > { %546 = vst [vmem:[#allocation2 + $0xa0] sm:$0xff] %v1686_v0 }
  0xc6   : > { %547 = vst [vmem:[#allocation2 + $0xf8] sm:$0xff] %v1686_v0 }
  0xc7   : > { %548 = vst [vmem:[#allocation2 + $0x20] sm:$0xff] %v1686_v0 }
  0xc8   : > { %549 = vst [vmem:[#allocation2 + $0x98] sm:$0xff] %v1686_v0 }
  0xc9 PF: > { %v757_v1 = vld [vmem:[%s2040_s30 + $0x178] sm:$0xff]  ;;  %v756_v2 = vld [vmem:[%s2040_s30 + $0x170] sm:$0xff]  ;;  %v755_v6 = vld [vmem:[%s2040_s30 + $0x168] sm:$0xff]  ;;  %p1567_p13 = scmp.ne.s32.totalorder %s1668_s17, 1 }
  0xca   : > { %v773_v3 = vld [vmem:[%s2040_s30 + $0x1f8] sm:$0xff]  ;;  %1000 = vmatpush.msra.mxu2 %v757_v1  ;;  %v772_v7 = vld [vmem:[%s2040_s30 + $0x1f0] sm:$0xff]  ;;  %v771_v10 = vld [vmem:[%s2040_s30 + $0x1e8] sm:$0xff] }
  0xcb   : > { %1113 = vmatpush.msra.mxu3 %v773_v3  ;;  %v725_v4 = vld [vmem:[%s2040_s30 + $0x78] sm:$0xff]  ;;  %v724_v8 = vld [vmem:[%s2040_s30 + $0x70] sm:$0xff]  ;;  %v723_v11 = vld [vmem:[%s2040_s30 + $0x68] sm:$0xff] }
  0xcc   : > { %v741_v5 = vld [vmem:[%s2040_s30 + $0xf8] sm:$0xff]  ;;  %774 = vmatpush.msra.mxu0 %v725_v4  ;;  %v740_v9 = vld [vmem:[%s2040_s30 + $0xf0] sm:$0xff]  ;;  %1001 = vmatpush.msra.mxu2 %v756_v2  ;;  %v754_v12 = vld [vmem:[%s2040_s30 + $0x160] sm:$0xff] }
  0xcd   : > { %887 = vmatpush.msra.mxu1 %v741_v5  ;;  %1114 = vmatpush.msra.mxu3 %v772_v7  ;;  %v739_v13 = vld [vmem:[%s2040_s30 + $0xe8] sm:$0xff]  ;;  %v770_v14 = vld [vmem:[%s2040_s30 + $0x1e0] sm:$0xff]  ;;  %v753_v17 = vld [vmem:[%s2040_s30 + $0x158] sm:$0xff] }
  0xce   : > { %775 = vmatpush.msra.mxu0 %v724_v8  ;;  %1002 = vmatpush.msra.mxu2 %v755_v6  ;;  %v722_v15 = vld [vmem:[%s2040_s30 + $0x60] sm:$0xff]  ;;  %v769_v18 = vld [vmem:[%s2040_s30 + $0x1d8] sm:$0xff]  ;;  %v752_v21 = vld [vmem:[%s2040_s30 + $0x150] sm:$0xff] }
  0xcf   : > { %888 = vmatpush.msra.mxu1 %v740_v9  ;;  %1115 = vmatpush.msra.mxu3 %v771_v10  ;;  %v738_v16 = vld [vmem:[%s2040_s30 + $0xe0] sm:$0xff]  ;;  %v721_v19 = vld [vmem:[%s2040_s30 + $0x58] sm:$0xff]  ;;  %v768_v22 = vld [vmem:[%s2040_s30 + $0x1d0] sm:$0xff] }
  0xd0   : > { %776 = vmatpush.msra.mxu0 %v723_v11  ;;  %1003 = vmatpush.msra.mxu2 %v754_v12  ;;  %v737_v20 = vld [vmem:[%s2040_s30 + $0xd8] sm:$0xff]  ;;  %v720_v23 = vld [vmem:[%s2040_s30 + $0x50] sm:$0xff]  ;;  %v751_v25 = vld [vmem:[%s2040_s30 + $0x148] sm:$0xff] }
  0xd1   : > { %889 = vmatpush.msra.mxu1 %v739_v13  ;;  %1116 = vmatpush.msra.mxu3 %v770_v14  ;;  %v736_v24 = vld [vmem:[%s2040_s30 + $0xd0] sm:$0xff]  ;;  %v767_v26 = vld [vmem:[%s2040_s30 + $0x1c8] sm:$0xff]  ;;  %v750_v29 = vld [vmem:[%s2040_s30 + $0x140] sm:$0xff] }
  0xd2   : > { %777 = vmatpush.msra.mxu0 %v722_v15  ;;  %1004 = vmatpush.msra.mxu2 %v753_v17  ;;  %v719_v27 = vld [vmem:[%s2040_s30 + $0x48] sm:$0xff]  ;;  %v766_v30 = vld [vmem:[%s2040_s30 + $0x1c0] sm:$0xff]  ;;  %v749_v33 = vld [vmem:[%s2040_s30 + $0x138] sm:$0xff] }
  0xd3   : > { %890 = vmatpush.msra.mxu1 %v738_v16  ;;  %1117 = vmatpush.msra.mxu3 %v769_v18  ;;  %v735_v28 = vld [vmem:[%s2040_s30 + $0xc8] sm:$0xff]  ;;  %v718_v31 = vld [vmem:[%s2040_s30 + $0x40] sm:$0xff]  ;;  %v765_v34 = vld [vmem:[%s2040_s30 + $0x1b8] sm:$0xff] }
  0xd4   : > { %778 = vmatpush.msra.mxu0 %v721_v19  ;;  %1005 = vmatpush.msra.mxu2 %v752_v21  ;;  %v734_v32 = vld [vmem:[%s2040_s30 + $0xc0] sm:$0xff]  ;;  %v717_v35 = vld [vmem:[%s2040_s30 + $0x38] sm:$0xff]  ;;  %v748_v37 = vld [vmem:[%s2040_s30 + $0x130] sm:$0xff] }
  0xd5   : > { %891 = vmatpush.msra.mxu1 %v737_v20  ;;  %1118 = vmatpush.msra.mxu3 %v768_v22  ;;  %v733_v36 = vld [vmem:[%s2040_s30 + $0xb8] sm:$0xff]  ;;  %v764_v38 = vld [vmem:[%s2040_s30 + $0x1b0] sm:$0xff]  ;;  %v747_v41 = vld [vmem:[%s2040_s30 + $0x128] sm:$0xff] }
  0xd6   : > { %779 = vmatpush.msra.mxu0 %v720_v23  ;;  %1006 = vmatpush.msra.mxu2 %v751_v25  ;;  %v716_v39 = vld [vmem:[%s2040_s30 + $0x30] sm:$0xff]  ;;  %v763_v42 = vld [vmem:[%s2040_s30 + $0x1a8] sm:$0xff]  ;;  %v746_v45 = vld [vmem:[%s2040_s30 + $0x120] sm:$0xff] }
  0xd7   : > { %892 = vmatpush.msra.mxu1 %v736_v24  ;;  %1119 = vmatpush.msra.mxu3 %v767_v26  ;;  %v732_v40 = vld [vmem:[%s2040_s30 + $0xb0] sm:$0xff]  ;;  %v715_v43 = vld [vmem:[%s2040_s30 + $0x28] sm:$0xff]  ;;  %v762_v46 = vld [vmem:[%s2040_s30 + $0x1a0] sm:$0xff] }
  0xd8   : > { %780 = vmatpush.msra.mxu0 %v719_v27  ;;  %1007 = vmatpush.msra.mxu2 %v750_v29  ;;  %v731_v44 = vld [vmem:[%s2040_s30 + $0xa8] sm:$0xff]  ;;  %v714_v47 = vld [vmem:[%s2040_s30 + $0x20] sm:$0xff]  ;;  %v745_v49 = vld [vmem:[%s2040_s30 + $0x118] sm:$0xff] }
  0xd9   : > { %893 = vmatpush.msra.mxu1 %v735_v28  ;;  %1120 = vmatpush.msra.mxu3 %v766_v30  ;;  %v730_v48 = vld [vmem:[%s2040_s30 + $0xa0] sm:$0xff]  ;;  %v761_v50 = vld [vmem:[%s2040_s30 + $0x198] sm:$0xff]  ;;  %v744_v53 = vld [vmem:[%s2040_s30 + $0x110] sm:$0xff] }
  0xda   : > { %781 = vmatpush.msra.mxu0 %v718_v31  ;;  %1008 = vmatpush.msra.mxu2 %v749_v33  ;;  %v713_v51 = vld [vmem:[%s2040_s30 + $0x18] sm:$0xff]  ;;  %v760_v54 = vld [vmem:[%s2040_s30 + $0x190] sm:$0xff]  ;;  %v743_v57 = vld [vmem:[%s2040_s30 + $0x108] sm:$0xff] }
  0xdb   : > { %894 = vmatpush.msra.mxu1 %v734_v32  ;;  %1121 = vmatpush.msra.mxu3 %v765_v34  ;;  %v729_v52 = vld [vmem:[%s2040_s30 + $0x98] sm:$0xff]  ;;  %v712_v55 = vld [vmem:[%s2040_s30 + $0x10] sm:$0xff]  ;;  %v759_v58 = vld [vmem:[%s2040_s30 + $0x188] sm:$0xff] }
  0xdc   : > { %782 = vmatpush.msra.mxu0 %v717_v35  ;;  %1009 = vmatpush.msra.mxu2 %v748_v37  ;;  %v728_v56 = vld [vmem:[%s2040_s30 + $0x90] sm:$0xff]  ;;  %v711_v59 = vld [vmem:[%s2040_s30 + $0x8] sm:$0xff]  ;;  %v742_v61 = vld [vmem:[%s2040_s30 + $0x100] sm:$0xff] }
  0xdd   : > { %895 = vmatpush.msra.mxu1 %v733_v36  ;;  %1122 = vmatpush.msra.mxu3 %v764_v38  ;;  %v727_v60 = vld [vmem:[%s2040_s30 + $0x88] sm:$0xff]  ;;  %v758_v62 = vld [vmem:[%s2040_s30 + $0x180] sm:$0xff]  ;;  %v584_v63 = vld [vmem:[%s2047_s15 + $0x10] sm:$0xff] }
  0xde   : > { %783 = vmatpush.msra.mxu0 %v716_v39  ;;  %1010 = vmatpush.msra.mxu2 %v747_v41  ;;  %v585_v0 = vld [vmem:[%s2047_s15 + $0x18] sm:$0xff]  ;;  %v710_v1 = vld [vmem:[%s2040_s30] sm:$0xff]  ;;  %v583_v4 = vld [vmem:[%s2047_s15 + $0x8] sm:$0xff] }
  0xdf   : > { %896 = vmatpush.msra.mxu1 %v732_v40  ;;  %1123 = vmatpush.msra.mxu3 %v763_v42  ;;  %v726_v2 = vld [vmem:[%s2040_s30 + $0x80] sm:$0xff]  ;;  %v588_v5 = vld [vmem:[%s2047_s15 + $0x30] sm:$0xff]  ;;  %v589_v6 = vld [vmem:[%s2047_s15 + $0x38] sm:$0xff] }
  0xe0   : > { %784 = vmatpush.msra.mxu0 %v715_v43  ;;  %1011 = vmatpush.msra.mxu2 %v746_v45  ;;  %v582_v3 = vld [vmem:[%s2047_s15] sm:$0xff]  ;;  %v587_v8 = vld [vmem:[%s2047_s15 + $0x28] sm:$0xff]  ;;  %v592_v9 = vld [vmem:[%s2047_s15 + $0x50] sm:$0xff] }
  0xe1   : > { %897 = vmatpush.msra.mxu1 %v731_v44  ;;  %1124 = vmatpush.msra.mxu3 %v762_v46  ;;  %v586_v7 = vld [vmem:[%s2047_s15 + $0x20] sm:$0xff]  ;;  %v593_v10 = vld [vmem:[%s2047_s15 + $0x58] sm:$0xff]  ;;  %v591_v12 = vld [vmem:[%s2047_s15 + $0x48] sm:$0xff] }
  0xe2   : > { %785 = vmatpush.msra.mxu0 %v714_v47  ;;  %1012 = vmatpush.msra.mxu2 %v745_v49  ;;  %v590_v11 = vld [vmem:[%s2047_s15 + $0x40] sm:$0xff]  ;;  %v596_v13 = vld [vmem:[%s2047_s15 + $0x70] sm:$0xff]  ;;  %v597_v14 = vld [vmem:[%s2047_s15 + $0x78] sm:$0xff] }
  0xe3   : > { %898 = vmatpush.msra.mxu1 %v730_v48  ;;  %1125 = vmatpush.msra.mxu3 %v761_v50  ;;  %v594_v15 = vld [vmem:[%s2047_s15 + $0x60] sm:$0xff]  ;;  %v595_v16 = vld [vmem:[%s2047_s15 + $0x68] sm:$0xff]  ;;  %v600_v17 = vld [vmem:[%s2047_s15 + $0x90] sm:$0xff] }
  0xe4   : > { %786 = vmatpush.msra.mxu0 %v713_v51  ;;  %1013 = vmatpush.msra.mxu2 %v744_v53  ;;  %v601_v18 = vld [vmem:[%s2047_s15 + $0x98] sm:$0xff]  ;;  %v598_v19 = vld [vmem:[%s2047_s15 + $0x80] sm:$0xff]  ;;  %v599_v20 = vld [vmem:[%s2047_s15 + $0x88] sm:$0xff] }
  0xe5   : > { %899 = vmatpush.msra.mxu1 %v729_v52  ;;  %1126 = vmatpush.msra.mxu3 %v760_v54  ;;  %v604_v21 = vld [vmem:[%s2047_s15 + $0xb0] sm:$0xff]  ;;  %v605_v22 = vld [vmem:[%s2047_s15 + $0xb8] sm:$0xff]  ;;  %v602_v23 = vld [vmem:[%s2047_s15 + $0xa0] sm:$0xff] }
  0xe6   : > { %787 = vmatpush.msra.mxu0 %v712_v55  ;;  %1014 = vmatpush.msra.mxu2 %v743_v57  ;;  %v603_v24 = vld [vmem:[%s2047_s15 + $0xa8] sm:$0xff]  ;;  %v608_v25 = vld [vmem:[%s2047_s15 + $0xd0] sm:$0xff]  ;;  %v609_v26 = vld [vmem:[%s2047_s15 + $0xd8] sm:$0xff] }
  0xe7   : > { %900 = vmatpush.msra.mxu1 %v728_v56  ;;  %1127 = vmatpush.msra.mxu3 %v759_v58  ;;  %v606_v27 = vld [vmem:[%s2047_s15 + $0xc0] sm:$0xff]  ;;  %v607_v28 = vld [vmem:[%s2047_s15 + $0xc8] sm:$0xff]  ;;  %v612_v29 = vld [vmem:[%s2047_s15 + $0xf0] sm:$0xff] }
  0xe8   : > { %788 = vmatpush.msra.mxu0 %v711_v59  ;;  %1015 = vmatpush.msra.mxu2 %v742_v61  ;;  %v613_v30 = vld [vmem:[%s2047_s15 + $0xf8] sm:$0xff]  ;;  %v610_v31 = vld [vmem:[%s2047_s15 + $0xe0] sm:$0xff]  ;;  %v611_v32 = vld [vmem:[%s2047_s15 + $0xe8] sm:$0xff] }
  0xe9   : > { %901 = vmatpush.msra.mxu1 %v727_v60  ;;  %1128 = vmatpush.msra.mxu3 %v758_v62  ;;  %v616_v33 = vld [vmem:[%s2047_s15 + $0x110] sm:$0xff]  ;;  %v617_v34 = vld [vmem:[%s2047_s15 + $0x118] sm:$0xff]  ;;  %v614_v35 = vld [vmem:[%s2047_s15 + $0x100] sm:$0xff] }
  0xea   : > { %1016 = vmatmul.f32.vlgmr.msra.gmra.mxu2 %v584_v63  ;;  %1129 = vmatmul.f32.vlgmr.msra.gmra.mxu3 %v585_v0  ;;  %v615_v36 = vld [vmem:[%s2047_s15 + $0x108] sm:$0xff]  ;;  %v620_v37 = vld [vmem:[%s2047_s15 + $0x130] sm:$0xff]  ;;  %v621_v38 = vld [vmem:[%s2047_s15 + $0x138] sm:$0xff] }
  0xeb   : > { %789 = vmatpush.msra.mxu0 %v710_v1  ;;  %902 = vmatpush.msra.mxu1 %v726_v2  ;;  %v618_v39 = vld [vmem:[%s2047_s15 + $0x120] sm:$0xff]  ;;  %v619_v40 = vld [vmem:[%s2047_s15 + $0x128] sm:$0xff]  ;;  %v624_v41 = vld [vmem:[%s2047_s15 + $0x150] sm:$0xff] }
  0xec   : > { %790 = vmatmul.f32.vlgmr.msra.gmra.mxu0 %v582_v3  ;;  %903 = vmatmul.f32.vlgmr.msra.gmra.mxu1 %v583_v4  ;;  %v625_v42 = vld [vmem:[%s2047_s15 + $0x158] sm:$0xff]  ;;  %v622_v43 = vld [vmem:[%s2047_s15 + $0x140] sm:$0xff]  ;;  %v623_v44 = vld [vmem:[%s2047_s15 + $0x148] sm:$0xff] }
  0xed   : > { %v628_v45 = vld [vmem:[%s2047_s15 + $0x170] sm:$0xff]  ;;  %v629_v46 = vld [vmem:[%s2047_s15 + $0x178] sm:$0xff]  ;;  %v626_v47 = vld [vmem:[%s2047_s15 + $0x160] sm:$0xff] }
  0xee   : > { %v627_v48 = vld [vmem:[%s2047_s15 + $0x168] sm:$0xff]  ;;  %v632_v49 = vld [vmem:[%s2047_s15 + $0x190] sm:$0xff]  ;;  %v633_v50 = vld [vmem:[%s2047_s15 + $0x198] sm:$0xff] }
  0xef   : > { %v630_v51 = vld [vmem:[%s2047_s15 + $0x180] sm:$0xff]  ;;  %v631_v52 = vld [vmem:[%s2047_s15 + $0x188] sm:$0xff]  ;;  %v636_v53 = vld [vmem:[%s2047_s15 + $0x1b0] sm:$0xff] }
  0xf0   : > { %v637_v54 = vld [vmem:[%s2047_s15 + $0x1b8] sm:$0xff]  ;;  %v634_v55 = vld [vmem:[%s2047_s15 + $0x1a0] sm:$0xff]  ;;  %v635_v56 = vld [vmem:[%s2047_s15 + $0x1a8] sm:$0xff] }
  0xf1   : > { %v640_v57 = vld [vmem:[%s2047_s15 + $0x1d0] sm:$0xff]  ;;  %v641_v58 = vld [vmem:[%s2047_s15 + $0x1d8] sm:$0xff]  ;;  %v638_v59 = vld [vmem:[%s2047_s15 + $0x1c0] sm:$0xff] }
  0xf2   : > { %1019 = vmatmul.f32.gmra.mxu2 %v588_v5  ;;  %1132 = vmatmul.f32.gmra.mxu3 %v589_v6  ;;  %v639_v60 = vld [vmem:[%s2047_s15 + $0x1c8] sm:$0xff]  ;;  %v644_v61 = vld [vmem:[%s2047_s15 + $0x1f0] sm:$0xff]  ;;  %v645_v62 = vld [vmem:[%s2047_s15 + $0x1f8] sm:$0xff] }
  0xf3   : > { %v642_v63 = vld [vmem:[%s2047_s15 + $0x1e0] sm:$0xff]  ;;  %v643_v0 = vld [vmem:[%s2047_s15 + $0x1e8] sm:$0xff]  ;;  %v648_v1 = vld [vmem:[%s2047_s15 + $0x210] sm:$0xff] }
  0xf4   : > { %793 = vmatmul.f32.gmra.mxu0 %v586_v7  ;;  %906 = vmatmul.f32.gmra.mxu1 %v587_v8  ;;  %v649_v2 = vld [vmem:[%s2047_s15 + $0x218] sm:$0xff]  ;;  %v646_v5 = vld [vmem:[%s2047_s15 + $0x200] sm:$0xff]  ;;  %v647_v6 = vld [vmem:[%s2047_s15 + $0x208] sm:$0xff] }
  0xfa   : > { %1022 = vmatmul.f32.gmra.mxu2 %v592_v9  ;;  %1135 = vmatmul.f32.gmra.mxu3 %v593_v10 }
  0xfc   : > { %796 = vmatmul.f32.gmra.mxu0 %v590_v11  ;;  %909 = vmatmul.f32.gmra.mxu1 %v591_v12  ;;  %v550_v11 = vld [vmem:[#allocation2 + $0xb0] sm:$0xff] }
  0xfd   : > { %v652_v12 = vld [vmem:[%s2047_s15 + $0x230] sm:$0xff] }
 0x102   : > { %1025 = vmatmul.f32.gmra.mxu2 %v596_v13  ;;  %1138 = vmatmul.f32.gmra.mxu3 %v597_v14  ;;  %v653_v13 = vld [vmem:[%s2047_s15 + $0x238] sm:$0xff] }
 0x104   : > { %799 = vmatmul.f32.gmra.mxu0 %v594_v15  ;;  %912 = vmatmul.f32.gmra.mxu1 %v595_v16 }
 0x10a   : > { %1028 = vmatmul.f32.gmra.mxu2 %v600_v17  ;;  %1141 = vmatmul.f32.gmra.mxu3 %v601_v18  ;;  %v650_v17 = vld [vmem:[%s2047_s15 + $0x220] sm:$0xff]  ;;  %v651_v18 = vld [vmem:[%s2047_s15 + $0x228] sm:$0xff] }
 0x10c   : > { %802 = vmatmul.f32.gmra.mxu0 %v598_v19  ;;  %915 = vmatmul.f32.gmra.mxu1 %v599_v20 }
 0x112   : > { %1031 = vmatmul.f32.gmra.mxu2 %v604_v21  ;;  %1144 = vmatmul.f32.gmra.mxu3 %v605_v22 }
 0x114   : > { %805 = vmatmul.f32.gmra.mxu0 %v602_v23  ;;  %918 = vmatmul.f32.gmra.mxu1 %v603_v24  ;;  %v551_v24 = vld [vmem:[#allocation2] sm:$0xff] }
 0x11a   : > { %1034 = vmatmul.f32.gmra.mxu2 %v608_v25  ;;  %1147 = vmatmul.f32.gmra.mxu3 %v609_v26  ;;  %v656_v25 = vld [vmem:[%s2047_s15 + $0x250] sm:$0xff]  ;;  %v657_v26 = vld [vmem:[%s2047_s15 + $0x258] sm:$0xff] }
 0x11c   : > { %808 = vmatmul.f32.gmra.mxu0 %v606_v27  ;;  %921 = vmatmul.f32.gmra.mxu1 %v607_v28 }
 0x122   : > { %1037 = vmatmul.f32.gmra.mxu2 %v612_v29  ;;  %1150 = vmatmul.f32.gmra.mxu3 %v613_v30  ;;  %v654_v30 = vld [vmem:[%s2047_s15 + $0x240] sm:$0xff] }
 0x124   : > { %811 = vmatmul.f32.gmra.mxu0 %v610_v31  ;;  %924 = vmatmul.f32.gmra.mxu1 %v611_v32  ;;  %v655_v31 = vld [vmem:[%s2047_s15 + $0x248] sm:$0xff] }
 0x12a   : > { %1040 = vmatmul.f32.gmra.mxu2 %v616_v33  ;;  %1153 = vmatmul.f32.gmra.mxu3 %v617_v34 }
 0x12c   : > { %814 = vmatmul.f32.gmra.mxu0 %v614_v35  ;;  %927 = vmatmul.f32.gmra.mxu1 %v615_v36 }
 0x132   : > { %1043 = vmatmul.f32.gmra.mxu2 %v620_v37  ;;  %1156 = vmatmul.f32.gmra.mxu3 %v621_v38  ;;  %v552_v37 = vld [vmem:[#allocation2 + $0xd8] sm:$0xff]  ;;  %v660_v38 = vld [vmem:[%s2047_s15 + $0x270] sm:$0xff] }
 0x134   : > { %817 = vmatmul.f32.gmra.mxu0 %v618_v39  ;;  %930 = vmatmul.f32.gmra.mxu1 %v619_v40  ;;  %v661_v39 = vld [vmem:[%s2047_s15 + $0x278] sm:$0xff] }
 0x13a   : > { %1046 = vmatmul.f32.gmra.mxu2 %v624_v41  ;;  %1159 = vmatmul.f32.gmra.mxu3 %v625_v42 }
 0x13c   : > { %820 = vmatmul.f32.gmra.mxu0 %v622_v43  ;;  %933 = vmatmul.f32.gmra.mxu1 %v623_v44  ;;  %v658_v43 = vld [vmem:[%s2047_s15 + $0x260] sm:$0xff]  ;;  %v659_v44 = vld [vmem:[%s2047_s15 + $0x268] sm:$0xff] }
 0x142   : > { %1049 = vmatmul.f32.gmra.mxu2 %v628_v45  ;;  %1162 = vmatmul.f32.gmra.mxu3 %v629_v46 }
 0x144   : > { %823 = vmatmul.f32.gmra.mxu0 %v626_v47  ;;  %936 = vmatmul.f32.gmra.mxu1 %v627_v48 }
 0x14a   : > { %1052 = vmatmul.f32.gmra.mxu2 %v632_v49  ;;  %1165 = vmatmul.f32.gmra.mxu3 %v633_v50  ;;  %v553_v50 = vld [vmem:[#allocation2 + $0x18] sm:$0xff] }
 0x14c   : > { %826 = vmatmul.f32.gmra.mxu0 %v630_v51  ;;  %939 = vmatmul.f32.gmra.mxu1 %v631_v52  ;;  %v664_v51 = vld [vmem:[%s2047_s15 + $0x290] sm:$0xff]  ;;  %v665_v52 = vld [vmem:[%s2047_s15 + $0x298] sm:$0xff] }
 0x152   : > { %1055 = vmatmul.f32.gmra.mxu2 %v636_v53  ;;  %1168 = vmatmul.f32.gmra.mxu3 %v637_v54 }
 0x154   : > { %829 = vmatmul.f32.gmra.mxu0 %v634_v55  ;;  %942 = vmatmul.f32.gmra.mxu1 %v635_v56  ;;  %v662_v56 = vld [vmem:[%s2047_s15 + $0x280] sm:$0xff] }
 0x15a   : > { %1058 = vmatmul.f32.gmra.mxu2 %v640_v57  ;;  %1171 = vmatmul.f32.gmra.mxu3 %v641_v58  ;;  %v663_v57 = vld [vmem:[%s2047_s15 + $0x288] sm:$0xff] }
 0x15c   : > { %832 = vmatmul.f32.gmra.mxu0 %v638_v59  ;;  %945 = vmatmul.f32.gmra.mxu1 %v639_v60 }
 0x162   : > { %1061 = vmatmul.f32.gmra.mxu2 %v644_v61  ;;  %1174 = vmatmul.f32.gmra.mxu3 %v645_v62 }
 0x164   : > { %835 = vmatmul.f32.gmra.mxu0 %v642_v63  ;;  %948 = vmatmul.f32.gmra.mxu1 %v643_v0  ;;  %v554_v63 = vld [vmem:[#allocation2 + $0x50] sm:$0xff] }
 0x165   : > { %v668_v0 = vld [vmem:[%s2047_s15 + $0x2b0] sm:$0xff] }
 0x169   : > { %v791_v3 = vpop.f32.mrf.mxu0  ;;  %v904_v4 = vpop.f32.mrf.mxu1 }
 0x16a   : > { %1064 = vmatmul.f32.gmra.mxu2 %v648_v1  ;;  %v905_v7 = vadd.f32 %v904_v4, %v791_v3  ;;  %1177 = vmatmul.f32.gmra.mxu3 %v649_v2  ;;  %v669_v1 = vld [vmem:[%s2047_s15 + $0x2b8] sm:$0xff] }
 0x16c   : > { %838 = vmatmul.f32.gmra.mxu0 %v646_v5  ;;  %951 = vmatmul.f32.gmra.mxu1 %v647_v6  ;;  %v666_v5 = vld [vmem:[%s2047_s15 + $0x2a0] sm:$0xff]  ;;  %v667_v6 = vld [vmem:[%s2047_s15 + $0x2a8] sm:$0xff] }
 0x16d   : > { %v1017_v8 = vpop.f32.mrf.mxu2  ;;  %v1130_v9 = vpop.f32.mrf.mxu3 }
 0x16e   : > { %v1018_v10 = vadd.f32 %v1017_v8, %v905_v7 }
 0x170   : > { %v1131_v14 = vadd.f32 %v1130_v9, %v1018_v10 }
 0x171   : > { %v794_v15 = vpop.f32.mrf.mxu0  ;;  %v907_v16 = vpop.f32.mrf.mxu1 }
 0x172   : > { %v1226_v19 = vadd.f32 %v1131_v14, %v550_v11  ;;  %1067 = vmatmul.f32.gmra.mxu2 %v652_v12  ;;  %v908_v20 = vadd.f32 %v907_v16, %v794_v15  ;;  %1180 = vmatmul.f32.gmra.mxu3 %v653_v13  ;;  %v555_v12 = vld [vmem:[#allocation2 + $0x68] sm:$0xff]  ;;  %v672_v13 = vld [vmem:[%s2047_s15 + $0x2d0] sm:$0xff]  ;;  %v673_v14 = vld [vmem:[%s2047_s15 + $0x2d8] sm:$0xff] }
 0x174   : > { %1258 = vst [vmem:[#allocation2 + $0xb0] sm:$0xff] %v1226_v19  ;;  %841 = vmatmul.f32.gmra.mxu0 %v650_v17  ;;  %954 = vmatmul.f32.gmra.mxu1 %v651_v18  ;;  %v670_v18 = vld [vmem:[%s2047_s15 + $0x2c0] sm:$0xff]  ;;  %v671_v19 = vld [vmem:[%s2047_s15 + $0x2c8] sm:$0xff] }
 0x175   : > { %v1020_v21 = vpop.f32.mrf.mxu2  ;;  %v1133_v22 = vpop.f32.mrf.mxu3 }
 0x176   : > { %v1021_v23 = vadd.f32 %v1020_v21, %v908_v20 }
 0x178   : > { %v1134_v27 = vadd.f32 %v1133_v22, %v1021_v23 }
 0x179   : > { %v797_v28 = vpop.f32.mrf.mxu0  ;;  %v910_v29 = vpop.f32.mrf.mxu1 }
 0x17a   : > { %v1227_v32 = vadd.f32 %v1134_v27, %v551_v24  ;;  %1070 = vmatmul.f32.gmra.mxu2 %v656_v25  ;;  %v911_v33 = vadd.f32 %v910_v29, %v797_v28  ;;  %1183 = vmatmul.f32.gmra.mxu3 %v657_v26  ;;  %v556_v25 = vld [vmem:[#allocation2 + $0x30] sm:$0xff]  ;;  %v677_v27 = vld [vmem:[%s2047_s15 + $0x2f8] sm:$0xff] }
 0x17b   : > { %v676_v26 = vld [vmem:[%s2047_s15 + $0x2f0] sm:$0xff] }
 0x17c   : > { %1259 = vst [vmem:[#allocation2] sm:$0xff] %v1227_v32  ;;  %844 = vmatmul.f32.gmra.mxu0 %v654_v30  ;;  %957 = vmatmul.f32.gmra.mxu1 %v655_v31  ;;  %v674_v31 = vld [vmem:[%s2047_s15 + $0x2e0] sm:$0xff]  ;;  %v675_v32 = vld [vmem:[%s2047_s15 + $0x2e8] sm:$0xff] }
 0x17d   : > { %v1023_v34 = vpop.f32.mrf.mxu2  ;;  %v1136_v35 = vpop.f32.mrf.mxu3 }
 0x17e   : > { %v1024_v36 = vadd.f32 %v1023_v34, %v911_v33 }
 0x180   : > { %v1137_v40 = vadd.f32 %v1136_v35, %v1024_v36 }
 0x181   : > { %v800_v41 = vpop.f32.mrf.mxu0  ;;  %v913_v42 = vpop.f32.mrf.mxu1 }
 0x182   : > { %v1228_v45 = vadd.f32 %v1137_v40, %v552_v37  ;;  %1073 = vmatmul.f32.gmra.mxu2 %v660_v38  ;;  %v914_v46 = vadd.f32 %v913_v42, %v800_v41  ;;  %1186 = vmatmul.f32.gmra.mxu3 %v661_v39  ;;  %v557_v38 = vld [vmem:[#allocation2 + $0x48] sm:$0xff]  ;;  %v680_v39 = vld [vmem:[%s2047_s15 + $0x310] sm:$0xff]  ;;  %v681_v40 = vld [vmem:[%s2047_s15 + $0x318] sm:$0xff] }
 0x184   : > { %1260 = vst [vmem:[#allocation2 + $0xd8] sm:$0xff] %v1228_v45  ;;  %847 = vmatmul.f32.gmra.mxu0 %v658_v43  ;;  %960 = vmatmul.f32.gmra.mxu1 %v659_v44  ;;  %v678_v44 = vld [vmem:[%s2047_s15 + $0x300] sm:$0xff]  ;;  %v679_v45 = vld [vmem:[%s2047_s15 + $0x308] sm:$0xff] }
 0x185   : > { %v1026_v47 = vpop.f32.mrf.mxu2  ;;  %v1139_v48 = vpop.f32.mrf.mxu3 }
 0x186   : > { %v1027_v49 = vadd.f32 %v1026_v47, %v914_v46 }
 0x188   : > { %v1140_v53 = vadd.f32 %v1139_v48, %v1027_v49 }
 0x189   : > { %v803_v54 = vpop.f32.mrf.mxu0  ;;  %v916_v55 = vpop.f32.mrf.mxu1 }
 0x18a   : > { %v1229_v58 = vadd.f32 %v1140_v53, %v553_v50  ;;  %1076 = vmatmul.f32.gmra.mxu2 %v664_v51  ;;  %v917_v59 = vadd.f32 %v916_v55, %v803_v54  ;;  %1189 = vmatmul.f32.gmra.mxu3 %v665_v52  ;;  %v558_v51 = vld [vmem:[#allocation2 + $0x80] sm:$0xff]  ;;  %v684_v52 = vld [vmem:[%s2047_s15 + $0x330] sm:$0xff]  ;;  %v685_v53 = vld [vmem:[%s2047_s15 + $0x338] sm:$0xff] }
 0x18c   : > { %1261 = vst [vmem:[#allocation2 + $0x18] sm:$0xff] %v1229_v58  ;;  %850 = vmatmul.f32.gmra.mxu0 %v662_v56  ;;  %963 = vmatmul.f32.gmra.mxu1 %v663_v57  ;;  %v682_v57 = vld [vmem:[%s2047_s15 + $0x320] sm:$0xff]  ;;  %v683_v58 = vld [vmem:[%s2047_s15 + $0x328] sm:$0xff] }
 0x18d   : > { %v1029_v60 = vpop.f32.mrf.mxu2  ;;  %v1142_v61 = vpop.f32.mrf.mxu3 }
 0x18e   : > { %v1030_v62 = vadd.f32 %v1029_v60, %v917_v59 }
 0x190   : > { %v1143_v2 = vadd.f32 %v1142_v61, %v1030_v62 }
 0x191   : > { %v806_v3 = vpop.f32.mrf.mxu0  ;;  %v919_v4 = vpop.f32.mrf.mxu1 }
 0x192   : > { %v1230_v7 = vadd.f32 %v1143_v2, %v554_v63  ;;  %1079 = vmatmul.f32.gmra.mxu2 %v668_v0  ;;  %v920_v8 = vadd.f32 %v919_v4, %v806_v3  ;;  %1192 = vmatmul.f32.gmra.mxu3 %v669_v1  ;;  %v559_v0 = vld [vmem:[#allocation2 + $0x88] sm:$0xff]  ;;  %v688_v1 = vld [vmem:[%s2047_s15 + $0x350] sm:$0xff]  ;;  %v689_v2 = vld [vmem:[%s2047_s15 + $0x358] sm:$0xff] }
 0x194   : > { %1262 = vst [vmem:[#allocation2 + $0x50] sm:$0xff] %v1230_v7  ;;  %853 = vmatmul.f32.gmra.mxu0 %v666_v5  ;;  %966 = vmatmul.f32.gmra.mxu1 %v667_v6  ;;  %v686_v6 = vld [vmem:[%s2047_s15 + $0x340] sm:$0xff]  ;;  %v687_v7 = vld [vmem:[%s2047_s15 + $0x348] sm:$0xff] }
 0x195   : > { %v1032_v9 = vpop.f32.mrf.mxu2  ;;  %v1145_v10 = vpop.f32.mrf.mxu3 }
 0x196   : > { %v1033_v11 = vadd.f32 %v1032_v9, %v920_v8 }
 0x198   : > { %v1146_v15 = vadd.f32 %v1145_v10, %v1033_v11 }
 0x199   : > { %v809_v16 = vpop.f32.mrf.mxu0  ;;  %v922_v17 = vpop.f32.mrf.mxu1 }
 0x19a   : > { %v1231_v20 = vadd.f32 %v1146_v15, %v555_v12  ;;  %1082 = vmatmul.f32.gmra.mxu2 %v672_v13  ;;  %v923_v21 = vadd.f32 %v922_v17, %v809_v16  ;;  %1195 = vmatmul.f32.gmra.mxu3 %v673_v14  ;;  %v560_v13 = vld [vmem:[#allocation2 + $0xe8] sm:$0xff]  ;;  %v692_v14 = vld [vmem:[%s2047_s15 + $0x370] sm:$0xff]  ;;  %v693_v15 = vld [vmem:[%s2047_s15 + $0x378] sm:$0xff] }
 0x19c   : > { %1263 = vst [vmem:[#allocation2 + $0x68] sm:$0xff] %v1231_v20  ;;  %856 = vmatmul.f32.gmra.mxu0 %v670_v18  ;;  %969 = vmatmul.f32.gmra.mxu1 %v671_v19  ;;  %v690_v19 = vld [vmem:[%s2047_s15 + $0x360] sm:$0xff]  ;;  %v691_v20 = vld [vmem:[%s2047_s15 + $0x368] sm:$0xff] }
 0x19d   : > { %v1035_v22 = vpop.f32.mrf.mxu2  ;;  %v1148_v23 = vpop.f32.mrf.mxu3 }
 0x19e   : > { %v1036_v24 = vadd.f32 %v1035_v22, %v923_v21 }
 0x1a0   : > { %v1149_v28 = vadd.f32 %v1148_v23, %v1036_v24 }
 0x1a1   : > { %v812_v29 = vpop.f32.mrf.mxu0  ;;  %v925_v30 = vpop.f32.mrf.mxu1 }
 0x1a2   : > { %v1232_v33 = vadd.f32 %v1149_v28, %v556_v25  ;;  %1085 = vmatmul.f32.gmra.mxu2 %v676_v26  ;;  %v926_v34 = vadd.f32 %v925_v30, %v812_v29  ;;  %1198 = vmatmul.f32.gmra.mxu3 %v677_v27  ;;  %v561_v26 = vld [vmem:[#allocation2 + $0xb8] sm:$0xff]  ;;  %v696_v27 = vld [vmem:[%s2047_s15 + $0x390] sm:$0xff] }
 0x1a3   : > { %v697_v28 = vld [vmem:[%s2047_s15 + $0x398] sm:$0xff] }
 0x1a4   : > { %1264 = vst [vmem:[#allocation2 + $0x30] sm:$0xff] %v1232_v33  ;;  %859 = vmatmul.f32.gmra.mxu0 %v674_v31  ;;  %972 = vmatmul.f32.gmra.mxu1 %v675_v32  ;;  %v694_v32 = vld [vmem:[%s2047_s15 + $0x380] sm:$0xff]  ;;  %v695_v33 = vld [vmem:[%s2047_s15 + $0x388] sm:$0xff] }
 0x1a5   : > { %v1038_v35 = vpop.f32.mrf.mxu2  ;;  %v1151_v36 = vpop.f32.mrf.mxu3 }
 0x1a6   : > { %v1039_v37 = vadd.f32 %v1038_v35, %v926_v34 }
 0x1a8   : > { %v1152_v41 = vadd.f32 %v1151_v36, %v1039_v37 }
 0x1a9   : > { %v815_v42 = vpop.f32.mrf.mxu0  ;;  %v928_v43 = vpop.f32.mrf.mxu1 }
 0x1aa   : > { %v1233_v46 = vadd.f32 %v1152_v41, %v557_v38  ;;  %1088 = vmatmul.f32.gmra.mxu2 %v680_v39  ;;  %v929_v47 = vadd.f32 %v928_v43, %v815_v42  ;;  %1201 = vmatmul.f32.gmra.mxu3 %v681_v40  ;;  %v562_v39 = vld [vmem:[#allocation2 + $0x60] sm:$0xff]  ;;  %v700_v40 = vld [vmem:[%s2047_s15 + $0x3b0] sm:$0xff]  ;;  %v701_v41 = vld [vmem:[%s2047_s15 + $0x3b8] sm:$0xff] }
 0x1ac   : > { %1265 = vst [vmem:[#allocation2 + $0x48] sm:$0xff] %v1233_v46  ;;  %862 = vmatmul.f32.gmra.mxu0 %v678_v44  ;;  %975 = vmatmul.f32.gmra.mxu1 %v679_v45  ;;  %v698_v45 = vld [vmem:[%s2047_s15 + $0x3a0] sm:$0xff]  ;;  %v699_v46 = vld [vmem:[%s2047_s15 + $0x3a8] sm:$0xff] }
 0x1ad   : > { %v1041_v48 = vpop.f32.mrf.mxu2  ;;  %v1154_v49 = vpop.f32.mrf.mxu3 }
 0x1ae   : > { %v1042_v50 = vadd.f32 %v1041_v48, %v929_v47 }
 0x1b0   : > { %v1155_v54 = vadd.f32 %v1154_v49, %v1042_v50 }
 0x1b1   : > { %v818_v55 = vpop.f32.mrf.mxu0  ;;  %v931_v56 = vpop.f32.mrf.mxu1 }
 0x1b2   : > { %v1234_v59 = vadd.f32 %v1155_v54, %v558_v51  ;;  %1091 = vmatmul.f32.gmra.mxu2 %v684_v52  ;;  %v932_v60 = vadd.f32 %v931_v56, %v818_v55  ;;  %1204 = vmatmul.f32.gmra.mxu3 %v685_v53  ;;  %v563_v52 = vld [vmem:[#allocation2 + $0xf0] sm:$0xff]  ;;  %v705_v54 = vld [vmem:[%s2047_s15 + $0x3d8] sm:$0xff] }
 0x1b3   : > { %v704_v53 = vld [vmem:[%s2047_s15 + $0x3d0] sm:$0xff] }
 0x1b4   : > { %1266 = vst [vmem:[#allocation2 + $0x80] sm:$0xff] %v1234_v59  ;;  %865 = vmatmul.f32.gmra.mxu0 %v682_v57  ;;  %978 = vmatmul.f32.gmra.mxu1 %v683_v58  ;;  %v702_v58 = vld [vmem:[%s2047_s15 + $0x3c0] sm:$0xff]  ;;  %v703_v59 = vld [vmem:[%s2047_s15 + $0x3c8] sm:$0xff] }
 0x1b5   : > { %v1044_v61 = vpop.f32.mrf.mxu2  ;;  %v1157_v62 = vpop.f32.mrf.mxu3 }
 0x1b6   : > { %v1045_v63 = vadd.f32 %v1044_v61, %v932_v60 }
 0x1b8   : > { %v1158_v3 = vadd.f32 %v1157_v62, %v1045_v63 }
 0x1b9   : > { %v821_v4 = vpop.f32.mrf.mxu0  ;;  %v934_v5 = vpop.f32.mrf.mxu1 }
 0x1ba   : > { %v1235_v8 = vadd.f32 %v1158_v3, %v559_v0  ;;  %1094 = vmatmul.f32.gmra.mxu2 %v688_v1  ;;  %v935_v9 = vadd.f32 %v934_v5, %v821_v4  ;;  %1207 = vmatmul.f32.gmra.mxu3 %v689_v2  ;;  %v564_v1 = vld [vmem:[#allocation2 + $0x8] sm:$0xff]  ;;  %v708_v2 = vld [vmem:[%s2047_s15 + $0x3f0] sm:$0xff]  ;;  %v709_v3 = vld [vmem:[%s2047_s15 + $0x3f8] sm:$0xff] }
 0x1bc   : > { %1267 = vst [vmem:[#allocation2 + $0x88] sm:$0xff] %v1235_v8  ;;  %868 = vmatmul.f32.gmra.mxu0 %v686_v6  ;;  %981 = vmatmul.f32.gmra.mxu1 %v687_v7  ;;  %v706_v7 = vld [vmem:[%s2047_s15 + $0x3e0] sm:$0xff]  ;;  %v707_v8 = vld [vmem:[%s2047_s15 + $0x3e8] sm:$0xff] }
 0x1bd   : > { %v1047_v10 = vpop.f32.mrf.mxu2  ;;  %v1160_v11 = vpop.f32.mrf.mxu3 }
 0x1be   : > { %v1048_v12 = vadd.f32 %v1047_v10, %v935_v9 }
 0x1c0   : > { %v1161_v16 = vadd.f32 %v1160_v11, %v1048_v12 }
 0x1c1   : > { %v824_v17 = vpop.f32.mrf.mxu0  ;;  %v937_v18 = vpop.f32.mrf.mxu1 }
 0x1c2   : > { %v1236_v21 = vadd.f32 %v1161_v16, %v560_v13  ;;  %1097 = vmatmul.f32.gmra.mxu2 %v692_v14  ;;  %v938_v22 = vadd.f32 %v937_v18, %v824_v17  ;;  %1210 = vmatmul.f32.gmra.mxu3 %v693_v15  ;;  %v565_v14 = vld [vmem:[#allocation2 + $0x78] sm:$0xff] }
 0x1c4   : > { %1268 = vst [vmem:[#allocation2 + $0xe8] sm:$0xff] %v1236_v21  ;;  %871 = vmatmul.f32.gmra.mxu0 %v690_v19  ;;  %984 = vmatmul.f32.gmra.mxu1 %v691_v20 }
 0x1c5   : > { %v1050_v23 = vpop.f32.mrf.mxu2  ;;  %v1163_v24 = vpop.f32.mrf.mxu3 }
 0x1c6   : > { %v1051_v25 = vadd.f32 %v1050_v23, %v938_v22  ;;  %v566_v23 = vld [vmem:[#allocation2 + $0x38] sm:$0xff] }
 0x1c8   : > { %v1164_v29 = vadd.f32 %v1163_v24, %v1051_v25 }
 0x1c9   : > { %v827_v30 = vpop.f32.mrf.mxu0  ;;  %v940_v31 = vpop.f32.mrf.mxu1 }
 0x1ca   : > { %v1237_v34 = vadd.f32 %v1164_v29, %v561_v26  ;;  %1100 = vmatmul.f32.gmra.mxu2 %v696_v27  ;;  %v941_v35 = vadd.f32 %v940_v31, %v827_v30  ;;  %1213 = vmatmul.f32.gmra.mxu3 %v697_v28 }
 0x1cc   : > { %1269 = vst [vmem:[#allocation2 + $0xb8] sm:$0xff] %v1237_v34  ;;  %874 = vmatmul.f32.gmra.mxu0 %v694_v32  ;;  %987 = vmatmul.f32.gmra.mxu1 %v695_v33  ;;  %v567_v32 = vld [vmem:[#allocation2 + $0x58] sm:$0xff] }
 0x1cd   : > { %v1053_v36 = vpop.f32.mrf.mxu2  ;;  %v1166_v37 = vpop.f32.mrf.mxu3 }
 0x1ce   : > { %v1054_v38 = vadd.f32 %v1053_v36, %v941_v35 }
 0x1d0   : > { %v1167_v42 = vadd.f32 %v1166_v37, %v1054_v38 }
 0x1d1   : > { %v830_v43 = vpop.f32.mrf.mxu0  ;;  %v943_v44 = vpop.f32.mrf.mxu1 }
 0x1d2   : > { %v1238_v47 = vadd.f32 %v1167_v42, %v562_v39  ;;  %1103 = vmatmul.f32.gmra.mxu2 %v700_v40  ;;  %v944_v48 = vadd.f32 %v943_v44, %v830_v43  ;;  %1216 = vmatmul.f32.gmra.mxu3 %v701_v41  ;;  %v568_v41 = vld [vmem:[#allocation2 + $0x40] sm:$0xff] }
 0x1d4   : > { %1270 = vst [vmem:[#allocation2 + $0x60] sm:$0xff] %v1238_v47  ;;  %877 = vmatmul.f32.gmra.mxu0 %v698_v45  ;;  %990 = vmatmul.f32.gmra.mxu1 %v699_v46 }
 0x1d5   : > { %v1056_v49 = vpop.f32.mrf.mxu2  ;;  %v1169_v50 = vpop.f32.mrf.mxu3 }
 0x1d6   : > { %v1057_v51 = vadd.f32 %v1056_v49, %v944_v48 }
 0x1d8   : > { %v1170_v55 = vadd.f32 %v1169_v50, %v1057_v51  ;;  %v569_v50 = vld [vmem:[#allocation2 + $0xc8] sm:$0xff] }
 0x1d9   : > { %v833_v56 = vpop.f32.mrf.mxu0  ;;  %v946_v57 = vpop.f32.mrf.mxu1 }
 0x1da   : > { %v1239_v60 = vadd.f32 %v1170_v55, %v563_v52  ;;  %1106 = vmatmul.f32.gmra.mxu2 %v704_v53  ;;  %v947_v61 = vadd.f32 %v946_v57, %v833_v56  ;;  %1219 = vmatmul.f32.gmra.mxu3 %v705_v54 }
 0x1dc   : > { %1271 = vst [vmem:[#allocation2 + $0xf0] sm:$0xff] %v1239_v60  ;;  %880 = vmatmul.f32.gmra.mxu0 %v702_v58  ;;  %993 = vmatmul.f32.gmra.mxu1 %v703_v59  ;;  %v570_v59 = vld [vmem:[#allocation2 + $0xe0] sm:$0xff] }
 0x1dd   : > { %v1059_v62 = vpop.f32.mrf.mxu2  ;;  %v1172_v63 = vpop.f32.mrf.mxu3 }
 0x1de   : > { %v1060_v0 = vadd.f32 %v1059_v62, %v947_v61 }
 0x1e0   : > { %v1173_v4 = vadd.f32 %v1172_v63, %v1060_v0 }
 0x1e1   : > { %v836_v5 = vpop.f32.mrf.mxu0  ;;  %v949_v6 = vpop.f32.mrf.mxu1 }
 0x1e2   : > { %v1240_v9 = vadd.f32 %v1173_v4, %v564_v1  ;;  %1109 = vmatmul.f32.gmra.mxu2 %v708_v2  ;;  %v950_v10 = vadd.f32 %v949_v6, %v836_v5  ;;  %1222 = vmatmul.f32.gmra.mxu3 %v709_v3  ;;  %v571_v4 = vld [vmem:[#allocation2 + $0x90] sm:$0xff] }
 0x1e4   : > { %1272 = vst [vmem:[#allocation2 + $0x8] sm:$0xff] %v1240_v9  ;;  %883 = vmatmul.f32.gmra.mxu0 %v706_v7  ;;  %996 = vmatmul.f32.gmra.mxu1 %v707_v8 }
 0x1e5   : > { %v1062_v11 = vpop.f32.mrf.mxu2  ;;  %v1175_v12 = vpop.f32.mrf.mxu3 }
 0x1e6   : > { %v1063_v13 = vadd.f32 %v1062_v11, %v950_v10 }
 0x1e8   : > { %v1176_v15 = vadd.f32 %v1175_v12, %v1063_v13  ;;  %v572_v13 = vld [vmem:[#allocation2 + $0x70] sm:$0xff] }
 0x1e9   : > { %v839_v16 = vpop.f32.mrf.mxu0  ;;  %v952_v17 = vpop.f32.mrf.mxu1 }
 0x1ea   : > { %v1241_v18 = vadd.f32 %v1176_v15, %v565_v14  ;;  %v953_v19 = vadd.f32 %v952_v17, %v839_v16 }
 0x1ec   : > { %1273 = vst [vmem:[#allocation2 + $0x78] sm:$0xff] %v1241_v18 }
 0x1ed   : > { %v1065_v20 = vpop.f32.mrf.mxu2  ;;  %v1178_v21 = vpop.f32.mrf.mxu3 }
 0x1ee   : > { %v1066_v22 = vadd.f32 %v1065_v20, %v953_v19 }
 0x1f0   : > { %v1179_v24 = vadd.f32 %v1178_v21, %v1066_v22  ;;  %v573_v22 = vld [vmem:[#allocation2 + $0xc0] sm:$0xff] }
 0x1f1   : > { %v842_v25 = vpop.f32.mrf.mxu0  ;;  %v955_v26 = vpop.f32.mrf.mxu1 }
 0x1f2   : > { %v1242_v27 = vadd.f32 %v1179_v24, %v566_v23  ;;  %v956_v28 = vadd.f32 %v955_v26, %v842_v25 }
 0x1f4   : > { %1274 = vst [vmem:[#allocation2 + $0x38] sm:$0xff] %v1242_v27 }
 0x1f5   : > { %v1068_v29 = vpop.f32.mrf.mxu2  ;;  %v1181_v30 = vpop.f32.mrf.mxu3 }
 0x1f6   : > { %v1069_v31 = vadd.f32 %v1068_v29, %v956_v28 }
 0x1f8   : > { %v1182_v33 = vadd.f32 %v1181_v30, %v1069_v31  ;;  %v574_v31 = vld [vmem:[#allocation2 + $0xa8] sm:$0xff] }
 0x1f9   : > { %v845_v34 = vpop.f32.mrf.mxu0  ;;  %v958_v35 = vpop.f32.mrf.mxu1 }
 0x1fa   : > { %v1243_v36 = vadd.f32 %v1182_v33, %v567_v32  ;;  %v959_v37 = vadd.f32 %v958_v35, %v845_v34 }
 0x1fc   : > { %1275 = vst [vmem:[#allocation2 + $0x58] sm:$0xff] %v1243_v36 }
 0x1fd   : > { %v1071_v38 = vpop.f32.mrf.mxu2  ;;  %v1184_v39 = vpop.f32.mrf.mxu3 }
 0x1fe   : > { %v1072_v40 = vadd.f32 %v1071_v38, %v959_v37 }
 0x200   : > { %v1185_v42 = vadd.f32 %v1184_v39, %v1072_v40  ;;  %v575_v40 = vld [vmem:[#allocation2 + $0xd0] sm:$0xff] }
 0x201   : > { %v848_v43 = vpop.f32.mrf.mxu0  ;;  %v961_v44 = vpop.f32.mrf.mxu1 }
 0x202   : > { %v1244_v45 = vadd.f32 %v1185_v42, %v568_v41  ;;  %v962_v46 = vadd.f32 %v961_v44, %v848_v43 }
 0x204   : > { %1276 = vst [vmem:[#allocation2 + $0x40] sm:$0xff] %v1244_v45 }
 0x205   : > { %v1074_v47 = vpop.f32.mrf.mxu2  ;;  %v1187_v48 = vpop.f32.mrf.mxu3 }
 0x206   : > { %v1075_v49 = vadd.f32 %v1074_v47, %v962_v46 }
 0x208   : > { %v1188_v51 = vadd.f32 %v1187_v48, %v1075_v49  ;;  %v576_v49 = vld [vmem:[#allocation2 + $0x10] sm:$0xff] }
 0x209   : > { %v851_v52 = vpop.f32.mrf.mxu0  ;;  %v964_v53 = vpop.f32.mrf.mxu1 }
 0x20a   : > { %v1245_v54 = vadd.f32 %v1188_v51, %v569_v50  ;;  %v965_v55 = vadd.f32 %v964_v53, %v851_v52 }
 0x20c   : > { %1277 = vst [vmem:[#allocation2 + $0xc8] sm:$0xff] %v1245_v54 }
 0x20d   : > { %v1077_v56 = vpop.f32.mrf.mxu2  ;;  %v1190_v57 = vpop.f32.mrf.mxu3 }
 0x20e   : > { %v1078_v58 = vadd.f32 %v1077_v56, %v965_v55 }
 0x210   : > { %v1191_v60 = vadd.f32 %v1190_v57, %v1078_v58  ;;  %v577_v58 = vld [vmem:[#allocation2 + $0x28] sm:$0xff] }
 0x211   : > { %v854_v61 = vpop.f32.mrf.mxu0  ;;  %v967_v62 = vpop.f32.mrf.mxu1 }
 0x212   : > { %v1246_v63 = vadd.f32 %v1191_v60, %v570_v59  ;;  %v968_v0 = vadd.f32 %v967_v62, %v854_v61 }
 0x214   : > { %1278 = vst [vmem:[#allocation2 + $0xe0] sm:$0xff] %v1246_v63 }
 0x215   : > { %v1080_v1 = vpop.f32.mrf.mxu2  ;;  %v1193_v2 = vpop.f32.mrf.mxu3 }
 0x216   : > { %v1081_v3 = vadd.f32 %v1080_v1, %v968_v0 }
 0x218   : > { %v1194_v5 = vadd.f32 %v1193_v2, %v1081_v3  ;;  %v578_v3 = vld [vmem:[#allocation2 + $0xa0] sm:$0xff] }
 0x219   : > { %v857_v6 = vpop.f32.mrf.mxu0  ;;  %v970_v7 = vpop.f32.mrf.mxu1 }
 0x21a   : > { %v1247_v8 = vadd.f32 %v1194_v5, %v571_v4  ;;  %v971_v9 = vadd.f32 %v970_v7, %v857_v6 }
 0x21c   : > { %1279 = vst [vmem:[#allocation2 + $0x90] sm:$0xff] %v1247_v8 }
 0x21d   : > { %v1083_v10 = vpop.f32.mrf.mxu2  ;;  %v1196_v11 = vpop.f32.mrf.mxu3 }
 0x21e   : > { %v1084_v12 = vadd.f32 %v1083_v10, %v971_v9 }
 0x220   : > { %v1197_v14 = vadd.f32 %v1196_v11, %v1084_v12  ;;  %v579_v12 = vld [vmem:[#allocation2 + $0xf8] sm:$0xff] }
 0x221   : > { %v860_v15 = vpop.f32.mrf.mxu0  ;;  %v973_v16 = vpop.f32.mrf.mxu1 }
 0x222   : > { %v1248_v17 = vadd.f32 %v1197_v14, %v572_v13  ;;  %v974_v18 = vadd.f32 %v973_v16, %v860_v15 }
 0x224   : > { %1280 = vst [vmem:[#allocation2 + $0x70] sm:$0xff] %v1248_v17 }
 0x225   : > { %v1086_v19 = vpop.f32.mrf.mxu2  ;;  %v1199_v20 = vpop.f32.mrf.mxu3 }
 0x226   : > { %v1087_v21 = vadd.f32 %v1086_v19, %v974_v18 }
 0x228   : > { %v1200_v23 = vadd.f32 %v1199_v20, %v1087_v21  ;;  %v580_v21 = vld [vmem:[#allocation2 + $0x20] sm:$0xff] }
 0x229   : > { %v863_v24 = vpop.f32.mrf.mxu0  ;;  %v976_v25 = vpop.f32.mrf.mxu1 }
 0x22a   : > { %v1249_v26 = vadd.f32 %v1200_v23, %v573_v22  ;;  %v977_v27 = vadd.f32 %v976_v25, %v863_v24 }
 0x22c   : > { %1281 = vst [vmem:[#allocation2 + $0xc0] sm:$0xff] %v1249_v26 }
 0x22d   : > { %v1089_v28 = vpop.f32.mrf.mxu2  ;;  %v1202_v29 = vpop.f32.mrf.mxu3 }
 0x22e   : > { %v1090_v30 = vadd.f32 %v1089_v28, %v977_v27 }
 0x230   : > { %v1203_v32 = vadd.f32 %v1202_v29, %v1090_v30  ;;  %v581_v30 = vld [vmem:[#allocation2 + $0x98] sm:$0xff] }
 0x231   : > { %v866_v33 = vpop.f32.mrf.mxu0  ;;  %v979_v34 = vpop.f32.mrf.mxu1 }
 0x232   : > { %v1250_v35 = vadd.f32 %v1203_v32, %v574_v31  ;;  %v980_v36 = vadd.f32 %v979_v34, %v866_v33 }
 0x234   : > { %1282 = vst [vmem:[#allocation2 + $0xa8] sm:$0xff] %v1250_v35 }
 0x235   : > { %v1092_v37 = vpop.f32.mrf.mxu2  ;;  %v1205_v38 = vpop.f32.mrf.mxu3 }
 0x236   : > { %v1093_v39 = vadd.f32 %v1092_v37, %v980_v36 }
 0x238   : > { %v1206_v41 = vadd.f32 %v1205_v38, %v1093_v39 }
 0x239   : > { %v869_v42 = vpop.f32.mrf.mxu0  ;;  %v982_v43 = vpop.f32.mrf.mxu1 }
 0x23a   : > { %v1251_v44 = vadd.f32 %v1206_v41, %v575_v40  ;;  %v983_v45 = vadd.f32 %v982_v43, %v869_v42 }
 0x23c   : > { %1283 = vst [vmem:[#allocation2 + $0xd0] sm:$0xff] %v1251_v44 }
 0x23d   : > { %v1095_v46 = vpop.f32.mrf.mxu2  ;;  %v1208_v47 = vpop.f32.mrf.mxu3 }
 0x23e   : > { %v1096_v48 = vadd.f32 %v1095_v46, %v983_v45 }
 0x240   : > { %v1209_v50 = vadd.f32 %v1208_v47, %v1096_v48 }
 0x241   : > { %v872_v51 = vpop.f32.mrf.mxu0  ;;  %v985_v52 = vpop.f32.mrf.mxu1 }
 0x242   : > { %v1252_v53 = vadd.f32 %v1209_v50, %v576_v49  ;;  %v986_v54 = vadd.f32 %v985_v52, %v872_v51 }
 0x244   : > { %1284 = vst [vmem:[#allocation2 + $0x10] sm:$0xff] %v1252_v53 }
 0x245   : > { %v1098_v55 = vpop.f32.mrf.mxu2  ;;  %v1211_v56 = vpop.f32.mrf.mxu3 }
 0x246   : > { %v1099_v57 = vadd.f32 %v1098_v55, %v986_v54 }
 0x248   : > { %v1212_v59 = vadd.f32 %v1211_v56, %v1099_v57 }
 0x249   : > { %v875_v60 = vpop.f32.mrf.mxu0  ;;  %v988_v61 = vpop.f32.mrf.mxu1 }
 0x24a   : > { %v1253_v62 = vadd.f32 %v1212_v59, %v577_v58  ;;  %v989_v63 = vadd.f32 %v988_v61, %v875_v60 }
 0x24c   : > { %1285 = vst [vmem:[#allocation2 + $0x28] sm:$0xff] %v1253_v62 }
 0x24d   : > { %v1101_v0 = vpop.f32.mrf.mxu2  ;;  %v1214_v1 = vpop.f32.mrf.mxu3 }
 0x24e   : > { %v1102_v2 = vadd.f32 %v1101_v0, %v989_v63 }
 0x250   : > { %v1215_v4 = vadd.f32 %v1214_v1, %v1102_v2 }
 0x251   : > { %v878_v5 = vpop.f32.mrf.mxu0  ;;  %v991_v6 = vpop.f32.mrf.mxu1 }
 0x252   : > { %v1254_v7 = vadd.f32 %v1215_v4, %v578_v3  ;;  %v992_v8 = vadd.f32 %v991_v6, %v878_v5 }
 0x254   : > { %1286 = vst [vmem:[#allocation2 + $0xa0] sm:$0xff] %v1254_v7 }
 0x255   : > { %v1104_v9 = vpop.f32.mrf.mxu2  ;;  %v1217_v10 = vpop.f32.mrf.mxu3 }
 0x256   : > { %v1105_v11 = vadd.f32 %v1104_v9, %v992_v8 }
 0x258   : > { %v1218_v13 = vadd.f32 %v1217_v10, %v1105_v11 }
 0x259   : > { %v881_v14 = vpop.f32.mrf.mxu0  ;;  %v994_v15 = vpop.f32.mrf.mxu1 }
 0x25a   : > { %v1255_v16 = vadd.f32 %v1218_v13, %v579_v12  ;;  %v995_v17 = vadd.f32 %v994_v15, %v881_v14 }
 0x25c   : > { %1287 = vst [vmem:[#allocation2 + $0xf8] sm:$0xff] %v1255_v16 }
 0x25d   : > { %v1107_v18 = vpop.f32.mrf.mxu2  ;;  %v1220_v19 = vpop.f32.mrf.mxu3 }
 0x25e   : > { %v1108_v20 = vadd.f32 %v1107_v18, %v995_v17 }
 0x260   : > { %v1221_v22 = vadd.f32 %v1220_v19, %v1108_v20 }
 0x261   : > { %v884_v23 = vpop.f32.mrf.mxu0  ;;  %v997_v24 = vpop.f32.mrf.mxu1 }
 0x262   : > { %v1256_v25 = vadd.f32 %v1221_v22, %v580_v21  ;;  %v998_v26 = vadd.f32 %v997_v24, %v884_v23 }
 0x264   : > { %1288 = vst [vmem:[#allocation2 + $0x20] sm:$0xff] %v1256_v25 }
 0x265   : > { %v1110_v27 = vpop.f32.mrf.mxu2  ;;  %v1223_v28 = vpop.f32.mrf.mxu3 }
 0x266   : > { %v1111_v29 = vadd.f32 %v1110_v27, %v998_v26 }
 0x268   : > { %v1224_v31 = vadd.f32 %v1223_v28, %v1111_v29  ;;  %1293 = sbr.rel (%p1567_p13) target bundleno = 660 (0x294), region = 67 }
 0x26a   : > { %v1257_v32 = vadd.f32 %v1224_v31, %v581_v30 }
 0x26c   : > { %1289 = vst [vmem:[#allocation2 + $0x98] sm:$0xff] %v1257_v32 }
 0x26d   : > { %v1294_v33 = vld [vmem:[#allocation2 + $0xb0] sm:$0xff]  ;;  %v2246_v34 = vld [vmem:[%s2372_s2] ss:$0 sm:$0xff]  ;;  %v1296_v39 = vld [vmem:[#allocation2 + $0xd8] sm:$0xff] }
 0x26e   : > { %v2251_v35 = vld [vmem:[%s2373_s3] ss:$0 sm:$0xff]  ;;  %v1330_v37 = vmul.f32 %v2246_v34, %v1294_v33  ;;  %v1297_v40 = vld [vmem:[#allocation2 + $0x18] sm:$0xff]  ;;  %v1298_v41 = vld [vmem:[#allocation2 + $0x50] sm:$0xff]  ;;  %v1332_v42 = vmul.f32 %v2246_v34, %v1296_v39 }
 0x26f   : > { %v1295_v36 = vld [vmem:[#allocation2] sm:$0xff]  ;;  %v1333_v43 = vmul.f32 %v2246_v34, %v1297_v40  ;;  %v1334_v44 = vmul.f32 %v2246_v34, %v1298_v41  ;;  %v1299_v45 = vld [vmem:[#allocation2 + $0x68] sm:$0xff]  ;;  %v1300_v46 = vld [vmem:[#allocation2 + $0x30] sm:$0xff] }
 0x270   : > { %v1331_v38 = vmul.f32 %v2246_v34, %v1295_v36  ;;  %v1301_v47 = vld [vmem:[#allocation2 + $0x48] sm:$0xff]  ;;  %v1366_v48 = vadd.f32 %v2251_v35, %v1330_v37  ;;  %v1335_v50 = vmul.f32 %v2246_v34, %v1299_v45  ;;  %v1336_v51 = vmul.f32 %v2246_v34, %v1300_v46  ;;  %v1302_v56 = vld [vmem:[#allocation2 + $0x80] sm:$0xff]  ;;  %v1305_v63 = vld [vmem:[#allocation2 + $0xb8] sm:$0xff] }
 0x271   : > { %v1368_v52 = vadd.f32 %v2251_v35, %v1332_v42  ;;  %v1369_v53 = vadd.f32 %v2251_v35, %v1333_v43  ;;  %v1370_v54 = vadd.f32 %v2251_v35, %v1334_v44  ;;  %v1337_v55 = vmul.f32 %v2246_v34, %v1301_v47  ;;  %v1303_v57 = vld [vmem:[#allocation2 + $0x88] sm:$0xff]  ;;  %v1306_v0 = vld [vmem:[#allocation2 + $0x60] sm:$0xff]  ;;  %v1307_v4 = vld [vmem:[#allocation2 + $0xf0] sm:$0xff] }
 0x272   : > { %v1367_v49 = vadd.f32 %v2251_v35, %v1331_v38  ;;  %v1398_v58 = vmax.f32 %v1366_v48, 0.0  ;;  %v1371_v60 = vadd.f32 %v2251_v35, %v1335_v50  ;;  %v1372_v61 = vadd.f32 %v2251_v35, %v1336_v51  ;;  %v1304_v62 = vld [vmem:[#allocation2 + $0xe8] sm:$0xff]  ;;  %v1309_v10 = vld [vmem:[#allocation2 + $0x78] sm:$0xff]  ;;  %v1312_v27 = vld [vmem:[#allocation2 + $0x40] sm:$0xff] }
 0x273   : > { %v1400_v1 = vmax.f32 %v1368_v52, 0.0  ;;  %v1401_v2 = vmax.f32 %v1369_v53, 0.0  ;;  %v1373_v3 = vadd.f32 %v2251_v35, %v1337_v55  ;;  %v1308_v5 = vld [vmem:[#allocation2 + $0x8] sm:$0xff]  ;;  %v1402_v6 = vmax.f32 %v1370_v54, 0.0  ;;  %v1310_v23 = vld [vmem:[#allocation2 + $0x38] sm:$0xff]  ;;  %v1314_v31 = vld [vmem:[#allocation2 + $0xe0] sm:$0xff] }
 0x274   : > { %v1399_v59 = vmax.f32 %v1367_v49, 0.0  ;;  %1430 = vst [vmem:[%s2045_s8] sm:$0xff] %v1398_v58  ;;  %v1403_v7 = vmax.f32 %v1371_v60, 0.0  ;;  %v1338_v8 = vmul.f32 %v2246_v34, %v1302_v56  ;;  %v1339_v9 = vmul.f32 %v2246_v34, %v1303_v57  ;;  %v1311_v24 = vld [vmem:[#allocation2 + $0x58] sm:$0xff]  ;;  %v1313_v28 = vld [vmem:[#allocation2 + $0xc8] sm:$0xff]  ;;  %v1315_v38 = vld [vmem:[#allocation2 + $0x90] sm:$0xff] }
 0x275   : > { %v1404_v11 = vmax.f32 %v1372_v61, 0.0  ;;  %v1340_v12 = vmul.f32 %v2246_v34, %v1304_v62  ;;  %v1341_v13 = vmul.f32 %v2246_v34, %v1305_v63  ;;  %v1342_v14 = vmul.f32 %v2246_v34, %v1306_v0  ;;  %1432 = vst [vmem:[%s2045_s8 + $0x10] sm:$0xff] %v1400_v1  ;;  %v1316_v43 = vld [vmem:[#allocation2 + $0x70] sm:$0xff]  ;;  %v1317_v47 = vld [vmem:[#allocation2 + $0xc0] sm:$0xff]  ;;  %v1318_v51 = vld [vmem:[#allocation2 + $0xa8] sm:$0xff] }
 0x276   : > { %1431 = vst [vmem:[%s2045_s8 + $0x8] sm:$0xff] %v1399_v59  ;;  %v1374_v15 = vadd.f32 %v2251_v35, %v1338_v8  ;;  %v1375_v16 = vadd.f32 %v2251_v35, %v1339_v9  ;;  %v1343_v17 = vmul.f32 %v2246_v34, %v1307_v4  ;;  %v1344_v18 = vmul.f32 %v2246_v34, %v1308_v5  ;;  %v1319_v55 = vld [vmem:[#allocation2 + $0xd0] sm:$0xff]  ;;  %v1321_v63 = vld [vmem:[#allocation2 + $0x28] sm:$0xff] }
 0x277   : > { %1433 = vst [vmem:[%s2045_s8 + $0x18] sm:$0xff] %v1401_v2  ;;  %v1405_v19 = vmax.f32 %v1373_v3, 0.0  ;;  %v1376_v20 = vadd.f32 %v2251_v35, %v1340_v12  ;;  %v1377_v21 = vadd.f32 %v2251_v35, %v1341_v13  ;;  %v1345_v22 = vmul.f32 %v2246_v34, %v1309_v10  ;;  %v1320_v59 = vld [vmem:[#allocation2 + $0x10] sm:$0xff]  ;;  %v1322_v3 = vld [vmem:[#allocation2 + $0xa0] sm:$0xff] }
 0x278   : > { %1434 = vst [vmem:[%s2045_s8 + $0x20] sm:$0xff] %v1402_v6  ;;  %v1406_v25 = vmax.f32 %v1374_v15, 0.0  ;;  %v1378_v26 = vadd.f32 %v2251_v35, %v1342_v14  ;;  %v1407_v29 = vmax.f32 %v1375_v16, 0.0  ;;  %v1379_v30 = vadd.f32 %v2251_v35, %v1343_v17  ;;  %v1325_v15 = vld [vmem:[#allocation2 + $0x98] sm:$0xff] }
 0x279   : > { %1435 = vst [vmem:[%s2045_s8 + $0x28] sm:$0xff] %v1403_v7  ;;  %v1408_v32 = vmax.f32 %v1376_v20, 0.0  ;;  %v1380_v33 = vadd.f32 %v2251_v35, %v1344_v18  ;;  %v1346_v36 = vmul.f32 %v2246_v34, %v1310_v23  ;;  %v1347_v37 = vmul.f32 %v2246_v34, %v1311_v24  ;;  %v1323_v7 = vld [vmem:[#allocation2 + $0xf8] sm:$0xff] }
 0x27a   : > { %1436 = vst [vmem:[%s2045_s8 + $0x30] sm:$0xff] %v1404_v11  ;;  %v1409_v39 = vmax.f32 %v1377_v21, 0.0  ;;  %v1381_v40 = vadd.f32 %v2251_v35, %v1345_v22  ;;  %v1348_v41 = vmul.f32 %v2246_v34, %v1312_v27  ;;  %v1349_v42 = vmul.f32 %v2246_v34, %v1313_v28  ;;  %v1324_v11 = vld [vmem:[#allocation2 + $0x20] sm:$0xff] }
 0x27b   : > { %1437 = vst [vmem:[%s2045_s8 + $0x38] sm:$0xff] %v1405_v19  ;;  %v1410_v44 = vmax.f32 %v1378_v26, 0.0  ;;  %v1382_v45 = vadd.f32 %v2251_v35, %v1346_v36  ;;  %v1350_v46 = vmul.f32 %v2246_v34, %v1314_v31  ;;  %v1411_v48 = vmax.f32 %v1379_v30, 0.0 }
 0x27c   : > { %1438 = vst [vmem:[%s2045_s8 + $0x40] sm:$0xff] %v1406_v25  ;;  %v1383_v49 = vadd.f32 %v2251_v35, %v1347_v37  ;;  %v1351_v50 = vmul.f32 %v2246_v34, %v1315_v38  ;;  %v1412_v52 = vmax.f32 %v1380_v33, 0.0  ;;  %v1384_v53 = vadd.f32 %v2251_v35, %v1348_v41 }
 0x27d   : > { %1439 = vst [vmem:[%s2045_s8 + $0x48] sm:$0xff] %v1407_v29  ;;  %v1352_v54 = vmul.f32 %v2246_v34, %v1316_v43  ;;  %v1413_v56 = vmax.f32 %v1381_v40, 0.0  ;;  %v1385_v57 = vadd.f32 %v2251_v35, %v1349_v42  ;;  %v1353_v58 = vmul.f32 %v2246_v34, %v1317_v47 }
 0x27e   : > { %1440 = vst [vmem:[%s2045_s8 + $0x50] sm:$0xff] %v1408_v32  ;;  %v1414_v60 = vmax.f32 %v1382_v45, 0.0  ;;  %v1386_v61 = vadd.f32 %v2251_v35, %v1350_v46  ;;  %v1354_v62 = vmul.f32 %v2246_v34, %v1318_v51  ;;  %v1415_v0 = vmax.f32 %v1383_v49, 0.0 }
 0x27f   : > { %1441 = vst [vmem:[%s2045_s8 + $0x58] sm:$0xff] %v1409_v39  ;;  %v1387_v1 = vadd.f32 %v2251_v35, %v1351_v50  ;;  %v1355_v2 = vmul.f32 %v2246_v34, %v1319_v55  ;;  %v1416_v4 = vmax.f32 %v1384_v53, 0.0  ;;  %v1388_v5 = vadd.f32 %v2251_v35, %v1352_v54 }
 0x280   : > { %1442 = vst [vmem:[%s2045_s8 + $0x60] sm:$0xff] %v1410_v44  ;;  %v1356_v6 = vmul.f32 %v2246_v34, %v1320_v59  ;;  %v1417_v8 = vmax.f32 %v1385_v57, 0.0  ;;  %v1389_v9 = vadd.f32 %v2251_v35, %v1353_v58  ;;  %v1357_v10 = vmul.f32 %v2246_v34, %v1321_v63 }
 0x281   : > { %1443 = vst [vmem:[%s2045_s8 + $0x68] sm:$0xff] %v1411_v48  ;;  %v1418_v12 = vmax.f32 %v1386_v61, 0.0  ;;  %v1390_v13 = vadd.f32 %v2251_v35, %v1354_v62  ;;  %v1358_v14 = vmul.f32 %v2246_v34, %v1322_v3  ;;  %v1419_v16 = vmax.f32 %v1387_v1, 0.0 }
 0x282   : > { %1444 = vst [vmem:[%s2045_s8 + $0x70] sm:$0xff] %v1412_v52  ;;  %v1391_v17 = vadd.f32 %v2251_v35, %v1355_v2  ;;  %v1359_v18 = vmul.f32 %v2246_v34, %v1323_v7  ;;  %v1420_v19 = vmax.f32 %v1388_v5, 0.0  ;;  %v1392_v20 = vadd.f32 %v2251_v35, %v1356_v6 }
 0x283   : > { %1445 = vst [vmem:[%s2045_s8 + $0x78] sm:$0xff] %v1413_v56  ;;  %v1360_v21 = vmul.f32 %v2246_v34, %v1324_v11  ;;  %v1421_v22 = vmax.f32 %v1389_v9, 0.0  ;;  %v1393_v23 = vadd.f32 %v2251_v35, %v1357_v10  ;;  %v1361_v24 = vmul.f32 %v2246_v34, %v1325_v15 }
 0x284   : > { %1446 = vst [vmem:[%s2045_s8 + $0x80] sm:$0xff] %v1414_v60  ;;  %v1422_v25 = vmax.f32 %v1390_v13, 0.0  ;;  %v1394_v26 = vadd.f32 %v2251_v35, %v1358_v14  ;;  %v1423_v27 = vmax.f32 %v1391_v17, 0.0  ;;  %v1395_v28 = vadd.f32 %v2251_v35, %v1359_v18 }
 0x285   : > { %1447 = vst [vmem:[%s2045_s8 + $0x88] sm:$0xff] %v1415_v0  ;;  %v1424_v29 = vmax.f32 %v1392_v20, 0.0  ;;  %v1396_v30 = vadd.f32 %v2251_v35, %v1360_v21  ;;  %v1425_v34 = vmax.f32 %v1393_v23, 0.0  ;;  %v1397_v31 = vadd.f32 %v2251_v35, %v1361_v24 }
 0x286   : > { %1448 = vst [vmem:[%s2045_s8 + $0x90] sm:$0xff] %v1416_v4  ;;  %v1426_v32 = vmax.f32 %v1394_v26, 0.0  ;;  %v1427_v33 = vmax.f32 %v1395_v28, 0.0 }
 0x287   : > { %1449 = vst [vmem:[%s2045_s8 + $0x98] sm:$0xff] %v1417_v8  ;;  %v1428_v36 = vmax.f32 %v1396_v30, 0.0  ;;  %v1429_v37 = vmax.f32 %v1397_v31, 0.0 }
 0x288   : > { %1450 = vst [vmem:[%s2045_s8 + $0xa0] sm:$0xff] %v1418_v12 }
 0x289   : > { %1451 = vst [vmem:[%s2045_s8 + $0xa8] sm:$0xff] %v1419_v16 }
 0x28a   : > { %1452 = vst [vmem:[%s2045_s8 + $0xb0] sm:$0xff] %v1420_v19 }
 0x28b   : > { %1453 = vst [vmem:[%s2045_s8 + $0xb8] sm:$0xff] %v1421_v22 }
 0x28c   : > { %1454 = vst [vmem:[%s2045_s8 + $0xc0] sm:$0xff] %v1422_v25 }
 0x28d   : > { %1455 = vst [vmem:[%s2045_s8 + $0xc8] sm:$0xff] %v1423_v27 }
 0x28e   : > { %1456 = vst [vmem:[%s2045_s8 + $0xd0] sm:$0xff] %v1424_v29 }
 0x28f   : > { %1457 = vst [vmem:[%s2045_s8 + $0xd8] sm:$0xff] %v1425_v34 }
 0x290   : > { %1458 = vst [vmem:[%s2045_s8 + $0xe0] sm:$0xff] %v1426_v32 }
 0x291   : > { %1459 = vst [vmem:[%s2045_s8 + $0xe8] sm:$0xff] %v1427_v33 }
 0x292   : > { %1460 = vst [vmem:[%s2045_s8 + $0xf0] sm:$0xff] %v1428_v36 }
 0x293   : > { %1461 = vst [vmem:[%s2045_s8 + $0xf8] sm:$0xff] %v1429_v37 }
 0x294 PF: > { %s14_s21 = sadd.s32 1, %s1684_s21   ;;  %s2375_s15 = smov %s1664_s16 }
 0x295   : > { %p11_p0 = scmp.ge.s32.totalorder %s14_s21, 10   ;;  %s2376_s16 = smov %s1763_s28 }
 0x296   : > { %s2377_s17 = smov %s1676_s19  ;;  %s2378_s18 = smov %s1680_s20 }
 0x297   : > { %s2379_s19 = smov %s2382_s22  ;;  %s2380_s20 = smov %s2386_s23 }
 0x298   :  { %13 = sbr.rel (!%p11_p0) target bundleno = 4 (0x4), region = 105 }

// kernel: netg_forward.7
= control target key start
LH: loop header
LB: loop body
LE: loop exit
PB: predicated region body
PF: predicated region fallthrough
CT: control target
= control target key end

     0   :  { %s1440_s15 = smov 0   ;;  %s1442_s16 = smov 0   ;;  %s1920_s0 = inlined_call_operand.vmem [shape: f32[4096,512], index: 0, kind: input, shape index: {}]   ;;  %s1921_s1 = inlined_call_operand.vmem [shape: f32[512,128], index: 1, kind: input, shape index: {}]   ;;  %s1922_s2 = inlined_call_operand.vmem [shape: f32[1,128], index: 2, kind: input, shape index: {}]   ;;  %s1923_s3 = inlined_call_operand.vmem [shape: f32[1,128], index: 3, kind: input, shape index: {}]   ;;  %s1924_s4 = inlined_call_operand.vmem [shape: f32[4096,128], index: 4, kind: output, shape index: {}]  }
   0x1   :  { %s1444_s17 = smov 0  }
   0x2 LB: > { %s26_s18 = sadd.s32 1, %s1409_s16  ;;  %p1292_p0 = scmp.ge.s32.totalorder %s1413_s17, 1  ;;  %s1413_s17 = sphi %s1444_s17, %s14_s17   ;;  %s1409_s16 = sphi %s1442_s16, %s1927_s16   ;;  %s1405_s15 = sphi %s1440_s15, %s1926_s15  }
   0x3   : > { %p28_p1 = scmp.ge.s32.totalorder %s26_s18, 16  ;;  %p194_p2 = scmp.lt.s32.totalorder %s1413_s17, 17 }
   0x5   : > { %s1929_s18 = smov (%p28_p1, %s26_s18), 0  ;;  %p195_p3 = pnand %p1292_p0, %p194_p2 }
   0x6   : > { %s1293_s9 = sshll.u32 (!%p195_p3), %s1405_s15, 5 }
   0x7   : > { %198 = sbr.rel (%p195_p3) target bundleno = 441 (0x1b9), region = 36  ;;  %p1571_p4 = scmp.lt.s32.totalorder (!%p195_p3), %s1293_s9, 511 }
   0xc   : > { %v497_v0 = vld [vmem:[%s1921_s1 + $0x178] sm:$0xff]  ;;  %v496_v1 = vld [vmem:[%s1921_s1 + $0x170] sm:$0xff]  ;;  %v495_v5 = vld [vmem:[%s1921_s1 + $0x168] sm:$0xff]  ;;  %s1931_s9 = smov (!%p1571_p4, %s1293_s9), 511 }
   0xd   : > { %v513_v2 = vld [vmem:[%s1921_s1 + $0x1f8] sm:$0xff]  ;;  %740 = vmatpush.msra.mxu2 %v497_v0  ;;  %v512_v6 = vld [vmem:[%s1921_s1 + $0x1f0] sm:$0xff]  ;;  %v511_v9 = vld [vmem:[%s1921_s1 + $0x1e8] sm:$0xff]  ;;  %s1300_s12 = sshll.u32 %s1931_s9, 5  ;;  %s1297_s27 = sshll.u32 %s1931_s9, 3 }
   0xe   : > { %853 = vmatpush.msra.mxu3 %v513_v2  ;;  %v465_v3 = vld [vmem:[%s1921_s1 + $0x78] sm:$0xff]  ;;  %v464_v7 = vld [vmem:[%s1921_s1 + $0x70] sm:$0xff]  ;;  %v463_v10 = vld [vmem:[%s1921_s1 + $0x68] sm:$0xff]  ;;  %s1651_s30 = scalar_lea.vmem %s1920_s0, %s1300_s12  ;;  %s1763_s26 = scalar_lea.vmem %s1924_s4, %s1297_s27 }
   0xf   : > { %v481_v4 = vld [vmem:[%s1921_s1 + $0xf8] sm:$0xff]  ;;  %514 = vmatpush.msra.mxu0 %v465_v3  ;;  %v480_v8 = vld [vmem:[%s1921_s1 + $0xf0] sm:$0xff]  ;;  %741 = vmatpush.msra.mxu2 %v496_v1  ;;  %v494_v11 = vld [vmem:[%s1921_s1 + $0x160] sm:$0xff] }
  0x10   : > { %627 = vmatpush.msra.mxu1 %v481_v4  ;;  %854 = vmatpush.msra.mxu3 %v512_v6  ;;  %v479_v12 = vld [vmem:[%s1921_s1 + $0xe8] sm:$0xff]  ;;  %v510_v13 = vld [vmem:[%s1921_s1 + $0x1e0] sm:$0xff]  ;;  %v493_v16 = vld [vmem:[%s1921_s1 + $0x158] sm:$0xff] }
  0x11   : > { %515 = vmatpush.msra.mxu0 %v464_v7  ;;  %742 = vmatpush.msra.mxu2 %v495_v5  ;;  %v462_v14 = vld [vmem:[%s1921_s1 + $0x60] sm:$0xff]  ;;  %v509_v17 = vld [vmem:[%s1921_s1 + $0x1d8] sm:$0xff]  ;;  %v492_v20 = vld [vmem:[%s1921_s1 + $0x150] sm:$0xff] }
  0x12   : > { %628 = vmatpush.msra.mxu1 %v480_v8  ;;  %855 = vmatpush.msra.mxu3 %v511_v9  ;;  %v478_v15 = vld [vmem:[%s1921_s1 + $0xe0] sm:$0xff]  ;;  %v461_v18 = vld [vmem:[%s1921_s1 + $0x58] sm:$0xff]  ;;  %v508_v21 = vld [vmem:[%s1921_s1 + $0x1d0] sm:$0xff] }
  0x13   : > { %516 = vmatpush.msra.mxu0 %v463_v10  ;;  %743 = vmatpush.msra.mxu2 %v494_v11  ;;  %v477_v19 = vld [vmem:[%s1921_s1 + $0xd8] sm:$0xff]  ;;  %v460_v22 = vld [vmem:[%s1921_s1 + $0x50] sm:$0xff]  ;;  %v491_v24 = vld [vmem:[%s1921_s1 + $0x148] sm:$0xff] }
  0x14   : > { %629 = vmatpush.msra.mxu1 %v479_v12  ;;  %856 = vmatpush.msra.mxu3 %v510_v13  ;;  %v476_v23 = vld [vmem:[%s1921_s1 + $0xd0] sm:$0xff]  ;;  %v507_v25 = vld [vmem:[%s1921_s1 + $0x1c8] sm:$0xff]  ;;  %v490_v28 = vld [vmem:[%s1921_s1 + $0x140] sm:$0xff] }
  0x15   : > { %517 = vmatpush.msra.mxu0 %v462_v14  ;;  %744 = vmatpush.msra.mxu2 %v493_v16  ;;  %v459_v26 = vld [vmem:[%s1921_s1 + $0x48] sm:$0xff]  ;;  %v506_v29 = vld [vmem:[%s1921_s1 + $0x1c0] sm:$0xff]  ;;  %v489_v32 = vld [vmem:[%s1921_s1 + $0x138] sm:$0xff] }
  0x16   : > { %630 = vmatpush.msra.mxu1 %v478_v15  ;;  %857 = vmatpush.msra.mxu3 %v509_v17  ;;  %v475_v27 = vld [vmem:[%s1921_s1 + $0xc8] sm:$0xff]  ;;  %v458_v30 = vld [vmem:[%s1921_s1 + $0x40] sm:$0xff]  ;;  %v505_v33 = vld [vmem:[%s1921_s1 + $0x1b8] sm:$0xff] }
  0x17   : > { %518 = vmatpush.msra.mxu0 %v461_v18  ;;  %745 = vmatpush.msra.mxu2 %v492_v20  ;;  %v474_v31 = vld [vmem:[%s1921_s1 + $0xc0] sm:$0xff]  ;;  %v457_v34 = vld [vmem:[%s1921_s1 + $0x38] sm:$0xff]  ;;  %v488_v36 = vld [vmem:[%s1921_s1 + $0x130] sm:$0xff] }
  0x18   : > { %631 = vmatpush.msra.mxu1 %v477_v19  ;;  %858 = vmatpush.msra.mxu3 %v508_v21  ;;  %v473_v35 = vld [vmem:[%s1921_s1 + $0xb8] sm:$0xff]  ;;  %v504_v37 = vld [vmem:[%s1921_s1 + $0x1b0] sm:$0xff]  ;;  %v487_v40 = vld [vmem:[%s1921_s1 + $0x128] sm:$0xff] }
  0x19   : > { %519 = vmatpush.msra.mxu0 %v460_v22  ;;  %746 = vmatpush.msra.mxu2 %v491_v24  ;;  %v456_v38 = vld [vmem:[%s1921_s1 + $0x30] sm:$0xff]  ;;  %v503_v41 = vld [vmem:[%s1921_s1 + $0x1a8] sm:$0xff]  ;;  %v486_v44 = vld [vmem:[%s1921_s1 + $0x120] sm:$0xff] }
  0x1a   : > { %632 = vmatpush.msra.mxu1 %v476_v23  ;;  %859 = vmatpush.msra.mxu3 %v507_v25  ;;  %v472_v39 = vld [vmem:[%s1921_s1 + $0xb0] sm:$0xff]  ;;  %v455_v42 = vld [vmem:[%s1921_s1 + $0x28] sm:$0xff]  ;;  %v502_v45 = vld [vmem:[%s1921_s1 + $0x1a0] sm:$0xff] }
  0x1b   : > { %520 = vmatpush.msra.mxu0 %v459_v26  ;;  %747 = vmatpush.msra.mxu2 %v490_v28  ;;  %v471_v43 = vld [vmem:[%s1921_s1 + $0xa8] sm:$0xff]  ;;  %v454_v46 = vld [vmem:[%s1921_s1 + $0x20] sm:$0xff]  ;;  %v485_v48 = vld [vmem:[%s1921_s1 + $0x118] sm:$0xff] }
  0x1c   : > { %633 = vmatpush.msra.mxu1 %v475_v27  ;;  %860 = vmatpush.msra.mxu3 %v506_v29  ;;  %v470_v47 = vld [vmem:[%s1921_s1 + $0xa0] sm:$0xff]  ;;  %v501_v49 = vld [vmem:[%s1921_s1 + $0x198] sm:$0xff]  ;;  %v484_v52 = vld [vmem:[%s1921_s1 + $0x110] sm:$0xff] }
  0x1d   : > { %521 = vmatpush.msra.mxu0 %v458_v30  ;;  %748 = vmatpush.msra.mxu2 %v489_v32  ;;  %v453_v50 = vld [vmem:[%s1921_s1 + $0x18] sm:$0xff]  ;;  %v500_v53 = vld [vmem:[%s1921_s1 + $0x190] sm:$0xff]  ;;  %v483_v56 = vld [vmem:[%s1921_s1 + $0x108] sm:$0xff] }
  0x1e   : > { %634 = vmatpush.msra.mxu1 %v474_v31  ;;  %861 = vmatpush.msra.mxu3 %v505_v33  ;;  %v469_v51 = vld [vmem:[%s1921_s1 + $0x98] sm:$0xff]  ;;  %v452_v54 = vld [vmem:[%s1921_s1 + $0x10] sm:$0xff]  ;;  %v499_v57 = vld [vmem:[%s1921_s1 + $0x188] sm:$0xff] }
  0x1f   : > { %522 = vmatpush.msra.mxu0 %v457_v34  ;;  %749 = vmatpush.msra.mxu2 %v488_v36  ;;  %v468_v55 = vld [vmem:[%s1921_s1 + $0x90] sm:$0xff]  ;;  %v451_v58 = vld [vmem:[%s1921_s1 + $0x8] sm:$0xff]  ;;  %v482_v60 = vld [vmem:[%s1921_s1 + $0x100] sm:$0xff] }
  0x20   : > { %635 = vmatpush.msra.mxu1 %v473_v35  ;;  %862 = vmatpush.msra.mxu3 %v504_v37  ;;  %v467_v59 = vld [vmem:[%s1921_s1 + $0x88] sm:$0xff]  ;;  %v498_v61 = vld [vmem:[%s1921_s1 + $0x180] sm:$0xff]  ;;  %v324_v62 = vld [vmem:[%s1651_s30 + $0x10] sm:$0xff] }
  0x21   : > { %523 = vmatpush.msra.mxu0 %v456_v38  ;;  %750 = vmatpush.msra.mxu2 %v487_v40  ;;  %v325_v63 = vld [vmem:[%s1651_s30 + $0x18] sm:$0xff]  ;;  %v450_v0 = vld [vmem:[%s1921_s1] sm:$0xff]  ;;  %v323_v3 = vld [vmem:[%s1651_s30 + $0x8] sm:$0xff] }
  0x22   : > { %636 = vmatpush.msra.mxu1 %v472_v39  ;;  %863 = vmatpush.msra.mxu3 %v503_v41  ;;  %v466_v1 = vld [vmem:[%s1921_s1 + $0x80] sm:$0xff]  ;;  %v328_v4 = vld [vmem:[%s1651_s30 + $0x30] sm:$0xff]  ;;  %v329_v5 = vld [vmem:[%s1651_s30 + $0x38] sm:$0xff] }
  0x23   : > { %524 = vmatpush.msra.mxu0 %v455_v42  ;;  %751 = vmatpush.msra.mxu2 %v486_v44  ;;  %v322_v2 = vld [vmem:[%s1651_s30] sm:$0xff]  ;;  %v327_v7 = vld [vmem:[%s1651_s30 + $0x28] sm:$0xff]  ;;  %v332_v8 = vld [vmem:[%s1651_s30 + $0x50] sm:$0xff] }
  0x24   : > { %637 = vmatpush.msra.mxu1 %v471_v43  ;;  %864 = vmatpush.msra.mxu3 %v502_v45  ;;  %v326_v6 = vld [vmem:[%s1651_s30 + $0x20] sm:$0xff]  ;;  %v333_v9 = vld [vmem:[%s1651_s30 + $0x58] sm:$0xff]  ;;  %v331_v11 = vld [vmem:[%s1651_s30 + $0x48] sm:$0xff] }
  0x25   : > { %525 = vmatpush.msra.mxu0 %v454_v46  ;;  %752 = vmatpush.msra.mxu2 %v485_v48  ;;  %v330_v10 = vld [vmem:[%s1651_s30 + $0x40] sm:$0xff]  ;;  %v336_v12 = vld [vmem:[%s1651_s30 + $0x70] sm:$0xff]  ;;  %v337_v13 = vld [vmem:[%s1651_s30 + $0x78] sm:$0xff] }
  0x26   : > { %638 = vmatpush.msra.mxu1 %v470_v47  ;;  %865 = vmatpush.msra.mxu3 %v501_v49  ;;  %v334_v14 = vld [vmem:[%s1651_s30 + $0x60] sm:$0xff]  ;;  %v335_v15 = vld [vmem:[%s1651_s30 + $0x68] sm:$0xff]  ;;  %v340_v16 = vld [vmem:[%s1651_s30 + $0x90] sm:$0xff] }
  0x27   : > { %526 = vmatpush.msra.mxu0 %v453_v50  ;;  %753 = vmatpush.msra.mxu2 %v484_v52  ;;  %v341_v17 = vld [vmem:[%s1651_s30 + $0x98] sm:$0xff]  ;;  %v338_v18 = vld [vmem:[%s1651_s30 + $0x80] sm:$0xff]  ;;  %v339_v19 = vld [vmem:[%s1651_s30 + $0x88] sm:$0xff] }
  0x28   : > { %639 = vmatpush.msra.mxu1 %v469_v51  ;;  %866 = vmatpush.msra.mxu3 %v500_v53  ;;  %v344_v20 = vld [vmem:[%s1651_s30 + $0xb0] sm:$0xff]  ;;  %v345_v21 = vld [vmem:[%s1651_s30 + $0xb8] sm:$0xff]  ;;  %v342_v22 = vld [vmem:[%s1651_s30 + $0xa0] sm:$0xff] }
  0x29   : > { %527 = vmatpush.msra.mxu0 %v452_v54  ;;  %754 = vmatpush.msra.mxu2 %v483_v56  ;;  %v343_v23 = vld [vmem:[%s1651_s30 + $0xa8] sm:$0xff]  ;;  %v348_v24 = vld [vmem:[%s1651_s30 + $0xd0] sm:$0xff]  ;;  %v349_v25 = vld [vmem:[%s1651_s30 + $0xd8] sm:$0xff] }
  0x2a   : > { %640 = vmatpush.msra.mxu1 %v468_v55  ;;  %867 = vmatpush.msra.mxu3 %v499_v57  ;;  %v346_v26 = vld [vmem:[%s1651_s30 + $0xc0] sm:$0xff]  ;;  %v347_v27 = vld [vmem:[%s1651_s30 + $0xc8] sm:$0xff]  ;;  %v352_v28 = vld [vmem:[%s1651_s30 + $0xf0] sm:$0xff] }
  0x2b   : > { %528 = vmatpush.msra.mxu0 %v451_v58  ;;  %755 = vmatpush.msra.mxu2 %v482_v60  ;;  %v353_v29 = vld [vmem:[%s1651_s30 + $0xf8] sm:$0xff]  ;;  %v350_v30 = vld [vmem:[%s1651_s30 + $0xe0] sm:$0xff]  ;;  %v351_v31 = vld [vmem:[%s1651_s30 + $0xe8] sm:$0xff] }
  0x2c   : > { %641 = vmatpush.msra.mxu1 %v467_v59  ;;  %868 = vmatpush.msra.mxu3 %v498_v61  ;;  %v356_v32 = vld [vmem:[%s1651_s30 + $0x110] sm:$0xff]  ;;  %v357_v33 = vld [vmem:[%s1651_s30 + $0x118] sm:$0xff]  ;;  %v354_v34 = vld [vmem:[%s1651_s30 + $0x100] sm:$0xff] }
  0x2d   : > { %756 = vmatmul.f32.vlgmr.msra.gmra.mxu2 %v324_v62  ;;  %869 = vmatmul.f32.vlgmr.msra.gmra.mxu3 %v325_v63  ;;  %v355_v35 = vld [vmem:[%s1651_s30 + $0x108] sm:$0xff]  ;;  %v360_v36 = vld [vmem:[%s1651_s30 + $0x130] sm:$0xff]  ;;  %v361_v37 = vld [vmem:[%s1651_s30 + $0x138] sm:$0xff] }
  0x2e   : > { %529 = vmatpush.msra.mxu0 %v450_v0  ;;  %642 = vmatpush.msra.mxu1 %v466_v1  ;;  %v358_v38 = vld [vmem:[%s1651_s30 + $0x120] sm:$0xff]  ;;  %v359_v39 = vld [vmem:[%s1651_s30 + $0x128] sm:$0xff]  ;;  %v364_v40 = vld [vmem:[%s1651_s30 + $0x150] sm:$0xff] }
  0x2f   : > { %530 = vmatmul.f32.vlgmr.msra.gmra.mxu0 %v322_v2  ;;  %643 = vmatmul.f32.vlgmr.msra.gmra.mxu1 %v323_v3  ;;  %v365_v41 = vld [vmem:[%s1651_s30 + $0x158] sm:$0xff]  ;;  %v362_v42 = vld [vmem:[%s1651_s30 + $0x140] sm:$0xff]  ;;  %v363_v43 = vld [vmem:[%s1651_s30 + $0x148] sm:$0xff] }
  0x30   : > { %v368_v44 = vld [vmem:[%s1651_s30 + $0x170] sm:$0xff]  ;;  %v369_v45 = vld [vmem:[%s1651_s30 + $0x178] sm:$0xff]  ;;  %v366_v46 = vld [vmem:[%s1651_s30 + $0x160] sm:$0xff] }
  0x31   : > { %v367_v47 = vld [vmem:[%s1651_s30 + $0x168] sm:$0xff]  ;;  %v372_v48 = vld [vmem:[%s1651_s30 + $0x190] sm:$0xff]  ;;  %v373_v49 = vld [vmem:[%s1651_s30 + $0x198] sm:$0xff] }
  0x32   : > { %v370_v50 = vld [vmem:[%s1651_s30 + $0x180] sm:$0xff]  ;;  %v371_v51 = vld [vmem:[%s1651_s30 + $0x188] sm:$0xff]  ;;  %v376_v52 = vld [vmem:[%s1651_s30 + $0x1b0] sm:$0xff] }
  0x33   : > { %v377_v53 = vld [vmem:[%s1651_s30 + $0x1b8] sm:$0xff]  ;;  %v374_v54 = vld [vmem:[%s1651_s30 + $0x1a0] sm:$0xff]  ;;  %v375_v55 = vld [vmem:[%s1651_s30 + $0x1a8] sm:$0xff] }
  0x34   : > { %v380_v56 = vld [vmem:[%s1651_s30 + $0x1d0] sm:$0xff]  ;;  %v381_v57 = vld [vmem:[%s1651_s30 + $0x1d8] sm:$0xff]  ;;  %v378_v58 = vld [vmem:[%s1651_s30 + $0x1c0] sm:$0xff] }
  0x35   : > { %759 = vmatmul.f32.gmra.mxu2 %v328_v4  ;;  %872 = vmatmul.f32.gmra.mxu3 %v329_v5  ;;  %v379_v59 = vld [vmem:[%s1651_s30 + $0x1c8] sm:$0xff]  ;;  %v384_v60 = vld [vmem:[%s1651_s30 + $0x1f0] sm:$0xff]  ;;  %v385_v61 = vld [vmem:[%s1651_s30 + $0x1f8] sm:$0xff] }
  0x36   : > { %v382_v62 = vld [vmem:[%s1651_s30 + $0x1e0] sm:$0xff]  ;;  %v383_v63 = vld [vmem:[%s1651_s30 + $0x1e8] sm:$0xff]  ;;  %v388_v0 = vld [vmem:[%s1651_s30 + $0x210] sm:$0xff] }
  0x37   : > { %533 = vmatmul.f32.gmra.mxu0 %v326_v6  ;;  %646 = vmatmul.f32.gmra.mxu1 %v327_v7  ;;  %v389_v1 = vld [vmem:[%s1651_s30 + $0x218] sm:$0xff]  ;;  %v386_v4 = vld [vmem:[%s1651_s30 + $0x200] sm:$0xff]  ;;  %v387_v5 = vld [vmem:[%s1651_s30 + $0x208] sm:$0xff] }
  0x3d   : > { %762 = vmatmul.f32.gmra.mxu2 %v332_v8  ;;  %875 = vmatmul.f32.gmra.mxu3 %v333_v9 }
  0x3f   : > { %536 = vmatmul.f32.gmra.mxu0 %v330_v10  ;;  %649 = vmatmul.f32.gmra.mxu1 %v331_v11  ;;  %v1742_v10 = vld [vmem:[%s1922_s2] ss:$0 sm:$0xff]  ;;  %v392_v11 = vld [vmem:[%s1651_s30 + $0x230] sm:$0xff] }
  0x45   : > { %765 = vmatmul.f32.gmra.mxu2 %v336_v12  ;;  %878 = vmatmul.f32.gmra.mxu3 %v337_v13  ;;  %v393_v12 = vld [vmem:[%s1651_s30 + $0x238] sm:$0xff] }
  0x47   : > { %539 = vmatmul.f32.gmra.mxu0 %v334_v14  ;;  %652 = vmatmul.f32.gmra.mxu1 %v335_v15  ;;  %v1749_v14 = vld [vmem:[%s1923_s3] ss:$0 sm:$0xff] }
  0x4d   : > { %768 = vmatmul.f32.gmra.mxu2 %v340_v16  ;;  %881 = vmatmul.f32.gmra.mxu3 %v341_v17  ;;  %v390_v17 = vld [vmem:[%s1651_s30 + $0x220] sm:$0xff] }
  0x4f   : > { %542 = vmatmul.f32.gmra.mxu0 %v338_v18  ;;  %655 = vmatmul.f32.gmra.mxu1 %v339_v19  ;;  %v391_v18 = vld [vmem:[%s1651_s30 + $0x228] sm:$0xff] }
  0x55   : > { %771 = vmatmul.f32.gmra.mxu2 %v344_v20  ;;  %884 = vmatmul.f32.gmra.mxu3 %v345_v21 }
  0x57   : > { %545 = vmatmul.f32.gmra.mxu0 %v342_v22  ;;  %658 = vmatmul.f32.gmra.mxu1 %v343_v23 }
  0x5d   : > { %774 = vmatmul.f32.gmra.mxu2 %v348_v24  ;;  %887 = vmatmul.f32.gmra.mxu3 %v349_v25  ;;  %v396_v25 = vld [vmem:[%s1651_s30 + $0x250] sm:$0xff] }
  0x5f   : > { %548 = vmatmul.f32.gmra.mxu0 %v346_v26  ;;  %661 = vmatmul.f32.gmra.mxu1 %v347_v27  ;;  %v397_v26 = vld [vmem:[%s1651_s30 + $0x258] sm:$0xff] }
  0x65   : > { %777 = vmatmul.f32.gmra.mxu2 %v352_v28  ;;  %890 = vmatmul.f32.gmra.mxu3 %v353_v29 }
  0x67   : > { %551 = vmatmul.f32.gmra.mxu0 %v350_v30  ;;  %664 = vmatmul.f32.gmra.mxu1 %v351_v31  ;;  %v394_v30 = vld [vmem:[%s1651_s30 + $0x240] sm:$0xff]  ;;  %v395_v31 = vld [vmem:[%s1651_s30 + $0x248] sm:$0xff] }
  0x6d   : > { %780 = vmatmul.f32.gmra.mxu2 %v356_v32  ;;  %893 = vmatmul.f32.gmra.mxu3 %v357_v33 }
  0x6f   : > { %554 = vmatmul.f32.gmra.mxu0 %v354_v34  ;;  %667 = vmatmul.f32.gmra.mxu1 %v355_v35 }
  0x75   : > { %783 = vmatmul.f32.gmra.mxu2 %v360_v36  ;;  %896 = vmatmul.f32.gmra.mxu3 %v361_v37 }
  0x77   : > { %557 = vmatmul.f32.gmra.mxu0 %v358_v38  ;;  %670 = vmatmul.f32.gmra.mxu1 %v359_v39  ;;  %v400_v39 = vld [vmem:[%s1651_s30 + $0x270] sm:$0xff] }
  0x7d   : > { %786 = vmatmul.f32.gmra.mxu2 %v364_v40  ;;  %899 = vmatmul.f32.gmra.mxu3 %v365_v41  ;;  %v401_v40 = vld [vmem:[%s1651_s30 + $0x278] sm:$0xff] }
  0x7f   : > { %560 = vmatmul.f32.gmra.mxu0 %v362_v42  ;;  %673 = vmatmul.f32.gmra.mxu1 %v363_v43 }
  0x85   : > { %789 = vmatmul.f32.gmra.mxu2 %v368_v44  ;;  %902 = vmatmul.f32.gmra.mxu3 %v369_v45  ;;  %v398_v44 = vld [vmem:[%s1651_s30 + $0x260] sm:$0xff]  ;;  %v399_v45 = vld [vmem:[%s1651_s30 + $0x268] sm:$0xff] }
  0x87   : > { %563 = vmatmul.f32.gmra.mxu0 %v366_v46  ;;  %676 = vmatmul.f32.gmra.mxu1 %v367_v47 }
  0x8d   : > { %792 = vmatmul.f32.gmra.mxu2 %v372_v48  ;;  %905 = vmatmul.f32.gmra.mxu3 %v373_v49 }
  0x8f   : > { %566 = vmatmul.f32.gmra.mxu0 %v370_v50  ;;  %679 = vmatmul.f32.gmra.mxu1 %v371_v51 }
  0x95   : > { %795 = vmatmul.f32.gmra.mxu2 %v376_v52  ;;  %908 = vmatmul.f32.gmra.mxu3 %v377_v53  ;;  %v404_v53 = vld [vmem:[%s1651_s30 + $0x290] sm:$0xff] }
  0x97   : > { %569 = vmatmul.f32.gmra.mxu0 %v374_v54  ;;  %682 = vmatmul.f32.gmra.mxu1 %v375_v55  ;;  %v405_v54 = vld [vmem:[%s1651_s30 + $0x298] sm:$0xff] }
  0x9d   : > { %798 = vmatmul.f32.gmra.mxu2 %v380_v56  ;;  %911 = vmatmul.f32.gmra.mxu3 %v381_v57 }
  0x9f   : > { %572 = vmatmul.f32.gmra.mxu0 %v378_v58  ;;  %685 = vmatmul.f32.gmra.mxu1 %v379_v59  ;;  %v402_v58 = vld [vmem:[%s1651_s30 + $0x280] sm:$0xff]  ;;  %v403_v59 = vld [vmem:[%s1651_s30 + $0x288] sm:$0xff] }
  0xa5   : > { %801 = vmatmul.f32.gmra.mxu2 %v384_v60  ;;  %914 = vmatmul.f32.gmra.mxu3 %v385_v61 }
  0xa7   : > { %575 = vmatmul.f32.gmra.mxu0 %v382_v62  ;;  %688 = vmatmul.f32.gmra.mxu1 %v383_v63 }
  0xac   : > { %v531_v2 = vpop.f32.mrf.mxu0  ;;  %v644_v3 = vpop.f32.mrf.mxu1 }
  0xad   : > { %804 = vmatmul.f32.gmra.mxu2 %v388_v0  ;;  %v645_v6 = vadd.f32 %v644_v3, %v531_v2  ;;  %917 = vmatmul.f32.gmra.mxu3 %v389_v1  ;;  %v408_v3 = vld [vmem:[%s1651_s30 + $0x2b0] sm:$0xff] }
  0xaf   : > { %578 = vmatmul.f32.gmra.mxu0 %v386_v4  ;;  %691 = vmatmul.f32.gmra.mxu1 %v387_v5  ;;  %v409_v4 = vld [vmem:[%s1651_s30 + $0x2b8] sm:$0xff] }
  0xb0   : > { %v757_v7 = vpop.f32.mrf.mxu2  ;;  %v870_v8 = vpop.f32.mrf.mxu3 }
  0xb1   : > { %v758_v9 = vadd.f32 %v757_v7, %v645_v6 }
  0xb3   : > { %v871_v13 = vadd.f32 %v870_v8, %v758_v9  ;;  %v406_v8 = vld [vmem:[%s1651_s30 + $0x2a0] sm:$0xff]  ;;  %v407_v9 = vld [vmem:[%s1651_s30 + $0x2a8] sm:$0xff] }
  0xb4   : > { %v534_v15 = vpop.f32.mrf.mxu0  ;;  %v647_v16 = vpop.f32.mrf.mxu1 }
  0xb5   : > { %v1069_v19 = vmul.f32 %v1742_v10, %v871_v13  ;;  %807 = vmatmul.f32.gmra.mxu2 %v392_v11  ;;  %v648_v20 = vadd.f32 %v647_v16, %v534_v15  ;;  %920 = vmatmul.f32.gmra.mxu3 %v393_v12 }
  0xb7   : > { %v1105_v21 = vadd.f32 %v1749_v14, %v1069_v19  ;;  %581 = vmatmul.f32.gmra.mxu0 %v390_v17  ;;  %694 = vmatmul.f32.gmra.mxu1 %v391_v18  ;;  %v412_v19 = vld [vmem:[%s1651_s30 + $0x2d0] sm:$0xff] }
  0xb8   : > { %v760_v22 = vpop.f32.mrf.mxu2  ;;  %v873_v23 = vpop.f32.mrf.mxu3 }
  0xb9   : > { %1327 = vtanh.f32 %v1105_v21  ;;  %v761_v24 = vadd.f32 %v760_v22, %v648_v20  ;;  %v413_v20 = vld [vmem:[%s1651_s30 + $0x2d8] sm:$0xff] }
  0xbb   : > { %v874_v27 = vadd.f32 %v873_v23, %v761_v24  ;;  %v410_v24 = vld [vmem:[%s1651_s30 + $0x2c0] sm:$0xff] }
  0xbc   : > { %v537_v28 = vpop.f32.mrf.mxu0  ;;  %v650_v29 = vpop.f32.mrf.mxu1 }
  0xbd   : > { %v1070_v32 = vmul.f32 %v1742_v10, %v874_v27  ;;  %810 = vmatmul.f32.gmra.mxu2 %v396_v25  ;;  %v651_v33 = vadd.f32 %v650_v29, %v537_v28  ;;  %923 = vmatmul.f32.gmra.mxu3 %v397_v26  ;;  %v411_v25 = vld [vmem:[%s1651_s30 + $0x2c8] sm:$0xff] }
  0xbf   : > { %v1328_v34 = vpop.eup %1327  ;;  %v1106_v35 = vadd.f32 %v1749_v14, %v1070_v32  ;;  %584 = vmatmul.f32.gmra.mxu0 %v394_v30  ;;  %697 = vmatmul.f32.gmra.mxu1 %v395_v31 }
  0xc0   : > { %1169 = vst [vmem:[%s1763_s26] sm:$0xff] %v1328_v34  ;;  %v763_v36 = vpop.f32.mrf.mxu2  ;;  %v876_v37 = vpop.f32.mrf.mxu3  ;;  %v417_v34 = vld [vmem:[%s1651_s30 + $0x2f8] sm:$0xff] }
  0xc1   : > { %1329 = vtanh.f32 %v1106_v35  ;;  %v764_v38 = vadd.f32 %v763_v36, %v651_v33  ;;  %v416_v33 = vld [vmem:[%s1651_s30 + $0x2f0] sm:$0xff] }
  0xc3   : > { %v877_v41 = vadd.f32 %v876_v37, %v764_v38  ;;  %v414_v38 = vld [vmem:[%s1651_s30 + $0x2e0] sm:$0xff] }
  0xc4   : > { %v540_v42 = vpop.f32.mrf.mxu0  ;;  %v653_v43 = vpop.f32.mrf.mxu1 }
  0xc5   : > { %v1071_v46 = vmul.f32 %v1742_v10, %v877_v41  ;;  %813 = vmatmul.f32.gmra.mxu2 %v400_v39  ;;  %v654_v47 = vadd.f32 %v653_v43, %v540_v42  ;;  %926 = vmatmul.f32.gmra.mxu3 %v401_v40  ;;  %v415_v39 = vld [vmem:[%s1651_s30 + $0x2e8] sm:$0xff] }
  0xc7   : > { %v1330_v48 = vpop.eup %1329  ;;  %v1107_v49 = vadd.f32 %v1749_v14, %v1071_v46  ;;  %587 = vmatmul.f32.gmra.mxu0 %v398_v44  ;;  %700 = vmatmul.f32.gmra.mxu1 %v399_v45 }
  0xc8   : > { %1170 = vst [vmem:[%s1763_s26 + $0x8] sm:$0xff] %v1330_v48  ;;  %v766_v50 = vpop.f32.mrf.mxu2  ;;  %v879_v51 = vpop.f32.mrf.mxu3  ;;  %v421_v48 = vld [vmem:[%s1651_s30 + $0x318] sm:$0xff] }
  0xc9   : > { %1331 = vtanh.f32 %v1107_v49  ;;  %v767_v52 = vadd.f32 %v766_v50, %v654_v47  ;;  %v420_v47 = vld [vmem:[%s1651_s30 + $0x310] sm:$0xff] }
  0xcb   : > { %v880_v55 = vadd.f32 %v879_v51, %v767_v52  ;;  %v418_v52 = vld [vmem:[%s1651_s30 + $0x300] sm:$0xff] }
  0xcc   : > { %v543_v56 = vpop.f32.mrf.mxu0  ;;  %v656_v57 = vpop.f32.mrf.mxu1 }
  0xcd   : > { %v1072_v60 = vmul.f32 %v1742_v10, %v880_v55  ;;  %816 = vmatmul.f32.gmra.mxu2 %v404_v53  ;;  %v657_v61 = vadd.f32 %v656_v57, %v543_v56  ;;  %929 = vmatmul.f32.gmra.mxu3 %v405_v54  ;;  %v419_v53 = vld [vmem:[%s1651_s30 + $0x308] sm:$0xff] }
  0xcf   : > { %v1332_v62 = vpop.eup %1331  ;;  %v1108_v63 = vadd.f32 %v1749_v14, %v1072_v60  ;;  %590 = vmatmul.f32.gmra.mxu0 %v402_v58  ;;  %703 = vmatmul.f32.gmra.mxu1 %v403_v59 }
  0xd0   : > { %1171 = vst [vmem:[%s1763_s26 + $0x10] sm:$0xff] %v1332_v62  ;;  %v769_v0 = vpop.f32.mrf.mxu2  ;;  %v882_v1 = vpop.f32.mrf.mxu3  ;;  %v425_v62 = vld [vmem:[%s1651_s30 + $0x338] sm:$0xff] }
  0xd1   : > { %1333 = vtanh.f32 %v1108_v63  ;;  %v770_v2 = vadd.f32 %v769_v0, %v657_v61  ;;  %v424_v61 = vld [vmem:[%s1651_s30 + $0x330] sm:$0xff] }
  0xd3   : > { %v883_v5 = vadd.f32 %v882_v1, %v770_v2  ;;  %v422_v2 = vld [vmem:[%s1651_s30 + $0x320] sm:$0xff] }
  0xd4   : > { %v546_v6 = vpop.f32.mrf.mxu0  ;;  %v659_v7 = vpop.f32.mrf.mxu1 }
  0xd5   : > { %v1073_v11 = vmul.f32 %v1742_v10, %v883_v5  ;;  %819 = vmatmul.f32.gmra.mxu2 %v408_v3  ;;  %v660_v12 = vadd.f32 %v659_v7, %v546_v6  ;;  %932 = vmatmul.f32.gmra.mxu3 %v409_v4  ;;  %v423_v3 = vld [vmem:[%s1651_s30 + $0x328] sm:$0xff] }
  0xd7   : > { %v1334_v13 = vpop.eup %1333  ;;  %v1109_v15 = vadd.f32 %v1749_v14, %v1073_v11  ;;  %593 = vmatmul.f32.gmra.mxu0 %v406_v8  ;;  %706 = vmatmul.f32.gmra.mxu1 %v407_v9 }
  0xd8   : > { %1172 = vst [vmem:[%s1763_s26 + $0x18] sm:$0xff] %v1334_v13  ;;  %v772_v16 = vpop.f32.mrf.mxu2  ;;  %v885_v17 = vpop.f32.mrf.mxu3  ;;  %v429_v13 = vld [vmem:[%s1651_s30 + $0x358] sm:$0xff] }
  0xd9   : > { %1335 = vtanh.f32 %v1109_v15  ;;  %v773_v18 = vadd.f32 %v772_v16, %v660_v12  ;;  %v428_v12 = vld [vmem:[%s1651_s30 + $0x350] sm:$0xff] }
  0xdb   : > { %v886_v21 = vadd.f32 %v885_v17, %v773_v18  ;;  %v426_v18 = vld [vmem:[%s1651_s30 + $0x340] sm:$0xff] }
  0xdc   : > { %v549_v22 = vpop.f32.mrf.mxu0  ;;  %v662_v23 = vpop.f32.mrf.mxu1 }
  0xdd   : > { %v1074_v26 = vmul.f32 %v1742_v10, %v886_v21  ;;  %822 = vmatmul.f32.gmra.mxu2 %v412_v19  ;;  %v663_v27 = vadd.f32 %v662_v23, %v549_v22  ;;  %935 = vmatmul.f32.gmra.mxu3 %v413_v20  ;;  %v427_v19 = vld [vmem:[%s1651_s30 + $0x348] sm:$0xff] }
  0xdf   : > { %v1336_v28 = vpop.eup %1335  ;;  %v1110_v29 = vadd.f32 %v1749_v14, %v1074_v26  ;;  %596 = vmatmul.f32.gmra.mxu0 %v410_v24  ;;  %709 = vmatmul.f32.gmra.mxu1 %v411_v25 }
  0xe0   : > { %1173 = vst [vmem:[%s1763_s26 + $0x20] sm:$0xff] %v1336_v28  ;;  %v775_v30 = vpop.f32.mrf.mxu2  ;;  %v888_v31 = vpop.f32.mrf.mxu3  ;;  %v433_v28 = vld [vmem:[%s1651_s30 + $0x378] sm:$0xff] }
  0xe1   : > { %1337 = vtanh.f32 %v1110_v29  ;;  %v776_v32 = vadd.f32 %v775_v30, %v663_v27  ;;  %v432_v27 = vld [vmem:[%s1651_s30 + $0x370] sm:$0xff] }
  0xe3   : > { %v889_v35 = vadd.f32 %v888_v31, %v776_v32  ;;  %v430_v32 = vld [vmem:[%s1651_s30 + $0x360] sm:$0xff] }
  0xe4   : > { %v552_v36 = vpop.f32.mrf.mxu0  ;;  %v665_v37 = vpop.f32.mrf.mxu1 }
  0xe5   : > { %v1075_v40 = vmul.f32 %v1742_v10, %v889_v35  ;;  %825 = vmatmul.f32.gmra.mxu2 %v416_v33  ;;  %v666_v41 = vadd.f32 %v665_v37, %v552_v36  ;;  %938 = vmatmul.f32.gmra.mxu3 %v417_v34  ;;  %v431_v33 = vld [vmem:[%s1651_s30 + $0x368] sm:$0xff] }
  0xe7   : > { %v1338_v42 = vpop.eup %1337  ;;  %v1111_v43 = vadd.f32 %v1749_v14, %v1075_v40  ;;  %599 = vmatmul.f32.gmra.mxu0 %v414_v38  ;;  %712 = vmatmul.f32.gmra.mxu1 %v415_v39 }
  0xe8   : > { %1174 = vst [vmem:[%s1763_s26 + $0x28] sm:$0xff] %v1338_v42  ;;  %v778_v44 = vpop.f32.mrf.mxu2  ;;  %v891_v45 = vpop.f32.mrf.mxu3  ;;  %v437_v42 = vld [vmem:[%s1651_s30 + $0x398] sm:$0xff] }
  0xe9   : > { %1339 = vtanh.f32 %v1111_v43  ;;  %v779_v46 = vadd.f32 %v778_v44, %v666_v41  ;;  %v436_v41 = vld [vmem:[%s1651_s30 + $0x390] sm:$0xff] }
  0xeb   : > { %v892_v49 = vadd.f32 %v891_v45, %v779_v46  ;;  %v434_v46 = vld [vmem:[%s1651_s30 + $0x380] sm:$0xff] }
  0xec   : > { %v555_v50 = vpop.f32.mrf.mxu0  ;;  %v668_v51 = vpop.f32.mrf.mxu1 }
  0xed   : > { %v1076_v54 = vmul.f32 %v1742_v10, %v892_v49  ;;  %828 = vmatmul.f32.gmra.mxu2 %v420_v47  ;;  %v669_v55 = vadd.f32 %v668_v51, %v555_v50  ;;  %941 = vmatmul.f32.gmra.mxu3 %v421_v48  ;;  %v435_v47 = vld [vmem:[%s1651_s30 + $0x388] sm:$0xff] }
  0xef   : > { %v1340_v56 = vpop.eup %1339  ;;  %v1112_v57 = vadd.f32 %v1749_v14, %v1076_v54  ;;  %602 = vmatmul.f32.gmra.mxu0 %v418_v52  ;;  %715 = vmatmul.f32.gmra.mxu1 %v419_v53 }
  0xf0   : > { %1175 = vst [vmem:[%s1763_s26 + $0x30] sm:$0xff] %v1340_v56  ;;  %v781_v58 = vpop.f32.mrf.mxu2  ;;  %v894_v59 = vpop.f32.mrf.mxu3  ;;  %v441_v56 = vld [vmem:[%s1651_s30 + $0x3b8] sm:$0xff] }
  0xf1   : > { %1341 = vtanh.f32 %v1112_v57  ;;  %v782_v60 = vadd.f32 %v781_v58, %v669_v55  ;;  %v440_v55 = vld [vmem:[%s1651_s30 + $0x3b0] sm:$0xff] }
  0xf3   : > { %v895_v63 = vadd.f32 %v894_v59, %v782_v60  ;;  %v438_v60 = vld [vmem:[%s1651_s30 + $0x3a0] sm:$0xff] }
  0xf4   : > { %v558_v0 = vpop.f32.mrf.mxu0  ;;  %v671_v1 = vpop.f32.mrf.mxu1 }
  0xf5   : > { %v1077_v4 = vmul.f32 %v1742_v10, %v895_v63  ;;  %831 = vmatmul.f32.gmra.mxu2 %v424_v61  ;;  %v672_v5 = vadd.f32 %v671_v1, %v558_v0  ;;  %944 = vmatmul.f32.gmra.mxu3 %v425_v62  ;;  %v439_v61 = vld [vmem:[%s1651_s30 + $0x3a8] sm:$0xff] }
  0xf7   : > { %v1342_v6 = vpop.eup %1341  ;;  %v1113_v7 = vadd.f32 %v1749_v14, %v1077_v4  ;;  %605 = vmatmul.f32.gmra.mxu0 %v422_v2  ;;  %718 = vmatmul.f32.gmra.mxu1 %v423_v3 }
  0xf8   : > { %1176 = vst [vmem:[%s1763_s26 + $0x38] sm:$0xff] %v1342_v6  ;;  %v784_v8 = vpop.f32.mrf.mxu2  ;;  %v897_v9 = vpop.f32.mrf.mxu3  ;;  %v445_v6 = vld [vmem:[%s1651_s30 + $0x3d8] sm:$0xff] }
  0xf9   : > { %1343 = vtanh.f32 %v1113_v7  ;;  %v785_v11 = vadd.f32 %v784_v8, %v672_v5  ;;  %v444_v5 = vld [vmem:[%s1651_s30 + $0x3d0] sm:$0xff] }
  0xfb   : > { %v898_v15 = vadd.f32 %v897_v9, %v785_v11  ;;  %v442_v11 = vld [vmem:[%s1651_s30 + $0x3c0] sm:$0xff] }
  0xfc   : > { %v561_v16 = vpop.f32.mrf.mxu0  ;;  %v674_v17 = vpop.f32.mrf.mxu1 }
  0xfd   : > { %v1078_v20 = vmul.f32 %v1742_v10, %v898_v15  ;;  %834 = vmatmul.f32.gmra.mxu2 %v428_v12  ;;  %v675_v21 = vadd.f32 %v674_v17, %v561_v16  ;;  %947 = vmatmul.f32.gmra.mxu3 %v429_v13  ;;  %v443_v12 = vld [vmem:[%s1651_s30 + $0x3c8] sm:$0xff] }
  0xff   : > { %v1344_v22 = vpop.eup %1343  ;;  %v1114_v23 = vadd.f32 %v1749_v14, %v1078_v20  ;;  %608 = vmatmul.f32.gmra.mxu0 %v426_v18  ;;  %721 = vmatmul.f32.gmra.mxu1 %v427_v19 }
 0x100   : > { %1177 = vst [vmem:[%s1763_s26 + $0x40] sm:$0xff] %v1344_v22  ;;  %v787_v24 = vpop.f32.mrf.mxu2  ;;  %v900_v25 = vpop.f32.mrf.mxu3  ;;  %v449_v22 = vld [vmem:[%s1651_s30 + $0x3f8] sm:$0xff] }
 0x101   : > { %1345 = vtanh.f32 %v1114_v23  ;;  %v788_v26 = vadd.f32 %v787_v24, %v675_v21  ;;  %v448_v21 = vld [vmem:[%s1651_s30 + $0x3f0] sm:$0xff] }
 0x103   : > { %v901_v29 = vadd.f32 %v900_v25, %v788_v26  ;;  %v446_v26 = vld [vmem:[%s1651_s30 + $0x3e0] sm:$0xff] }
 0x104   : > { %v564_v30 = vpop.f32.mrf.mxu0  ;;  %v677_v31 = vpop.f32.mrf.mxu1 }
 0x105   : > { %v1079_v34 = vmul.f32 %v1742_v10, %v901_v29  ;;  %837 = vmatmul.f32.gmra.mxu2 %v432_v27  ;;  %v678_v35 = vadd.f32 %v677_v31, %v564_v30  ;;  %950 = vmatmul.f32.gmra.mxu3 %v433_v28  ;;  %v447_v27 = vld [vmem:[%s1651_s30 + $0x3e8] sm:$0xff] }
 0x107   : > { %v1346_v36 = vpop.eup %1345  ;;  %v1115_v37 = vadd.f32 %v1749_v14, %v1079_v34  ;;  %611 = vmatmul.f32.gmra.mxu0 %v430_v32  ;;  %724 = vmatmul.f32.gmra.mxu1 %v431_v33 }
 0x108   : > { %1178 = vst [vmem:[%s1763_s26 + $0x48] sm:$0xff] %v1346_v36  ;;  %v790_v38 = vpop.f32.mrf.mxu2  ;;  %v903_v39 = vpop.f32.mrf.mxu3 }
 0x109   : > { %1347 = vtanh.f32 %v1115_v37  ;;  %v791_v40 = vadd.f32 %v790_v38, %v678_v35 }
 0x10b   : > { %v904_v43 = vadd.f32 %v903_v39, %v791_v40 }
 0x10c   : > { %v567_v44 = vpop.f32.mrf.mxu0  ;;  %v680_v45 = vpop.f32.mrf.mxu1 }
 0x10d   : > { %v1080_v48 = vmul.f32 %v1742_v10, %v904_v43  ;;  %840 = vmatmul.f32.gmra.mxu2 %v436_v41  ;;  %v681_v49 = vadd.f32 %v680_v45, %v567_v44  ;;  %953 = vmatmul.f32.gmra.mxu3 %v437_v42 }
 0x10f   : > { %v1348_v50 = vpop.eup %1347  ;;  %v1116_v51 = vadd.f32 %v1749_v14, %v1080_v48  ;;  %614 = vmatmul.f32.gmra.mxu0 %v434_v46  ;;  %727 = vmatmul.f32.gmra.mxu1 %v435_v47 }
 0x110   : > { %1179 = vst [vmem:[%s1763_s26 + $0x50] sm:$0xff] %v1348_v50  ;;  %v793_v52 = vpop.f32.mrf.mxu2  ;;  %v906_v53 = vpop.f32.mrf.mxu3 }
 0x111   : > { %1349 = vtanh.f32 %v1116_v51  ;;  %v794_v54 = vadd.f32 %v793_v52, %v681_v49 }
 0x113   : > { %v907_v57 = vadd.f32 %v906_v53, %v794_v54 }
 0x114   : > { %v570_v58 = vpop.f32.mrf.mxu0  ;;  %v683_v59 = vpop.f32.mrf.mxu1 }
 0x115   : > { %v1081_v62 = vmul.f32 %v1742_v10, %v907_v57  ;;  %843 = vmatmul.f32.gmra.mxu2 %v440_v55  ;;  %v684_v63 = vadd.f32 %v683_v59, %v570_v58  ;;  %956 = vmatmul.f32.gmra.mxu3 %v441_v56 }
 0x117   : > { %v1350_v0 = vpop.eup %1349  ;;  %v1117_v1 = vadd.f32 %v1749_v14, %v1081_v62  ;;  %617 = vmatmul.f32.gmra.mxu0 %v438_v60  ;;  %730 = vmatmul.f32.gmra.mxu1 %v439_v61 }
 0x118   : > { %1180 = vst [vmem:[%s1763_s26 + $0x58] sm:$0xff] %v1350_v0  ;;  %v796_v2 = vpop.f32.mrf.mxu2  ;;  %v909_v3 = vpop.f32.mrf.mxu3 }
 0x119   : > { %1351 = vtanh.f32 %v1117_v1  ;;  %v797_v4 = vadd.f32 %v796_v2, %v684_v63 }
 0x11b   : > { %v910_v7 = vadd.f32 %v909_v3, %v797_v4 }
 0x11c   : > { %v573_v8 = vpop.f32.mrf.mxu0  ;;  %v686_v9 = vpop.f32.mrf.mxu1 }
 0x11d   : > { %v1082_v13 = vmul.f32 %v1742_v10, %v910_v7  ;;  %846 = vmatmul.f32.gmra.mxu2 %v444_v5  ;;  %v687_v15 = vadd.f32 %v686_v9, %v573_v8  ;;  %959 = vmatmul.f32.gmra.mxu3 %v445_v6 }
 0x11f   : > { %v1352_v16 = vpop.eup %1351  ;;  %v1118_v17 = vadd.f32 %v1749_v14, %v1082_v13  ;;  %620 = vmatmul.f32.gmra.mxu0 %v442_v11  ;;  %733 = vmatmul.f32.gmra.mxu1 %v443_v12 }
 0x120   : > { %1181 = vst [vmem:[%s1763_s26 + $0x60] sm:$0xff] %v1352_v16  ;;  %v799_v18 = vpop.f32.mrf.mxu2  ;;  %v912_v19 = vpop.f32.mrf.mxu3 }
 0x121   : > { %1353 = vtanh.f32 %v1118_v17  ;;  %v800_v20 = vadd.f32 %v799_v18, %v687_v15 }
 0x123   : > { %v913_v23 = vadd.f32 %v912_v19, %v800_v20 }
 0x124   : > { %v576_v24 = vpop.f32.mrf.mxu0  ;;  %v689_v25 = vpop.f32.mrf.mxu1 }
 0x125   : > { %v1083_v28 = vmul.f32 %v1742_v10, %v913_v23  ;;  %849 = vmatmul.f32.gmra.mxu2 %v448_v21  ;;  %v690_v29 = vadd.f32 %v689_v25, %v576_v24  ;;  %962 = vmatmul.f32.gmra.mxu3 %v449_v22 }
 0x127   : > { %v1354_v30 = vpop.eup %1353  ;;  %v1119_v31 = vadd.f32 %v1749_v14, %v1083_v28  ;;  %623 = vmatmul.f32.gmra.mxu0 %v446_v26  ;;  %736 = vmatmul.f32.gmra.mxu1 %v447_v27 }
 0x128   : > { %1182 = vst [vmem:[%s1763_s26 + $0x68] sm:$0xff] %v1354_v30  ;;  %v802_v32 = vpop.f32.mrf.mxu2  ;;  %v915_v33 = vpop.f32.mrf.mxu3 }
 0x129   : > { %1355 = vtanh.f32 %v1119_v31  ;;  %v803_v34 = vadd.f32 %v802_v32, %v690_v29 }
 0x12b   : > { %v916_v35 = vadd.f32 %v915_v33, %v803_v34 }
 0x12c   : > { %v579_v36 = vpop.f32.mrf.mxu0  ;;  %v692_v37 = vpop.f32.mrf.mxu1 }
 0x12d   : > { %v1084_v38 = vmul.f32 %v1742_v10, %v916_v35  ;;  %v693_v39 = vadd.f32 %v692_v37, %v579_v36 }
 0x12f   : > { %v1356_v40 = vpop.eup %1355  ;;  %v1120_v41 = vadd.f32 %v1749_v14, %v1084_v38 }
 0x130   : > { %1183 = vst [vmem:[%s1763_s26 + $0x70] sm:$0xff] %v1356_v40  ;;  %v805_v42 = vpop.f32.mrf.mxu2  ;;  %v918_v43 = vpop.f32.mrf.mxu3 }
 0x131   : > { %1357 = vtanh.f32 %v1120_v41  ;;  %v806_v44 = vadd.f32 %v805_v42, %v693_v39 }
 0x133   : > { %v919_v45 = vadd.f32 %v918_v43, %v806_v44 }
 0x134   : > { %v582_v46 = vpop.f32.mrf.mxu0  ;;  %v695_v47 = vpop.f32.mrf.mxu1 }
 0x135   : > { %v1085_v48 = vmul.f32 %v1742_v10, %v919_v45  ;;  %v696_v49 = vadd.f32 %v695_v47, %v582_v46 }
 0x137   : > { %v1358_v50 = vpop.eup %1357  ;;  %v1121_v51 = vadd.f32 %v1749_v14, %v1085_v48 }
 0x138   : > { %1184 = vst [vmem:[%s1763_s26 + $0x78] sm:$0xff] %v1358_v50  ;;  %v808_v52 = vpop.f32.mrf.mxu2  ;;  %v921_v53 = vpop.f32.mrf.mxu3 }
 0x139   : > { %1359 = vtanh.f32 %v1121_v51  ;;  %v809_v54 = vadd.f32 %v808_v52, %v696_v49 }
 0x13b   : > { %v922_v55 = vadd.f32 %v921_v53, %v809_v54 }
 0x13c   : > { %v585_v56 = vpop.f32.mrf.mxu0  ;;  %v698_v57 = vpop.f32.mrf.mxu1 }
 0x13d   : > { %v1086_v58 = vmul.f32 %v1742_v10, %v922_v55  ;;  %v699_v59 = vadd.f32 %v698_v57, %v585_v56 }
 0x13f   : > { %v1360_v60 = vpop.eup %1359  ;;  %v1122_v61 = vadd.f32 %v1749_v14, %v1086_v58 }
 0x140   : > { %1185 = vst [vmem:[%s1763_s26 + $0x80] sm:$0xff] %v1360_v60  ;;  %v811_v62 = vpop.f32.mrf.mxu2  ;;  %v924_v63 = vpop.f32.mrf.mxu3 }
 0x141   : > { %1361 = vtanh.f32 %v1122_v61  ;;  %v812_v0 = vadd.f32 %v811_v62, %v699_v59 }
 0x143   : > { %v925_v1 = vadd.f32 %v924_v63, %v812_v0 }
 0x144   : > { %v588_v2 = vpop.f32.mrf.mxu0  ;;  %v701_v3 = vpop.f32.mrf.mxu1 }
 0x145   : > { %v1087_v4 = vmul.f32 %v1742_v10, %v925_v1  ;;  %v702_v5 = vadd.f32 %v701_v3, %v588_v2 }
 0x147   : > { %v1362_v6 = vpop.eup %1361  ;;  %v1123_v7 = vadd.f32 %v1749_v14, %v1087_v4 }
 0x148   : > { %1186 = vst [vmem:[%s1763_s26 + $0x88] sm:$0xff] %v1362_v6  ;;  %v814_v8 = vpop.f32.mrf.mxu2  ;;  %v927_v9 = vpop.f32.mrf.mxu3 }
 0x149   : > { %1363 = vtanh.f32 %v1123_v7  ;;  %v815_v11 = vadd.f32 %v814_v8, %v702_v5 }
 0x14b   : > { %v928_v12 = vadd.f32 %v927_v9, %v815_v11 }
 0x14c   : > { %v591_v13 = vpop.f32.mrf.mxu0  ;;  %v704_v15 = vpop.f32.mrf.mxu1 }
 0x14d   : > { %v1088_v16 = vmul.f32 %v1742_v10, %v928_v12  ;;  %v705_v17 = vadd.f32 %v704_v15, %v591_v13 }
 0x14f   : > { %v1364_v18 = vpop.eup %1363  ;;  %v1124_v19 = vadd.f32 %v1749_v14, %v1088_v16 }
 0x150   : > { %1187 = vst [vmem:[%s1763_s26 + $0x90] sm:$0xff] %v1364_v18  ;;  %v817_v20 = vpop.f32.mrf.mxu2  ;;  %v930_v21 = vpop.f32.mrf.mxu3 }
 0x151   : > { %1365 = vtanh.f32 %v1124_v19  ;;  %v818_v22 = vadd.f32 %v817_v20, %v705_v17 }
 0x153   : > { %v931_v23 = vadd.f32 %v930_v21, %v818_v22 }
 0x154   : > { %v594_v24 = vpop.f32.mrf.mxu0  ;;  %v707_v25 = vpop.f32.mrf.mxu1 }
 0x155   : > { %v1089_v26 = vmul.f32 %v1742_v10, %v931_v23  ;;  %v708_v27 = vadd.f32 %v707_v25, %v594_v24 }
 0x157   : > { %v1366_v28 = vpop.eup %1365  ;;  %v1125_v29 = vadd.f32 %v1749_v14, %v1089_v26 }
 0x158   : > { %1188 = vst [vmem:[%s1763_s26 + $0x98] sm:$0xff] %v1366_v28  ;;  %v820_v30 = vpop.f32.mrf.mxu2  ;;  %v933_v31 = vpop.f32.mrf.mxu3 }
 0x159   : > { %1367 = vtanh.f32 %v1125_v29  ;;  %v821_v32 = vadd.f32 %v820_v30, %v708_v27 }
 0x15b   : > { %v934_v33 = vadd.f32 %v933_v31, %v821_v32 }
 0x15c   : > { %v597_v34 = vpop.f32.mrf.mxu0  ;;  %v710_v35 = vpop.f32.mrf.mxu1 }
 0x15d   : > { %v1090_v36 = vmul.f32 %v1742_v10, %v934_v33  ;;  %v711_v37 = vadd.f32 %v710_v35, %v597_v34 }
 0x15f   : > { %v1368_v38 = vpop.eup %1367  ;;  %v1126_v39 = vadd.f32 %v1749_v14, %v1090_v36 }
 0x160   : > { %1189 = vst [vmem:[%s1763_s26 + $0xa0] sm:$0xff] %v1368_v38  ;;  %v823_v40 = vpop.f32.mrf.mxu2  ;;  %v936_v41 = vpop.f32.mrf.mxu3 }
 0x161   : > { %1369 = vtanh.f32 %v1126_v39  ;;  %v824_v42 = vadd.f32 %v823_v40, %v711_v37 }
 0x163   : > { %v937_v43 = vadd.f32 %v936_v41, %v824_v42 }
 0x164   : > { %v600_v44 = vpop.f32.mrf.mxu0  ;;  %v713_v45 = vpop.f32.mrf.mxu1 }
 0x165   : > { %v1091_v46 = vmul.f32 %v1742_v10, %v937_v43  ;;  %v714_v47 = vadd.f32 %v713_v45, %v600_v44 }
 0x167   : > { %v1370_v48 = vpop.eup %1369  ;;  %v1127_v49 = vadd.f32 %v1749_v14, %v1091_v46 }
 0x168   : > { %1190 = vst [vmem:[%s1763_s26 + $0xa8] sm:$0xff] %v1370_v48  ;;  %v826_v50 = vpop.f32.mrf.mxu2  ;;  %v939_v51 = vpop.f32.mrf.mxu3 }
 0x169   : > { %1371 = vtanh.f32 %v1127_v49  ;;  %v827_v52 = vadd.f32 %v826_v50, %v714_v47 }
 0x16b   : > { %v940_v53 = vadd.f32 %v939_v51, %v827_v52 }
 0x16c   : > { %v603_v54 = vpop.f32.mrf.mxu0  ;;  %v716_v55 = vpop.f32.mrf.mxu1 }
 0x16d   : > { %v1092_v56 = vmul.f32 %v1742_v10, %v940_v53  ;;  %v717_v57 = vadd.f32 %v716_v55, %v603_v54 }
 0x16f   : > { %v1372_v58 = vpop.eup %1371  ;;  %v1128_v59 = vadd.f32 %v1749_v14, %v1092_v56 }
 0x170   : > { %1191 = vst [vmem:[%s1763_s26 + $0xb0] sm:$0xff] %v1372_v58  ;;  %v829_v60 = vpop.f32.mrf.mxu2  ;;  %v942_v61 = vpop.f32.mrf.mxu3 }
 0x171   : > { %1373 = vtanh.f32 %v1128_v59  ;;  %v830_v62 = vadd.f32 %v829_v60, %v717_v57 }
 0x173   : > { %v943_v63 = vadd.f32 %v942_v61, %v830_v62 }
 0x174   : > { %v606_v0 = vpop.f32.mrf.mxu0  ;;  %v719_v1 = vpop.f32.mrf.mxu1 }
 0x175   : > { %v1093_v2 = vmul.f32 %v1742_v10, %v943_v63  ;;  %v720_v3 = vadd.f32 %v719_v1, %v606_v0 }
 0x177   : > { %v1374_v4 = vpop.eup %1373  ;;  %v1129_v5 = vadd.f32 %v1749_v14, %v1093_v2 }
 0x178   : > { %1192 = vst [vmem:[%s1763_s26 + $0xb8] sm:$0xff] %v1374_v4  ;;  %v832_v6 = vpop.f32.mrf.mxu2  ;;  %v945_v7 = vpop.f32.mrf.mxu3 }
 0x179   : > { %1375 = vtanh.f32 %v1129_v5  ;;  %v833_v8 = vadd.f32 %v832_v6, %v720_v3 }
 0x17b   : > { %v946_v9 = vadd.f32 %v945_v7, %v833_v8 }
 0x17c   : > { %v609_v11 = vpop.f32.mrf.mxu0  ;;  %v722_v12 = vpop.f32.mrf.mxu1 }
 0x17d   : > { %v1094_v13 = vmul.f32 %v1742_v10, %v946_v9  ;;  %v723_v15 = vadd.f32 %v722_v12, %v609_v11 }
 0x17f   : > { %v1376_v16 = vpop.eup %1375  ;;  %v1130_v17 = vadd.f32 %v1749_v14, %v1094_v13 }
 0x180   : > { %1193 = vst [vmem:[%s1763_s26 + $0xc0] sm:$0xff] %v1376_v16  ;;  %v835_v18 = vpop.f32.mrf.mxu2  ;;  %v948_v19 = vpop.f32.mrf.mxu3 }
 0x181   : > { %1377 = vtanh.f32 %v1130_v17  ;;  %v836_v20 = vadd.f32 %v835_v18, %v723_v15 }
 0x183   : > { %v949_v21 = vadd.f32 %v948_v19, %v836_v20 }
 0x184   : > { %v612_v22 = vpop.f32.mrf.mxu0  ;;  %v725_v23 = vpop.f32.mrf.mxu1 }
 0x185   : > { %v1095_v24 = vmul.f32 %v1742_v10, %v949_v21  ;;  %v726_v25 = vadd.f32 %v725_v23, %v612_v22 }
 0x187   : > { %v1378_v26 = vpop.eup %1377  ;;  %v1131_v27 = vadd.f32 %v1749_v14, %v1095_v24 }
 0x188   : > { %1194 = vst [vmem:[%s1763_s26 + $0xc8] sm:$0xff] %v1378_v26  ;;  %v838_v28 = vpop.f32.mrf.mxu2  ;;  %v951_v29 = vpop.f32.mrf.mxu3 }
 0x189   : > { %1379 = vtanh.f32 %v1131_v27  ;;  %v839_v30 = vadd.f32 %v838_v28, %v726_v25 }
 0x18b   : > { %v952_v31 = vadd.f32 %v951_v29, %v839_v30 }
 0x18c   : > { %v615_v32 = vpop.f32.mrf.mxu0  ;;  %v728_v33 = vpop.f32.mrf.mxu1 }
 0x18d   : > { %v1096_v34 = vmul.f32 %v1742_v10, %v952_v31  ;;  %v729_v35 = vadd.f32 %v728_v33, %v615_v32 }
 0x18f   : > { %v1380_v36 = vpop.eup %1379  ;;  %v1132_v37 = vadd.f32 %v1749_v14, %v1096_v34 }
 0x190   : > { %1195 = vst [vmem:[%s1763_s26 + $0xd0] sm:$0xff] %v1380_v36  ;;  %v841_v38 = vpop.f32.mrf.mxu2  ;;  %v954_v39 = vpop.f32.mrf.mxu3 }
 0x191   : > { %1381 = vtanh.f32 %v1132_v37  ;;  %v842_v40 = vadd.f32 %v841_v38, %v729_v35 }
 0x193   : > { %v955_v41 = vadd.f32 %v954_v39, %v842_v40 }
 0x194   : > { %v618_v42 = vpop.f32.mrf.mxu0  ;;  %v731_v43 = vpop.f32.mrf.mxu1 }
 0x195   : > { %v1097_v44 = vmul.f32 %v1742_v10, %v955_v41  ;;  %v732_v45 = vadd.f32 %v731_v43, %v618_v42 }
 0x197   : > { %v1382_v46 = vpop.eup %1381  ;;  %v1133_v47 = vadd.f32 %v1749_v14, %v1097_v44 }
 0x198   : > { %1196 = vst [vmem:[%s1763_s26 + $0xd8] sm:$0xff] %v1382_v46  ;;  %v844_v48 = vpop.f32.mrf.mxu2  ;;  %v957_v49 = vpop.f32.mrf.mxu3 }
 0x199   : > { %1383 = vtanh.f32 %v1133_v47  ;;  %v845_v50 = vadd.f32 %v844_v48, %v732_v45 }
 0x19b   : > { %v958_v51 = vadd.f32 %v957_v49, %v845_v50 }
 0x19c   : > { %v621_v52 = vpop.f32.mrf.mxu0  ;;  %v734_v53 = vpop.f32.mrf.mxu1 }
 0x19d   : > { %v1098_v54 = vmul.f32 %v1742_v10, %v958_v51  ;;  %v735_v55 = vadd.f32 %v734_v53, %v621_v52 }
 0x19f   : > { %v1384_v56 = vpop.eup %1383  ;;  %v1134_v57 = vadd.f32 %v1749_v14, %v1098_v54 }
 0x1a0   : > { %1197 = vst [vmem:[%s1763_s26 + $0xe0] sm:$0xff] %v1384_v56  ;;  %v847_v58 = vpop.f32.mrf.mxu2  ;;  %v960_v59 = vpop.f32.mrf.mxu3 }
 0x1a1   : > { %1385 = vtanh.f32 %v1134_v57  ;;  %v848_v60 = vadd.f32 %v847_v58, %v735_v55 }
 0x1a3   : > { %v961_v61 = vadd.f32 %v960_v59, %v848_v60 }
 0x1a4   : > { %v624_v62 = vpop.f32.mrf.mxu0  ;;  %v737_v63 = vpop.f32.mrf.mxu1 }
 0x1a5   : > { %v1099_v0 = vmul.f32 %v1742_v10, %v961_v61  ;;  %v738_v1 = vadd.f32 %v737_v63, %v624_v62 }
 0x1a7   : > { %v1386_v2 = vpop.eup %1385  ;;  %v1135_v3 = vadd.f32 %v1749_v14, %v1099_v0 }
 0x1a8   : > { %1198 = vst [vmem:[%s1763_s26 + $0xe8] sm:$0xff] %v1386_v2  ;;  %v850_v4 = vpop.f32.mrf.mxu2  ;;  %v963_v5 = vpop.f32.mrf.mxu3 }
 0x1a9   : > { %1387 = vtanh.f32 %v1135_v3  ;;  %v851_v6 = vadd.f32 %v850_v4, %v738_v1 }
 0x1ab   : > { %v964_v7 = vadd.f32 %v963_v5, %v851_v6 }
 0x1ad   : > { %v1100_v8 = vmul.f32 %v1742_v10, %v964_v7 }
 0x1af   : > { %v1388_v9 = vpop.eup %1387  ;;  %v1136_v11 = vadd.f32 %v1749_v14, %v1100_v8 }
 0x1b0   : > { %1199 = vst [vmem:[%s1763_s26 + $0xf0] sm:$0xff] %v1388_v9 }
 0x1b1   : > { %1389 = vtanh.f32 %v1136_v11 }
 0x1b7   : > { %v1390_v12 = vpop.eup %1389 }
 0x1b8   : > { %1200 = vst [vmem:[%s1763_s26 + $0xf8] sm:$0xff] %v1390_v12 }
 0x1b9 PF: > { %s14_s17 = sadd.s32 1, %s1413_s17   ;;  %s1926_s15 = smov %s1409_s16 }
 0x1ba   : > { %p11_p5 = scmp.ge.s32.totalorder %s14_s17, 18   ;;  %s1927_s16 = smov %s1929_s18 }
 0x1bc   :  { %13 = sbr.rel (!%p11_p5) target bundleno = 2 (0x2), region = 77 }

</bundles_post_ra>
